<compile_context>
chip_gen: v6e
topology: v6e:2x2x1
jax: 0.10.0
libtpu: 0.0.40
codegen_flags: <defaults>
</compile_context>

<pallas_src>
import random

import jax
import jax.numpy as jnp
from jax.experimental import pallas as pl
from jax.experimental.pallas import tpu as pltpu

F32 = jnp.float32

# ----------------------------- config (small, synthetic) -----------------------------
INPUT_DIM = 20      # src vocab size
OUTPUT_DIM = 40     # trg vocab size (decoder.output_dim; unused for output width, as in reference)
EMB_DIM = 32        # decoder.emb_dim -> width of the per-step output
ENC_HID = 32
DEC_HID = 32
SRC_PAD_IDX = 0
SRC_LEN = 8         # max src sequence length
TRG_LEN = 8
BATCH = 2

_VMEM = pl.BlockSpec(memory_space=pltpu.MemorySpace.VMEM)
_SMEM = pl.BlockSpec(memory_space=pltpu.MemorySpace.SMEM)


# ----------------------------- shared GRU gate math -----------------------------
def _gru_gates(gi, gh, h, H):
    """PyTorch-semantics GRU gates, (r, z, n) order."""
    r = jax.nn.sigmoid(gi[:, :H] + gh[:, :H])
    z = jax.nn.sigmoid(gi[:, H:2 * H] + gh[:, H:2 * H])
    n = jnp.tanh(gi[:, 2 * H:] + r * gh[:, 2 * H:])
    return (1.0 - z) * n + z * h


# ----------------------------- single fused kernel -----------------------------
def _seq2seq_kernel(coin_ref,                                           # SMEM: teacher-forcing coins
                    gif_ref, gib_ref, valid_ref, mask_ref, trg_emb_ref,
                    whhf_ref, bhhf_ref, whhb_ref, bhhb_ref,
                    fcw_ref, fcb_ref,
                    we_ref, ab_ref, av_ref, whcomb_ref,
                    dwih_ref, dbih_ref, dbhh_ref,
                    demb_ref, wout_ref, bout_ref,
                    out_ref,
                    enc_scr, eenc_scr, emb_scr):
    S = gif_ref.shape[0]
    B = gif_ref.shape[1]
    He = whhf_ref.shape[0]
    Hd = whcomb_ref.shape[0]
    Ha = we_ref.shape[1]
    EMB = trg_emb_ref.shape[2]
    V = demb_ref.shape[0]
    T = out_ref.shape[0]

    # =============== encoder: interleaved forward / backward GRU (packed-seq masking) ===============
    h_f = jnp.zeros((B, He), F32)
    h_b = jnp.zeros((B, He), F32)
    outs_f = [None] * S
    outs_b = [None] * S
    for t in range(S):                       # fwd step t and bwd step S-1-t share one unrolled iter
        tb = S - 1 - t
        vf = valid_ref[t]                    # [B, 1]
        vb = valid_ref[tb]
        ghf = jnp.dot(h_f, whhf_ref[...], preferred_element_type=F32) + bhhf_ref[...]
        ghb = jnp.dot(h_b, whhb_ref[...], preferred_element_type=F32) + bhhb_ref[...]
        hf_new = _gru_gates(gif_ref[t], ghf, h_f, He)
        hb_new = _gru_gates(gib_ref[tb], ghb, h_b, He)
        outs_f[t] = vf * hf_new              # padded positions emit zeros (pad_packed_sequence)
        outs_b[tb] = vb * hb_new
        h_f = vf * hf_new + (1.0 - vf) * h_f
        h_b = vb * hb_new + (1.0 - vb) * h_b

    # encoder outputs + step-invariant attention projection enc @ W_e, resident in VMEM
    for t in range(S):
        cat = jnp.concatenate([outs_f[t], outs_b[t]], axis=-1)          # [B, 2He]
        enc_scr[t] = cat
        eenc_scr[t] = jnp.dot(cat, we_ref[...], preferred_element_type=F32)

    h_cat = jnp.concatenate([h_f, h_b], axis=-1)                        # [B, 2He]
    h = jnp.tanh(jnp.dot(h_cat, fcw_ref[...], preferred_element_type=F32) + fcb_ref[...])

    enc = enc_scr[...]                                                  # [S, B, 2He]
    eenc = eenc_scr[...]                                                # [S, B, Ha]
    mask = mask_ref[...] > 0.0                                          # [S, B]
    ab = ab_ref[...]
    av = av_ref[...]

    # =============== decoder: fully unrolled time loop, state threaded through the unroll ===============
    out_ref[0] = jnp.zeros((B, EMB), F32)                               # outputs[0] stays zero
    prev_out = jnp.zeros((B, EMB), F32)

    for t in range(1, T):
        i = t - 1
        # ---- input select: teacher forcing (precomputed trg embedding) vs guarded argmax feedback ----
        emb_scr[...] = trg_emb_ref[i]                                   # default: teacher input trg[t-1]

        @pl.when(coin_ref[i] == 0)
        def _(po=prev_out):
            mx = jnp.max(po, axis=1, keepdims=True)
            col = jax.lax.broadcasted_iota(jnp.int32, po.shape, 1).astype(F32)
            top1 = jnp.min(jnp.where(po >= mx, col, jnp.float32(po.shape[1])),
                           axis=1, keepdims=True)                       # [B, 1] first-argmax index
            voc = jax.lax.broadcasted_iota(jnp.int32, (B, V), 1).astype(F32)
            onehot = (voc == top1).astype(F32)                          # [B, V]
            emb_scr[...] = jnp.dot(onehot, demb_ref[...],
                                   preferred_element_type=F32)          # dec_emb[top1]

        embedded = emb_scr[...]                                         # [B, EMB]

        # ---- fused h-projection: [attention e_hid | GRU gh] in one [B, 128] matmul ----
        hw = jnp.dot(h, whcomb_ref[...], preferred_element_type=F32)    # [B, Ha + 3Hd]
        e_hid = hw[:, :Ha]                                              # [B, Ha]
        gh = hw[:, Ha:] + dbhh_ref[...]                                 # [B, 3Hd]

        # ---- Bahdanau attention (enc @ We hoisted; masked softmax) ----
        energy = jnp.tanh(eenc + e_hid[None, :, :] + ab)                # [S, B, Ha]
        scores = jnp.sum(energy * av, axis=-1)                          # [S, B]
        scores = jnp.where(mask, scores, jnp.float32(-1e10))
        m = jnp.max(scores, axis=0, keepdims=True)
        ex = jnp.exp(scores - m)
        attn = ex * pl.reciprocal(jnp.sum(ex, axis=0, keepdims=True), approx=True)
        context = jnp.sum(attn[:, :, None] * enc, axis=0)               # [B, 2He]

        # ---- GRU cell ----
        rnn_in = jnp.concatenate([embedded, context], axis=-1)          # [B, EMB + 2He]
        gi = jnp.dot(rnn_in, dwih_ref[...], preferred_element_type=F32) + dbih_ref[...]
        h = _gru_gates(gi, gh, h, Hd)

        # ---- output linear head ----
        pred_in = jnp.concatenate([h, context, embedded], axis=-1)      # [B, Hd + 2He + EMB]
        out = jnp.dot(pred_in, wout_ref[...], preferred_element_type=F32) + bout_ref[...]

        out_ref[t] = out
        prev_out = out


# ----------------------------- wrapper -----------------------------
@jax.jit
def seq2seq_forward(params, src, src_len, trg, coins):
    S, B = src.shape
    T = trg.shape[0]

    # XLA glue: embedding gathers + step-invariant encoder input projections (one matmul / direction)
    emb = params['enc_emb'][src]                                        # [S, B, E]
    gi_f = jnp.einsum('sbe,eg->sbg', emb, params['enc_wih_f']) + params['enc_bih_f']
    gi_b = jnp.einsum('sbe,eg->sbg', emb, params['enc_wih_b']) + params['enc_bih_b']
    pos = jnp.arange(S, dtype=jnp.int32)[:, None]
    valid = (pos < src_len[None, :]).astype(F32)[:, :, None]            # [S, B, 1]
    mask = (src != SRC_PAD_IDX).astype(F32)                             # [S, B] (create_mask, seq-major)
    trg_emb = params['dec_emb'][trg]                                    # [T, B, EMB] teacher-forced inputs
    wh_comb = jnp.concatenate([params['attn_wh'], params['dec_whh']], axis=1)   # [Hd, Ha + 3Hd]

    return pl.pallas_call(
        _seq2seq_kernel,
        out_shape=jax.ShapeDtypeStruct((T, B, EMB_DIM), F32),
        in_specs=[_SMEM] + [_VMEM] * 21,
        out_specs=_VMEM,
        scratch_shapes=[pltpu.VMEM((S, B, 2 * ENC_HID), F32),           # enc outputs (resident)
                        pltpu.VMEM((S, B, DEC_HID), F32),               # enc @ We (resident)
                        pltpu.VMEM((BATCH, EMB_DIM), F32)],             # per-step input embedding
    )(coins,
      gi_f, gi_b, valid, mask, trg_emb,
      params['enc_whh_f'], params['enc_bhh_f'],
      params['enc_whh_b'], params['enc_bhh_b'],
      params['enc_fc_w'], params['enc_fc_b'],
      params['attn_we'], params['attn_b'], params['attn_v'], wh_comb,
      params['dec_wih'], params['dec_bih'], params['dec_bhh'],
      params['dec_emb'], params['dec_out_w'], params['dec_out_b'])


# ----------------------------- deterministic parameter init -----------------------------
def init_params(key):
    ks = iter(jax.random.split(key, 32))

    def w(shape, scale=0.1):
        return jax.random.normal(next(ks), shape, dtype=F32) * scale

    return {
        # encoder
        'enc_emb':  w((INPUT_DIM, EMB_DIM)),
        'enc_wih_f': w((EMB_DIM, 3 * ENC_HID)), 'enc_whh_f': w((ENC_HID, 3 * ENC_HID)),
        'enc_bih_f': w((1, 3 * ENC_HID)),       'enc_bhh_f': w((1, 3 * ENC_HID)),
        'enc_wih_b': w((EMB_DIM, 3 * ENC_HID)), 'enc_whh_b': w((ENC_HID, 3 * ENC_HID)),
        'enc_bih_b': w((1, 3 * ENC_HID)),       'enc_bhh_b': w((1, 3 * ENC_HID)),
        'enc_fc_w': w((2 * ENC_HID, DEC_HID)),  'enc_fc_b': w((1, DEC_HID)),
        # attention (attn Linear split into hidden / enc parts; v has no bias)
        'attn_wh': w((DEC_HID, DEC_HID)),
        'attn_we': w((2 * ENC_HID, DEC_HID)),
        'attn_b':  w((1, DEC_HID)),
        'attn_v':  w((1, DEC_HID)),
        # decoder
        'dec_emb': w((OUTPUT_DIM, EMB_DIM)),
        'dec_wih': w((EMB_DIM + 2 * ENC_HID, 3 * DEC_HID)),
        'dec_whh': w((DEC_HID, 3 * DEC_HID)),
        'dec_bih': w((1, 3 * DEC_HID)),
        'dec_bhh': w((1, 3 * DEC_HID)),
        'dec_out_w': w((DEC_HID + 2 * ENC_HID + EMB_DIM, EMB_DIM)),
        'dec_out_b': w((1, EMB_DIM)),
    }


# ----------------------------- main -----------------------------
if __name__ == "__main__":
    key = jax.random.PRNGKey(0)
    k_param, k_src, k_trg = jax.random.split(key, 3)
    params = init_params(k_param)

    # src: [SRC_LEN, BATCH] with padding at the tail according to src_len
    src_len = jnp.array([SRC_LEN, 5], dtype=jnp.int32)
    src = jax.random.randint(k_src, (SRC_LEN, BATCH), 1, INPUT_DIM, dtype=jnp.int32)
    pos = jnp.arange(SRC_LEN, dtype=jnp.int32)[:, None]                 # [S, 1]
    src = jnp.where(pos < src_len[None, :], src, SRC_PAD_IDX)

    # trg: [TRG_LEN, BATCH]
    trg = jax.random.randint(k_trg, (TRG_LEN, BATCH), 0, OUTPUT_DIM, dtype=jnp.int32)

    # teacher-forcing coin flips precomputed on the host (same random.random() call pattern
    # as the reference loop); coins[0]=1 forces trg[0] as the first decoder input.
    # TODO(synk): per-call host RNG, like the PyTorch module, is inherently outside the kernel.
    random.seed(0)
    tf_ratio = 0.5
    coins = jnp.asarray([1] + [int(random.random() < tf_ratio) for _ in range(1, TRG_LEN)],
                        dtype=jnp.int32)

    out = seq2seq_forward(params, src, src_len, trg, coins)
    out = jax.block_until_ready(out)

    assert out.shape == (TRG_LEN, BATCH, EMB_DIM), out.shape
    assert out.dtype == jnp.float32
    assert bool(jnp.all(jnp.isfinite(out)))
    print("KERNEL_OK")
</pallas_src>

<mosaic_0001>
module attributes {stable_mosaic.version = 11 : i64} {
  func.func @_seq2seq_kernel(%arg0: memref<8xi32, #tpu.memory_space<smem>>, %arg1: memref<8x2x96xf32, #tpu.memory_space<vmem>>, %arg2: memref<8x2x96xf32, #tpu.memory_space<vmem>>, %arg3: memref<8x2x1xf32, #tpu.memory_space<vmem>>, %arg4: memref<8x2xf32, #tpu.memory_space<vmem>>, %arg5: memref<8x2x32xf32, #tpu.memory_space<vmem>>, %arg6: memref<32x96xf32, #tpu.memory_space<vmem>>, %arg7: memref<1x96xf32, #tpu.memory_space<vmem>>, %arg8: memref<32x96xf32, #tpu.memory_space<vmem>>, %arg9: memref<1x96xf32, #tpu.memory_space<vmem>>, %arg10: memref<64x32xf32, #tpu.memory_space<vmem>>, %arg11: memref<1x32xf32, #tpu.memory_space<vmem>>, %arg12: memref<64x32xf32, #tpu.memory_space<vmem>>, %arg13: memref<1x32xf32, #tpu.memory_space<vmem>>, %arg14: memref<1x32xf32, #tpu.memory_space<vmem>>, %arg15: memref<32x128xf32, #tpu.memory_space<vmem>>, %arg16: memref<96x96xf32, #tpu.memory_space<vmem>>, %arg17: memref<1x96xf32, #tpu.memory_space<vmem>>, %arg18: memref<1x96xf32, #tpu.memory_space<vmem>>, %arg19: memref<40x32xf32, #tpu.memory_space<vmem>>, %arg20: memref<128x32xf32, #tpu.memory_space<vmem>>, %arg21: memref<1x32xf32, #tpu.memory_space<vmem>>, %arg22: memref<8x2x32xf32, #tpu.memory_space<vmem>>, %arg23: memref<8x2x64xf32, #tpu.memory_space<vmem>>, %arg24: memref<8x2x32xf32, #tpu.memory_space<vmem>>, %arg25: memref<2x32xf32, #tpu.memory_space<vmem>>) attributes {dimension_semantics = [], scalar_prefetch = 0 : i64, scratch_operands = 3 : i64, tpu.core_type = #tpu.core_type<tc>} {
    %cst = arith.constant 0.000000e+00 : f32
    %0 = vector.broadcast %cst : f32 to vector<2x32xf32>
    %cst_0 = arith.constant 0.000000e+00 : f32
    %1 = vector.broadcast %cst_0 : f32 to vector<2x32xf32>
    %c0 = arith.constant 0 : index
    %c0_1 = arith.constant 0 : index
    %c0_2 = arith.constant 0 : index
    %2 = vector.load %arg3[%c0, %c0_1, %c0_2] : memref<8x2x1xf32, #tpu.memory_space<vmem>>, vector<1x2x1xf32>
    %3 = vector.shape_cast %2 : vector<1x2x1xf32> to vector<2x1xf32>
    %c7 = arith.constant 7 : index
    %c0_3 = arith.constant 0 : index
    %c0_4 = arith.constant 0 : index
    %4 = vector.load %arg3[%c7, %c0_3, %c0_4] : memref<8x2x1xf32, #tpu.memory_space<vmem>>, vector<1x2x1xf32>
    %5 = vector.shape_cast %4 : vector<1x2x1xf32> to vector<2x1xf32>
    %c0_5 = arith.constant 0 : index
    %c0_6 = arith.constant 0 : index
    %6 = vector.load %arg6[%c0_5, %c0_6] : memref<32x96xf32, #tpu.memory_space<vmem>>, vector<32x96xf32>
    %cst_7 = arith.constant dense<0.000000e+00> : vector<2x96xf32>
    %7 = tpu.matmul %0, %6, %cst_7 {dimension_numbers = #tpu.dot_dimension_numbers<[1], [0], [0], [1], [0, 0, 1, 1], [], []>} : vector<2x32xf32>, vector<32x96xf32>, vector<2x96xf32> -> vector<2x96xf32>
    %c0_8 = arith.constant 0 : index
    %c0_9 = arith.constant 0 : index
    %8 = vector.load %arg7[%c0_8, %c0_9] : memref<1x96xf32, #tpu.memory_space<vmem>>, vector<1x96xf32>
    %9 = vector.broadcast %8 : vector<1x96xf32> to vector<2x96xf32>
    %10 = arith.addf %7, %9 : vector<2x96xf32>
    %c0_10 = arith.constant 0 : index
    %c0_11 = arith.constant 0 : index
    %11 = vector.load %arg8[%c0_10, %c0_11] : memref<32x96xf32, #tpu.memory_space<vmem>>, vector<32x96xf32>
    %cst_12 = arith.constant dense<0.000000e+00> : vector<2x96xf32>
    %12 = tpu.matmul %1, %11, %cst_12 {dimension_numbers = #tpu.dot_dimension_numbers<[1], [0], [0], [1], [0, 0, 1, 1], [], []>} : vector<2x32xf32>, vector<32x96xf32>, vector<2x96xf32> -> vector<2x96xf32>
    %c0_13 = arith.constant 0 : index
    %c0_14 = arith.constant 0 : index
    %13 = vector.load %arg9[%c0_13, %c0_14] : memref<1x96xf32, #tpu.memory_space<vmem>>, vector<1x96xf32>
    %14 = vector.broadcast %13 : vector<1x96xf32> to vector<2x96xf32>
    %15 = arith.addf %12, %14 : vector<2x96xf32>
    %c0_15 = arith.constant 0 : index
    %c0_16 = arith.constant 0 : index
    %c0_17 = arith.constant 0 : index
    %16 = vector.load %arg1[%c0_15, %c0_16, %c0_17] : memref<8x2x96xf32, #tpu.memory_space<vmem>>, vector<1x2x96xf32>
    %17 = vector.shape_cast %16 : vector<1x2x96xf32> to vector<2x96xf32>
    %18 = vector.extract_strided_slice %17 {offsets = [0, 0], sizes = [2, 32], strides = [1, 1]} : vector<2x96xf32> to vector<2x32xf32>
    %19 = vector.extract_strided_slice %10 {offsets = [0, 0], sizes = [2, 32], strides = [1, 1]} : vector<2x96xf32> to vector<2x32xf32>
    %20 = arith.addf %18, %19 : vector<2x32xf32>
    %21 = arith.negf %20 : vector<2x32xf32>
    %22 = math.exp %21 : vector<2x32xf32>
    %cst_18 = arith.constant 1.000000e+00 : f32
    %23 = vector.broadcast %cst_18 : f32 to vector<2x32xf32>
    %24 = arith.addf %23, %22 : vector<2x32xf32>
    %25 = arith.divf %23, %24 : vector<2x32xf32>
    %26 = vector.extract_strided_slice %17 {offsets = [0, 32], sizes = [2, 32], strides = [1, 1]} : vector<2x96xf32> to vector<2x32xf32>
    %27 = vector.extract_strided_slice %10 {offsets = [0, 32], sizes = [2, 32], strides = [1, 1]} : vector<2x96xf32> to vector<2x32xf32>
    %28 = arith.addf %26, %27 : vector<2x32xf32>
    %29 = arith.negf %28 : vector<2x32xf32>
    %30 = math.exp %29 : vector<2x32xf32>
    %cst_19 = arith.constant 1.000000e+00 : f32
    %31 = vector.broadcast %cst_19 : f32 to vector<2x32xf32>
    %32 = arith.addf %31, %30 : vector<2x32xf32>
    %33 = arith.divf %31, %32 : vector<2x32xf32>
    %34 = vector.extract_strided_slice %17 {offsets = [0, 64], sizes = [2, 32], strides = [1, 1]} : vector<2x96xf32> to vector<2x32xf32>
    %35 = vector.extract_strided_slice %10 {offsets = [0, 64], sizes = [2, 32], strides = [1, 1]} : vector<2x96xf32> to vector<2x32xf32>
    %36 = arith.mulf %25, %35 : vector<2x32xf32>
    %37 = arith.addf %34, %36 : vector<2x32xf32>
    %38 = math.tanh %37 : vector<2x32xf32>
    %cst_20 = arith.constant 1.000000e+00 : f32
    %39 = vector.broadcast %cst_20 : f32 to vector<2x32xf32>
    %40 = arith.subf %39, %33 : vector<2x32xf32>
    %41 = arith.mulf %40, %38 : vector<2x32xf32>
    %42 = arith.mulf %33, %0 : vector<2x32xf32>
    %43 = arith.addf %41, %42 : vector<2x32xf32>
    %c7_21 = arith.constant 7 : index
    %c0_22 = arith.constant 0 : index
    %c0_23 = arith.constant 0 : index
    %44 = vector.load %arg2[%c7_21, %c0_22, %c0_23] : memref<8x2x96xf32, #tpu.memory_space<vmem>>, vector<1x2x96xf32>
    %45 = vector.shape_cast %44 : vector<1x2x96xf32> to vector<2x96xf32>
    %46 = vector.extract_strided_slice %45 {offsets = [0, 0], sizes = [2, 32], strides = [1, 1]} : vector<2x96xf32> to vector<2x32xf32>
    %47 = vector.extract_strided_slice %15 {offsets = [0, 0], sizes = [2, 32], strides = [1, 1]} : vector<2x96xf32> to vector<2x32xf32>
    %48 = arith.addf %46, %47 : vector<2x32xf32>
    %49 = arith.negf %48 : vector<2x32xf32>
    %50 = math.exp %49 : vector<2x32xf32>
    %cst_24 = arith.constant 1.000000e+00 : f32
    %51 = vector.broadcast %cst_24 : f32 to vector<2x32xf32>
    %52 = arith.addf %51, %50 : vector<2x32xf32>
    %53 = arith.divf %51, %52 : vector<2x32xf32>
    %54 = vector.extract_strided_slice %45 {offsets = [0, 32], sizes = [2, 32], strides = [1, 1]} : vector<2x96xf32> to vector<2x32xf32>
    %55 = vector.extract_strided_slice %15 {offsets = [0, 32], sizes = [2, 32], strides = [1, 1]} : vector<2x96xf32> to vector<2x32xf32>
    %56 = arith.addf %54, %55 : vector<2x32xf32>
    %57 = arith.negf %56 : vector<2x32xf32>
    %58 = math.exp %57 : vector<2x32xf32>
    %cst_25 = arith.constant 1.000000e+00 : f32
    %59 = vector.broadcast %cst_25 : f32 to vector<2x32xf32>
    %60 = arith.addf %59, %58 : vector<2x32xf32>
    %61 = arith.divf %59, %60 : vector<2x32xf32>
    %62 = vector.extract_strided_slice %45 {offsets = [0, 64], sizes = [2, 32], strides = [1, 1]} : vector<2x96xf32> to vector<2x32xf32>
    %63 = vector.extract_strided_slice %15 {offsets = [0, 64], sizes = [2, 32], strides = [1, 1]} : vector<2x96xf32> to vector<2x32xf32>
    %64 = arith.mulf %53, %63 : vector<2x32xf32>
    %65 = arith.addf %62, %64 : vector<2x32xf32>
    %66 = math.tanh %65 : vector<2x32xf32>
    %cst_26 = arith.constant 1.000000e+00 : f32
    %67 = vector.broadcast %cst_26 : f32 to vector<2x32xf32>
    %68 = arith.subf %67, %61 : vector<2x32xf32>
    %69 = arith.mulf %68, %66 : vector<2x32xf32>
    %70 = arith.mulf %61, %1 : vector<2x32xf32>
    %71 = arith.addf %69, %70 : vector<2x32xf32>
    %72 = vector.broadcast %3 : vector<2x1xf32> to vector<2x32xf32>
    %73 = arith.mulf %72, %43 : vector<2x32xf32>
    %74 = vector.broadcast %5 : vector<2x1xf32> to vector<2x32xf32>
    %75 = arith.mulf %74, %71 : vector<2x32xf32>
    %76 = vector.broadcast %3 : vector<2x1xf32> to vector<2x32xf32>
    %77 = arith.mulf %76, %43 : vector<2x32xf32>
    %cst_27 = arith.constant 1.000000e+00 : f32
    %78 = vector.broadcast %cst_27 : f32 to vector<2x1xf32>
    %79 = arith.subf %78, %3 : vector<2x1xf32>
    %80 = vector.broadcast %79 : vector<2x1xf32> to vector<2x32xf32>
    %81 = arith.mulf %80, %0 : vector<2x32xf32>
    %82 = arith.addf %77, %81 : vector<2x32xf32>
    %83 = vector.broadcast %5 : vector<2x1xf32> to vector<2x32xf32>
    %84 = arith.mulf %83, %71 : vector<2x32xf32>
    %cst_28 = arith.constant 1.000000e+00 : f32
    %85 = vector.broadcast %cst_28 : f32 to vector<2x1xf32>
    %86 = arith.subf %85, %5 : vector<2x1xf32>
    %87 = vector.broadcast %86 : vector<2x1xf32> to vector<2x32xf32>
    %88 = arith.mulf %87, %1 : vector<2x32xf32>
    %89 = arith.addf %84, %88 : vector<2x32xf32>
    %c1 = arith.constant 1 : index
    %c0_29 = arith.constant 0 : index
    %c0_30 = arith.constant 0 : index
    %90 = vector.load %arg3[%c1, %c0_29, %c0_30] : memref<8x2x1xf32, #tpu.memory_space<vmem>>, vector<1x2x1xf32>
    %91 = vector.shape_cast %90 : vector<1x2x1xf32> to vector<2x1xf32>
    %c6 = arith.constant 6 : index
    %c0_31 = arith.constant 0 : index
    %c0_32 = arith.constant 0 : index
    %92 = vector.load %arg3[%c6, %c0_31, %c0_32] : memref<8x2x1xf32, #tpu.memory_space<vmem>>, vector<1x2x1xf32>
    %93 = vector.shape_cast %92 : vector<1x2x1xf32> to vector<2x1xf32>
    %c0_33 = arith.constant 0 : index
    %c0_34 = arith.constant 0 : index
    %94 = vector.load %arg6[%c0_33, %c0_34] : memref<32x96xf32, #tpu.memory_space<vmem>>, vector<32x96xf32>
    %cst_35 = arith.constant dense<0.000000e+00> : vector<2x96xf32>
    %95 = tpu.matmul %82, %94, %cst_35 {dimension_numbers = #tpu.dot_dimension_numbers<[1], [0], [0], [1], [0, 0, 1, 1], [], []>} : vector<2x32xf32>, vector<32x96xf32>, vector<2x96xf32> -> vector<2x96xf32>
    %c0_36 = arith.constant 0 : index
    %c0_37 = arith.constant 0 : index
    %96 = vector.load %arg7[%c0_36, %c0_37] : memref<1x96xf32, #tpu.memory_space<vmem>>, vector<1x96xf32>
    %97 = vector.broadcast %96 : vector<1x96xf32> to vector<2x96xf32>
    %98 = arith.addf %95, %97 : vector<2x96xf32>
    %c0_38 = arith.constant 0 : index
    %c0_39 = arith.constant 0 : index
    %99 = vector.load %arg8[%c0_38, %c0_39] : memref<32x96xf32, #tpu.memory_space<vmem>>, vector<32x96xf32>
    %cst_40 = arith.constant dense<0.000000e+00> : vector<2x96xf32>
    %100 = tpu.matmul %89, %99, %cst_40 {dimension_numbers = #tpu.dot_dimension_numbers<[1], [0], [0], [1], [0, 0, 1, 1], [], []>} : vector<2x32xf32>, vector<32x96xf32>, vector<2x96xf32> -> vector<2x96xf32>
    %c0_41 = arith.constant 0 : index
    %c0_42 = arith.constant 0 : index
    %101 = vector.load %arg9[%c0_41, %c0_42] : memref<1x96xf32, #tpu.memory_space<vmem>>, vector<1x96xf32>
    %102 = vector.broadcast %101 : vector<1x96xf32> to vector<2x96xf32>
    %103 = arith.addf %100, %102 : vector<2x96xf32>
    %c1_43 = arith.constant 1 : index
    %c0_44 = arith.constant 0 : index
    %c0_45 = arith.constant 0 : index
    %104 = vector.load %arg1[%c1_43, %c0_44, %c0_45] : memref<8x2x96xf32, #tpu.memory_space<vmem>>, vector<1x2x96xf32>
    %105 = vector.shape_cast %104 : vector<1x2x96xf32> to vector<2x96xf32>
    %106 = vector.extract_strided_slice %105 {offsets = [0, 0], sizes = [2, 32], strides = [1, 1]} : vector<2x96xf32> to vector<2x32xf32>
    %107 = vector.extract_strided_slice %98 {offsets = [0, 0], sizes = [2, 32], strides = [1, 1]} : vector<2x96xf32> to vector<2x32xf32>
    %108 = arith.addf %106, %107 : vector<2x32xf32>
    %109 = arith.negf %108 : vector<2x32xf32>
    %110 = math.exp %109 : vector<2x32xf32>
    %cst_46 = arith.constant 1.000000e+00 : f32
    %111 = vector.broadcast %cst_46 : f32 to vector<2x32xf32>
    %112 = arith.addf %111, %110 : vector<2x32xf32>
    %113 = arith.divf %111, %112 : vector<2x32xf32>
    %114 = vector.extract_strided_slice %105 {offsets = [0, 32], sizes = [2, 32], strides = [1, 1]} : vector<2x96xf32> to vector<2x32xf32>
    %115 = vector.extract_strided_slice %98 {offsets = [0, 32], sizes = [2, 32], strides = [1, 1]} : vector<2x96xf32> to vector<2x32xf32>
    %116 = arith.addf %114, %115 : vector<2x32xf32>
    %117 = arith.negf %116 : vector<2x32xf32>
    %118 = math.exp %117 : vector<2x32xf32>
    %cst_47 = arith.constant 1.000000e+00 : f32
    %119 = vector.broadcast %cst_47 : f32 to vector<2x32xf32>
    %120 = arith.addf %119, %118 : vector<2x32xf32>
    %121 = arith.divf %119, %120 : vector<2x32xf32>
    %122 = vector.extract_strided_slice %105 {offsets = [0, 64], sizes = [2, 32], strides = [1, 1]} : vector<2x96xf32> to vector<2x32xf32>
    %123 = vector.extract_strided_slice %98 {offsets = [0, 64], sizes = [2, 32], strides = [1, 1]} : vector<2x96xf32> to vector<2x32xf32>
    %124 = arith.mulf %113, %123 : vector<2x32xf32>
    %125 = arith.addf %122, %124 : vector<2x32xf32>
    %126 = math.tanh %125 : vector<2x32xf32>
    %cst_48 = arith.constant 1.000000e+00 : f32
    %127 = vector.broadcast %cst_48 : f32 to vector<2x32xf32>
    %128 = arith.subf %127, %121 : vector<2x32xf32>
    %129 = arith.mulf %128, %126 : vector<2x32xf32>
    %130 = arith.mulf %121, %82 : vector<2x32xf32>
    %131 = arith.addf %129, %130 : vector<2x32xf32>
    %c6_49 = arith.constant 6 : index
    %c0_50 = arith.constant 0 : index
    %c0_51 = arith.constant 0 : index
    %132 = vector.load %arg2[%c6_49, %c0_50, %c0_51] : memref<8x2x96xf32, #tpu.memory_space<vmem>>, vector<1x2x96xf32>
    %133 = vector.shape_cast %132 : vector<1x2x96xf32> to vector<2x96xf32>
    %134 = vector.extract_strided_slice %133 {offsets = [0, 0], sizes = [2, 32], strides = [1, 1]} : vector<2x96xf32> to vector<2x32xf32>
    %135 = vector.extract_strided_slice %103 {offsets = [0, 0], sizes = [2, 32], strides = [1, 1]} : vector<2x96xf32> to vector<2x32xf32>
    %136 = arith.addf %134, %135 : vector<2x32xf32>
    %137 = arith.negf %136 : vector<2x32xf32>
    %138 = math.exp %137 : vector<2x32xf32>
    %cst_52 = arith.constant 1.000000e+00 : f32
    %139 = vector.broadcast %cst_52 : f32 to vector<2x32xf32>
    %140 = arith.addf %139, %138 : vector<2x32xf32>
    %141 = arith.divf %139, %140 : vector<2x32xf32>
    %142 = vector.extract_strided_slice %133 {offsets = [0, 32], sizes = [2, 32], strides = [1, 1]} : vector<2x96xf32> to vector<2x32xf32>
    %143 = vector.extract_strided_slice %103 {offsets = [0, 32], sizes = [2, 32], strides = [1, 1]} : vector<2x96xf32> to vector<2x32xf32>
    %144 = arith.addf %142, %143 : vector<2x32xf32>
    %145 = arith.negf %144 : vector<2x32xf32>
    %146 = math.exp %145 : vector<2x32xf32>
    %cst_53 = arith.constant 1.000000e+00 : f32
    %147 = vector.broadcast %cst_53 : f32 to vector<2x32xf32>
    %148 = arith.addf %147, %146 : vector<2x32xf32>
    %149 = arith.divf %147, %148 : vector<2x32xf32>
    %150 = vector.extract_strided_slice %133 {offsets = [0, 64], sizes = [2, 32], strides = [1, 1]} : vector<2x96xf32> to vector<2x32xf32>
    %151 = vector.extract_strided_slice %103 {offsets = [0, 64], sizes = [2, 32], strides = [1, 1]} : vector<2x96xf32> to vector<2x32xf32>
    %152 = arith.mulf %141, %151 : vector<2x32xf32>
    %153 = arith.addf %150, %152 : vector<2x32xf32>
    %154 = math.tanh %153 : vector<2x32xf32>
    %cst_54 = arith.constant 1.000000e+00 : f32
    %155 = vector.broadcast %cst_54 : f32 to vector<2x32xf32>
    %156 = arith.subf %155, %149 : vector<2x32xf32>
    %157 = arith.mulf %156, %154 : vector<2x32xf32>
    %158 = arith.mulf %149, %89 : vector<2x32xf32>
    %159 = arith.addf %157, %158 : vector<2x32xf32>
    %160 = vector.broadcast %91 : vector<2x1xf32> to vector<2x32xf32>
    %161 = arith.mulf %160, %131 : vector<2x32xf32>
    %162 = vector.broadcast %93 : vector<2x1xf32> to vector<2x32xf32>
    %163 = arith.mulf %162, %159 : vector<2x32xf32>
    %164 = vector.broadcast %91 : vector<2x1xf32> to vector<2x32xf32>
    %165 = arith.mulf %164, %131 : vector<2x32xf32>
    %cst_55 = arith.constant 1.000000e+00 : f32
    %166 = vector.broadcast %cst_55 : f32 to vector<2x1xf32>
    %167 = arith.subf %166, %91 : vector<2x1xf32>
    %168 = vector.broadcast %167 : vector<2x1xf32> to vector<2x32xf32>
    %169 = arith.mulf %168, %82 : vector<2x32xf32>
    %170 = arith.addf %165, %169 : vector<2x32xf32>
    %171 = vector.broadcast %93 : vector<2x1xf32> to vector<2x32xf32>
    %172 = arith.mulf %171, %159 : vector<2x32xf32>
    %cst_56 = arith.constant 1.000000e+00 : f32
    %173 = vector.broadcast %cst_56 : f32 to vector<2x1xf32>
    %174 = arith.subf %173, %93 : vector<2x1xf32>
    %175 = vector.broadcast %174 : vector<2x1xf32> to vector<2x32xf32>
    %176 = arith.mulf %175, %89 : vector<2x32xf32>
    %177 = arith.addf %172, %176 : vector<2x32xf32>
    %c2 = arith.constant 2 : index
    %c0_57 = arith.constant 0 : index
    %c0_58 = arith.constant 0 : index
    %178 = vector.load %arg3[%c2, %c0_57, %c0_58] : memref<8x2x1xf32, #tpu.memory_space<vmem>>, vector<1x2x1xf32>
    %179 = vector.shape_cast %178 : vector<1x2x1xf32> to vector<2x1xf32>
    %c5 = arith.constant 5 : index
    %c0_59 = arith.constant 0 : index
    %c0_60 = arith.constant 0 : index
    %180 = vector.load %arg3[%c5, %c0_59, %c0_60] : memref<8x2x1xf32, #tpu.memory_space<vmem>>, vector<1x2x1xf32>
    %181 = vector.shape_cast %180 : vector<1x2x1xf32> to vector<2x1xf32>
    %c0_61 = arith.constant 0 : index
    %c0_62 = arith.constant 0 : index
    %182 = vector.load %arg6[%c0_61, %c0_62] : memref<32x96xf32, #tpu.memory_space<vmem>>, vector<32x96xf32>
    %cst_63 = arith.constant dense<0.000000e+00> : vector<2x96xf32>
    %183 = tpu.matmul %170, %182, %cst_63 {dimension_numbers = #tpu.dot_dimension_numbers<[1], [0], [0], [1], [0, 0, 1, 1], [], []>} : vector<2x32xf32>, vector<32x96xf32>, vector<2x96xf32> -> vector<2x96xf32>
    %c0_64 = arith.constant 0 : index
    %c0_65 = arith.constant 0 : index
    %184 = vector.load %arg7[%c0_64, %c0_65] : memref<1x96xf32, #tpu.memory_space<vmem>>, vector<1x96xf32>
    %185 = vector.broadcast %184 : vector<1x96xf32> to vector<2x96xf32>
    %186 = arith.addf %183, %185 : vector<2x96xf32>
    %c0_66 = arith.constant 0 : index
    %c0_67 = arith.constant 0 : index
    %187 = vector.load %arg8[%c0_66, %c0_67] : memref<32x96xf32, #tpu.memory_space<vmem>>, vector<32x96xf32>
    %cst_68 = arith.constant dense<0.000000e+00> : vector<2x96xf32>
    %188 = tpu.matmul %177, %187, %cst_68 {dimension_numbers = #tpu.dot_dimension_numbers<[1], [0], [0], [1], [0, 0, 1, 1], [], []>} : vector<2x32xf32>, vector<32x96xf32>, vector<2x96xf32> -> vector<2x96xf32>
    %c0_69 = arith.constant 0 : index
    %c0_70 = arith.constant 0 : index
    %189 = vector.load %arg9[%c0_69, %c0_70] : memref<1x96xf32, #tpu.memory_space<vmem>>, vector<1x96xf32>
    %190 = vector.broadcast %189 : vector<1x96xf32> to vector<2x96xf32>
    %191 = arith.addf %188, %190 : vector<2x96xf32>
    %c2_71 = arith.constant 2 : index
    %c0_72 = arith.constant 0 : index
    %c0_73 = arith.constant 0 : index
    %192 = vector.load %arg1[%c2_71, %c0_72, %c0_73] : memref<8x2x96xf32, #tpu.memory_space<vmem>>, vector<1x2x96xf32>
    %193 = vector.shape_cast %192 : vector<1x2x96xf32> to vector<2x96xf32>
    %194 = vector.extract_strided_slice %193 {offsets = [0, 0], sizes = [2, 32], strides = [1, 1]} : vector<2x96xf32> to vector<2x32xf32>
    %195 = vector.extract_strided_slice %186 {offsets = [0, 0], sizes = [2, 32], strides = [1, 1]} : vector<2x96xf32> to vector<2x32xf32>
    %196 = arith.addf %194, %195 : vector<2x32xf32>
    %197 = arith.negf %196 : vector<2x32xf32>
    %198 = math.exp %197 : vector<2x32xf32>
    %cst_74 = arith.constant 1.000000e+00 : f32
    %199 = vector.broadcast %cst_74 : f32 to vector<2x32xf32>
    %200 = arith.addf %199, %198 : vector<2x32xf32>
    %201 = arith.divf %199, %200 : vector<2x32xf32>
    %202 = vector.extract_strided_slice %193 {offsets = [0, 32], sizes = [2, 32], strides = [1, 1]} : vector<2x96xf32> to vector<2x32xf32>
    %203 = vector.extract_strided_slice %186 {offsets = [0, 32], sizes = [2, 32], strides = [1, 1]} : vector<2x96xf32> to vector<2x32xf32>
    %204 = arith.addf %202, %203 : vector<2x32xf32>
    %205 = arith.negf %204 : vector<2x32xf32>
    %206 = math.exp %205 : vector<2x32xf32>
    %cst_75 = arith.constant 1.000000e+00 : f32
    %207 = vector.broadcast %cst_75 : f32 to vector<2x32xf32>
    %208 = arith.addf %207, %206 : vector<2x32xf32>
    %209 = arith.divf %207, %208 : vector<2x32xf32>
    %210 = vector.extract_strided_slice %193 {offsets = [0, 64], sizes = [2, 32], strides = [1, 1]} : vector<2x96xf32> to vector<2x32xf32>
    %211 = vector.extract_strided_slice %186 {offsets = [0, 64], sizes = [2, 32], strides = [1, 1]} : vector<2x96xf32> to vector<2x32xf32>
    %212 = arith.mulf %201, %211 : vector<2x32xf32>
    %213 = arith.addf %210, %212 : vector<2x32xf32>
    %214 = math.tanh %213 : vector<2x32xf32>
    %cst_76 = arith.constant 1.000000e+00 : f32
    %215 = vector.broadcast %cst_76 : f32 to vector<2x32xf32>
    %216 = arith.subf %215, %209 : vector<2x32xf32>
    %217 = arith.mulf %216, %214 : vector<2x32xf32>
    %218 = arith.mulf %209, %170 : vector<2x32xf32>
    %219 = arith.addf %217, %218 : vector<2x32xf32>
    %c5_77 = arith.constant 5 : index
    %c0_78 = arith.constant 0 : index
    %c0_79 = arith.constant 0 : index
    %220 = vector.load %arg2[%c5_77, %c0_78, %c0_79] : memref<8x2x96xf32, #tpu.memory_space<vmem>>, vector<1x2x96xf32>
    %221 = vector.shape_cast %220 : vector<1x2x96xf32> to vector<2x96xf32>
    %222 = vector.extract_strided_slice %221 {offsets = [0, 0], sizes = [2, 32], strides = [1, 1]} : vector<2x96xf32> to vector<2x32xf32>
    %223 = vector.extract_strided_slice %191 {offsets = [0, 0], sizes = [2, 32], strides = [1, 1]} : vector<2x96xf32> to vector<2x32xf32>
    %224 = arith.addf %222, %223 : vector<2x32xf32>
    %225 = arith.negf %224 : vector<2x32xf32>
    %226 = math.exp %225 : vector<2x32xf32>
    %cst_80 = arith.constant 1.000000e+00 : f32
    %227 = vector.broadcast %cst_80 : f32 to vector<2x32xf32>
    %228 = arith.addf %227, %226 : vector<2x32xf32>
    %229 = arith.divf %227, %228 : vector<2x32xf32>
    %230 = vector.extract_strided_slice %221 {offsets = [0, 32], sizes = [2, 32], strides = [1, 1]} : vector<2x96xf32> to vector<2x32xf32>
    %231 = vector.extract_strided_slice %191 {offsets = [0, 32], sizes = [2, 32], strides = [1, 1]} : vector<2x96xf32> to vector<2x32xf32>
    %232 = arith.addf %230, %231 : vector<2x32xf32>
    %233 = arith.negf %232 : vector<2x32xf32>
    %234 = math.exp %233 : vector<2x32xf32>
    %cst_81 = arith.constant 1.000000e+00 : f32
    %235 = vector.broadcast %cst_81 : f32 to vector<2x32xf32>
    %236 = arith.addf %235, %234 : vector<2x32xf32>
    %237 = arith.divf %235, %236 : vector<2x32xf32>
    %238 = vector.extract_strided_slice %221 {offsets = [0, 64], sizes = [2, 32], strides = [1, 1]} : vector<2x96xf32> to vector<2x32xf32>
    %239 = vector.extract_strided_slice %191 {offsets = [0, 64], sizes = [2, 32], strides = [1, 1]} : vector<2x96xf32> to vector<2x32xf32>
    %240 = arith.mulf %229, %239 : vector<2x32xf32>
    %241 = arith.addf %238, %240 : vector<2x32xf32>
    %242 = math.tanh %241 : vector<2x32xf32>
    %cst_82 = arith.constant 1.000000e+00 : f32
    %243 = vector.broadcast %cst_82 : f32 to vector<2x32xf32>
    %244 = arith.subf %243, %237 : vector<2x32xf32>
    %245 = arith.mulf %244, %242 : vector<2x32xf32>
    %246 = arith.mulf %237, %177 : vector<2x32xf32>
    %247 = arith.addf %245, %246 : vector<2x32xf32>
    %248 = vector.broadcast %179 : vector<2x1xf32> to vector<2x32xf32>
    %249 = arith.mulf %248, %219 : vector<2x32xf32>
    %250 = vector.broadcast %181 : vector<2x1xf32> to vector<2x32xf32>
    %251 = arith.mulf %250, %247 : vector<2x32xf32>
    %252 = vector.broadcast %179 : vector<2x1xf32> to vector<2x32xf32>
    %253 = arith.mulf %252, %219 : vector<2x32xf32>
    %cst_83 = arith.constant 1.000000e+00 : f32
    %254 = vector.broadcast %cst_83 : f32 to vector<2x1xf32>
    %255 = arith.subf %254, %179 : vector<2x1xf32>
    %256 = vector.broadcast %255 : vector<2x1xf32> to vector<2x32xf32>
    %257 = arith.mulf %256, %170 : vector<2x32xf32>
    %258 = arith.addf %253, %257 : vector<2x32xf32>
    %259 = vector.broadcast %181 : vector<2x1xf32> to vector<2x32xf32>
    %260 = arith.mulf %259, %247 : vector<2x32xf32>
    %cst_84 = arith.constant 1.000000e+00 : f32
    %261 = vector.broadcast %cst_84 : f32 to vector<2x1xf32>
    %262 = arith.subf %261, %181 : vector<2x1xf32>
    %263 = vector.broadcast %262 : vector<2x1xf32> to vector<2x32xf32>
    %264 = arith.mulf %263, %177 : vector<2x32xf32>
    %265 = arith.addf %260, %264 : vector<2x32xf32>
    %c3 = arith.constant 3 : index
    %c0_85 = arith.constant 0 : index
    %c0_86 = arith.constant 0 : index
    %266 = vector.load %arg3[%c3, %c0_85, %c0_86] : memref<8x2x1xf32, #tpu.memory_space<vmem>>, vector<1x2x1xf32>
    %267 = vector.shape_cast %266 : vector<1x2x1xf32> to vector<2x1xf32>
    %c4 = arith.constant 4 : index
    %c0_87 = arith.constant 0 : index
    %c0_88 = arith.constant 0 : index
    %268 = vector.load %arg3[%c4, %c0_87, %c0_88] : memref<8x2x1xf32, #tpu.memory_space<vmem>>, vector<1x2x1xf32>
    %269 = vector.shape_cast %268 : vector<1x2x1xf32> to vector<2x1xf32>
    %c0_89 = arith.constant 0 : index
    %c0_90 = arith.constant 0 : index
    %270 = vector.load %arg6[%c0_89, %c0_90] : memref<32x96xf32, #tpu.memory_space<vmem>>, vector<32x96xf32>
    %cst_91 = arith.constant dense<0.000000e+00> : vector<2x96xf32>
    %271 = tpu.matmul %258, %270, %cst_91 {dimension_numbers = #tpu.dot_dimension_numbers<[1], [0], [0], [1], [0, 0, 1, 1], [], []>} : vector<2x32xf32>, vector<32x96xf32>, vector<2x96xf32> -> vector<2x96xf32>
    %c0_92 = arith.constant 0 : index
    %c0_93 = arith.constant 0 : index
    %272 = vector.load %arg7[%c0_92, %c0_93] : memref<1x96xf32, #tpu.memory_space<vmem>>, vector<1x96xf32>
    %273 = vector.broadcast %272 : vector<1x96xf32> to vector<2x96xf32>
    %274 = arith.addf %271, %273 : vector<2x96xf32>
    %c0_94 = arith.constant 0 : index
    %c0_95 = arith.constant 0 : index
    %275 = vector.load %arg8[%c0_94, %c0_95] : memref<32x96xf32, #tpu.memory_space<vmem>>, vector<32x96xf32>
    %cst_96 = arith.constant dense<0.000000e+00> : vector<2x96xf32>
    %276 = tpu.matmul %265, %275, %cst_96 {dimension_numbers = #tpu.dot_dimension_numbers<[1], [0], [0], [1], [0, 0, 1, 1], [], []>} : vector<2x32xf32>, vector<32x96xf32>, vector<2x96xf32> -> vector<2x96xf32>
    %c0_97 = arith.constant 0 : index
    %c0_98 = arith.constant 0 : index
    %277 = vector.load %arg9[%c0_97, %c0_98] : memref<1x96xf32, #tpu.memory_space<vmem>>, vector<1x96xf32>
    %278 = vector.broadcast %277 : vector<1x96xf32> to vector<2x96xf32>
    %279 = arith.addf %276, %278 : vector<2x96xf32>
    %c3_99 = arith.constant 3 : index
    %c0_100 = arith.constant 0 : index
    %c0_101 = arith.constant 0 : index
    %280 = vector.load %arg1[%c3_99, %c0_100, %c0_101] : memref<8x2x96xf32, #tpu.memory_space<vmem>>, vector<1x2x96xf32>
    %281 = vector.shape_cast %280 : vector<1x2x96xf32> to vector<2x96xf32>
    %282 = vector.extract_strided_slice %281 {offsets = [0, 0], sizes = [2, 32], strides = [1, 1]} : vector<2x96xf32> to vector<2x32xf32>
    %283 = vector.extract_strided_slice %274 {offsets = [0, 0], sizes = [2, 32], strides = [1, 1]} : vector<2x96xf32> to vector<2x32xf32>
    %284 = arith.addf %282, %283 : vector<2x32xf32>
    %285 = arith.negf %284 : vector<2x32xf32>
    %286 = math.exp %285 : vector<2x32xf32>
    %cst_102 = arith.constant 1.000000e+00 : f32
    %287 = vector.broadcast %cst_102 : f32 to vector<2x32xf32>
    %288 = arith.addf %287, %286 : vector<2x32xf32>
    %289 = arith.divf %287, %288 : vector<2x32xf32>
    %290 = vector.extract_strided_slice %281 {offsets = [0, 32], sizes = [2, 32], strides = [1, 1]} : vector<2x96xf32> to vector<2x32xf32>
    %291 = vector.extract_strided_slice %274 {offsets = [0, 32], sizes = [2, 32], strides = [1, 1]} : vector<2x96xf32> to vector<2x32xf32>
    %292 = arith.addf %290, %291 : vector<2x32xf32>
    %293 = arith.negf %292 : vector<2x32xf32>
    %294 = math.exp %293 : vector<2x32xf32>
    %cst_103 = arith.constant 1.000000e+00 : f32
    %295 = vector.broadcast %cst_103 : f32 to vector<2x32xf32>
    %296 = arith.addf %295, %294 : vector<2x32xf32>
    %297 = arith.divf %295, %296 : vector<2x32xf32>
    %298 = vector.extract_strided_slice %281 {offsets = [0, 64], sizes = [2, 32], strides = [1, 1]} : vector<2x96xf32> to vector<2x32xf32>
    %299 = vector.extract_strided_slice %274 {offsets = [0, 64], sizes = [2, 32], strides = [1, 1]} : vector<2x96xf32> to vector<2x32xf32>
    %300 = arith.mulf %289, %299 : vector<2x32xf32>
    %301 = arith.addf %298, %300 : vector<2x32xf32>
    %302 = math.tanh %301 : vector<2x32xf32>
    %cst_104 = arith.constant 1.000000e+00 : f32
    %303 = vector.broadcast %cst_104 : f32 to vector<2x32xf32>
    %304 = arith.subf %303, %297 : vector<2x32xf32>
    %305 = arith.mulf %304, %302 : vector<2x32xf32>
    %306 = arith.mulf %297, %258 : vector<2x32xf32>
    %307 = arith.addf %305, %306 : vector<2x32xf32>
    %c4_105 = arith.constant 4 : index
    %c0_106 = arith.constant 0 : index
    %c0_107 = arith.constant 0 : index
    %308 = vector.load %arg2[%c4_105, %c0_106, %c0_107] : memref<8x2x96xf32, #tpu.memory_space<vmem>>, vector<1x2x96xf32>
    %309 = vector.shape_cast %308 : vector<1x2x96xf32> to vector<2x96xf32>
    %310 = vector.extract_strided_slice %309 {offsets = [0, 0], sizes = [2, 32], strides = [1, 1]} : vector<2x96xf32> to vector<2x32xf32>
    %311 = vector.extract_strided_slice %279 {offsets = [0, 0], sizes = [2, 32], strides = [1, 1]} : vector<2x96xf32> to vector<2x32xf32>
    %312 = arith.addf %310, %311 : vector<2x32xf32>
    %313 = arith.negf %312 : vector<2x32xf32>
    %314 = math.exp %313 : vector<2x32xf32>
    %cst_108 = arith.constant 1.000000e+00 : f32
    %315 = vector.broadcast %cst_108 : f32 to vector<2x32xf32>
    %316 = arith.addf %315, %314 : vector<2x32xf32>
    %317 = arith.divf %315, %316 : vector<2x32xf32>
    %318 = vector.extract_strided_slice %309 {offsets = [0, 32], sizes = [2, 32], strides = [1, 1]} : vector<2x96xf32> to vector<2x32xf32>
    %319 = vector.extract_strided_slice %279 {offsets = [0, 32], sizes = [2, 32], strides = [1, 1]} : vector<2x96xf32> to vector<2x32xf32>
    %320 = arith.addf %318, %319 : vector<2x32xf32>
    %321 = arith.negf %320 : vector<2x32xf32>
    %322 = math.exp %321 : vector<2x32xf32>
    %cst_109 = arith.constant 1.000000e+00 : f32
    %323 = vector.broadcast %cst_109 : f32 to vector<2x32xf32>
    %324 = arith.addf %323, %322 : vector<2x32xf32>
    %325 = arith.divf %323, %324 : vector<2x32xf32>
    %326 = vector.extract_strided_slice %309 {offsets = [0, 64], sizes = [2, 32], strides = [1, 1]} : vector<2x96xf32> to vector<2x32xf32>
    %327 = vector.extract_strided_slice %279 {offsets = [0, 64], sizes = [2, 32], strides = [1, 1]} : vector<2x96xf32> to vector<2x32xf32>
    %328 = arith.mulf %317, %327 : vector<2x32xf32>
    %329 = arith.addf %326, %328 : vector<2x32xf32>
    %330 = math.tanh %329 : vector<2x32xf32>
    %cst_110 = arith.constant 1.000000e+00 : f32
    %331 = vector.broadcast %cst_110 : f32 to vector<2x32xf32>
    %332 = arith.subf %331, %325 : vector<2x32xf32>
    %333 = arith.mulf %332, %330 : vector<2x32xf32>
    %334 = arith.mulf %325, %265 : vector<2x32xf32>
    %335 = arith.addf %333, %334 : vector<2x32xf32>
    %336 = vector.broadcast %267 : vector<2x1xf32> to vector<2x32xf32>
    %337 = arith.mulf %336, %307 : vector<2x32xf32>
    %338 = vector.broadcast %269 : vector<2x1xf32> to vector<2x32xf32>
    %339 = arith.mulf %338, %335 : vector<2x32xf32>
    %340 = vector.broadcast %267 : vector<2x1xf32> to vector<2x32xf32>
    %341 = arith.mulf %340, %307 : vector<2x32xf32>
    %cst_111 = arith.constant 1.000000e+00 : f32
    %342 = vector.broadcast %cst_111 : f32 to vector<2x1xf32>
    %343 = arith.subf %342, %267 : vector<2x1xf32>
    %344 = vector.broadcast %343 : vector<2x1xf32> to vector<2x32xf32>
    %345 = arith.mulf %344, %258 : vector<2x32xf32>
    %346 = arith.addf %341, %345 : vector<2x32xf32>
    %347 = vector.broadcast %269 : vector<2x1xf32> to vector<2x32xf32>
    %348 = arith.mulf %347, %335 : vector<2x32xf32>
    %cst_112 = arith.constant 1.000000e+00 : f32
    %349 = vector.broadcast %cst_112 : f32 to vector<2x1xf32>
    %350 = arith.subf %349, %269 : vector<2x1xf32>
    %351 = vector.broadcast %350 : vector<2x1xf32> to vector<2x32xf32>
    %352 = arith.mulf %351, %265 : vector<2x32xf32>
    %353 = arith.addf %348, %352 : vector<2x32xf32>
    %c4_113 = arith.constant 4 : index
    %c0_114 = arith.constant 0 : index
    %c0_115 = arith.constant 0 : index
    %354 = vector.load %arg3[%c4_113, %c0_114, %c0_115] : memref<8x2x1xf32, #tpu.memory_space<vmem>>, vector<1x2x1xf32>
    %355 = vector.shape_cast %354 : vector<1x2x1xf32> to vector<2x1xf32>
    %c3_116 = arith.constant 3 : index
    %c0_117 = arith.constant 0 : index
    %c0_118 = arith.constant 0 : index
    %356 = vector.load %arg3[%c3_116, %c0_117, %c0_118] : memref<8x2x1xf32, #tpu.memory_space<vmem>>, vector<1x2x1xf32>
    %357 = vector.shape_cast %356 : vector<1x2x1xf32> to vector<2x1xf32>
    %c0_119 = arith.constant 0 : index
    %c0_120 = arith.constant 0 : index
    %358 = vector.load %arg6[%c0_119, %c0_120] : memref<32x96xf32, #tpu.memory_space<vmem>>, vector<32x96xf32>
    %cst_121 = arith.constant dense<0.000000e+00> : vector<2x96xf32>
    %359 = tpu.matmul %346, %358, %cst_121 {dimension_numbers = #tpu.dot_dimension_numbers<[1], [0], [0], [1], [0, 0, 1, 1], [], []>} : vector<2x32xf32>, vector<32x96xf32>, vector<2x96xf32> -> vector<2x96xf32>
    %c0_122 = arith.constant 0 : index
    %c0_123 = arith.constant 0 : index
    %360 = vector.load %arg7[%c0_122, %c0_123] : memref<1x96xf32, #tpu.memory_space<vmem>>, vector<1x96xf32>
    %361 = vector.broadcast %360 : vector<1x96xf32> to vector<2x96xf32>
    %362 = arith.addf %359, %361 : vector<2x96xf32>
    %c0_124 = arith.constant 0 : index
    %c0_125 = arith.constant 0 : index
    %363 = vector.load %arg8[%c0_124, %c0_125] : memref<32x96xf32, #tpu.memory_space<vmem>>, vector<32x96xf32>
    %cst_126 = arith.constant dense<0.000000e+00> : vector<2x96xf32>
    %364 = tpu.matmul %353, %363, %cst_126 {dimension_numbers = #tpu.dot_dimension_numbers<[1], [0], [0], [1], [0, 0, 1, 1], [], []>} : vector<2x32xf32>, vector<32x96xf32>, vector<2x96xf32> -> vector<2x96xf32>
    %c0_127 = arith.constant 0 : index
    %c0_128 = arith.constant 0 : index
    %365 = vector.load %arg9[%c0_127, %c0_128] : memref<1x96xf32, #tpu.memory_space<vmem>>, vector<1x96xf32>
    %366 = vector.broadcast %365 : vector<1x96xf32> to vector<2x96xf32>
    %367 = arith.addf %364, %366 : vector<2x96xf32>
    %c4_129 = arith.constant 4 : index
    %c0_130 = arith.constant 0 : index
    %c0_131 = arith.constant 0 : index
    %368 = vector.load %arg1[%c4_129, %c0_130, %c0_131] : memref<8x2x96xf32, #tpu.memory_space<vmem>>, vector<1x2x96xf32>
    %369 = vector.shape_cast %368 : vector<1x2x96xf32> to vector<2x96xf32>
    %370 = vector.extract_strided_slice %369 {offsets = [0, 0], sizes = [2, 32], strides = [1, 1]} : vector<2x96xf32> to vector<2x32xf32>
    %371 = vector.extract_strided_slice %362 {offsets = [0, 0], sizes = [2, 32], strides = [1, 1]} : vector<2x96xf32> to vector<2x32xf32>
    %372 = arith.addf %370, %371 : vector<2x32xf32>
    %373 = arith.negf %372 : vector<2x32xf32>
    %374 = math.exp %373 : vector<2x32xf32>
    %cst_132 = arith.constant 1.000000e+00 : f32
    %375 = vector.broadcast %cst_132 : f32 to vector<2x32xf32>
    %376 = arith.addf %375, %374 : vector<2x32xf32>
    %377 = arith.divf %375, %376 : vector<2x32xf32>
    %378 = vector.extract_strided_slice %369 {offsets = [0, 32], sizes = [2, 32], strides = [1, 1]} : vector<2x96xf32> to vector<2x32xf32>
    %379 = vector.extract_strided_slice %362 {offsets = [0, 32], sizes = [2, 32], strides = [1, 1]} : vector<2x96xf32> to vector<2x32xf32>
    %380 = arith.addf %378, %379 : vector<2x32xf32>
    %381 = arith.negf %380 : vector<2x32xf32>
    %382 = math.exp %381 : vector<2x32xf32>
    %cst_133 = arith.constant 1.000000e+00 : f32
    %383 = vector.broadcast %cst_133 : f32 to vector<2x32xf32>
    %384 = arith.addf %383, %382 : vector<2x32xf32>
    %385 = arith.divf %383, %384 : vector<2x32xf32>
    %386 = vector.extract_strided_slice %369 {offsets = [0, 64], sizes = [2, 32], strides = [1, 1]} : vector<2x96xf32> to vector<2x32xf32>
    %387 = vector.extract_strided_slice %362 {offsets = [0, 64], sizes = [2, 32], strides = [1, 1]} : vector<2x96xf32> to vector<2x32xf32>
    %388 = arith.mulf %377, %387 : vector<2x32xf32>
    %389 = arith.addf %386, %388 : vector<2x32xf32>
    %390 = math.tanh %389 : vector<2x32xf32>
    %cst_134 = arith.constant 1.000000e+00 : f32
    %391 = vector.broadcast %cst_134 : f32 to vector<2x32xf32>
    %392 = arith.subf %391, %385 : vector<2x32xf32>
    %393 = arith.mulf %392, %390 : vector<2x32xf32>
    %394 = arith.mulf %385, %346 : vector<2x32xf32>
    %395 = arith.addf %393, %394 : vector<2x32xf32>
    %c3_135 = arith.constant 3 : index
    %c0_136 = arith.constant 0 : index
    %c0_137 = arith.constant 0 : index
    %396 = vector.load %arg2[%c3_135, %c0_136, %c0_137] : memref<8x2x96xf32, #tpu.memory_space<vmem>>, vector<1x2x96xf32>
    %397 = vector.shape_cast %396 : vector<1x2x96xf32> to vector<2x96xf32>
    %398 = vector.extract_strided_slice %397 {offsets = [0, 0], sizes = [2, 32], strides = [1, 1]} : vector<2x96xf32> to vector<2x32xf32>
    %399 = vector.extract_strided_slice %367 {offsets = [0, 0], sizes = [2, 32], strides = [1, 1]} : vector<2x96xf32> to vector<2x32xf32>
    %400 = arith.addf %398, %399 : vector<2x32xf32>
    %401 = arith.negf %400 : vector<2x32xf32>
    %402 = math.exp %401 : vector<2x32xf32>
    %cst_138 = arith.constant 1.000000e+00 : f32
    %403 = vector.broadcast %cst_138 : f32 to vector<2x32xf32>
    %404 = arith.addf %403, %402 : vector<2x32xf32>
    %405 = arith.divf %403, %404 : vector<2x32xf32>
    %406 = vector.extract_strided_slice %397 {offsets = [0, 32], sizes = [2, 32], strides = [1, 1]} : vector<2x96xf32> to vector<2x32xf32>
    %407 = vector.extract_strided_slice %367 {offsets = [0, 32], sizes = [2, 32], strides = [1, 1]} : vector<2x96xf32> to vector<2x32xf32>
    %408 = arith.addf %406, %407 : vector<2x32xf32>
    %409 = arith.negf %408 : vector<2x32xf32>
    %410 = math.exp %409 : vector<2x32xf32>
    %cst_139 = arith.constant 1.000000e+00 : f32
    %411 = vector.broadcast %cst_139 : f32 to vector<2x32xf32>
    %412 = arith.addf %411, %410 : vector<2x32xf32>
    %413 = arith.divf %411, %412 : vector<2x32xf32>
    %414 = vector.extract_strided_slice %397 {offsets = [0, 64], sizes = [2, 32], strides = [1, 1]} : vector<2x96xf32> to vector<2x32xf32>
    %415 = vector.extract_strided_slice %367 {offsets = [0, 64], sizes = [2, 32], strides = [1, 1]} : vector<2x96xf32> to vector<2x32xf32>
    %416 = arith.mulf %405, %415 : vector<2x32xf32>
    %417 = arith.addf %414, %416 : vector<2x32xf32>
    %418 = math.tanh %417 : vector<2x32xf32>
    %cst_140 = arith.constant 1.000000e+00 : f32
    %419 = vector.broadcast %cst_140 : f32 to vector<2x32xf32>
    %420 = arith.subf %419, %413 : vector<2x32xf32>
    %421 = arith.mulf %420, %418 : vector<2x32xf32>
    %422 = arith.mulf %413, %353 : vector<2x32xf32>
    %423 = arith.addf %421, %422 : vector<2x32xf32>
    %424 = vector.broadcast %355 : vector<2x1xf32> to vector<2x32xf32>
    %425 = arith.mulf %424, %395 : vector<2x32xf32>
    %426 = vector.broadcast %357 : vector<2x1xf32> to vector<2x32xf32>
    %427 = arith.mulf %426, %423 : vector<2x32xf32>
    %428 = vector.broadcast %355 : vector<2x1xf32> to vector<2x32xf32>
    %429 = arith.mulf %428, %395 : vector<2x32xf32>
    %cst_141 = arith.constant 1.000000e+00 : f32
    %430 = vector.broadcast %cst_141 : f32 to vector<2x1xf32>
    %431 = arith.subf %430, %355 : vector<2x1xf32>
    %432 = vector.broadcast %431 : vector<2x1xf32> to vector<2x32xf32>
    %433 = arith.mulf %432, %346 : vector<2x32xf32>
    %434 = arith.addf %429, %433 : vector<2x32xf32>
    %435 = vector.broadcast %357 : vector<2x1xf32> to vector<2x32xf32>
    %436 = arith.mulf %435, %423 : vector<2x32xf32>
    %cst_142 = arith.constant 1.000000e+00 : f32
    %437 = vector.broadcast %cst_142 : f32 to vector<2x1xf32>
    %438 = arith.subf %437, %357 : vector<2x1xf32>
    %439 = vector.broadcast %438 : vector<2x1xf32> to vector<2x32xf32>
    %440 = arith.mulf %439, %353 : vector<2x32xf32>
    %441 = arith.addf %436, %440 : vector<2x32xf32>
    %c5_143 = arith.constant 5 : index
    %c0_144 = arith.constant 0 : index
    %c0_145 = arith.constant 0 : index
    %442 = vector.load %arg3[%c5_143, %c0_144, %c0_145] : memref<8x2x1xf32, #tpu.memory_space<vmem>>, vector<1x2x1xf32>
    %443 = vector.shape_cast %442 : vector<1x2x1xf32> to vector<2x1xf32>
    %c2_146 = arith.constant 2 : index
    %c0_147 = arith.constant 0 : index
    %c0_148 = arith.constant 0 : index
    %444 = vector.load %arg3[%c2_146, %c0_147, %c0_148] : memref<8x2x1xf32, #tpu.memory_space<vmem>>, vector<1x2x1xf32>
    %445 = vector.shape_cast %444 : vector<1x2x1xf32> to vector<2x1xf32>
    %c0_149 = arith.constant 0 : index
    %c0_150 = arith.constant 0 : index
    %446 = vector.load %arg6[%c0_149, %c0_150] : memref<32x96xf32, #tpu.memory_space<vmem>>, vector<32x96xf32>
    %cst_151 = arith.constant dense<0.000000e+00> : vector<2x96xf32>
    %447 = tpu.matmul %434, %446, %cst_151 {dimension_numbers = #tpu.dot_dimension_numbers<[1], [0], [0], [1], [0, 0, 1, 1], [], []>} : vector<2x32xf32>, vector<32x96xf32>, vector<2x96xf32> -> vector<2x96xf32>
    %c0_152 = arith.constant 0 : index
    %c0_153 = arith.constant 0 : index
    %448 = vector.load %arg7[%c0_152, %c0_153] : memref<1x96xf32, #tpu.memory_space<vmem>>, vector<1x96xf32>
    %449 = vector.broadcast %448 : vector<1x96xf32> to vector<2x96xf32>
    %450 = arith.addf %447, %449 : vector<2x96xf32>
    %c0_154 = arith.constant 0 : index
    %c0_155 = arith.constant 0 : index
    %451 = vector.load %arg8[%c0_154, %c0_155] : memref<32x96xf32, #tpu.memory_space<vmem>>, vector<32x96xf32>
    %cst_156 = arith.constant dense<0.000000e+00> : vector<2x96xf32>
    %452 = tpu.matmul %441, %451, %cst_156 {dimension_numbers = #tpu.dot_dimension_numbers<[1], [0], [0], [1], [0, 0, 1, 1], [], []>} : vector<2x32xf32>, vector<32x96xf32>, vector<2x96xf32> -> vector<2x96xf32>
    %c0_157 = arith.constant 0 : index
    %c0_158 = arith.constant 0 : index
    %453 = vector.load %arg9[%c0_157, %c0_158] : memref<1x96xf32, #tpu.memory_space<vmem>>, vector<1x96xf32>
    %454 = vector.broadcast %453 : vector<1x96xf32> to vector<2x96xf32>
    %455 = arith.addf %452, %454 : vector<2x96xf32>
    %c5_159 = arith.constant 5 : index
    %c0_160 = arith.constant 0 : index
    %c0_161 = arith.constant 0 : index
    %456 = vector.load %arg1[%c5_159, %c0_160, %c0_161] : memref<8x2x96xf32, #tpu.memory_space<vmem>>, vector<1x2x96xf32>
    %457 = vector.shape_cast %456 : vector<1x2x96xf32> to vector<2x96xf32>
    %458 = vector.extract_strided_slice %457 {offsets = [0, 0], sizes = [2, 32], strides = [1, 1]} : vector<2x96xf32> to vector<2x32xf32>
    %459 = vector.extract_strided_slice %450 {offsets = [0, 0], sizes = [2, 32], strides = [1, 1]} : vector<2x96xf32> to vector<2x32xf32>
    %460 = arith.addf %458, %459 : vector<2x32xf32>
    %461 = arith.negf %460 : vector<2x32xf32>
    %462 = math.exp %461 : vector<2x32xf32>
    %cst_162 = arith.constant 1.000000e+00 : f32
    %463 = vector.broadcast %cst_162 : f32 to vector<2x32xf32>
    %464 = arith.addf %463, %462 : vector<2x32xf32>
    %465 = arith.divf %463, %464 : vector<2x32xf32>
    %466 = vector.extract_strided_slice %457 {offsets = [0, 32], sizes = [2, 32], strides = [1, 1]} : vector<2x96xf32> to vector<2x32xf32>
    %467 = vector.extract_strided_slice %450 {offsets = [0, 32], sizes = [2, 32], strides = [1, 1]} : vector<2x96xf32> to vector<2x32xf32>
    %468 = arith.addf %466, %467 : vector<2x32xf32>
    %469 = arith.negf %468 : vector<2x32xf32>
    %470 = math.exp %469 : vector<2x32xf32>
    %cst_163 = arith.constant 1.000000e+00 : f32
    %471 = vector.broadcast %cst_163 : f32 to vector<2x32xf32>
    %472 = arith.addf %471, %470 : vector<2x32xf32>
    %473 = arith.divf %471, %472 : vector<2x32xf32>
    %474 = vector.extract_strided_slice %457 {offsets = [0, 64], sizes = [2, 32], strides = [1, 1]} : vector<2x96xf32> to vector<2x32xf32>
    %475 = vector.extract_strided_slice %450 {offsets = [0, 64], sizes = [2, 32], strides = [1, 1]} : vector<2x96xf32> to vector<2x32xf32>
    %476 = arith.mulf %465, %475 : vector<2x32xf32>
    %477 = arith.addf %474, %476 : vector<2x32xf32>
    %478 = math.tanh %477 : vector<2x32xf32>
    %cst_164 = arith.constant 1.000000e+00 : f32
    %479 = vector.broadcast %cst_164 : f32 to vector<2x32xf32>
    %480 = arith.subf %479, %473 : vector<2x32xf32>
    %481 = arith.mulf %480, %478 : vector<2x32xf32>
    %482 = arith.mulf %473, %434 : vector<2x32xf32>
    %483 = arith.addf %481, %482 : vector<2x32xf32>
    %c2_165 = arith.constant 2 : index
    %c0_166 = arith.constant 0 : index
    %c0_167 = arith.constant 0 : index
    %484 = vector.load %arg2[%c2_165, %c0_166, %c0_167] : memref<8x2x96xf32, #tpu.memory_space<vmem>>, vector<1x2x96xf32>
    %485 = vector.shape_cast %484 : vector<1x2x96xf32> to vector<2x96xf32>
    %486 = vector.extract_strided_slice %485 {offsets = [0, 0], sizes = [2, 32], strides = [1, 1]} : vector<2x96xf32> to vector<2x32xf32>
    %487 = vector.extract_strided_slice %455 {offsets = [0, 0], sizes = [2, 32], strides = [1, 1]} : vector<2x96xf32> to vector<2x32xf32>
    %488 = arith.addf %486, %487 : vector<2x32xf32>
    %489 = arith.negf %488 : vector<2x32xf32>
    %490 = math.exp %489 : vector<2x32xf32>
    %cst_168 = arith.constant 1.000000e+00 : f32
    %491 = vector.broadcast %cst_168 : f32 to vector<2x32xf32>
    %492 = arith.addf %491, %490 : vector<2x32xf32>
    %493 = arith.divf %491, %492 : vector<2x32xf32>
    %494 = vector.extract_strided_slice %485 {offsets = [0, 32], sizes = [2, 32], strides = [1, 1]} : vector<2x96xf32> to vector<2x32xf32>
    %495 = vector.extract_strided_slice %455 {offsets = [0, 32], sizes = [2, 32], strides = [1, 1]} : vector<2x96xf32> to vector<2x32xf32>
    %496 = arith.addf %494, %495 : vector<2x32xf32>
    %497 = arith.negf %496 : vector<2x32xf32>
    %498 = math.exp %497 : vector<2x32xf32>
    %cst_169 = arith.constant 1.000000e+00 : f32
    %499 = vector.broadcast %cst_169 : f32 to vector<2x32xf32>
    %500 = arith.addf %499, %498 : vector<2x32xf32>
    %501 = arith.divf %499, %500 : vector<2x32xf32>
    %502 = vector.extract_strided_slice %485 {offsets = [0, 64], sizes = [2, 32], strides = [1, 1]} : vector<2x96xf32> to vector<2x32xf32>
    %503 = vector.extract_strided_slice %455 {offsets = [0, 64], sizes = [2, 32], strides = [1, 1]} : vector<2x96xf32> to vector<2x32xf32>
    %504 = arith.mulf %493, %503 : vector<2x32xf32>
    %505 = arith.addf %502, %504 : vector<2x32xf32>
    %506 = math.tanh %505 : vector<2x32xf32>
    %cst_170 = arith.constant 1.000000e+00 : f32
    %507 = vector.broadcast %cst_170 : f32 to vector<2x32xf32>
    %508 = arith.subf %507, %501 : vector<2x32xf32>
    %509 = arith.mulf %508, %506 : vector<2x32xf32>
    %510 = arith.mulf %501, %441 : vector<2x32xf32>
    %511 = arith.addf %509, %510 : vector<2x32xf32>
    %512 = vector.broadcast %443 : vector<2x1xf32> to vector<2x32xf32>
    %513 = arith.mulf %512, %483 : vector<2x32xf32>
    %514 = vector.broadcast %445 : vector<2x1xf32> to vector<2x32xf32>
    %515 = arith.mulf %514, %511 : vector<2x32xf32>
    %516 = vector.broadcast %443 : vector<2x1xf32> to vector<2x32xf32>
    %517 = arith.mulf %516, %483 : vector<2x32xf32>
    %cst_171 = arith.constant 1.000000e+00 : f32
    %518 = vector.broadcast %cst_171 : f32 to vector<2x1xf32>
    %519 = arith.subf %518, %443 : vector<2x1xf32>
    %520 = vector.broadcast %519 : vector<2x1xf32> to vector<2x32xf32>
    %521 = arith.mulf %520, %434 : vector<2x32xf32>
    %522 = arith.addf %517, %521 : vector<2x32xf32>
    %523 = vector.broadcast %445 : vector<2x1xf32> to vector<2x32xf32>
    %524 = arith.mulf %523, %511 : vector<2x32xf32>
    %cst_172 = arith.constant 1.000000e+00 : f32
    %525 = vector.broadcast %cst_172 : f32 to vector<2x1xf32>
    %526 = arith.subf %525, %445 : vector<2x1xf32>
    %527 = vector.broadcast %526 : vector<2x1xf32> to vector<2x32xf32>
    %528 = arith.mulf %527, %441 : vector<2x32xf32>
    %529 = arith.addf %524, %528 : vector<2x32xf32>
    %c6_173 = arith.constant 6 : index
    %c0_174 = arith.constant 0 : index
    %c0_175 = arith.constant 0 : index
    %530 = vector.load %arg3[%c6_173, %c0_174, %c0_175] : memref<8x2x1xf32, #tpu.memory_space<vmem>>, vector<1x2x1xf32>
    %531 = vector.shape_cast %530 : vector<1x2x1xf32> to vector<2x1xf32>
    %c1_176 = arith.constant 1 : index
    %c0_177 = arith.constant 0 : index
    %c0_178 = arith.constant 0 : index
    %532 = vector.load %arg3[%c1_176, %c0_177, %c0_178] : memref<8x2x1xf32, #tpu.memory_space<vmem>>, vector<1x2x1xf32>
    %533 = vector.shape_cast %532 : vector<1x2x1xf32> to vector<2x1xf32>
    %c0_179 = arith.constant 0 : index
    %c0_180 = arith.constant 0 : index
    %534 = vector.load %arg6[%c0_179, %c0_180] : memref<32x96xf32, #tpu.memory_space<vmem>>, vector<32x96xf32>
    %cst_181 = arith.constant dense<0.000000e+00> : vector<2x96xf32>
    %535 = tpu.matmul %522, %534, %cst_181 {dimension_numbers = #tpu.dot_dimension_numbers<[1], [0], [0], [1], [0, 0, 1, 1], [], []>} : vector<2x32xf32>, vector<32x96xf32>, vector<2x96xf32> -> vector<2x96xf32>
    %c0_182 = arith.constant 0 : index
    %c0_183 = arith.constant 0 : index
    %536 = vector.load %arg7[%c0_182, %c0_183] : memref<1x96xf32, #tpu.memory_space<vmem>>, vector<1x96xf32>
    %537 = vector.broadcast %536 : vector<1x96xf32> to vector<2x96xf32>
    %538 = arith.addf %535, %537 : vector<2x96xf32>
    %c0_184 = arith.constant 0 : index
    %c0_185 = arith.constant 0 : index
    %539 = vector.load %arg8[%c0_184, %c0_185] : memref<32x96xf32, #tpu.memory_space<vmem>>, vector<32x96xf32>
    %cst_186 = arith.constant dense<0.000000e+00> : vector<2x96xf32>
    %540 = tpu.matmul %529, %539, %cst_186 {dimension_numbers = #tpu.dot_dimension_numbers<[1], [0], [0], [1], [0, 0, 1, 1], [], []>} : vector<2x32xf32>, vector<32x96xf32>, vector<2x96xf32> -> vector<2x96xf32>
    %c0_187 = arith.constant 0 : index
    %c0_188 = arith.constant 0 : index
    %541 = vector.load %arg9[%c0_187, %c0_188] : memref<1x96xf32, #tpu.memory_space<vmem>>, vector<1x96xf32>
    %542 = vector.broadcast %541 : vector<1x96xf32> to vector<2x96xf32>
    %543 = arith.addf %540, %542 : vector<2x96xf32>
    %c6_189 = arith.constant 6 : index
    %c0_190 = arith.constant 0 : index
    %c0_191 = arith.constant 0 : index
    %544 = vector.load %arg1[%c6_189, %c0_190, %c0_191] : memref<8x2x96xf32, #tpu.memory_space<vmem>>, vector<1x2x96xf32>
    %545 = vector.shape_cast %544 : vector<1x2x96xf32> to vector<2x96xf32>
    %546 = vector.extract_strided_slice %545 {offsets = [0, 0], sizes = [2, 32], strides = [1, 1]} : vector<2x96xf32> to vector<2x32xf32>
    %547 = vector.extract_strided_slice %538 {offsets = [0, 0], sizes = [2, 32], strides = [1, 1]} : vector<2x96xf32> to vector<2x32xf32>
    %548 = arith.addf %546, %547 : vector<2x32xf32>
    %549 = arith.negf %548 : vector<2x32xf32>
    %550 = math.exp %549 : vector<2x32xf32>
    %cst_192 = arith.constant 1.000000e+00 : f32
    %551 = vector.broadcast %cst_192 : f32 to vector<2x32xf32>
    %552 = arith.addf %551, %550 : vector<2x32xf32>
    %553 = arith.divf %551, %552 : vector<2x32xf32>
    %554 = vector.extract_strided_slice %545 {offsets = [0, 32], sizes = [2, 32], strides = [1, 1]} : vector<2x96xf32> to vector<2x32xf32>
    %555 = vector.extract_strided_slice %538 {offsets = [0, 32], sizes = [2, 32], strides = [1, 1]} : vector<2x96xf32> to vector<2x32xf32>
    %556 = arith.addf %554, %555 : vector<2x32xf32>
    %557 = arith.negf %556 : vector<2x32xf32>
    %558 = math.exp %557 : vector<2x32xf32>
    %cst_193 = arith.constant 1.000000e+00 : f32
    %559 = vector.broadcast %cst_193 : f32 to vector<2x32xf32>
    %560 = arith.addf %559, %558 : vector<2x32xf32>
    %561 = arith.divf %559, %560 : vector<2x32xf32>
    %562 = vector.extract_strided_slice %545 {offsets = [0, 64], sizes = [2, 32], strides = [1, 1]} : vector<2x96xf32> to vector<2x32xf32>
    %563 = vector.extract_strided_slice %538 {offsets = [0, 64], sizes = [2, 32], strides = [1, 1]} : vector<2x96xf32> to vector<2x32xf32>
    %564 = arith.mulf %553, %563 : vector<2x32xf32>
    %565 = arith.addf %562, %564 : vector<2x32xf32>
    %566 = math.tanh %565 : vector<2x32xf32>
    %cst_194 = arith.constant 1.000000e+00 : f32
    %567 = vector.broadcast %cst_194 : f32 to vector<2x32xf32>
    %568 = arith.subf %567, %561 : vector<2x32xf32>
    %569 = arith.mulf %568, %566 : vector<2x32xf32>
    %570 = arith.mulf %561, %522 : vector<2x32xf32>
    %571 = arith.addf %569, %570 : vector<2x32xf32>
    %c1_195 = arith.constant 1 : index
    %c0_196 = arith.constant 0 : index
    %c0_197 = arith.constant 0 : index
    %572 = vector.load %arg2[%c1_195, %c0_196, %c0_197] : memref<8x2x96xf32, #tpu.memory_space<vmem>>, vector<1x2x96xf32>
    %573 = vector.shape_cast %572 : vector<1x2x96xf32> to vector<2x96xf32>
    %574 = vector.extract_strided_slice %573 {offsets = [0, 0], sizes = [2, 32], strides = [1, 1]} : vector<2x96xf32> to vector<2x32xf32>
    %575 = vector.extract_strided_slice %543 {offsets = [0, 0], sizes = [2, 32], strides = [1, 1]} : vector<2x96xf32> to vector<2x32xf32>
    %576 = arith.addf %574, %575 : vector<2x32xf32>
    %577 = arith.negf %576 : vector<2x32xf32>
    %578 = math.exp %577 : vector<2x32xf32>
    %cst_198 = arith.constant 1.000000e+00 : f32
    %579 = vector.broadcast %cst_198 : f32 to vector<2x32xf32>
    %580 = arith.addf %579, %578 : vector<2x32xf32>
    %581 = arith.divf %579, %580 : vector<2x32xf32>
    %582 = vector.extract_strided_slice %573 {offsets = [0, 32], sizes = [2, 32], strides = [1, 1]} : vector<2x96xf32> to vector<2x32xf32>
    %583 = vector.extract_strided_slice %543 {offsets = [0, 32], sizes = [2, 32], strides = [1, 1]} : vector<2x96xf32> to vector<2x32xf32>
    %584 = arith.addf %582, %583 : vector<2x32xf32>
    %585 = arith.negf %584 : vector<2x32xf32>
    %586 = math.exp %585 : vector<2x32xf32>
    %cst_199 = arith.constant 1.000000e+00 : f32
    %587 = vector.broadcast %cst_199 : f32 to vector<2x32xf32>
    %588 = arith.addf %587, %586 : vector<2x32xf32>
    %589 = arith.divf %587, %588 : vector<2x32xf32>
    %590 = vector.extract_strided_slice %573 {offsets = [0, 64], sizes = [2, 32], strides = [1, 1]} : vector<2x96xf32> to vector<2x32xf32>
    %591 = vector.extract_strided_slice %543 {offsets = [0, 64], sizes = [2, 32], strides = [1, 1]} : vector<2x96xf32> to vector<2x32xf32>
    %592 = arith.mulf %581, %591 : vector<2x32xf32>
    %593 = arith.addf %590, %592 : vector<2x32xf32>
    %594 = math.tanh %593 : vector<2x32xf32>
    %cst_200 = arith.constant 1.000000e+00 : f32
    %595 = vector.broadcast %cst_200 : f32 to vector<2x32xf32>
    %596 = arith.subf %595, %589 : vector<2x32xf32>
    %597 = arith.mulf %596, %594 : vector<2x32xf32>
    %598 = arith.mulf %589, %529 : vector<2x32xf32>
    %599 = arith.addf %597, %598 : vector<2x32xf32>
    %600 = vector.broadcast %531 : vector<2x1xf32> to vector<2x32xf32>
    %601 = arith.mulf %600, %571 : vector<2x32xf32>
    %602 = vector.broadcast %533 : vector<2x1xf32> to vector<2x32xf32>
    %603 = arith.mulf %602, %599 : vector<2x32xf32>
    %604 = vector.broadcast %531 : vector<2x1xf32> to vector<2x32xf32>
    %605 = arith.mulf %604, %571 : vector<2x32xf32>
    %cst_201 = arith.constant 1.000000e+00 : f32
    %606 = vector.broadcast %cst_201 : f32 to vector<2x1xf32>
    %607 = arith.subf %606, %531 : vector<2x1xf32>
    %608 = vector.broadcast %607 : vector<2x1xf32> to vector<2x32xf32>
    %609 = arith.mulf %608, %522 : vector<2x32xf32>
    %610 = arith.addf %605, %609 : vector<2x32xf32>
    %611 = vector.broadcast %533 : vector<2x1xf32> to vector<2x32xf32>
    %612 = arith.mulf %611, %599 : vector<2x32xf32>
    %cst_202 = arith.constant 1.000000e+00 : f32
    %613 = vector.broadcast %cst_202 : f32 to vector<2x1xf32>
    %614 = arith.subf %613, %533 : vector<2x1xf32>
    %615 = vector.broadcast %614 : vector<2x1xf32> to vector<2x32xf32>
    %616 = arith.mulf %615, %529 : vector<2x32xf32>
    %617 = arith.addf %612, %616 : vector<2x32xf32>
    %c7_203 = arith.constant 7 : index
    %c0_204 = arith.constant 0 : index
    %c0_205 = arith.constant 0 : index
    %618 = vector.load %arg3[%c7_203, %c0_204, %c0_205] : memref<8x2x1xf32, #tpu.memory_space<vmem>>, vector<1x2x1xf32>
    %619 = vector.shape_cast %618 : vector<1x2x1xf32> to vector<2x1xf32>
    %c0_206 = arith.constant 0 : index
    %c0_207 = arith.constant 0 : index
    %c0_208 = arith.constant 0 : index
    %620 = vector.load %arg3[%c0_206, %c0_207, %c0_208] : memref<8x2x1xf32, #tpu.memory_space<vmem>>, vector<1x2x1xf32>
    %621 = vector.shape_cast %620 : vector<1x2x1xf32> to vector<2x1xf32>
    %c0_209 = arith.constant 0 : index
    %c0_210 = arith.constant 0 : index
    %622 = vector.load %arg6[%c0_209, %c0_210] : memref<32x96xf32, #tpu.memory_space<vmem>>, vector<32x96xf32>
    %cst_211 = arith.constant dense<0.000000e+00> : vector<2x96xf32>
    %623 = tpu.matmul %610, %622, %cst_211 {dimension_numbers = #tpu.dot_dimension_numbers<[1], [0], [0], [1], [0, 0, 1, 1], [], []>} : vector<2x32xf32>, vector<32x96xf32>, vector<2x96xf32> -> vector<2x96xf32>
    %c0_212 = arith.constant 0 : index
    %c0_213 = arith.constant 0 : index
    %624 = vector.load %arg7[%c0_212, %c0_213] : memref<1x96xf32, #tpu.memory_space<vmem>>, vector<1x96xf32>
    %625 = vector.broadcast %624 : vector<1x96xf32> to vector<2x96xf32>
    %626 = arith.addf %623, %625 : vector<2x96xf32>
    %c0_214 = arith.constant 0 : index
    %c0_215 = arith.constant 0 : index
    %627 = vector.load %arg8[%c0_214, %c0_215] : memref<32x96xf32, #tpu.memory_space<vmem>>, vector<32x96xf32>
    %cst_216 = arith.constant dense<0.000000e+00> : vector<2x96xf32>
    %628 = tpu.matmul %617, %627, %cst_216 {dimension_numbers = #tpu.dot_dimension_numbers<[1], [0], [0], [1], [0, 0, 1, 1], [], []>} : vector<2x32xf32>, vector<32x96xf32>, vector<2x96xf32> -> vector<2x96xf32>
    %c0_217 = arith.constant 0 : index
    %c0_218 = arith.constant 0 : index
    %629 = vector.load %arg9[%c0_217, %c0_218] : memref<1x96xf32, #tpu.memory_space<vmem>>, vector<1x96xf32>
    %630 = vector.broadcast %629 : vector<1x96xf32> to vector<2x96xf32>
    %631 = arith.addf %628, %630 : vector<2x96xf32>
    %c7_219 = arith.constant 7 : index
    %c0_220 = arith.constant 0 : index
    %c0_221 = arith.constant 0 : index
    %632 = vector.load %arg1[%c7_219, %c0_220, %c0_221] : memref<8x2x96xf32, #tpu.memory_space<vmem>>, vector<1x2x96xf32>
    %633 = vector.shape_cast %632 : vector<1x2x96xf32> to vector<2x96xf32>
    %634 = vector.extract_strided_slice %633 {offsets = [0, 0], sizes = [2, 32], strides = [1, 1]} : vector<2x96xf32> to vector<2x32xf32>
    %635 = vector.extract_strided_slice %626 {offsets = [0, 0], sizes = [2, 32], strides = [1, 1]} : vector<2x96xf32> to vector<2x32xf32>
    %636 = arith.addf %634, %635 : vector<2x32xf32>
    %637 = arith.negf %636 : vector<2x32xf32>
    %638 = math.exp %637 : vector<2x32xf32>
    %cst_222 = arith.constant 1.000000e+00 : f32
    %639 = vector.broadcast %cst_222 : f32 to vector<2x32xf32>
    %640 = arith.addf %639, %638 : vector<2x32xf32>
    %641 = arith.divf %639, %640 : vector<2x32xf32>
    %642 = vector.extract_strided_slice %633 {offsets = [0, 32], sizes = [2, 32], strides = [1, 1]} : vector<2x96xf32> to vector<2x32xf32>
    %643 = vector.extract_strided_slice %626 {offsets = [0, 32], sizes = [2, 32], strides = [1, 1]} : vector<2x96xf32> to vector<2x32xf32>
    %644 = arith.addf %642, %643 : vector<2x32xf32>
    %645 = arith.negf %644 : vector<2x32xf32>
    %646 = math.exp %645 : vector<2x32xf32>
    %cst_223 = arith.constant 1.000000e+00 : f32
    %647 = vector.broadcast %cst_223 : f32 to vector<2x32xf32>
    %648 = arith.addf %647, %646 : vector<2x32xf32>
    %649 = arith.divf %647, %648 : vector<2x32xf32>
    %650 = vector.extract_strided_slice %633 {offsets = [0, 64], sizes = [2, 32], strides = [1, 1]} : vector<2x96xf32> to vector<2x32xf32>
    %651 = vector.extract_strided_slice %626 {offsets = [0, 64], sizes = [2, 32], strides = [1, 1]} : vector<2x96xf32> to vector<2x32xf32>
    %652 = arith.mulf %641, %651 : vector<2x32xf32>
    %653 = arith.addf %650, %652 : vector<2x32xf32>
    %654 = math.tanh %653 : vector<2x32xf32>
    %cst_224 = arith.constant 1.000000e+00 : f32
    %655 = vector.broadcast %cst_224 : f32 to vector<2x32xf32>
    %656 = arith.subf %655, %649 : vector<2x32xf32>
    %657 = arith.mulf %656, %654 : vector<2x32xf32>
    %658 = arith.mulf %649, %610 : vector<2x32xf32>
    %659 = arith.addf %657, %658 : vector<2x32xf32>
    %c0_225 = arith.constant 0 : index
    %c0_226 = arith.constant 0 : index
    %c0_227 = arith.constant 0 : index
    %660 = vector.load %arg2[%c0_225, %c0_226, %c0_227] : memref<8x2x96xf32, #tpu.memory_space<vmem>>, vector<1x2x96xf32>
    %661 = vector.shape_cast %660 : vector<1x2x96xf32> to vector<2x96xf32>
    %662 = vector.extract_strided_slice %661 {offsets = [0, 0], sizes = [2, 32], strides = [1, 1]} : vector<2x96xf32> to vector<2x32xf32>
    %663 = vector.extract_strided_slice %631 {offsets = [0, 0], sizes = [2, 32], strides = [1, 1]} : vector<2x96xf32> to vector<2x32xf32>
    %664 = arith.addf %662, %663 : vector<2x32xf32>
    %665 = arith.negf %664 : vector<2x32xf32>
    %666 = math.exp %665 : vector<2x32xf32>
    %cst_228 = arith.constant 1.000000e+00 : f32
    %667 = vector.broadcast %cst_228 : f32 to vector<2x32xf32>
    %668 = arith.addf %667, %666 : vector<2x32xf32>
    %669 = arith.divf %667, %668 : vector<2x32xf32>
    %670 = vector.extract_strided_slice %661 {offsets = [0, 32], sizes = [2, 32], strides = [1, 1]} : vector<2x96xf32> to vector<2x32xf32>
    %671 = vector.extract_strided_slice %631 {offsets = [0, 32], sizes = [2, 32], strides = [1, 1]} : vector<2x96xf32> to vector<2x32xf32>
    %672 = arith.addf %670, %671 : vector<2x32xf32>
    %673 = arith.negf %672 : vector<2x32xf32>
    %674 = math.exp %673 : vector<2x32xf32>
    %cst_229 = arith.constant 1.000000e+00 : f32
    %675 = vector.broadcast %cst_229 : f32 to vector<2x32xf32>
    %676 = arith.addf %675, %674 : vector<2x32xf32>
    %677 = arith.divf %675, %676 : vector<2x32xf32>
    %678 = vector.extract_strided_slice %661 {offsets = [0, 64], sizes = [2, 32], strides = [1, 1]} : vector<2x96xf32> to vector<2x32xf32>
    %679 = vector.extract_strided_slice %631 {offsets = [0, 64], sizes = [2, 32], strides = [1, 1]} : vector<2x96xf32> to vector<2x32xf32>
    %680 = arith.mulf %669, %679 : vector<2x32xf32>
    %681 = arith.addf %678, %680 : vector<2x32xf32>
    %682 = math.tanh %681 : vector<2x32xf32>
    %cst_230 = arith.constant 1.000000e+00 : f32
    %683 = vector.broadcast %cst_230 : f32 to vector<2x32xf32>
    %684 = arith.subf %683, %677 : vector<2x32xf32>
    %685 = arith.mulf %684, %682 : vector<2x32xf32>
    %686 = arith.mulf %677, %617 : vector<2x32xf32>
    %687 = arith.addf %685, %686 : vector<2x32xf32>
    %688 = vector.broadcast %619 : vector<2x1xf32> to vector<2x32xf32>
    %689 = arith.mulf %688, %659 : vector<2x32xf32>
    %690 = vector.broadcast %621 : vector<2x1xf32> to vector<2x32xf32>
    %691 = arith.mulf %690, %687 : vector<2x32xf32>
    %692 = vector.broadcast %619 : vector<2x1xf32> to vector<2x32xf32>
    %693 = arith.mulf %692, %659 : vector<2x32xf32>
    %cst_231 = arith.constant 1.000000e+00 : f32
    %694 = vector.broadcast %cst_231 : f32 to vector<2x1xf32>
    %695 = arith.subf %694, %619 : vector<2x1xf32>
    %696 = vector.broadcast %695 : vector<2x1xf32> to vector<2x32xf32>
    %697 = arith.mulf %696, %610 : vector<2x32xf32>
    %698 = arith.addf %693, %697 : vector<2x32xf32>
    %699 = vector.broadcast %621 : vector<2x1xf32> to vector<2x32xf32>
    %700 = arith.mulf %699, %687 : vector<2x32xf32>
    %cst_232 = arith.constant 1.000000e+00 : f32
    %701 = vector.broadcast %cst_232 : f32 to vector<2x1xf32>
    %702 = arith.subf %701, %621 : vector<2x1xf32>
    %703 = vector.broadcast %702 : vector<2x1xf32> to vector<2x32xf32>
    %704 = arith.mulf %703, %617 : vector<2x32xf32>
    %705 = arith.addf %700, %704 : vector<2x32xf32>
    %706 = tpu.concatenate %73, %691 in 1 : vector<2x32xf32>, vector<2x32xf32> -> vector<2x64xf32>
    %c0_233 = arith.constant 0 : index
    %c0_234 = arith.constant 0 : index
    %c0_235 = arith.constant 0 : index
    %707 = vector.load %arg23[%c0_233, %c0_234, %c0_235] : memref<8x2x64xf32, #tpu.memory_space<vmem>>, vector<1x2x64xf32>
    %708 = vector.shape_cast %707 : vector<1x2x64xf32> to vector<2x64xf32>
    %709 = vector.shape_cast %706 : vector<2x64xf32> to vector<1x2x64xf32>
    tpu.vector_store %arg23[%c0_233, %c0_234, %c0_235], %709 {strides = array<i32>} : memref<8x2x64xf32, #tpu.memory_space<vmem>>, vector<1x2x64xf32>,
    %c0_236 = arith.constant 0 : index
    %c0_237 = arith.constant 0 : index
    %710 = vector.load %arg12[%c0_236, %c0_237] : memref<64x32xf32, #tpu.memory_space<vmem>>, vector<64x32xf32>
    %cst_238 = arith.constant dense<0.000000e+00> : vector<2x32xf32>
    %711 = tpu.matmul %706, %710, %cst_238 {dimension_numbers = #tpu.dot_dimension_numbers<[1], [0], [0], [1], [0, 0, 1, 1], [], []>} : vector<2x64xf32>, vector<64x32xf32>, vector<2x32xf32> -> vector<2x32xf32>
    %c0_239 = arith.constant 0 : index
    %c0_240 = arith.constant 0 : index
    %c0_241 = arith.constant 0 : index
    %712 = vector.load %arg24[%c0_239, %c0_240, %c0_241] : memref<8x2x32xf32, #tpu.memory_space<vmem>>, vector<1x2x32xf32>
    %713 = vector.shape_cast %712 : vector<1x2x32xf32> to vector<2x32xf32>
    %714 = vector.shape_cast %711 : vector<2x32xf32> to vector<1x2x32xf32>
    tpu.vector_store %arg24[%c0_239, %c0_240, %c0_241], %714 {strides = array<i32>} : memref<8x2x32xf32, #tpu.memory_space<vmem>>, vector<1x2x32xf32>,
    %715 = tpu.concatenate %161, %603 in 1 : vector<2x32xf32>, vector<2x32xf32> -> vector<2x64xf32>
    %c1_242 = arith.constant 1 : index
    %c0_243 = arith.constant 0 : index
    %c0_244 = arith.constant 0 : index
    %716 = vector.load %arg23[%c1_242, %c0_243, %c0_244] : memref<8x2x64xf32, #tpu.memory_space<vmem>>, vector<1x2x64xf32>
    %717 = vector.shape_cast %716 : vector<1x2x64xf32> to vector<2x64xf32>
    %718 = vector.shape_cast %715 : vector<2x64xf32> to vector<1x2x64xf32>
    tpu.vector_store %arg23[%c1_242, %c0_243, %c0_244], %718 {strides = array<i32>} : memref<8x2x64xf32, #tpu.memory_space<vmem>>, vector<1x2x64xf32>,
    %c0_245 = arith.constant 0 : index
    %c0_246 = arith.constant 0 : index
    %719 = vector.load %arg12[%c0_245, %c0_246] : memref<64x32xf32, #tpu.memory_space<vmem>>, vector<64x32xf32>
    %cst_247 = arith.constant dense<0.000000e+00> : vector<2x32xf32>
    %720 = tpu.matmul %715, %719, %cst_247 {dimension_numbers = #tpu.dot_dimension_numbers<[1], [0], [0], [1], [0, 0, 1, 1], [], []>} : vector<2x64xf32>, vector<64x32xf32>, vector<2x32xf32> -> vector<2x32xf32>
    %c1_248 = arith.constant 1 : index
    %c0_249 = arith.constant 0 : index
    %c0_250 = arith.constant 0 : index
    %721 = vector.load %arg24[%c1_248, %c0_249, %c0_250] : memref<8x2x32xf32, #tpu.memory_space<vmem>>, vector<1x2x32xf32>
    %722 = vector.shape_cast %721 : vector<1x2x32xf32> to vector<2x32xf32>
    %723 = vector.shape_cast %720 : vector<2x32xf32> to vector<1x2x32xf32>
    tpu.vector_store %arg24[%c1_248, %c0_249, %c0_250], %723 {strides = array<i32>} : memref<8x2x32xf32, #tpu.memory_space<vmem>>, vector<1x2x32xf32>,
    %724 = tpu.concatenate %249, %515 in 1 : vector<2x32xf32>, vector<2x32xf32> -> vector<2x64xf32>
    %c2_251 = arith.constant 2 : index
    %c0_252 = arith.constant 0 : index
    %c0_253 = arith.constant 0 : index
    %725 = vector.load %arg23[%c2_251, %c0_252, %c0_253] : memref<8x2x64xf32, #tpu.memory_space<vmem>>, vector<1x2x64xf32>
    %726 = vector.shape_cast %725 : vector<1x2x64xf32> to vector<2x64xf32>
    %727 = vector.shape_cast %724 : vector<2x64xf32> to vector<1x2x64xf32>
    tpu.vector_store %arg23[%c2_251, %c0_252, %c0_253], %727 {strides = array<i32>} : memref<8x2x64xf32, #tpu.memory_space<vmem>>, vector<1x2x64xf32>,
    %c0_254 = arith.constant 0 : index
    %c0_255 = arith.constant 0 : index
    %728 = vector.load %arg12[%c0_254, %c0_255] : memref<64x32xf32, #tpu.memory_space<vmem>>, vector<64x32xf32>
    %cst_256 = arith.constant dense<0.000000e+00> : vector<2x32xf32>
    %729 = tpu.matmul %724, %728, %cst_256 {dimension_numbers = #tpu.dot_dimension_numbers<[1], [0], [0], [1], [0, 0, 1, 1], [], []>} : vector<2x64xf32>, vector<64x32xf32>, vector<2x32xf32> -> vector<2x32xf32>
    %c2_257 = arith.constant 2 : index
    %c0_258 = arith.constant 0 : index
    %c0_259 = arith.constant 0 : index
    %730 = vector.load %arg24[%c2_257, %c0_258, %c0_259] : memref<8x2x32xf32, #tpu.memory_space<vmem>>, vector<1x2x32xf32>
    %731 = vector.shape_cast %730 : vector<1x2x32xf32> to vector<2x32xf32>
    %732 = vector.shape_cast %729 : vector<2x32xf32> to vector<1x2x32xf32>
    tpu.vector_store %arg24[%c2_257, %c0_258, %c0_259], %732 {strides = array<i32>} : memref<8x2x32xf32, #tpu.memory_space<vmem>>, vector<1x2x32xf32>,
    %733 = tpu.concatenate %337, %427 in 1 : vector<2x32xf32>, vector<2x32xf32> -> vector<2x64xf32>
    %c3_260 = arith.constant 3 : index
    %c0_261 = arith.constant 0 : index
    %c0_262 = arith.constant 0 : index
    %734 = vector.load %arg23[%c3_260, %c0_261, %c0_262] : memref<8x2x64xf32, #tpu.memory_space<vmem>>, vector<1x2x64xf32>
    %735 = vector.shape_cast %734 : vector<1x2x64xf32> to vector<2x64xf32>
    %736 = vector.shape_cast %733 : vector<2x64xf32> to vector<1x2x64xf32>
    tpu.vector_store %arg23[%c3_260, %c0_261, %c0_262], %736 {strides = array<i32>} : memref<8x2x64xf32, #tpu.memory_space<vmem>>, vector<1x2x64xf32>,
    %c0_263 = arith.constant 0 : index
    %c0_264 = arith.constant 0 : index
    %737 = vector.load %arg12[%c0_263, %c0_264] : memref<64x32xf32, #tpu.memory_space<vmem>>, vector<64x32xf32>
    %cst_265 = arith.constant dense<0.000000e+00> : vector<2x32xf32>
    %738 = tpu.matmul %733, %737, %cst_265 {dimension_numbers = #tpu.dot_dimension_numbers<[1], [0], [0], [1], [0, 0, 1, 1], [], []>} : vector<2x64xf32>, vector<64x32xf32>, vector<2x32xf32> -> vector<2x32xf32>
    %c3_266 = arith.constant 3 : index
    %c0_267 = arith.constant 0 : index
    %c0_268 = arith.constant 0 : index
    %739 = vector.load %arg24[%c3_266, %c0_267, %c0_268] : memref<8x2x32xf32, #tpu.memory_space<vmem>>, vector<1x2x32xf32>
    %740 = vector.shape_cast %739 : vector<1x2x32xf32> to vector<2x32xf32>
    %741 = vector.shape_cast %738 : vector<2x32xf32> to vector<1x2x32xf32>
    tpu.vector_store %arg24[%c3_266, %c0_267, %c0_268], %741 {strides = array<i32>} : memref<8x2x32xf32, #tpu.memory_space<vmem>>, vector<1x2x32xf32>,
    %742 = tpu.concatenate %425, %339 in 1 : vector<2x32xf32>, vector<2x32xf32> -> vector<2x64xf32>
    %c4_269 = arith.constant 4 : index
    %c0_270 = arith.constant 0 : index
    %c0_271 = arith.constant 0 : index
    %743 = vector.load %arg23[%c4_269, %c0_270, %c0_271] : memref<8x2x64xf32, #tpu.memory_space<vmem>>, vector<1x2x64xf32>
    %744 = vector.shape_cast %743 : vector<1x2x64xf32> to vector<2x64xf32>
    %745 = vector.shape_cast %742 : vector<2x64xf32> to vector<1x2x64xf32>
    tpu.vector_store %arg23[%c4_269, %c0_270, %c0_271], %745 {strides = array<i32>} : memref<8x2x64xf32, #tpu.memory_space<vmem>>, vector<1x2x64xf32>,
    %c0_272 = arith.constant 0 : index
    %c0_273 = arith.constant 0 : index
    %746 = vector.load %arg12[%c0_272, %c0_273] : memref<64x32xf32, #tpu.memory_space<vmem>>, vector<64x32xf32>
    %cst_274 = arith.constant dense<0.000000e+00> : vector<2x32xf32>
    %747 = tpu.matmul %742, %746, %cst_274 {dimension_numbers = #tpu.dot_dimension_numbers<[1], [0], [0], [1], [0, 0, 1, 1], [], []>} : vector<2x64xf32>, vector<64x32xf32>, vector<2x32xf32> -> vector<2x32xf32>
    %c4_275 = arith.constant 4 : index
    %c0_276 = arith.constant 0 : index
    %c0_277 = arith.constant 0 : index
    %748 = vector.load %arg24[%c4_275, %c0_276, %c0_277] : memref<8x2x32xf32, #tpu.memory_space<vmem>>, vector<1x2x32xf32>
    %749 = vector.shape_cast %748 : vector<1x2x32xf32> to vector<2x32xf32>
    %750 = vector.shape_cast %747 : vector<2x32xf32> to vector<1x2x32xf32>
    tpu.vector_store %arg24[%c4_275, %c0_276, %c0_277], %750 {strides = array<i32>} : memref<8x2x32xf32, #tpu.memory_space<vmem>>, vector<1x2x32xf32>,
    %751 = tpu.concatenate %513, %251 in 1 : vector<2x32xf32>, vector<2x32xf32> -> vector<2x64xf32>
    %c5_278 = arith.constant 5 : index
    %c0_279 = arith.constant 0 : index
    %c0_280 = arith.constant 0 : index
    %752 = vector.load %arg23[%c5_278, %c0_279, %c0_280] : memref<8x2x64xf32, #tpu.memory_space<vmem>>, vector<1x2x64xf32>
    %753 = vector.shape_cast %752 : vector<1x2x64xf32> to vector<2x64xf32>
    %754 = vector.shape_cast %751 : vector<2x64xf32> to vector<1x2x64xf32>
    tpu.vector_store %arg23[%c5_278, %c0_279, %c0_280], %754 {strides = array<i32>} : memref<8x2x64xf32, #tpu.memory_space<vmem>>, vector<1x2x64xf32>,
    %c0_281 = arith.constant 0 : index
    %c0_282 = arith.constant 0 : index
    %755 = vector.load %arg12[%c0_281, %c0_282] : memref<64x32xf32, #tpu.memory_space<vmem>>, vector<64x32xf32>
    %cst_283 = arith.constant dense<0.000000e+00> : vector<2x32xf32>
    %756 = tpu.matmul %751, %755, %cst_283 {dimension_numbers = #tpu.dot_dimension_numbers<[1], [0], [0], [1], [0, 0, 1, 1], [], []>} : vector<2x64xf32>, vector<64x32xf32>, vector<2x32xf32> -> vector<2x32xf32>
    %c5_284 = arith.constant 5 : index
    %c0_285 = arith.constant 0 : index
    %c0_286 = arith.constant 0 : index
    %757 = vector.load %arg24[%c5_284, %c0_285, %c0_286] : memref<8x2x32xf32, #tpu.memory_space<vmem>>, vector<1x2x32xf32>
    %758 = vector.shape_cast %757 : vector<1x2x32xf32> to vector<2x32xf32>
    %759 = vector.shape_cast %756 : vector<2x32xf32> to vector<1x2x32xf32>
    tpu.vector_store %arg24[%c5_284, %c0_285, %c0_286], %759 {strides = array<i32>} : memref<8x2x32xf32, #tpu.memory_space<vmem>>, vector<1x2x32xf32>,
    %760 = tpu.concatenate %601, %163 in 1 : vector<2x32xf32>, vector<2x32xf32> -> vector<2x64xf32>
    %c6_287 = arith.constant 6 : index
    %c0_288 = arith.constant 0 : index
    %c0_289 = arith.constant 0 : index
    %761 = vector.load %arg23[%c6_287, %c0_288, %c0_289] : memref<8x2x64xf32, #tpu.memory_space<vmem>>, vector<1x2x64xf32>
    %762 = vector.shape_cast %761 : vector<1x2x64xf32> to vector<2x64xf32>
    %763 = vector.shape_cast %760 : vector<2x64xf32> to vector<1x2x64xf32>
    tpu.vector_store %arg23[%c6_287, %c0_288, %c0_289], %763 {strides = array<i32>} : memref<8x2x64xf32, #tpu.memory_space<vmem>>, vector<1x2x64xf32>,
    %c0_290 = arith.constant 0 : index
    %c0_291 = arith.constant 0 : index
    %764 = vector.load %arg12[%c0_290, %c0_291] : memref<64x32xf32, #tpu.memory_space<vmem>>, vector<64x32xf32>
    %cst_292 = arith.constant dense<0.000000e+00> : vector<2x32xf32>
    %765 = tpu.matmul %760, %764, %cst_292 {dimension_numbers = #tpu.dot_dimension_numbers<[1], [0], [0], [1], [0, 0, 1, 1], [], []>} : vector<2x64xf32>, vector<64x32xf32>, vector<2x32xf32> -> vector<2x32xf32>
    %c6_293 = arith.constant 6 : index
    %c0_294 = arith.constant 0 : index
    %c0_295 = arith.constant 0 : index
    %766 = vector.load %arg24[%c6_293, %c0_294, %c0_295] : memref<8x2x32xf32, #tpu.memory_space<vmem>>, vector<1x2x32xf32>
    %767 = vector.shape_cast %766 : vector<1x2x32xf32> to vector<2x32xf32>
    %768 = vector.shape_cast %765 : vector<2x32xf32> to vector<1x2x32xf32>
    tpu.vector_store %arg24[%c6_293, %c0_294, %c0_295], %768 {strides = array<i32>} : memref<8x2x32xf32, #tpu.memory_space<vmem>>, vector<1x2x32xf32>,
    %769 = tpu.concatenate %689, %75 in 1 : vector<2x32xf32>, vector<2x32xf32> -> vector<2x64xf32>
    %c7_296 = arith.constant 7 : index
    %c0_297 = arith.constant 0 : index
    %c0_298 = arith.constant 0 : index
    %770 = vector.load %arg23[%c7_296, %c0_297, %c0_298] : memref<8x2x64xf32, #tpu.memory_space<vmem>>, vector<1x2x64xf32>
    %771 = vector.shape_cast %770 : vector<1x2x64xf32> to vector<2x64xf32>
    %772 = vector.shape_cast %769 : vector<2x64xf32> to vector<1x2x64xf32>
    tpu.vector_store %arg23[%c7_296, %c0_297, %c0_298], %772 {strides = array<i32>} : memref<8x2x64xf32, #tpu.memory_space<vmem>>, vector<1x2x64xf32>,
    %c0_299 = arith.constant 0 : index
    %c0_300 = arith.constant 0 : index
    %773 = vector.load %arg12[%c0_299, %c0_300] : memref<64x32xf32, #tpu.memory_space<vmem>>, vector<64x32xf32>
    %cst_301 = arith.constant dense<0.000000e+00> : vector<2x32xf32>
    %774 = tpu.matmul %769, %773, %cst_301 {dimension_numbers = #tpu.dot_dimension_numbers<[1], [0], [0], [1], [0, 0, 1, 1], [], []>} : vector<2x64xf32>, vector<64x32xf32>, vector<2x32xf32> -> vector<2x32xf32>
    %c7_302 = arith.constant 7 : index
    %c0_303 = arith.constant 0 : index
    %c0_304 = arith.constant 0 : index
    %775 = vector.load %arg24[%c7_302, %c0_303, %c0_304] : memref<8x2x32xf32, #tpu.memory_space<vmem>>, vector<1x2x32xf32>
    %776 = vector.shape_cast %775 : vector<1x2x32xf32> to vector<2x32xf32>
    %777 = vector.shape_cast %774 : vector<2x32xf32> to vector<1x2x32xf32>
    tpu.vector_store %arg24[%c7_302, %c0_303, %c0_304], %777 {strides = array<i32>} : memref<8x2x32xf32, #tpu.memory_space<vmem>>, vector<1x2x32xf32>,
    %778 = tpu.concatenate %698, %705 in 1 : vector<2x32xf32>, vector<2x32xf32> -> vector<2x64xf32>
    %c0_305 = arith.constant 0 : index
    %c0_306 = arith.constant 0 : index
    %779 = vector.load %arg10[%c0_305, %c0_306] : memref<64x32xf32, #tpu.memory_space<vmem>>, vector<64x32xf32>
    %cst_307 = arith.constant dense<0.000000e+00> : vector<2x32xf32>
    %780 = tpu.matmul %778, %779, %cst_307 {dimension_numbers = #tpu.dot_dimension_numbers<[1], [0], [0], [1], [0, 0, 1, 1], [], []>} : vector<2x64xf32>, vector<64x32xf32>, vector<2x32xf32> -> vector<2x32xf32>
    %c0_308 = arith.constant 0 : index
    %c0_309 = arith.constant 0 : index
    %781 = vector.load %arg11[%c0_308, %c0_309] : memref<1x32xf32, #tpu.memory_space<vmem>>, vector<1x32xf32>
    %782 = vector.broadcast %781 : vector<1x32xf32> to vector<2x32xf32>
    %783 = arith.addf %780, %782 : vector<2x32xf32>
    %784 = math.tanh %783 : vector<2x32xf32>
    %c0_310 = arith.constant 0 : index
    %c0_311 = arith.constant 0 : index
    %c0_312 = arith.constant 0 : index
    %785 = vector.load %arg23[%c0_310, %c0_311, %c0_312] : memref<8x2x64xf32, #tpu.memory_space<vmem>>, vector<8x2x64xf32>
    %c0_313 = arith.constant 0 : index
    %c0_314 = arith.constant 0 : index
    %c0_315 = arith.constant 0 : index
    %786 = vector.load %arg24[%c0_313, %c0_314, %c0_315] : memref<8x2x32xf32, #tpu.memory_space<vmem>>, vector<8x2x32xf32>
    %c0_316 = arith.constant 0 : index
    %c0_317 = arith.constant 0 : index
    %787 = vector.load %arg4[%c0_316, %c0_317] : memref<8x2xf32, #tpu.memory_space<vmem>>, vector<8x2xf32>
    %cst_318 = arith.constant 0.000000e+00 : f32
    %788 = vector.broadcast %cst_318 : f32 to vector<8x2xf32>
    %789 = arith.cmpf ogt, %787, %788 : vector<8x2xf32>
    %c0_319 = arith.constant 0 : index
    %c0_320 = arith.constant 0 : index
    %790 = vector.load %arg13[%c0_319, %c0_320] : memref<1x32xf32, #tpu.memory_space<vmem>>, vector<1x32xf32>
    %c0_321 = arith.constant 0 : index
    %c0_322 = arith.constant 0 : index
    %791 = vector.load %arg14[%c0_321, %c0_322] : memref<1x32xf32, #tpu.memory_space<vmem>>, vector<1x32xf32>
    %cst_323 = arith.constant 0.000000e+00 : f32
    %792 = vector.broadcast %cst_323 : f32 to vector<2x32xf32>
    %c0_324 = arith.constant 0 : index
    %c0_325 = arith.constant 0 : index
    %c0_326 = arith.constant 0 : index
    %793 = vector.load %arg22[%c0_324, %c0_325, %c0_326] : memref<8x2x32xf32, #tpu.memory_space<vmem>>, vector<1x2x32xf32>
    %794 = vector.shape_cast %793 : vector<1x2x32xf32> to vector<2x32xf32>
    %795 = vector.shape_cast %792 : vector<2x32xf32> to vector<1x2x32xf32>
    tpu.vector_store %arg22[%c0_324, %c0_325, %c0_326], %795 {strides = array<i32>} : memref<8x2x32xf32, #tpu.memory_space<vmem>>, vector<1x2x32xf32>,
    %cst_327 = arith.constant 0.000000e+00 : f32
    %796 = vector.broadcast %cst_327 : f32 to vector<2x32xf32>
    %c0_328 = arith.constant 0 : index
    %c0_329 = arith.constant 0 : index
    %c0_330 = arith.constant 0 : index
    %797 = vector.load %arg5[%c0_328, %c0_329, %c0_330] : memref<8x2x32xf32, #tpu.memory_space<vmem>>, vector<1x2x32xf32>
    %798 = vector.shape_cast %797 : vector<1x2x32xf32> to vector<2x32xf32>
    %c0_331 = arith.constant 0 : index
    %c0_332 = arith.constant 0 : index
    %799 = vector.load %arg25[%c0_331, %c0_332] : memref<2x32xf32, #tpu.memory_space<vmem>>, vector<2x32xf32>
    tpu.vector_store %arg25[%c0_331, %c0_332], %798 {strides = array<i32>} : memref<2x32xf32, #tpu.memory_space<vmem>>, vector<2x32xf32>,
    %c0_333 = arith.constant 0 : index
    %800 = memref.load %arg0[%c0_333] : memref<8xi32, #tpu.memory_space<smem>>
    %c0_i32 = arith.constant 0 : i32
    %801 = arith.cmpi eq, %800, %c0_i32 : i32
    %802 = arith.extui %801 : i1 to i32
    %c0_i32_334 = arith.constant 0 : i32
    %803 = arith.cmpi ne, %802, %c0_i32_334 : i32
    scf.if %803 {
      %cst_579 = arith.constant dense<0xFF800000> : vector<2xf32>
      %1378 = vector.multi_reduction <maximumf>, %796, %cst_579 [1] : vector<2x32xf32> to vector<2xf32>
      %1379 = vector.shape_cast %1378 : vector<2xf32> to vector<2x1xf32>
      %1380 = tpu.iota {dimensions = array<i32: 1>} : vector<2x32xi32>
      %1381 = arith.sitofp %1380 : vector<2x32xi32> to vector<2x32xf32>
      %1382 = vector.broadcast %1379 : vector<2x1xf32> to vector<2x32xf32>
      %1383 = arith.cmpf oge, %796, %1382 : vector<2x32xf32>
      %cst_580 = arith.constant 3.200000e+01 : f32
      %1384 = vector.broadcast %cst_580 : f32 to vector<2x32xf32>
      %1385 = arith.select %1383, %1381, %1384 : vector<2x32xi1>, vector<2x32xf32>
      %cst_581 = arith.constant dense<0x7F800000> : vector<2xf32>
      %1386 = vector.multi_reduction <minimumf>, %1385, %cst_581 [1] : vector<2x32xf32> to vector<2xf32>
      %1387 = vector.shape_cast %1386 : vector<2xf32> to vector<2x1xf32>
      %1388 = tpu.iota {dimensions = array<i32: 1>} : vector<2x40xi32>
      %1389 = arith.sitofp %1388 : vector<2x40xi32> to vector<2x40xf32>
      %1390 = vector.broadcast %1387 : vector<2x1xf32> to vector<2x40xf32>
      %1391 = arith.cmpf oeq, %1389, %1390 : vector<2x40xf32>
      %1392 = arith.extui %1391 : vector<2x40xi1> to vector<2x40xi32>
      %1393 = arith.sitofp %1392 : vector<2x40xi32> to vector<2x40xf32>
      %c0_582 = arith.constant 0 : index
      %c0_583 = arith.constant 0 : index
      %1394 = vector.load %arg19[%c0_582, %c0_583] : memref<40x32xf32, #tpu.memory_space<vmem>>, vector<40x32xf32>
      %cst_584 = arith.constant dense<0.000000e+00> : vector<2x32xf32>
      %1395 = tpu.matmul %1393, %1394, %cst_584 {dimension_numbers = #tpu.dot_dimension_numbers<[1], [0], [0], [1], [0, 0, 1, 1], [], []>} : vector<2x40xf32>, vector<40x32xf32>, vector<2x32xf32> -> vector<2x32xf32>
      %c0_585 = arith.constant 0 : index
      %c0_586 = arith.constant 0 : index
      %1396 = vector.load %arg25[%c0_585, %c0_586] : memref<2x32xf32, #tpu.memory_space<vmem>>, vector<2x32xf32>
      tpu.vector_store %arg25[%c0_585, %c0_586], %1395 {strides = array<i32>} : memref<2x32xf32, #tpu.memory_space<vmem>>, vector<2x32xf32>,
    } else {
    }
    %c0_335 = arith.constant 0 : index
    %c0_336 = arith.constant 0 : index
    %804 = vector.load %arg25[%c0_335, %c0_336] : memref<2x32xf32, #tpu.memory_space<vmem>>, vector<2x32xf32>
    %c0_337 = arith.constant 0 : index
    %c0_338 = arith.constant 0 : index
    %805 = vector.load %arg15[%c0_337, %c0_338] : memref<32x128xf32, #tpu.memory_space<vmem>>, vector<32x128xf32>
    %cst_339 = arith.constant dense<0.000000e+00> : vector<2x128xf32>
    %806 = tpu.matmul %784, %805, %cst_339 {dimension_numbers = #tpu.dot_dimension_numbers<[1], [0], [0], [1], [0, 0, 1, 1], [], []>} : vector<2x32xf32>, vector<32x128xf32>, vector<2x128xf32> -> vector<2x128xf32>
    %807 = vector.extract_strided_slice %806 {offsets = [0, 0], sizes = [2, 32], strides = [1, 1]} : vector<2x128xf32> to vector<2x32xf32>
    %808 = vector.extract_strided_slice %806 {offsets = [0, 32], sizes = [2, 96], strides = [1, 1]} : vector<2x128xf32> to vector<2x96xf32>
    %c0_340 = arith.constant 0 : index
    %c0_341 = arith.constant 0 : index
    %809 = vector.load %arg18[%c0_340, %c0_341] : memref<1x96xf32, #tpu.memory_space<vmem>>, vector<1x96xf32>
    %810 = vector.broadcast %809 : vector<1x96xf32> to vector<2x96xf32>
    %811 = arith.addf %808, %810 : vector<2x96xf32>
    %812 = vector.shape_cast %807 : vector<2x32xf32> to vector<1x2x32xf32>
    %813 = vector.broadcast %812 : vector<1x2x32xf32> to vector<8x2x32xf32>
    %814 = arith.addf %786, %813 : vector<8x2x32xf32>
    %815 = vector.shape_cast %790 : vector<1x32xf32> to vector<1x1x32xf32>
    %816 = vector.broadcast %815 : vector<1x1x32xf32> to vector<8x2x32xf32>
    %817 = arith.addf %814, %816 : vector<8x2x32xf32>
    %818 = math.tanh %817 : vector<8x2x32xf32>
    %819 = vector.shape_cast %791 : vector<1x32xf32> to vector<1x1x32xf32>
    %820 = vector.broadcast %819 : vector<1x1x32xf32> to vector<8x2x32xf32>
    %821 = arith.mulf %818, %820 : vector<8x2x32xf32>
    %cst_342 = arith.constant dense<0.000000e+00> : vector<8x2xf32>
    %822 = vector.multi_reduction <add>, %821, %cst_342 [2] : vector<8x2x32xf32> to vector<8x2xf32>
    %cst_343 = arith.constant -1.000000e+10 : f32
    %823 = vector.broadcast %cst_343 : f32 to vector<8x2xf32>
    %824 = arith.select %789, %822, %823 : vector<8x2xi1>, vector<8x2xf32>
    %cst_344 = arith.constant dense<0xFF800000> : vector<2xf32>
    %825 = vector.multi_reduction <maximumf>, %824, %cst_344 [0] : vector<8x2xf32> to vector<2xf32>
    %826 = vector.shape_cast %825 : vector<2xf32> to vector<1x2xf32>
    %827 = vector.broadcast %826 : vector<1x2xf32> to vector<8x2xf32>
    %828 = arith.subf %824, %827 : vector<8x2xf32>
    %829 = math.exp %828 : vector<8x2xf32>
    %cst_345 = arith.constant dense<0.000000e+00> : vector<2xf32>
    %830 = vector.multi_reduction <add>, %829, %cst_345 [0] : vector<8x2xf32> to vector<2xf32>
    %831 = vector.shape_cast %830 : vector<2xf32> to vector<1x2xf32>
    %832 = tpu.reciprocal %831 {approx = true} : vector<1x2xf32> -> vector<1x2xf32>
    %833 = vector.broadcast %832 : vector<1x2xf32> to vector<8x2xf32>
    %834 = arith.mulf %829, %833 : vector<8x2xf32>
    %835 = vector.shape_cast %834 : vector<8x2xf32> to vector<8x2x1xf32>
    %836 = vector.broadcast %835 : vector<8x2x1xf32> to vector<8x2x64xf32>
    %837 = arith.mulf %836, %785 : vector<8x2x64xf32>
    %cst_346 = arith.constant dense<0.000000e+00> : vector<2x64xf32>
    %838 = vector.multi_reduction <add>, %837, %cst_346 [0] : vector<8x2x64xf32> to vector<2x64xf32>
    %839 = tpu.concatenate %804, %838 in 1 : vector<2x32xf32>, vector<2x64xf32> -> vector<2x96xf32>
    %c0_347 = arith.constant 0 : index
    %c0_348 = arith.constant 0 : index
    %840 = vector.load %arg16[%c0_347, %c0_348] : memref<96x96xf32, #tpu.memory_space<vmem>>, vector<96x96xf32>
    %cst_349 = arith.constant dense<0.000000e+00> : vector<2x96xf32>
    %841 = tpu.matmul %839, %840, %cst_349 {dimension_numbers = #tpu.dot_dimension_numbers<[1], [0], [0], [1], [0, 0, 1, 1], [], []>} : vector<2x96xf32>, vector<96x96xf32>, vector<2x96xf32> -> vector<2x96xf32>
    %c0_350 = arith.constant 0 : index
    %c0_351 = arith.constant 0 : index
    %842 = vector.load %arg17[%c0_350, %c0_351] : memref<1x96xf32, #tpu.memory_space<vmem>>, vector<1x96xf32>
    %843 = vector.broadcast %842 : vector<1x96xf32> to vector<2x96xf32>
    %844 = arith.addf %841, %843 : vector<2x96xf32>
    %845 = vector.extract_strided_slice %844 {offsets = [0, 0], sizes = [2, 32], strides = [1, 1]} : vector<2x96xf32> to vector<2x32xf32>
    %846 = vector.extract_strided_slice %811 {offsets = [0, 0], sizes = [2, 32], strides = [1, 1]} : vector<2x96xf32> to vector<2x32xf32>
    %847 = arith.addf %845, %846 : vector<2x32xf32>
    %848 = arith.negf %847 : vector<2x32xf32>
    %849 = math.exp %848 : vector<2x32xf32>
    %cst_352 = arith.constant 1.000000e+00 : f32
    %850 = vector.broadcast %cst_352 : f32 to vector<2x32xf32>
    %851 = arith.addf %850, %849 : vector<2x32xf32>
    %852 = arith.divf %850, %851 : vector<2x32xf32>
    %853 = vector.extract_strided_slice %844 {offsets = [0, 32], sizes = [2, 32], strides = [1, 1]} : vector<2x96xf32> to vector<2x32xf32>
    %854 = vector.extract_strided_slice %811 {offsets = [0, 32], sizes = [2, 32], strides = [1, 1]} : vector<2x96xf32> to vector<2x32xf32>
    %855 = arith.addf %853, %854 : vector<2x32xf32>
    %856 = arith.negf %855 : vector<2x32xf32>
    %857 = math.exp %856 : vector<2x32xf32>
    %cst_353 = arith.constant 1.000000e+00 : f32
    %858 = vector.broadcast %cst_353 : f32 to vector<2x32xf32>
    %859 = arith.addf %858, %857 : vector<2x32xf32>
    %860 = arith.divf %858, %859 : vector<2x32xf32>
    %861 = vector.extract_strided_slice %844 {offsets = [0, 64], sizes = [2, 32], strides = [1, 1]} : vector<2x96xf32> to vector<2x32xf32>
    %862 = vector.extract_strided_slice %811 {offsets = [0, 64], sizes = [2, 32], strides = [1, 1]} : vector<2x96xf32> to vector<2x32xf32>
    %863 = arith.mulf %852, %862 : vector<2x32xf32>
    %864 = arith.addf %861, %863 : vector<2x32xf32>
    %865 = math.tanh %864 : vector<2x32xf32>
    %cst_354 = arith.constant 1.000000e+00 : f32
    %866 = vector.broadcast %cst_354 : f32 to vector<2x32xf32>
    %867 = arith.subf %866, %860 : vector<2x32xf32>
    %868 = arith.mulf %867, %865 : vector<2x32xf32>
    %869 = arith.mulf %860, %784 : vector<2x32xf32>
    %870 = arith.addf %868, %869 : vector<2x32xf32>
    %871 = tpu.concatenate %870, %838, %804 in 1 : vector<2x32xf32>, vector<2x64xf32>, vector<2x32xf32> -> vector<2x128xf32>
    %c0_355 = arith.constant 0 : index
    %c0_356 = arith.constant 0 : index
    %872 = vector.load %arg20[%c0_355, %c0_356] : memref<128x32xf32, #tpu.memory_space<vmem>>, vector<128x32xf32>
    %cst_357 = arith.constant dense<0.000000e+00> : vector<2x32xf32>
    %873 = tpu.matmul %871, %872, %cst_357 {dimension_numbers = #tpu.dot_dimension_numbers<[1], [0], [0], [1], [0, 0, 1, 1], [], []>} : vector<2x128xf32>, vector<128x32xf32>, vector<2x32xf32> -> vector<2x32xf32>
    %c0_358 = arith.constant 0 : index
    %c0_359 = arith.constant 0 : index
    %874 = vector.load %arg21[%c0_358, %c0_359] : memref<1x32xf32, #tpu.memory_space<vmem>>, vector<1x32xf32>
    %875 = vector.broadcast %874 : vector<1x32xf32> to vector<2x32xf32>
    %876 = arith.addf %873, %875 : vector<2x32xf32>
    %c1_360 = arith.constant 1 : index
    %c0_361 = arith.constant 0 : index
    %c0_362 = arith.constant 0 : index
    %877 = vector.load %arg22[%c1_360, %c0_361, %c0_362] : memref<8x2x32xf32, #tpu.memory_space<vmem>>, vector<1x2x32xf32>
    %878 = vector.shape_cast %877 : vector<1x2x32xf32> to vector<2x32xf32>
    %879 = vector.shape_cast %876 : vector<2x32xf32> to vector<1x2x32xf32>
    tpu.vector_store %arg22[%c1_360, %c0_361, %c0_362], %879 {strides = array<i32>} : memref<8x2x32xf32, #tpu.memory_space<vmem>>, vector<1x2x32xf32>,
    %c1_363 = arith.constant 1 : index
    %c0_364 = arith.constant 0 : index
    %c0_365 = arith.constant 0 : index
    %880 = vector.load %arg5[%c1_363, %c0_364, %c0_365] : memref<8x2x32xf32, #tpu.memory_space<vmem>>, vector<1x2x32xf32>
    %881 = vector.shape_cast %880 : vector<1x2x32xf32> to vector<2x32xf32>
    %c0_366 = arith.constant 0 : index
    %c0_367 = arith.constant 0 : index
    %882 = vector.load %arg25[%c0_366, %c0_367] : memref<2x32xf32, #tpu.memory_space<vmem>>, vector<2x32xf32>
    tpu.vector_store %arg25[%c0_366, %c0_367], %881 {strides = array<i32>} : memref<2x32xf32, #tpu.memory_space<vmem>>, vector<2x32xf32>,
    %c1_368 = arith.constant 1 : index
    %883 = memref.load %arg0[%c1_368] : memref<8xi32, #tpu.memory_space<smem>>
    %c0_i32_369 = arith.constant 0 : i32
    %884 = arith.cmpi eq, %883, %c0_i32_369 : i32
    %885 = arith.extui %884 : i1 to i32
    %c0_i32_370 = arith.constant 0 : i32
    %886 = arith.cmpi ne, %885, %c0_i32_370 : i32
    scf.if %886 {
      %cst_579 = arith.constant dense<0xFF800000> : vector<2xf32>
      %1378 = vector.multi_reduction <maximumf>, %876, %cst_579 [1] : vector<2x32xf32> to vector<2xf32>
      %1379 = vector.shape_cast %1378 : vector<2xf32> to vector<2x1xf32>
      %1380 = tpu.iota {dimensions = array<i32: 1>} : vector<2x32xi32>
      %1381 = arith.sitofp %1380 : vector<2x32xi32> to vector<2x32xf32>
      %1382 = vector.broadcast %1379 : vector<2x1xf32> to vector<2x32xf32>
      %1383 = arith.cmpf oge, %876, %1382 : vector<2x32xf32>
      %cst_580 = arith.constant 3.200000e+01 : f32
      %1384 = vector.broadcast %cst_580 : f32 to vector<2x32xf32>
      %1385 = arith.select %1383, %1381, %1384 : vector<2x32xi1>, vector<2x32xf32>
      %cst_581 = arith.constant dense<0x7F800000> : vector<2xf32>
      %1386 = vector.multi_reduction <minimumf>, %1385, %cst_581 [1] : vector<2x32xf32> to vector<2xf32>
      %1387 = vector.shape_cast %1386 : vector<2xf32> to vector<2x1xf32>
      %1388 = tpu.iota {dimensions = array<i32: 1>} : vector<2x40xi32>
      %1389 = arith.sitofp %1388 : vector<2x40xi32> to vector<2x40xf32>
      %1390 = vector.broadcast %1387 : vector<2x1xf32> to vector<2x40xf32>
      %1391 = arith.cmpf oeq, %1389, %1390 : vector<2x40xf32>
      %1392 = arith.extui %1391 : vector<2x40xi1> to vector<2x40xi32>
      %1393 = arith.sitofp %1392 : vector<2x40xi32> to vector<2x40xf32>
      %c0_582 = arith.constant 0 : index
      %c0_583 = arith.constant 0 : index
      %1394 = vector.load %arg19[%c0_582, %c0_583] : memref<40x32xf32, #tpu.memory_space<vmem>>, vector<40x32xf32>
      %cst_584 = arith.constant dense<0.000000e+00> : vector<2x32xf32>
      %1395 = tpu.matmul %1393, %1394, %cst_584 {dimension_numbers = #tpu.dot_dimension_numbers<[1], [0], [0], [1], [0, 0, 1, 1], [], []>} : vector<2x40xf32>, vector<40x32xf32>, vector<2x32xf32> -> vector<2x32xf32>
      %c0_585 = arith.constant 0 : index
      %c0_586 = arith.constant 0 : index
      %1396 = vector.load %arg25[%c0_585, %c0_586] : memref<2x32xf32, #tpu.memory_space<vmem>>, vector<2x32xf32>
      tpu.vector_store %arg25[%c0_585, %c0_586], %1395 {strides = array<i32>} : memref<2x32xf32, #tpu.memory_space<vmem>>, vector<2x32xf32>,
    } else {
    }
    %c0_371 = arith.constant 0 : index
    %c0_372 = arith.constant 0 : index
    %887 = vector.load %arg25[%c0_371, %c0_372] : memref<2x32xf32, #tpu.memory_space<vmem>>, vector<2x32xf32>
    %c0_373 = arith.constant 0 : index
    %c0_374 = arith.constant 0 : index
    %888 = vector.load %arg15[%c0_373, %c0_374] : memref<32x128xf32, #tpu.memory_space<vmem>>, vector<32x128xf32>
    %cst_375 = arith.constant dense<0.000000e+00> : vector<2x128xf32>
    %889 = tpu.matmul %870, %888, %cst_375 {dimension_numbers = #tpu.dot_dimension_numbers<[1], [0], [0], [1], [0, 0, 1, 1], [], []>} : vector<2x32xf32>, vector<32x128xf32>, vector<2x128xf32> -> vector<2x128xf32>
    %890 = vector.extract_strided_slice %889 {offsets = [0, 0], sizes = [2, 32], strides = [1, 1]} : vector<2x128xf32> to vector<2x32xf32>
    %891 = vector.extract_strided_slice %889 {offsets = [0, 32], sizes = [2, 96], strides = [1, 1]} : vector<2x128xf32> to vector<2x96xf32>
    %c0_376 = arith.constant 0 : index
    %c0_377 = arith.constant 0 : index
    %892 = vector.load %arg18[%c0_376, %c0_377] : memref<1x96xf32, #tpu.memory_space<vmem>>, vector<1x96xf32>
    %893 = vector.broadcast %892 : vector<1x96xf32> to vector<2x96xf32>
    %894 = arith.addf %891, %893 : vector<2x96xf32>
    %895 = vector.shape_cast %890 : vector<2x32xf32> to vector<1x2x32xf32>
    %896 = vector.broadcast %895 : vector<1x2x32xf32> to vector<8x2x32xf32>
    %897 = arith.addf %786, %896 : vector<8x2x32xf32>
    %898 = vector.shape_cast %790 : vector<1x32xf32> to vector<1x1x32xf32>
    %899 = vector.broadcast %898 : vector<1x1x32xf32> to vector<8x2x32xf32>
    %900 = arith.addf %897, %899 : vector<8x2x32xf32>
    %901 = math.tanh %900 : vector<8x2x32xf32>
    %902 = vector.shape_cast %791 : vector<1x32xf32> to vector<1x1x32xf32>
    %903 = vector.broadcast %902 : vector<1x1x32xf32> to vector<8x2x32xf32>
    %904 = arith.mulf %901, %903 : vector<8x2x32xf32>
    %cst_378 = arith.constant dense<0.000000e+00> : vector<8x2xf32>
    %905 = vector.multi_reduction <add>, %904, %cst_378 [2] : vector<8x2x32xf32> to vector<8x2xf32>
    %cst_379 = arith.constant -1.000000e+10 : f32
    %906 = vector.broadcast %cst_379 : f32 to vector<8x2xf32>
    %907 = arith.select %789, %905, %906 : vector<8x2xi1>, vector<8x2xf32>
    %cst_380 = arith.constant dense<0xFF800000> : vector<2xf32>
    %908 = vector.multi_reduction <maximumf>, %907, %cst_380 [0] : vector<8x2xf32> to vector<2xf32>
    %909 = vector.shape_cast %908 : vector<2xf32> to vector<1x2xf32>
    %910 = vector.broadcast %909 : vector<1x2xf32> to vector<8x2xf32>
    %911 = arith.subf %907, %910 : vector<8x2xf32>
    %912 = math.exp %911 : vector<8x2xf32>
    %cst_381 = arith.constant dense<0.000000e+00> : vector<2xf32>
    %913 = vector.multi_reduction <add>, %912, %cst_381 [0] : vector<8x2xf32> to vector<2xf32>
    %914 = vector.shape_cast %913 : vector<2xf32> to vector<1x2xf32>
    %915 = tpu.reciprocal %914 {approx = true} : vector<1x2xf32> -> vector<1x2xf32>
    %916 = vector.broadcast %915 : vector<1x2xf32> to vector<8x2xf32>
    %917 = arith.mulf %912, %916 : vector<8x2xf32>
    %918 = vector.shape_cast %917 : vector<8x2xf32> to vector<8x2x1xf32>
    %919 = vector.broadcast %918 : vector<8x2x1xf32> to vector<8x2x64xf32>
    %920 = arith.mulf %919, %785 : vector<8x2x64xf32>
    %cst_382 = arith.constant dense<0.000000e+00> : vector<2x64xf32>
    %921 = vector.multi_reduction <add>, %920, %cst_382 [0] : vector<8x2x64xf32> to vector<2x64xf32>
    %922 = tpu.concatenate %887, %921 in 1 : vector<2x32xf32>, vector<2x64xf32> -> vector<2x96xf32>
    %c0_383 = arith.constant 0 : index
    %c0_384 = arith.constant 0 : index
    %923 = vector.load %arg16[%c0_383, %c0_384] : memref<96x96xf32, #tpu.memory_space<vmem>>, vector<96x96xf32>
    %cst_385 = arith.constant dense<0.000000e+00> : vector<2x96xf32>
    %924 = tpu.matmul %922, %923, %cst_385 {dimension_numbers = #tpu.dot_dimension_numbers<[1], [0], [0], [1], [0, 0, 1, 1], [], []>} : vector<2x96xf32>, vector<96x96xf32>, vector<2x96xf32> -> vector<2x96xf32>
    %c0_386 = arith.constant 0 : index
    %c0_387 = arith.constant 0 : index
    %925 = vector.load %arg17[%c0_386, %c0_387] : memref<1x96xf32, #tpu.memory_space<vmem>>, vector<1x96xf32>
    %926 = vector.broadcast %925 : vector<1x96xf32> to vector<2x96xf32>
    %927 = arith.addf %924, %926 : vector<2x96xf32>
    %928 = vector.extract_strided_slice %927 {offsets = [0, 0], sizes = [2, 32], strides = [1, 1]} : vector<2x96xf32> to vector<2x32xf32>
    %929 = vector.extract_strided_slice %894 {offsets = [0, 0], sizes = [2, 32], strides = [1, 1]} : vector<2x96xf32> to vector<2x32xf32>
    %930 = arith.addf %928, %929 : vector<2x32xf32>
    %931 = arith.negf %930 : vector<2x32xf32>
    %932 = math.exp %931 : vector<2x32xf32>
    %cst_388 = arith.constant 1.000000e+00 : f32
    %933 = vector.broadcast %cst_388 : f32 to vector<2x32xf32>
    %934 = arith.addf %933, %932 : vector<2x32xf32>
    %935 = arith.divf %933, %934 : vector<2x32xf32>
    %936 = vector.extract_strided_slice %927 {offsets = [0, 32], sizes = [2, 32], strides = [1, 1]} : vector<2x96xf32> to vector<2x32xf32>
    %937 = vector.extract_strided_slice %894 {offsets = [0, 32], sizes = [2, 32], strides = [1, 1]} : vector<2x96xf32> to vector<2x32xf32>
    %938 = arith.addf %936, %937 : vector<2x32xf32>
    %939 = arith.negf %938 : vector<2x32xf32>
    %940 = math.exp %939 : vector<2x32xf32>
    %cst_389 = arith.constant 1.000000e+00 : f32
    %941 = vector.broadcast %cst_389 : f32 to vector<2x32xf32>
    %942 = arith.addf %941, %940 : vector<2x32xf32>
    %943 = arith.divf %941, %942 : vector<2x32xf32>
    %944 = vector.extract_strided_slice %927 {offsets = [0, 64], sizes = [2, 32], strides = [1, 1]} : vector<2x96xf32> to vector<2x32xf32>
    %945 = vector.extract_strided_slice %894 {offsets = [0, 64], sizes = [2, 32], strides = [1, 1]} : vector<2x96xf32> to vector<2x32xf32>
    %946 = arith.mulf %935, %945 : vector<2x32xf32>
    %947 = arith.addf %944, %946 : vector<2x32xf32>
    %948 = math.tanh %947 : vector<2x32xf32>
    %cst_390 = arith.constant 1.000000e+00 : f32
    %949 = vector.broadcast %cst_390 : f32 to vector<2x32xf32>
    %950 = arith.subf %949, %943 : vector<2x32xf32>
    %951 = arith.mulf %950, %948 : vector<2x32xf32>
    %952 = arith.mulf %943, %870 : vector<2x32xf32>
    %953 = arith.addf %951, %952 : vector<2x32xf32>
    %954 = tpu.concatenate %953, %921, %887 in 1 : vector<2x32xf32>, vector<2x64xf32>, vector<2x32xf32> -> vector<2x128xf32>
    %c0_391 = arith.constant 0 : index
    %c0_392 = arith.constant 0 : index
    %955 = vector.load %arg20[%c0_391, %c0_392] : memref<128x32xf32, #tpu.memory_space<vmem>>, vector<128x32xf32>
    %cst_393 = arith.constant dense<0.000000e+00> : vector<2x32xf32>
    %956 = tpu.matmul %954, %955, %cst_393 {dimension_numbers = #tpu.dot_dimension_numbers<[1], [0], [0], [1], [0, 0, 1, 1], [], []>} : vector<2x128xf32>, vector<128x32xf32>, vector<2x32xf32> -> vector<2x32xf32>
    %c0_394 = arith.constant 0 : index
    %c0_395 = arith.constant 0 : index
    %957 = vector.load %arg21[%c0_394, %c0_395] : memref<1x32xf32, #tpu.memory_space<vmem>>, vector<1x32xf32>
    %958 = vector.broadcast %957 : vector<1x32xf32> to vector<2x32xf32>
    %959 = arith.addf %956, %958 : vector<2x32xf32>
    %c2_396 = arith.constant 2 : index
    %c0_397 = arith.constant 0 : index
    %c0_398 = arith.constant 0 : index
    %960 = vector.load %arg22[%c2_396, %c0_397, %c0_398] : memref<8x2x32xf32, #tpu.memory_space<vmem>>, vector<1x2x32xf32>
    %961 = vector.shape_cast %960 : vector<1x2x32xf32> to vector<2x32xf32>
    %962 = vector.shape_cast %959 : vector<2x32xf32> to vector<1x2x32xf32>
    tpu.vector_store %arg22[%c2_396, %c0_397, %c0_398], %962 {strides = array<i32>} : memref<8x2x32xf32, #tpu.memory_space<vmem>>, vector<1x2x32xf32>,
    %c2_399 = arith.constant 2 : index
    %c0_400 = arith.constant 0 : index
    %c0_401 = arith.constant 0 : index
    %963 = vector.load %arg5[%c2_399, %c0_400, %c0_401] : memref<8x2x32xf32, #tpu.memory_space<vmem>>, vector<1x2x32xf32>
    %964 = vector.shape_cast %963 : vector<1x2x32xf32> to vector<2x32xf32>
    %c0_402 = arith.constant 0 : index
    %c0_403 = arith.constant 0 : index
    %965 = vector.load %arg25[%c0_402, %c0_403] : memref<2x32xf32, #tpu.memory_space<vmem>>, vector<2x32xf32>
    tpu.vector_store %arg25[%c0_402, %c0_403], %964 {strides = array<i32>} : memref<2x32xf32, #tpu.memory_space<vmem>>, vector<2x32xf32>,
    %c2_404 = arith.constant 2 : index
    %966 = memref.load %arg0[%c2_404] : memref<8xi32, #tpu.memory_space<smem>>
    %c0_i32_405 = arith.constant 0 : i32
    %967 = arith.cmpi eq, %966, %c0_i32_405 : i32
    %968 = arith.extui %967 : i1 to i32
    %c0_i32_406 = arith.constant 0 : i32
    %969 = arith.cmpi ne, %968, %c0_i32_406 : i32
    scf.if %969 {
      %cst_579 = arith.constant dense<0xFF800000> : vector<2xf32>
      %1378 = vector.multi_reduction <maximumf>, %959, %cst_579 [1] : vector<2x32xf32> to vector<2xf32>
      %1379 = vector.shape_cast %1378 : vector<2xf32> to vector<2x1xf32>
      %1380 = tpu.iota {dimensions = array<i32: 1>} : vector<2x32xi32>
      %1381 = arith.sitofp %1380 : vector<2x32xi32> to vector<2x32xf32>
      %1382 = vector.broadcast %1379 : vector<2x1xf32> to vector<2x32xf32>
      %1383 = arith.cmpf oge, %959, %1382 : vector<2x32xf32>
      %cst_580 = arith.constant 3.200000e+01 : f32
      %1384 = vector.broadcast %cst_580 : f32 to vector<2x32xf32>
      %1385 = arith.select %1383, %1381, %1384 : vector<2x32xi1>, vector<2x32xf32>
      %cst_581 = arith.constant dense<0x7F800000> : vector<2xf32>
      %1386 = vector.multi_reduction <minimumf>, %1385, %cst_581 [1] : vector<2x32xf32> to vector<2xf32>
      %1387 = vector.shape_cast %1386 : vector<2xf32> to vector<2x1xf32>
      %1388 = tpu.iota {dimensions = array<i32: 1>} : vector<2x40xi32>
      %1389 = arith.sitofp %1388 : vector<2x40xi32> to vector<2x40xf32>
      %1390 = vector.broadcast %1387 : vector<2x1xf32> to vector<2x40xf32>
      %1391 = arith.cmpf oeq, %1389, %1390 : vector<2x40xf32>
      %1392 = arith.extui %1391 : vector<2x40xi1> to vector<2x40xi32>
      %1393 = arith.sitofp %1392 : vector<2x40xi32> to vector<2x40xf32>
      %c0_582 = arith.constant 0 : index
      %c0_583 = arith.constant 0 : index
      %1394 = vector.load %arg19[%c0_582, %c0_583] : memref<40x32xf32, #tpu.memory_space<vmem>>, vector<40x32xf32>
      %cst_584 = arith.constant dense<0.000000e+00> : vector<2x32xf32>
      %1395 = tpu.matmul %1393, %1394, %cst_584 {dimension_numbers = #tpu.dot_dimension_numbers<[1], [0], [0], [1], [0, 0, 1, 1], [], []>} : vector<2x40xf32>, vector<40x32xf32>, vector<2x32xf32> -> vector<2x32xf32>
      %c0_585 = arith.constant 0 : index
      %c0_586 = arith.constant 0 : index
      %1396 = vector.load %arg25[%c0_585, %c0_586] : memref<2x32xf32, #tpu.memory_space<vmem>>, vector<2x32xf32>
      tpu.vector_store %arg25[%c0_585, %c0_586], %1395 {strides = array<i32>} : memref<2x32xf32, #tpu.memory_space<vmem>>, vector<2x32xf32>,
    } else {
    }
    %c0_407 = arith.constant 0 : index
    %c0_408 = arith.constant 0 : index
    %970 = vector.load %arg25[%c0_407, %c0_408] : memref<2x32xf32, #tpu.memory_space<vmem>>, vector<2x32xf32>
    %c0_409 = arith.constant 0 : index
    %c0_410 = arith.constant 0 : index
    %971 = vector.load %arg15[%c0_409, %c0_410] : memref<32x128xf32, #tpu.memory_space<vmem>>, vector<32x128xf32>
    %cst_411 = arith.constant dense<0.000000e+00> : vector<2x128xf32>
    %972 = tpu.matmul %953, %971, %cst_411 {dimension_numbers = #tpu.dot_dimension_numbers<[1], [0], [0], [1], [0, 0, 1, 1], [], []>} : vector<2x32xf32>, vector<32x128xf32>, vector<2x128xf32> -> vector<2x128xf32>
    %973 = vector.extract_strided_slice %972 {offsets = [0, 0], sizes = [2, 32], strides = [1, 1]} : vector<2x128xf32> to vector<2x32xf32>
    %974 = vector.extract_strided_slice %972 {offsets = [0, 32], sizes = [2, 96], strides = [1, 1]} : vector<2x128xf32> to vector<2x96xf32>
    %c0_412 = arith.constant 0 : index
    %c0_413 = arith.constant 0 : index
    %975 = vector.load %arg18[%c0_412, %c0_413] : memref<1x96xf32, #tpu.memory_space<vmem>>, vector<1x96xf32>
    %976 = vector.broadcast %975 : vector<1x96xf32> to vector<2x96xf32>
    %977 = arith.addf %974, %976 : vector<2x96xf32>
    %978 = vector.shape_cast %973 : vector<2x32xf32> to vector<1x2x32xf32>
    %979 = vector.broadcast %978 : vector<1x2x32xf32> to vector<8x2x32xf32>
    %980 = arith.addf %786, %979 : vector<8x2x32xf32>
    %981 = vector.shape_cast %790 : vector<1x32xf32> to vector<1x1x32xf32>
    %982 = vector.broadcast %981 : vector<1x1x32xf32> to vector<8x2x32xf32>
    %983 = arith.addf %980, %982 : vector<8x2x32xf32>
    %984 = math.tanh %983 : vector<8x2x32xf32>
    %985 = vector.shape_cast %791 : vector<1x32xf32> to vector<1x1x32xf32>
    %986 = vector.broadcast %985 : vector<1x1x32xf32> to vector<8x2x32xf32>
    %987 = arith.mulf %984, %986 : vector<8x2x32xf32>
    %cst_414 = arith.constant dense<0.000000e+00> : vector<8x2xf32>
    %988 = vector.multi_reduction <add>, %987, %cst_414 [2] : vector<8x2x32xf32> to vector<8x2xf32>
    %cst_415 = arith.constant -1.000000e+10 : f32
    %989 = vector.broadcast %cst_415 : f32 to vector<8x2xf32>
    %990 = arith.select %789, %988, %989 : vector<8x2xi1>, vector<8x2xf32>
    %cst_416 = arith.constant dense<0xFF800000> : vector<2xf32>
    %991 = vector.multi_reduction <maximumf>, %990, %cst_416 [0] : vector<8x2xf32> to vector<2xf32>
    %992 = vector.shape_cast %991 : vector<2xf32> to vector<1x2xf32>
    %993 = vector.broadcast %992 : vector<1x2xf32> to vector<8x2xf32>
    %994 = arith.subf %990, %993 : vector<8x2xf32>
    %995 = math.exp %994 : vector<8x2xf32>
    %cst_417 = arith.constant dense<0.000000e+00> : vector<2xf32>
    %996 = vector.multi_reduction <add>, %995, %cst_417 [0] : vector<8x2xf32> to vector<2xf32>
    %997 = vector.shape_cast %996 : vector<2xf32> to vector<1x2xf32>
    %998 = tpu.reciprocal %997 {approx = true} : vector<1x2xf32> -> vector<1x2xf32>
    %999 = vector.broadcast %998 : vector<1x2xf32> to vector<8x2xf32>
    %1000 = arith.mulf %995, %999 : vector<8x2xf32>
    %1001 = vector.shape_cast %1000 : vector<8x2xf32> to vector<8x2x1xf32>
    %1002 = vector.broadcast %1001 : vector<8x2x1xf32> to vector<8x2x64xf32>
    %1003 = arith.mulf %1002, %785 : vector<8x2x64xf32>
    %cst_418 = arith.constant dense<0.000000e+00> : vector<2x64xf32>
    %1004 = vector.multi_reduction <add>, %1003, %cst_418 [0] : vector<8x2x64xf32> to vector<2x64xf32>
    %1005 = tpu.concatenate %970, %1004 in 1 : vector<2x32xf32>, vector<2x64xf32> -> vector<2x96xf32>
    %c0_419 = arith.constant 0 : index
    %c0_420 = arith.constant 0 : index
    %1006 = vector.load %arg16[%c0_419, %c0_420] : memref<96x96xf32, #tpu.memory_space<vmem>>, vector<96x96xf32>
    %cst_421 = arith.constant dense<0.000000e+00> : vector<2x96xf32>
    %1007 = tpu.matmul %1005, %1006, %cst_421 {dimension_numbers = #tpu.dot_dimension_numbers<[1], [0], [0], [1], [0, 0, 1, 1], [], []>} : vector<2x96xf32>, vector<96x96xf32>, vector<2x96xf32> -> vector<2x96xf32>
    %c0_422 = arith.constant 0 : index
    %c0_423 = arith.constant 0 : index
    %1008 = vector.load %arg17[%c0_422, %c0_423] : memref<1x96xf32, #tpu.memory_space<vmem>>, vector<1x96xf32>
    %1009 = vector.broadcast %1008 : vector<1x96xf32> to vector<2x96xf32>
    %1010 = arith.addf %1007, %1009 : vector<2x96xf32>
    %1011 = vector.extract_strided_slice %1010 {offsets = [0, 0], sizes = [2, 32], strides = [1, 1]} : vector<2x96xf32> to vector<2x32xf32>
    %1012 = vector.extract_strided_slice %977 {offsets = [0, 0], sizes = [2, 32], strides = [1, 1]} : vector<2x96xf32> to vector<2x32xf32>
    %1013 = arith.addf %1011, %1012 : vector<2x32xf32>
    %1014 = arith.negf %1013 : vector<2x32xf32>
    %1015 = math.exp %1014 : vector<2x32xf32>
    %cst_424 = arith.constant 1.000000e+00 : f32
    %1016 = vector.broadcast %cst_424 : f32 to vector<2x32xf32>
    %1017 = arith.addf %1016, %1015 : vector<2x32xf32>
    %1018 = arith.divf %1016, %1017 : vector<2x32xf32>
    %1019 = vector.extract_strided_slice %1010 {offsets = [0, 32], sizes = [2, 32], strides = [1, 1]} : vector<2x96xf32> to vector<2x32xf32>
    %1020 = vector.extract_strided_slice %977 {offsets = [0, 32], sizes = [2, 32], strides = [1, 1]} : vector<2x96xf32> to vector<2x32xf32>
    %1021 = arith.addf %1019, %1020 : vector<2x32xf32>
    %1022 = arith.negf %1021 : vector<2x32xf32>
    %1023 = math.exp %1022 : vector<2x32xf32>
    %cst_425 = arith.constant 1.000000e+00 : f32
    %1024 = vector.broadcast %cst_425 : f32 to vector<2x32xf32>
    %1025 = arith.addf %1024, %1023 : vector<2x32xf32>
    %1026 = arith.divf %1024, %1025 : vector<2x32xf32>
    %1027 = vector.extract_strided_slice %1010 {offsets = [0, 64], sizes = [2, 32], strides = [1, 1]} : vector<2x96xf32> to vector<2x32xf32>
    %1028 = vector.extract_strided_slice %977 {offsets = [0, 64], sizes = [2, 32], strides = [1, 1]} : vector<2x96xf32> to vector<2x32xf32>
    %1029 = arith.mulf %1018, %1028 : vector<2x32xf32>
    %1030 = arith.addf %1027, %1029 : vector<2x32xf32>
    %1031 = math.tanh %1030 : vector<2x32xf32>
    %cst_426 = arith.constant 1.000000e+00 : f32
    %1032 = vector.broadcast %cst_426 : f32 to vector<2x32xf32>
    %1033 = arith.subf %1032, %1026 : vector<2x32xf32>
    %1034 = arith.mulf %1033, %1031 : vector<2x32xf32>
    %1035 = arith.mulf %1026, %953 : vector<2x32xf32>
    %1036 = arith.addf %1034, %1035 : vector<2x32xf32>
    %1037 = tpu.concatenate %1036, %1004, %970 in 1 : vector<2x32xf32>, vector<2x64xf32>, vector<2x32xf32> -> vector<2x128xf32>
    %c0_427 = arith.constant 0 : index
    %c0_428 = arith.constant 0 : index
    %1038 = vector.load %arg20[%c0_427, %c0_428] : memref<128x32xf32, #tpu.memory_space<vmem>>, vector<128x32xf32>
    %cst_429 = arith.constant dense<0.000000e+00> : vector<2x32xf32>
    %1039 = tpu.matmul %1037, %1038, %cst_429 {dimension_numbers = #tpu.dot_dimension_numbers<[1], [0], [0], [1], [0, 0, 1, 1], [], []>} : vector<2x128xf32>, vector<128x32xf32>, vector<2x32xf32> -> vector<2x32xf32>
    %c0_430 = arith.constant 0 : index
    %c0_431 = arith.constant 0 : index
    %1040 = vector.load %arg21[%c0_430, %c0_431] : memref<1x32xf32, #tpu.memory_space<vmem>>, vector<1x32xf32>
    %1041 = vector.broadcast %1040 : vector<1x32xf32> to vector<2x32xf32>
    %1042 = arith.addf %1039, %1041 : vector<2x32xf32>
    %c3_432 = arith.constant 3 : index
    %c0_433 = arith.constant 0 : index
    %c0_434 = arith.constant 0 : index
    %1043 = vector.load %arg22[%c3_432, %c0_433, %c0_434] : memref<8x2x32xf32, #tpu.memory_space<vmem>>, vector<1x2x32xf32>
    %1044 = vector.shape_cast %1043 : vector<1x2x32xf32> to vector<2x32xf32>
    %1045 = vector.shape_cast %1042 : vector<2x32xf32> to vector<1x2x32xf32>
    tpu.vector_store %arg22[%c3_432, %c0_433, %c0_434], %1045 {strides = array<i32>} : memref<8x2x32xf32, #tpu.memory_space<vmem>>, vector<1x2x32xf32>,
    %c3_435 = arith.constant 3 : index
    %c0_436 = arith.constant 0 : index
    %c0_437 = arith.constant 0 : index
    %1046 = vector.load %arg5[%c3_435, %c0_436, %c0_437] : memref<8x2x32xf32, #tpu.memory_space<vmem>>, vector<1x2x32xf32>
    %1047 = vector.shape_cast %1046 : vector<1x2x32xf32> to vector<2x32xf32>
    %c0_438 = arith.constant 0 : index
    %c0_439 = arith.constant 0 : index
    %1048 = vector.load %arg25[%c0_438, %c0_439] : memref<2x32xf32, #tpu.memory_space<vmem>>, vector<2x32xf32>
    tpu.vector_store %arg25[%c0_438, %c0_439], %1047 {strides = array<i32>} : memref<2x32xf32, #tpu.memory_space<vmem>>, vector<2x32xf32>,
    %c3_440 = arith.constant 3 : index
    %1049 = memref.load %arg0[%c3_440] : memref<8xi32, #tpu.memory_space<smem>>
    %c0_i32_441 = arith.constant 0 : i32
    %1050 = arith.cmpi eq, %1049, %c0_i32_441 : i32
    %1051 = arith.extui %1050 : i1 to i32
    %c0_i32_442 = arith.constant 0 : i32
    %1052 = arith.cmpi ne, %1051, %c0_i32_442 : i32
    scf.if %1052 {
      %cst_579 = arith.constant dense<0xFF800000> : vector<2xf32>
      %1378 = vector.multi_reduction <maximumf>, %1042, %cst_579 [1] : vector<2x32xf32> to vector<2xf32>
      %1379 = vector.shape_cast %1378 : vector<2xf32> to vector<2x1xf32>
      %1380 = tpu.iota {dimensions = array<i32: 1>} : vector<2x32xi32>
      %1381 = arith.sitofp %1380 : vector<2x32xi32> to vector<2x32xf32>
      %1382 = vector.broadcast %1379 : vector<2x1xf32> to vector<2x32xf32>
      %1383 = arith.cmpf oge, %1042, %1382 : vector<2x32xf32>
      %cst_580 = arith.constant 3.200000e+01 : f32
      %1384 = vector.broadcast %cst_580 : f32 to vector<2x32xf32>
      %1385 = arith.select %1383, %1381, %1384 : vector<2x32xi1>, vector<2x32xf32>
      %cst_581 = arith.constant dense<0x7F800000> : vector<2xf32>
      %1386 = vector.multi_reduction <minimumf>, %1385, %cst_581 [1] : vector<2x32xf32> to vector<2xf32>
      %1387 = vector.shape_cast %1386 : vector<2xf32> to vector<2x1xf32>
      %1388 = tpu.iota {dimensions = array<i32: 1>} : vector<2x40xi32>
      %1389 = arith.sitofp %1388 : vector<2x40xi32> to vector<2x40xf32>
      %1390 = vector.broadcast %1387 : vector<2x1xf32> to vector<2x40xf32>
      %1391 = arith.cmpf oeq, %1389, %1390 : vector<2x40xf32>
      %1392 = arith.extui %1391 : vector<2x40xi1> to vector<2x40xi32>
      %1393 = arith.sitofp %1392 : vector<2x40xi32> to vector<2x40xf32>
      %c0_582 = arith.constant 0 : index
      %c0_583 = arith.constant 0 : index
      %1394 = vector.load %arg19[%c0_582, %c0_583] : memref<40x32xf32, #tpu.memory_space<vmem>>, vector<40x32xf32>
      %cst_584 = arith.constant dense<0.000000e+00> : vector<2x32xf32>
      %1395 = tpu.matmul %1393, %1394, %cst_584 {dimension_numbers = #tpu.dot_dimension_numbers<[1], [0], [0], [1], [0, 0, 1, 1], [], []>} : vector<2x40xf32>, vector<40x32xf32>, vector<2x32xf32> -> vector<2x32xf32>
      %c0_585 = arith.constant 0 : index
      %c0_586 = arith.constant 0 : index
      %1396 = vector.load %arg25[%c0_585, %c0_586] : memref<2x32xf32, #tpu.memory_space<vmem>>, vector<2x32xf32>
      tpu.vector_store %arg25[%c0_585, %c0_586], %1395 {strides = array<i32>} : memref<2x32xf32, #tpu.memory_space<vmem>>, vector<2x32xf32>,
    } else {
    }
    %c0_443 = arith.constant 0 : index
    %c0_444 = arith.constant 0 : index
    %1053 = vector.load %arg25[%c0_443, %c0_444] : memref<2x32xf32, #tpu.memory_space<vmem>>, vector<2x32xf32>
    %c0_445 = arith.constant 0 : index
    %c0_446 = arith.constant 0 : index
    %1054 = vector.load %arg15[%c0_445, %c0_446] : memref<32x128xf32, #tpu.memory_space<vmem>>, vector<32x128xf32>
    %cst_447 = arith.constant dense<0.000000e+00> : vector<2x128xf32>
    %1055 = tpu.matmul %1036, %1054, %cst_447 {dimension_numbers = #tpu.dot_dimension_numbers<[1], [0], [0], [1], [0, 0, 1, 1], [], []>} : vector<2x32xf32>, vector<32x128xf32>, vector<2x128xf32> -> vector<2x128xf32>
    %1056 = vector.extract_strided_slice %1055 {offsets = [0, 0], sizes = [2, 32], strides = [1, 1]} : vector<2x128xf32> to vector<2x32xf32>
    %1057 = vector.extract_strided_slice %1055 {offsets = [0, 32], sizes = [2, 96], strides = [1, 1]} : vector<2x128xf32> to vector<2x96xf32>
    %c0_448 = arith.constant 0 : index
    %c0_449 = arith.constant 0 : index
    %1058 = vector.load %arg18[%c0_448, %c0_449] : memref<1x96xf32, #tpu.memory_space<vmem>>, vector<1x96xf32>
    %1059 = vector.broadcast %1058 : vector<1x96xf32> to vector<2x96xf32>
    %1060 = arith.addf %1057, %1059 : vector<2x96xf32>
    %1061 = vector.shape_cast %1056 : vector<2x32xf32> to vector<1x2x32xf32>
    %1062 = vector.broadcast %1061 : vector<1x2x32xf32> to vector<8x2x32xf32>
    %1063 = arith.addf %786, %1062 : vector<8x2x32xf32>
    %1064 = vector.shape_cast %790 : vector<1x32xf32> to vector<1x1x32xf32>
    %1065 = vector.broadcast %1064 : vector<1x1x32xf32> to vector<8x2x32xf32>
    %1066 = arith.addf %1063, %1065 : vector<8x2x32xf32>
    %1067 = math.tanh %1066 : vector<8x2x32xf32>
    %1068 = vector.shape_cast %791 : vector<1x32xf32> to vector<1x1x32xf32>
    %1069 = vector.broadcast %1068 : vector<1x1x32xf32> to vector<8x2x32xf32>
    %1070 = arith.mulf %1067, %1069 : vector<8x2x32xf32>
    %cst_450 = arith.constant dense<0.000000e+00> : vector<8x2xf32>
    %1071 = vector.multi_reduction <add>, %1070, %cst_450 [2] : vector<8x2x32xf32> to vector<8x2xf32>
    %cst_451 = arith.constant -1.000000e+10 : f32
    %1072 = vector.broadcast %cst_451 : f32 to vector<8x2xf32>
    %1073 = arith.select %789, %1071, %1072 : vector<8x2xi1>, vector<8x2xf32>
    %cst_452 = arith.constant dense<0xFF800000> : vector<2xf32>
    %1074 = vector.multi_reduction <maximumf>, %1073, %cst_452 [0] : vector<8x2xf32> to vector<2xf32>
    %1075 = vector.shape_cast %1074 : vector<2xf32> to vector<1x2xf32>
    %1076 = vector.broadcast %1075 : vector<1x2xf32> to vector<8x2xf32>
    %1077 = arith.subf %1073, %1076 : vector<8x2xf32>
    %1078 = math.exp %1077 : vector<8x2xf32>
    %cst_453 = arith.constant dense<0.000000e+00> : vector<2xf32>
    %1079 = vector.multi_reduction <add>, %1078, %cst_453 [0] : vector<8x2xf32> to vector<2xf32>
    %1080 = vector.shape_cast %1079 : vector<2xf32> to vector<1x2xf32>
    %1081 = tpu.reciprocal %1080 {approx = true} : vector<1x2xf32> -> vector<1x2xf32>
    %1082 = vector.broadcast %1081 : vector<1x2xf32> to vector<8x2xf32>
    %1083 = arith.mulf %1078, %1082 : vector<8x2xf32>
    %1084 = vector.shape_cast %1083 : vector<8x2xf32> to vector<8x2x1xf32>
    %1085 = vector.broadcast %1084 : vector<8x2x1xf32> to vector<8x2x64xf32>
    %1086 = arith.mulf %1085, %785 : vector<8x2x64xf32>
    %cst_454 = arith.constant dense<0.000000e+00> : vector<2x64xf32>
    %1087 = vector.multi_reduction <add>, %1086, %cst_454 [0] : vector<8x2x64xf32> to vector<2x64xf32>
    %1088 = tpu.concatenate %1053, %1087 in 1 : vector<2x32xf32>, vector<2x64xf32> -> vector<2x96xf32>
    %c0_455 = arith.constant 0 : index
    %c0_456 = arith.constant 0 : index
    %1089 = vector.load %arg16[%c0_455, %c0_456] : memref<96x96xf32, #tpu.memory_space<vmem>>, vector<96x96xf32>
    %cst_457 = arith.constant dense<0.000000e+00> : vector<2x96xf32>
    %1090 = tpu.matmul %1088, %1089, %cst_457 {dimension_numbers = #tpu.dot_dimension_numbers<[1], [0], [0], [1], [0, 0, 1, 1], [], []>} : vector<2x96xf32>, vector<96x96xf32>, vector<2x96xf32> -> vector<2x96xf32>
    %c0_458 = arith.constant 0 : index
    %c0_459 = arith.constant 0 : index
    %1091 = vector.load %arg17[%c0_458, %c0_459] : memref<1x96xf32, #tpu.memory_space<vmem>>, vector<1x96xf32>
    %1092 = vector.broadcast %1091 : vector<1x96xf32> to vector<2x96xf32>
    %1093 = arith.addf %1090, %1092 : vector<2x96xf32>
    %1094 = vector.extract_strided_slice %1093 {offsets = [0, 0], sizes = [2, 32], strides = [1, 1]} : vector<2x96xf32> to vector<2x32xf32>
    %1095 = vector.extract_strided_slice %1060 {offsets = [0, 0], sizes = [2, 32], strides = [1, 1]} : vector<2x96xf32> to vector<2x32xf32>
    %1096 = arith.addf %1094, %1095 : vector<2x32xf32>
    %1097 = arith.negf %1096 : vector<2x32xf32>
    %1098 = math.exp %1097 : vector<2x32xf32>
    %cst_460 = arith.constant 1.000000e+00 : f32
    %1099 = vector.broadcast %cst_460 : f32 to vector<2x32xf32>
    %1100 = arith.addf %1099, %1098 : vector<2x32xf32>
    %1101 = arith.divf %1099, %1100 : vector<2x32xf32>
    %1102 = vector.extract_strided_slice %1093 {offsets = [0, 32], sizes = [2, 32], strides = [1, 1]} : vector<2x96xf32> to vector<2x32xf32>
    %1103 = vector.extract_strided_slice %1060 {offsets = [0, 32], sizes = [2, 32], strides = [1, 1]} : vector<2x96xf32> to vector<2x32xf32>
    %1104 = arith.addf %1102, %1103 : vector<2x32xf32>
    %1105 = arith.negf %1104 : vector<2x32xf32>
    %1106 = math.exp %1105 : vector<2x32xf32>
    %cst_461 = arith.constant 1.000000e+00 : f32
    %1107 = vector.broadcast %cst_461 : f32 to vector<2x32xf32>
    %1108 = arith.addf %1107, %1106 : vector<2x32xf32>
    %1109 = arith.divf %1107, %1108 : vector<2x32xf32>
    %1110 = vector.extract_strided_slice %1093 {offsets = [0, 64], sizes = [2, 32], strides = [1, 1]} : vector<2x96xf32> to vector<2x32xf32>
    %1111 = vector.extract_strided_slice %1060 {offsets = [0, 64], sizes = [2, 32], strides = [1, 1]} : vector<2x96xf32> to vector<2x32xf32>
    %1112 = arith.mulf %1101, %1111 : vector<2x32xf32>
    %1113 = arith.addf %1110, %1112 : vector<2x32xf32>
    %1114 = math.tanh %1113 : vector<2x32xf32>
    %cst_462 = arith.constant 1.000000e+00 : f32
    %1115 = vector.broadcast %cst_462 : f32 to vector<2x32xf32>
    %1116 = arith.subf %1115, %1109 : vector<2x32xf32>
    %1117 = arith.mulf %1116, %1114 : vector<2x32xf32>
    %1118 = arith.mulf %1109, %1036 : vector<2x32xf32>
    %1119 = arith.addf %1117, %1118 : vector<2x32xf32>
    %1120 = tpu.concatenate %1119, %1087, %1053 in 1 : vector<2x32xf32>, vector<2x64xf32>, vector<2x32xf32> -> vector<2x128xf32>
    %c0_463 = arith.constant 0 : index
    %c0_464 = arith.constant 0 : index
    %1121 = vector.load %arg20[%c0_463, %c0_464] : memref<128x32xf32, #tpu.memory_space<vmem>>, vector<128x32xf32>
    %cst_465 = arith.constant dense<0.000000e+00> : vector<2x32xf32>
    %1122 = tpu.matmul %1120, %1121, %cst_465 {dimension_numbers = #tpu.dot_dimension_numbers<[1], [0], [0], [1], [0, 0, 1, 1], [], []>} : vector<2x128xf32>, vector<128x32xf32>, vector<2x32xf32> -> vector<2x32xf32>
    %c0_466 = arith.constant 0 : index
    %c0_467 = arith.constant 0 : index
    %1123 = vector.load %arg21[%c0_466, %c0_467] : memref<1x32xf32, #tpu.memory_space<vmem>>, vector<1x32xf32>
    %1124 = vector.broadcast %1123 : vector<1x32xf32> to vector<2x32xf32>
    %1125 = arith.addf %1122, %1124 : vector<2x32xf32>
    %c4_468 = arith.constant 4 : index
    %c0_469 = arith.constant 0 : index
    %c0_470 = arith.constant 0 : index
    %1126 = vector.load %arg22[%c4_468, %c0_469, %c0_470] : memref<8x2x32xf32, #tpu.memory_space<vmem>>, vector<1x2x32xf32>
    %1127 = vector.shape_cast %1126 : vector<1x2x32xf32> to vector<2x32xf32>
    %1128 = vector.shape_cast %1125 : vector<2x32xf32> to vector<1x2x32xf32>
    tpu.vector_store %arg22[%c4_468, %c0_469, %c0_470], %1128 {strides = array<i32>} : memref<8x2x32xf32, #tpu.memory_space<vmem>>, vector<1x2x32xf32>,
    %c4_471 = arith.constant 4 : index
    %c0_472 = arith.constant 0 : index
    %c0_473 = arith.constant 0 : index
    %1129 = vector.load %arg5[%c4_471, %c0_472, %c0_473] : memref<8x2x32xf32, #tpu.memory_space<vmem>>, vector<1x2x32xf32>
    %1130 = vector.shape_cast %1129 : vector<1x2x32xf32> to vector<2x32xf32>
    %c0_474 = arith.constant 0 : index
    %c0_475 = arith.constant 0 : index
    %1131 = vector.load %arg25[%c0_474, %c0_475] : memref<2x32xf32, #tpu.memory_space<vmem>>, vector<2x32xf32>
    tpu.vector_store %arg25[%c0_474, %c0_475], %1130 {strides = array<i32>} : memref<2x32xf32, #tpu.memory_space<vmem>>, vector<2x32xf32>,
    %c4_476 = arith.constant 4 : index
    %1132 = memref.load %arg0[%c4_476] : memref<8xi32, #tpu.memory_space<smem>>
    %c0_i32_477 = arith.constant 0 : i32
    %1133 = arith.cmpi eq, %1132, %c0_i32_477 : i32
    %1134 = arith.extui %1133 : i1 to i32
    %c0_i32_478 = arith.constant 0 : i32
    %1135 = arith.cmpi ne, %1134, %c0_i32_478 : i32
    scf.if %1135 {
      %cst_579 = arith.constant dense<0xFF800000> : vector<2xf32>
      %1378 = vector.multi_reduction <maximumf>, %1125, %cst_579 [1] : vector<2x32xf32> to vector<2xf32>
      %1379 = vector.shape_cast %1378 : vector<2xf32> to vector<2x1xf32>
      %1380 = tpu.iota {dimensions = array<i32: 1>} : vector<2x32xi32>
      %1381 = arith.sitofp %1380 : vector<2x32xi32> to vector<2x32xf32>
      %1382 = vector.broadcast %1379 : vector<2x1xf32> to vector<2x32xf32>
      %1383 = arith.cmpf oge, %1125, %1382 : vector<2x32xf32>
      %cst_580 = arith.constant 3.200000e+01 : f32
      %1384 = vector.broadcast %cst_580 : f32 to vector<2x32xf32>
      %1385 = arith.select %1383, %1381, %1384 : vector<2x32xi1>, vector<2x32xf32>
      %cst_581 = arith.constant dense<0x7F800000> : vector<2xf32>
      %1386 = vector.multi_reduction <minimumf>, %1385, %cst_581 [1] : vector<2x32xf32> to vector<2xf32>
      %1387 = vector.shape_cast %1386 : vector<2xf32> to vector<2x1xf32>
      %1388 = tpu.iota {dimensions = array<i32: 1>} : vector<2x40xi32>
      %1389 = arith.sitofp %1388 : vector<2x40xi32> to vector<2x40xf32>
      %1390 = vector.broadcast %1387 : vector<2x1xf32> to vector<2x40xf32>
      %1391 = arith.cmpf oeq, %1389, %1390 : vector<2x40xf32>
      %1392 = arith.extui %1391 : vector<2x40xi1> to vector<2x40xi32>
      %1393 = arith.sitofp %1392 : vector<2x40xi32> to vector<2x40xf32>
      %c0_582 = arith.constant 0 : index
      %c0_583 = arith.constant 0 : index
      %1394 = vector.load %arg19[%c0_582, %c0_583] : memref<40x32xf32, #tpu.memory_space<vmem>>, vector<40x32xf32>
      %cst_584 = arith.constant dense<0.000000e+00> : vector<2x32xf32>
      %1395 = tpu.matmul %1393, %1394, %cst_584 {dimension_numbers = #tpu.dot_dimension_numbers<[1], [0], [0], [1], [0, 0, 1, 1], [], []>} : vector<2x40xf32>, vector<40x32xf32>, vector<2x32xf32> -> vector<2x32xf32>
      %c0_585 = arith.constant 0 : index
      %c0_586 = arith.constant 0 : index
      %1396 = vector.load %arg25[%c0_585, %c0_586] : memref<2x32xf32, #tpu.memory_space<vmem>>, vector<2x32xf32>
      tpu.vector_store %arg25[%c0_585, %c0_586], %1395 {strides = array<i32>} : memref<2x32xf32, #tpu.memory_space<vmem>>, vector<2x32xf32>,
    } else {
    }
    %c0_479 = arith.constant 0 : index
    %c0_480 = arith.constant 0 : index
    %1136 = vector.load %arg25[%c0_479, %c0_480] : memref<2x32xf32, #tpu.memory_space<vmem>>, vector<2x32xf32>
    %c0_481 = arith.constant 0 : index
    %c0_482 = arith.constant 0 : index
    %1137 = vector.load %arg15[%c0_481, %c0_482] : memref<32x128xf32, #tpu.memory_space<vmem>>, vector<32x128xf32>
    %cst_483 = arith.constant dense<0.000000e+00> : vector<2x128xf32>
    %1138 = tpu.matmul %1119, %1137, %cst_483 {dimension_numbers = #tpu.dot_dimension_numbers<[1], [0], [0], [1], [0, 0, 1, 1], [], []>} : vector<2x32xf32>, vector<32x128xf32>, vector<2x128xf32> -> vector<2x128xf32>
    %1139 = vector.extract_strided_slice %1138 {offsets = [0, 0], sizes = [2, 32], strides = [1, 1]} : vector<2x128xf32> to vector<2x32xf32>
    %1140 = vector.extract_strided_slice %1138 {offsets = [0, 32], sizes = [2, 96], strides = [1, 1]} : vector<2x128xf32> to vector<2x96xf32>
    %c0_484 = arith.constant 0 : index
    %c0_485 = arith.constant 0 : index
    %1141 = vector.load %arg18[%c0_484, %c0_485] : memref<1x96xf32, #tpu.memory_space<vmem>>, vector<1x96xf32>
    %1142 = vector.broadcast %1141 : vector<1x96xf32> to vector<2x96xf32>
    %1143 = arith.addf %1140, %1142 : vector<2x96xf32>
    %1144 = vector.shape_cast %1139 : vector<2x32xf32> to vector<1x2x32xf32>
    %1145 = vector.broadcast %1144 : vector<1x2x32xf32> to vector<8x2x32xf32>
    %1146 = arith.addf %786, %1145 : vector<8x2x32xf32>
    %1147 = vector.shape_cast %790 : vector<1x32xf32> to vector<1x1x32xf32>
    %1148 = vector.broadcast %1147 : vector<1x1x32xf32> to vector<8x2x32xf32>
    %1149 = arith.addf %1146, %1148 : vector<8x2x32xf32>
    %1150 = math.tanh %1149 : vector<8x2x32xf32>
    %1151 = vector.shape_cast %791 : vector<1x32xf32> to vector<1x1x32xf32>
    %1152 = vector.broadcast %1151 : vector<1x1x32xf32> to vector<8x2x32xf32>
    %1153 = arith.mulf %1150, %1152 : vector<8x2x32xf32>
    %cst_486 = arith.constant dense<0.000000e+00> : vector<8x2xf32>
    %1154 = vector.multi_reduction <add>, %1153, %cst_486 [2] : vector<8x2x32xf32> to vector<8x2xf32>
    %cst_487 = arith.constant -1.000000e+10 : f32
    %1155 = vector.broadcast %cst_487 : f32 to vector<8x2xf32>
    %1156 = arith.select %789, %1154, %1155 : vector<8x2xi1>, vector<8x2xf32>
    %cst_488 = arith.constant dense<0xFF800000> : vector<2xf32>
    %1157 = vector.multi_reduction <maximumf>, %1156, %cst_488 [0] : vector<8x2xf32> to vector<2xf32>
    %1158 = vector.shape_cast %1157 : vector<2xf32> to vector<1x2xf32>
    %1159 = vector.broadcast %1158 : vector<1x2xf32> to vector<8x2xf32>
    %1160 = arith.subf %1156, %1159 : vector<8x2xf32>
    %1161 = math.exp %1160 : vector<8x2xf32>
    %cst_489 = arith.constant dense<0.000000e+00> : vector<2xf32>
    %1162 = vector.multi_reduction <add>, %1161, %cst_489 [0] : vector<8x2xf32> to vector<2xf32>
    %1163 = vector.shape_cast %1162 : vector<2xf32> to vector<1x2xf32>
    %1164 = tpu.reciprocal %1163 {approx = true} : vector<1x2xf32> -> vector<1x2xf32>
    %1165 = vector.broadcast %1164 : vector<1x2xf32> to vector<8x2xf32>
    %1166 = arith.mulf %1161, %1165 : vector<8x2xf32>
    %1167 = vector.shape_cast %1166 : vector<8x2xf32> to vector<8x2x1xf32>
    %1168 = vector.broadcast %1167 : vector<8x2x1xf32> to vector<8x2x64xf32>
    %1169 = arith.mulf %1168, %785 : vector<8x2x64xf32>
    %cst_490 = arith.constant dense<0.000000e+00> : vector<2x64xf32>
    %1170 = vector.multi_reduction <add>, %1169, %cst_490 [0] : vector<8x2x64xf32> to vector<2x64xf32>
    %1171 = tpu.concatenate %1136, %1170 in 1 : vector<2x32xf32>, vector<2x64xf32> -> vector<2x96xf32>
    %c0_491 = arith.constant 0 : index
    %c0_492 = arith.constant 0 : index
    %1172 = vector.load %arg16[%c0_491, %c0_492] : memref<96x96xf32, #tpu.memory_space<vmem>>, vector<96x96xf32>
    %cst_493 = arith.constant dense<0.000000e+00> : vector<2x96xf32>
    %1173 = tpu.matmul %1171, %1172, %cst_493 {dimension_numbers = #tpu.dot_dimension_numbers<[1], [0], [0], [1], [0, 0, 1, 1], [], []>} : vector<2x96xf32>, vector<96x96xf32>, vector<2x96xf32> -> vector<2x96xf32>
    %c0_494 = arith.constant 0 : index
    %c0_495 = arith.constant 0 : index
    %1174 = vector.load %arg17[%c0_494, %c0_495] : memref<1x96xf32, #tpu.memory_space<vmem>>, vector<1x96xf32>
    %1175 = vector.broadcast %1174 : vector<1x96xf32> to vector<2x96xf32>
    %1176 = arith.addf %1173, %1175 : vector<2x96xf32>
    %1177 = vector.extract_strided_slice %1176 {offsets = [0, 0], sizes = [2, 32], strides = [1, 1]} : vector<2x96xf32> to vector<2x32xf32>
    %1178 = vector.extract_strided_slice %1143 {offsets = [0, 0], sizes = [2, 32], strides = [1, 1]} : vector<2x96xf32> to vector<2x32xf32>
    %1179 = arith.addf %1177, %1178 : vector<2x32xf32>
    %1180 = arith.negf %1179 : vector<2x32xf32>
    %1181 = math.exp %1180 : vector<2x32xf32>
    %cst_496 = arith.constant 1.000000e+00 : f32
    %1182 = vector.broadcast %cst_496 : f32 to vector<2x32xf32>
    %1183 = arith.addf %1182, %1181 : vector<2x32xf32>
    %1184 = arith.divf %1182, %1183 : vector<2x32xf32>
    %1185 = vector.extract_strided_slice %1176 {offsets = [0, 32], sizes = [2, 32], strides = [1, 1]} : vector<2x96xf32> to vector<2x32xf32>
    %1186 = vector.extract_strided_slice %1143 {offsets = [0, 32], sizes = [2, 32], strides = [1, 1]} : vector<2x96xf32> to vector<2x32xf32>
    %1187 = arith.addf %1185, %1186 : vector<2x32xf32>
    %1188 = arith.negf %1187 : vector<2x32xf32>
    %1189 = math.exp %1188 : vector<2x32xf32>
    %cst_497 = arith.constant 1.000000e+00 : f32
    %1190 = vector.broadcast %cst_497 : f32 to vector<2x32xf32>
    %1191 = arith.addf %1190, %1189 : vector<2x32xf32>
    %1192 = arith.divf %1190, %1191 : vector<2x32xf32>
    %1193 = vector.extract_strided_slice %1176 {offsets = [0, 64], sizes = [2, 32], strides = [1, 1]} : vector<2x96xf32> to vector<2x32xf32>
    %1194 = vector.extract_strided_slice %1143 {offsets = [0, 64], sizes = [2, 32], strides = [1, 1]} : vector<2x96xf32> to vector<2x32xf32>
    %1195 = arith.mulf %1184, %1194 : vector<2x32xf32>
    %1196 = arith.addf %1193, %1195 : vector<2x32xf32>
    %1197 = math.tanh %1196 : vector<2x32xf32>
    %cst_498 = arith.constant 1.000000e+00 : f32
    %1198 = vector.broadcast %cst_498 : f32 to vector<2x32xf32>
    %1199 = arith.subf %1198, %1192 : vector<2x32xf32>
    %1200 = arith.mulf %1199, %1197 : vector<2x32xf32>
    %1201 = arith.mulf %1192, %1119 : vector<2x32xf32>
    %1202 = arith.addf %1200, %1201 : vector<2x32xf32>
    %1203 = tpu.concatenate %1202, %1170, %1136 in 1 : vector<2x32xf32>, vector<2x64xf32>, vector<2x32xf32> -> vector<2x128xf32>
    %c0_499 = arith.constant 0 : index
    %c0_500 = arith.constant 0 : index
    %1204 = vector.load %arg20[%c0_499, %c0_500] : memref<128x32xf32, #tpu.memory_space<vmem>>, vector<128x32xf32>
    %cst_501 = arith.constant dense<0.000000e+00> : vector<2x32xf32>
    %1205 = tpu.matmul %1203, %1204, %cst_501 {dimension_numbers = #tpu.dot_dimension_numbers<[1], [0], [0], [1], [0, 0, 1, 1], [], []>} : vector<2x128xf32>, vector<128x32xf32>, vector<2x32xf32> -> vector<2x32xf32>
    %c0_502 = arith.constant 0 : index
    %c0_503 = arith.constant 0 : index
    %1206 = vector.load %arg21[%c0_502, %c0_503] : memref<1x32xf32, #tpu.memory_space<vmem>>, vector<1x32xf32>
    %1207 = vector.broadcast %1206 : vector<1x32xf32> to vector<2x32xf32>
    %1208 = arith.addf %1205, %1207 : vector<2x32xf32>
    %c5_504 = arith.constant 5 : index
    %c0_505 = arith.constant 0 : index
    %c0_506 = arith.constant 0 : index
    %1209 = vector.load %arg22[%c5_504, %c0_505, %c0_506] : memref<8x2x32xf32, #tpu.memory_space<vmem>>, vector<1x2x32xf32>
    %1210 = vector.shape_cast %1209 : vector<1x2x32xf32> to vector<2x32xf32>
    %1211 = vector.shape_cast %1208 : vector<2x32xf32> to vector<1x2x32xf32>
    tpu.vector_store %arg22[%c5_504, %c0_505, %c0_506], %1211 {strides = array<i32>} : memref<8x2x32xf32, #tpu.memory_space<vmem>>, vector<1x2x32xf32>,
    %c5_507 = arith.constant 5 : index
    %c0_508 = arith.constant 0 : index
    %c0_509 = arith.constant 0 : index
    %1212 = vector.load %arg5[%c5_507, %c0_508, %c0_509] : memref<8x2x32xf32, #tpu.memory_space<vmem>>, vector<1x2x32xf32>
    %1213 = vector.shape_cast %1212 : vector<1x2x32xf32> to vector<2x32xf32>
    %c0_510 = arith.constant 0 : index
    %c0_511 = arith.constant 0 : index
    %1214 = vector.load %arg25[%c0_510, %c0_511] : memref<2x32xf32, #tpu.memory_space<vmem>>, vector<2x32xf32>
    tpu.vector_store %arg25[%c0_510, %c0_511], %1213 {strides = array<i32>} : memref<2x32xf32, #tpu.memory_space<vmem>>, vector<2x32xf32>,
    %c5_512 = arith.constant 5 : index
    %1215 = memref.load %arg0[%c5_512] : memref<8xi32, #tpu.memory_space<smem>>
    %c0_i32_513 = arith.constant 0 : i32
    %1216 = arith.cmpi eq, %1215, %c0_i32_513 : i32
    %1217 = arith.extui %1216 : i1 to i32
    %c0_i32_514 = arith.constant 0 : i32
    %1218 = arith.cmpi ne, %1217, %c0_i32_514 : i32
    scf.if %1218 {
      %cst_579 = arith.constant dense<0xFF800000> : vector<2xf32>
      %1378 = vector.multi_reduction <maximumf>, %1208, %cst_579 [1] : vector<2x32xf32> to vector<2xf32>
      %1379 = vector.shape_cast %1378 : vector<2xf32> to vector<2x1xf32>
      %1380 = tpu.iota {dimensions = array<i32: 1>} : vector<2x32xi32>
      %1381 = arith.sitofp %1380 : vector<2x32xi32> to vector<2x32xf32>
      %1382 = vector.broadcast %1379 : vector<2x1xf32> to vector<2x32xf32>
      %1383 = arith.cmpf oge, %1208, %1382 : vector<2x32xf32>
      %cst_580 = arith.constant 3.200000e+01 : f32
      %1384 = vector.broadcast %cst_580 : f32 to vector<2x32xf32>
      %1385 = arith.select %1383, %1381, %1384 : vector<2x32xi1>, vector<2x32xf32>
      %cst_581 = arith.constant dense<0x7F800000> : vector<2xf32>
      %1386 = vector.multi_reduction <minimumf>, %1385, %cst_581 [1] : vector<2x32xf32> to vector<2xf32>
      %1387 = vector.shape_cast %1386 : vector<2xf32> to vector<2x1xf32>
      %1388 = tpu.iota {dimensions = array<i32: 1>} : vector<2x40xi32>
      %1389 = arith.sitofp %1388 : vector<2x40xi32> to vector<2x40xf32>
      %1390 = vector.broadcast %1387 : vector<2x1xf32> to vector<2x40xf32>
      %1391 = arith.cmpf oeq, %1389, %1390 : vector<2x40xf32>
      %1392 = arith.extui %1391 : vector<2x40xi1> to vector<2x40xi32>
      %1393 = arith.sitofp %1392 : vector<2x40xi32> to vector<2x40xf32>
      %c0_582 = arith.constant 0 : index
      %c0_583 = arith.constant 0 : index
      %1394 = vector.load %arg19[%c0_582, %c0_583] : memref<40x32xf32, #tpu.memory_space<vmem>>, vector<40x32xf32>
      %cst_584 = arith.constant dense<0.000000e+00> : vector<2x32xf32>
      %1395 = tpu.matmul %1393, %1394, %cst_584 {dimension_numbers = #tpu.dot_dimension_numbers<[1], [0], [0], [1], [0, 0, 1, 1], [], []>} : vector<2x40xf32>, vector<40x32xf32>, vector<2x32xf32> -> vector<2x32xf32>
      %c0_585 = arith.constant 0 : index
      %c0_586 = arith.constant 0 : index
      %1396 = vector.load %arg25[%c0_585, %c0_586] : memref<2x32xf32, #tpu.memory_space<vmem>>, vector<2x32xf32>
      tpu.vector_store %arg25[%c0_585, %c0_586], %1395 {strides = array<i32>} : memref<2x32xf32, #tpu.memory_space<vmem>>, vector<2x32xf32>,
    } else {
    }
    %c0_515 = arith.constant 0 : index
    %c0_516 = arith.constant 0 : index
    %1219 = vector.load %arg25[%c0_515, %c0_516] : memref<2x32xf32, #tpu.memory_space<vmem>>, vector<2x32xf32>
    %c0_517 = arith.constant 0 : index
    %c0_518 = arith.constant 0 : index
    %1220 = vector.load %arg15[%c0_517, %c0_518] : memref<32x128xf32, #tpu.memory_space<vmem>>, vector<32x128xf32>
    %cst_519 = arith.constant dense<0.000000e+00> : vector<2x128xf32>
    %1221 = tpu.matmul %1202, %1220, %cst_519 {dimension_numbers = #tpu.dot_dimension_numbers<[1], [0], [0], [1], [0, 0, 1, 1], [], []>} : vector<2x32xf32>, vector<32x128xf32>, vector<2x128xf32> -> vector<2x128xf32>
    %1222 = vector.extract_strided_slice %1221 {offsets = [0, 0], sizes = [2, 32], strides = [1, 1]} : vector<2x128xf32> to vector<2x32xf32>
    %1223 = vector.extract_strided_slice %1221 {offsets = [0, 32], sizes = [2, 96], strides = [1, 1]} : vector<2x128xf32> to vector<2x96xf32>
    %c0_520 = arith.constant 0 : index
    %c0_521 = arith.constant 0 : index
    %1224 = vector.load %arg18[%c0_520, %c0_521] : memref<1x96xf32, #tpu.memory_space<vmem>>, vector<1x96xf32>
    %1225 = vector.broadcast %1224 : vector<1x96xf32> to vector<2x96xf32>
    %1226 = arith.addf %1223, %1225 : vector<2x96xf32>
    %1227 = vector.shape_cast %1222 : vector<2x32xf32> to vector<1x2x32xf32>
    %1228 = vector.broadcast %1227 : vector<1x2x32xf32> to vector<8x2x32xf32>
    %1229 = arith.addf %786, %1228 : vector<8x2x32xf32>
    %1230 = vector.shape_cast %790 : vector<1x32xf32> to vector<1x1x32xf32>
    %1231 = vector.broadcast %1230 : vector<1x1x32xf32> to vector<8x2x32xf32>
    %1232 = arith.addf %1229, %1231 : vector<8x2x32xf32>
    %1233 = math.tanh %1232 : vector<8x2x32xf32>
    %1234 = vector.shape_cast %791 : vector<1x32xf32> to vector<1x1x32xf32>
    %1235 = vector.broadcast %1234 : vector<1x1x32xf32> to vector<8x2x32xf32>
    %1236 = arith.mulf %1233, %1235 : vector<8x2x32xf32>
    %cst_522 = arith.constant dense<0.000000e+00> : vector<8x2xf32>
    %1237 = vector.multi_reduction <add>, %1236, %cst_522 [2] : vector<8x2x32xf32> to vector<8x2xf32>
    %cst_523 = arith.constant -1.000000e+10 : f32
    %1238 = vector.broadcast %cst_523 : f32 to vector<8x2xf32>
    %1239 = arith.select %789, %1237, %1238 : vector<8x2xi1>, vector<8x2xf32>
    %cst_524 = arith.constant dense<0xFF800000> : vector<2xf32>
    %1240 = vector.multi_reduction <maximumf>, %1239, %cst_524 [0] : vector<8x2xf32> to vector<2xf32>
    %1241 = vector.shape_cast %1240 : vector<2xf32> to vector<1x2xf32>
    %1242 = vector.broadcast %1241 : vector<1x2xf32> to vector<8x2xf32>
    %1243 = arith.subf %1239, %1242 : vector<8x2xf32>
    %1244 = math.exp %1243 : vector<8x2xf32>
    %cst_525 = arith.constant dense<0.000000e+00> : vector<2xf32>
    %1245 = vector.multi_reduction <add>, %1244, %cst_525 [0] : vector<8x2xf32> to vector<2xf32>
    %1246 = vector.shape_cast %1245 : vector<2xf32> to vector<1x2xf32>
    %1247 = tpu.reciprocal %1246 {approx = true} : vector<1x2xf32> -> vector<1x2xf32>
    %1248 = vector.broadcast %1247 : vector<1x2xf32> to vector<8x2xf32>
    %1249 = arith.mulf %1244, %1248 : vector<8x2xf32>
    %1250 = vector.shape_cast %1249 : vector<8x2xf32> to vector<8x2x1xf32>
    %1251 = vector.broadcast %1250 : vector<8x2x1xf32> to vector<8x2x64xf32>
    %1252 = arith.mulf %1251, %785 : vector<8x2x64xf32>
    %cst_526 = arith.constant dense<0.000000e+00> : vector<2x64xf32>
    %1253 = vector.multi_reduction <add>, %1252, %cst_526 [0] : vector<8x2x64xf32> to vector<2x64xf32>
    %1254 = tpu.concatenate %1219, %1253 in 1 : vector<2x32xf32>, vector<2x64xf32> -> vector<2x96xf32>
    %c0_527 = arith.constant 0 : index
    %c0_528 = arith.constant 0 : index
    %1255 = vector.load %arg16[%c0_527, %c0_528] : memref<96x96xf32, #tpu.memory_space<vmem>>, vector<96x96xf32>
    %cst_529 = arith.constant dense<0.000000e+00> : vector<2x96xf32>
    %1256 = tpu.matmul %1254, %1255, %cst_529 {dimension_numbers = #tpu.dot_dimension_numbers<[1], [0], [0], [1], [0, 0, 1, 1], [], []>} : vector<2x96xf32>, vector<96x96xf32>, vector<2x96xf32> -> vector<2x96xf32>
    %c0_530 = arith.constant 0 : index
    %c0_531 = arith.constant 0 : index
    %1257 = vector.load %arg17[%c0_530, %c0_531] : memref<1x96xf32, #tpu.memory_space<vmem>>, vector<1x96xf32>
    %1258 = vector.broadcast %1257 : vector<1x96xf32> to vector<2x96xf32>
    %1259 = arith.addf %1256, %1258 : vector<2x96xf32>
    %1260 = vector.extract_strided_slice %1259 {offsets = [0, 0], sizes = [2, 32], strides = [1, 1]} : vector<2x96xf32> to vector<2x32xf32>
    %1261 = vector.extract_strided_slice %1226 {offsets = [0, 0], sizes = [2, 32], strides = [1, 1]} : vector<2x96xf32> to vector<2x32xf32>
    %1262 = arith.addf %1260, %1261 : vector<2x32xf32>
    %1263 = arith.negf %1262 : vector<2x32xf32>
    %1264 = math.exp %1263 : vector<2x32xf32>
    %cst_532 = arith.constant 1.000000e+00 : f32
    %1265 = vector.broadcast %cst_532 : f32 to vector<2x32xf32>
    %1266 = arith.addf %1265, %1264 : vector<2x32xf32>
    %1267 = arith.divf %1265, %1266 : vector<2x32xf32>
    %1268 = vector.extract_strided_slice %1259 {offsets = [0, 32], sizes = [2, 32], strides = [1, 1]} : vector<2x96xf32> to vector<2x32xf32>
    %1269 = vector.extract_strided_slice %1226 {offsets = [0, 32], sizes = [2, 32], strides = [1, 1]} : vector<2x96xf32> to vector<2x32xf32>
    %1270 = arith.addf %1268, %1269 : vector<2x32xf32>
    %1271 = arith.negf %1270 : vector<2x32xf32>
    %1272 = math.exp %1271 : vector<2x32xf32>
    %cst_533 = arith.constant 1.000000e+00 : f32
    %1273 = vector.broadcast %cst_533 : f32 to vector<2x32xf32>
    %1274 = arith.addf %1273, %1272 : vector<2x32xf32>
    %1275 = arith.divf %1273, %1274 : vector<2x32xf32>
    %1276 = vector.extract_strided_slice %1259 {offsets = [0, 64], sizes = [2, 32], strides = [1, 1]} : vector<2x96xf32> to vector<2x32xf32>
    %1277 = vector.extract_strided_slice %1226 {offsets = [0, 64], sizes = [2, 32], strides = [1, 1]} : vector<2x96xf32> to vector<2x32xf32>
    %1278 = arith.mulf %1267, %1277 : vector<2x32xf32>
    %1279 = arith.addf %1276, %1278 : vector<2x32xf32>
    %1280 = math.tanh %1279 : vector<2x32xf32>
    %cst_534 = arith.constant 1.000000e+00 : f32
    %1281 = vector.broadcast %cst_534 : f32 to vector<2x32xf32>
    %1282 = arith.subf %1281, %1275 : vector<2x32xf32>
    %1283 = arith.mulf %1282, %1280 : vector<2x32xf32>
    %1284 = arith.mulf %1275, %1202 : vector<2x32xf32>
    %1285 = arith.addf %1283, %1284 : vector<2x32xf32>
    %1286 = tpu.concatenate %1285, %1253, %1219 in 1 : vector<2x32xf32>, vector<2x64xf32>, vector<2x32xf32> -> vector<2x128xf32>
    %c0_535 = arith.constant 0 : index
    %c0_536 = arith.constant 0 : index
    %1287 = vector.load %arg20[%c0_535, %c0_536] : memref<128x32xf32, #tpu.memory_space<vmem>>, vector<128x32xf32>
    %cst_537 = arith.constant dense<0.000000e+00> : vector<2x32xf32>
    %1288 = tpu.matmul %1286, %1287, %cst_537 {dimension_numbers = #tpu.dot_dimension_numbers<[1], [0], [0], [1], [0, 0, 1, 1], [], []>} : vector<2x128xf32>, vector<128x32xf32>, vector<2x32xf32> -> vector<2x32xf32>
    %c0_538 = arith.constant 0 : index
    %c0_539 = arith.constant 0 : index
    %1289 = vector.load %arg21[%c0_538, %c0_539] : memref<1x32xf32, #tpu.memory_space<vmem>>, vector<1x32xf32>
    %1290 = vector.broadcast %1289 : vector<1x32xf32> to vector<2x32xf32>
    %1291 = arith.addf %1288, %1290 : vector<2x32xf32>
    %c6_540 = arith.constant 6 : index
    %c0_541 = arith.constant 0 : index
    %c0_542 = arith.constant 0 : index
    %1292 = vector.load %arg22[%c6_540, %c0_541, %c0_542] : memref<8x2x32xf32, #tpu.memory_space<vmem>>, vector<1x2x32xf32>
    %1293 = vector.shape_cast %1292 : vector<1x2x32xf32> to vector<2x32xf32>
    %1294 = vector.shape_cast %1291 : vector<2x32xf32> to vector<1x2x32xf32>
    tpu.vector_store %arg22[%c6_540, %c0_541, %c0_542], %1294 {strides = array<i32>} : memref<8x2x32xf32, #tpu.memory_space<vmem>>, vector<1x2x32xf32>,
    %c6_543 = arith.constant 6 : index
    %c0_544 = arith.constant 0 : index
    %c0_545 = arith.constant 0 : index
    %1295 = vector.load %arg5[%c6_543, %c0_544, %c0_545] : memref<8x2x32xf32, #tpu.memory_space<vmem>>, vector<1x2x32xf32>
    %1296 = vector.shape_cast %1295 : vector<1x2x32xf32> to vector<2x32xf32>
    %c0_546 = arith.constant 0 : index
    %c0_547 = arith.constant 0 : index
    %1297 = vector.load %arg25[%c0_546, %c0_547] : memref<2x32xf32, #tpu.memory_space<vmem>>, vector<2x32xf32>
    tpu.vector_store %arg25[%c0_546, %c0_547], %1296 {strides = array<i32>} : memref<2x32xf32, #tpu.memory_space<vmem>>, vector<2x32xf32>,
    %c6_548 = arith.constant 6 : index
    %1298 = memref.load %arg0[%c6_548] : memref<8xi32, #tpu.memory_space<smem>>
    %c0_i32_549 = arith.constant 0 : i32
    %1299 = arith.cmpi eq, %1298, %c0_i32_549 : i32
    %1300 = arith.extui %1299 : i1 to i32
    %c0_i32_550 = arith.constant 0 : i32
    %1301 = arith.cmpi ne, %1300, %c0_i32_550 : i32
    scf.if %1301 {
      %cst_579 = arith.constant dense<0xFF800000> : vector<2xf32>
      %1378 = vector.multi_reduction <maximumf>, %1291, %cst_579 [1] : vector<2x32xf32> to vector<2xf32>
      %1379 = vector.shape_cast %1378 : vector<2xf32> to vector<2x1xf32>
      %1380 = tpu.iota {dimensions = array<i32: 1>} : vector<2x32xi32>
      %1381 = arith.sitofp %1380 : vector<2x32xi32> to vector<2x32xf32>
      %1382 = vector.broadcast %1379 : vector<2x1xf32> to vector<2x32xf32>
      %1383 = arith.cmpf oge, %1291, %1382 : vector<2x32xf32>
      %cst_580 = arith.constant 3.200000e+01 : f32
      %1384 = vector.broadcast %cst_580 : f32 to vector<2x32xf32>
      %1385 = arith.select %1383, %1381, %1384 : vector<2x32xi1>, vector<2x32xf32>
      %cst_581 = arith.constant dense<0x7F800000> : vector<2xf32>
      %1386 = vector.multi_reduction <minimumf>, %1385, %cst_581 [1] : vector<2x32xf32> to vector<2xf32>
      %1387 = vector.shape_cast %1386 : vector<2xf32> to vector<2x1xf32>
      %1388 = tpu.iota {dimensions = array<i32: 1>} : vector<2x40xi32>
      %1389 = arith.sitofp %1388 : vector<2x40xi32> to vector<2x40xf32>
      %1390 = vector.broadcast %1387 : vector<2x1xf32> to vector<2x40xf32>
      %1391 = arith.cmpf oeq, %1389, %1390 : vector<2x40xf32>
      %1392 = arith.extui %1391 : vector<2x40xi1> to vector<2x40xi32>
      %1393 = arith.sitofp %1392 : vector<2x40xi32> to vector<2x40xf32>
      %c0_582 = arith.constant 0 : index
      %c0_583 = arith.constant 0 : index
      %1394 = vector.load %arg19[%c0_582, %c0_583] : memref<40x32xf32, #tpu.memory_space<vmem>>, vector<40x32xf32>
      %cst_584 = arith.constant dense<0.000000e+00> : vector<2x32xf32>
      %1395 = tpu.matmul %1393, %1394, %cst_584 {dimension_numbers = #tpu.dot_dimension_numbers<[1], [0], [0], [1], [0, 0, 1, 1], [], []>} : vector<2x40xf32>, vector<40x32xf32>, vector<2x32xf32> -> vector<2x32xf32>
      %c0_585 = arith.constant 0 : index
      %c0_586 = arith.constant 0 : index
      %1396 = vector.load %arg25[%c0_585, %c0_586] : memref<2x32xf32, #tpu.memory_space<vmem>>, vector<2x32xf32>
      tpu.vector_store %arg25[%c0_585, %c0_586], %1395 {strides = array<i32>} : memref<2x32xf32, #tpu.memory_space<vmem>>, vector<2x32xf32>,
    } else {
    }
    %c0_551 = arith.constant 0 : index
    %c0_552 = arith.constant 0 : index
    %1302 = vector.load %arg25[%c0_551, %c0_552] : memref<2x32xf32, #tpu.memory_space<vmem>>, vector<2x32xf32>
    %c0_553 = arith.constant 0 : index
    %c0_554 = arith.constant 0 : index
    %1303 = vector.load %arg15[%c0_553, %c0_554] : memref<32x128xf32, #tpu.memory_space<vmem>>, vector<32x128xf32>
    %cst_555 = arith.constant dense<0.000000e+00> : vector<2x128xf32>
    %1304 = tpu.matmul %1285, %1303, %cst_555 {dimension_numbers = #tpu.dot_dimension_numbers<[1], [0], [0], [1], [0, 0, 1, 1], [], []>} : vector<2x32xf32>, vector<32x128xf32>, vector<2x128xf32> -> vector<2x128xf32>
    %1305 = vector.extract_strided_slice %1304 {offsets = [0, 0], sizes = [2, 32], strides = [1, 1]} : vector<2x128xf32> to vector<2x32xf32>
    %1306 = vector.extract_strided_slice %1304 {offsets = [0, 32], sizes = [2, 96], strides = [1, 1]} : vector<2x128xf32> to vector<2x96xf32>
    %c0_556 = arith.constant 0 : index
    %c0_557 = arith.constant 0 : index
    %1307 = vector.load %arg18[%c0_556, %c0_557] : memref<1x96xf32, #tpu.memory_space<vmem>>, vector<1x96xf32>
    %1308 = vector.broadcast %1307 : vector<1x96xf32> to vector<2x96xf32>
    %1309 = arith.addf %1306, %1308 : vector<2x96xf32>
    %1310 = vector.shape_cast %1305 : vector<2x32xf32> to vector<1x2x32xf32>
    %1311 = vector.broadcast %1310 : vector<1x2x32xf32> to vector<8x2x32xf32>
    %1312 = arith.addf %786, %1311 : vector<8x2x32xf32>
    %1313 = vector.shape_cast %790 : vector<1x32xf32> to vector<1x1x32xf32>
    %1314 = vector.broadcast %1313 : vector<1x1x32xf32> to vector<8x2x32xf32>
    %1315 = arith.addf %1312, %1314 : vector<8x2x32xf32>
    %1316 = math.tanh %1315 : vector<8x2x32xf32>
    %1317 = vector.shape_cast %791 : vector<1x32xf32> to vector<1x1x32xf32>
    %1318 = vector.broadcast %1317 : vector<1x1x32xf32> to vector<8x2x32xf32>
    %1319 = arith.mulf %1316, %1318 : vector<8x2x32xf32>
    %cst_558 = arith.constant dense<0.000000e+00> : vector<8x2xf32>
    %1320 = vector.multi_reduction <add>, %1319, %cst_558 [2] : vector<8x2x32xf32> to vector<8x2xf32>
    %cst_559 = arith.constant -1.000000e+10 : f32
    %1321 = vector.broadcast %cst_559 : f32 to vector<8x2xf32>
    %1322 = arith.select %789, %1320, %1321 : vector<8x2xi1>, vector<8x2xf32>
    %cst_560 = arith.constant dense<0xFF800000> : vector<2xf32>
    %1323 = vector.multi_reduction <maximumf>, %1322, %cst_560 [0] : vector<8x2xf32> to vector<2xf32>
    %1324 = vector.shape_cast %1323 : vector<2xf32> to vector<1x2xf32>
    %1325 = vector.broadcast %1324 : vector<1x2xf32> to vector<8x2xf32>
    %1326 = arith.subf %1322, %1325 : vector<8x2xf32>
    %1327 = math.exp %1326 : vector<8x2xf32>
    %cst_561 = arith.constant dense<0.000000e+00> : vector<2xf32>
    %1328 = vector.multi_reduction <add>, %1327, %cst_561 [0] : vector<8x2xf32> to vector<2xf32>
    %1329 = vector.shape_cast %1328 : vector<2xf32> to vector<1x2xf32>
    %1330 = tpu.reciprocal %1329 {approx = true} : vector<1x2xf32> -> vector<1x2xf32>
    %1331 = vector.broadcast %1330 : vector<1x2xf32> to vector<8x2xf32>
    %1332 = arith.mulf %1327, %1331 : vector<8x2xf32>
    %1333 = vector.shape_cast %1332 : vector<8x2xf32> to vector<8x2x1xf32>
    %1334 = vector.broadcast %1333 : vector<8x2x1xf32> to vector<8x2x64xf32>
    %1335 = arith.mulf %1334, %785 : vector<8x2x64xf32>
    %cst_562 = arith.constant dense<0.000000e+00> : vector<2x64xf32>
    %1336 = vector.multi_reduction <add>, %1335, %cst_562 [0] : vector<8x2x64xf32> to vector<2x64xf32>
    %1337 = tpu.concatenate %1302, %1336 in 1 : vector<2x32xf32>, vector<2x64xf32> -> vector<2x96xf32>
    %c0_563 = arith.constant 0 : index
    %c0_564 = arith.constant 0 : index
    %1338 = vector.load %arg16[%c0_563, %c0_564] : memref<96x96xf32, #tpu.memory_space<vmem>>, vector<96x96xf32>
    %cst_565 = arith.constant dense<0.000000e+00> : vector<2x96xf32>
    %1339 = tpu.matmul %1337, %1338, %cst_565 {dimension_numbers = #tpu.dot_dimension_numbers<[1], [0], [0], [1], [0, 0, 1, 1], [], []>} : vector<2x96xf32>, vector<96x96xf32>, vector<2x96xf32> -> vector<2x96xf32>
    %c0_566 = arith.constant 0 : index
    %c0_567 = arith.constant 0 : index
    %1340 = vector.load %arg17[%c0_566, %c0_567] : memref<1x96xf32, #tpu.memory_space<vmem>>, vector<1x96xf32>
    %1341 = vector.broadcast %1340 : vector<1x96xf32> to vector<2x96xf32>
    %1342 = arith.addf %1339, %1341 : vector<2x96xf32>
    %1343 = vector.extract_strided_slice %1342 {offsets = [0, 0], sizes = [2, 32], strides = [1, 1]} : vector<2x96xf32> to vector<2x32xf32>
    %1344 = vector.extract_strided_slice %1309 {offsets = [0, 0], sizes = [2, 32], strides = [1, 1]} : vector<2x96xf32> to vector<2x32xf32>
    %1345 = arith.addf %1343, %1344 : vector<2x32xf32>
    %1346 = arith.negf %1345 : vector<2x32xf32>
    %1347 = math.exp %1346 : vector<2x32xf32>
    %cst_568 = arith.constant 1.000000e+00 : f32
    %1348 = vector.broadcast %cst_568 : f32 to vector<2x32xf32>
    %1349 = arith.addf %1348, %1347 : vector<2x32xf32>
    %1350 = arith.divf %1348, %1349 : vector<2x32xf32>
    %1351 = vector.extract_strided_slice %1342 {offsets = [0, 32], sizes = [2, 32], strides = [1, 1]} : vector<2x96xf32> to vector<2x32xf32>
    %1352 = vector.extract_strided_slice %1309 {offsets = [0, 32], sizes = [2, 32], strides = [1, 1]} : vector<2x96xf32> to vector<2x32xf32>
    %1353 = arith.addf %1351, %1352 : vector<2x32xf32>
    %1354 = arith.negf %1353 : vector<2x32xf32>
    %1355 = math.exp %1354 : vector<2x32xf32>
    %cst_569 = arith.constant 1.000000e+00 : f32
    %1356 = vector.broadcast %cst_569 : f32 to vector<2x32xf32>
    %1357 = arith.addf %1356, %1355 : vector<2x32xf32>
    %1358 = arith.divf %1356, %1357 : vector<2x32xf32>
    %1359 = vector.extract_strided_slice %1342 {offsets = [0, 64], sizes = [2, 32], strides = [1, 1]} : vector<2x96xf32> to vector<2x32xf32>
    %1360 = vector.extract_strided_slice %1309 {offsets = [0, 64], sizes = [2, 32], strides = [1, 1]} : vector<2x96xf32> to vector<2x32xf32>
    %1361 = arith.mulf %1350, %1360 : vector<2x32xf32>
    %1362 = arith.addf %1359, %1361 : vector<2x32xf32>
    %1363 = math.tanh %1362 : vector<2x32xf32>
    %cst_570 = arith.constant 1.000000e+00 : f32
    %1364 = vector.broadcast %cst_570 : f32 to vector<2x32xf32>
    %1365 = arith.subf %1364, %1358 : vector<2x32xf32>
    %1366 = arith.mulf %1365, %1363 : vector<2x32xf32>
    %1367 = arith.mulf %1358, %1285 : vector<2x32xf32>
    %1368 = arith.addf %1366, %1367 : vector<2x32xf32>
    %1369 = tpu.concatenate %1368, %1336, %1302 in 1 : vector<2x32xf32>, vector<2x64xf32>, vector<2x32xf32> -> vector<2x128xf32>
    %c0_571 = arith.constant 0 : index
    %c0_572 = arith.constant 0 : index
    %1370 = vector.load %arg20[%c0_571, %c0_572] : memref<128x32xf32, #tpu.memory_space<vmem>>, vector<128x32xf32>
    %cst_573 = arith.constant dense<0.000000e+00> : vector<2x32xf32>
    %1371 = tpu.matmul %1369, %1370, %cst_573 {dimension_numbers = #tpu.dot_dimension_numbers<[1], [0], [0], [1], [0, 0, 1, 1], [], []>} : vector<2x128xf32>, vector<128x32xf32>, vector<2x32xf32> -> vector<2x32xf32>
    %c0_574 = arith.constant 0 : index
    %c0_575 = arith.constant 0 : index
    %1372 = vector.load %arg21[%c0_574, %c0_575] : memref<1x32xf32, #tpu.memory_space<vmem>>, vector<1x32xf32>
    %1373 = vector.broadcast %1372 : vector<1x32xf32> to vector<2x32xf32>
    %1374 = arith.addf %1371, %1373 : vector<2x32xf32>
    %c7_576 = arith.constant 7 : index
    %c0_577 = arith.constant 0 : index
    %c0_578 = arith.constant 0 : index
    %1375 = vector.load %arg22[%c7_576, %c0_577, %c0_578] : memref<8x2x32xf32, #tpu.memory_space<vmem>>, vector<1x2x32xf32>
    %1376 = vector.shape_cast %1375 : vector<1x2x32xf32> to vector<2x32xf32>
    %1377 = vector.shape_cast %1374 : vector<2x32xf32> to vector<1x2x32xf32>
    tpu.vector_store %arg22[%c7_576, %c0_577, %c0_578], %1377 {strides = array<i32>} : memref<8x2x32xf32, #tpu.memory_space<vmem>>, vector<1x2x32xf32>,
    return
  }
}

</mosaic_0001>

<bundles_post_ra>
// kernel: seq2seq_forward.1
= control target key start
LH: loop header
LB: loop body
LE: loop exit
PB: predicated region body
PF: predicated region fallthrough
CT: control target
= control target key end

     0   :  { %s12074_s0 = inlined_call_operand.vmem [shape: s32[8], index: 0, kind: input, shape index: {}]   ;;  %s12075_s1 = inlined_call_operand.vmem [shape: f32[8,2,96], index: 1, kind: input, shape index: {}]   ;;  %s12076_s2 = inlined_call_operand.vmem [shape: f32[8,2,96], index: 2, kind: input, shape index: {}]   ;;  %s12077_s3 = inlined_call_operand.vmem [shape: f32[8,2,1], index: 3, kind: input, shape index: {}]   ;;  %s12078_s4 = inlined_call_operand.vmem [shape: f32[8,2], index: 4, kind: input, shape index: {}]   ;;  %s12079_s5 = inlined_call_operand.vmem [shape: f32[8,2,32], index: 5, kind: input, shape index: {}]   ;;  %s12080_s6 = inlined_call_operand.vmem [shape: f32[32,96], index: 6, kind: input, shape index: {}]   ;;  %s12081_s7 = inlined_call_operand.vmem [shape: f32[1,96], index: 7, kind: input, shape index: {}]   ;;  %s12082_s8 = inlined_call_operand.vmem [shape: f32[32,96], index: 8, kind: input, shape index: {}]   ;;  %s12083_s9 = inlined_call_operand.vmem [shape: f32[1,96], index: 9, kind: input, shape index: {}]   ;;  %s12084_s10 = inlined_call_operand.vmem [shape: f32[64,32], index: 10, kind: input, shape index: {}]   ;;  %s12085_s11 = inlined_call_operand.vmem [shape: f32[1,32], index: 11, kind: input, shape index: {}]   ;;  %s12086_s12 = inlined_call_operand.vmem [shape: f32[64,32], index: 12, kind: input, shape index: {}]   ;;  %s12087_s13 = inlined_call_operand.vmem [shape: f32[1,32], index: 13, kind: input, shape index: {}]   ;;  %s12088_s14 = inlined_call_operand.vmem [shape: f32[1,32], index: 14, kind: input, shape index: {}]   ;;  %s12089_s15 = inlined_call_operand.vmem [shape: f32[32,128], index: 15, kind: input, shape index: {}]   ;;  %s12090_s16 = inlined_call_operand.vmem [shape: f32[96,96], index: 16, kind: input, shape index: {}]   ;;  %s12091_s17 = inlined_call_operand.vmem [shape: f32[1,96], index: 17, kind: input, shape index: {}]   ;;  %s12092_s18 = inlined_call_operand.vmem [shape: f32[1,96], index: 18, kind: input, shape index: {}]   ;;  %s12093_s19 = inlined_call_operand.vmem [shape: f32[40,32], index: 19, kind: input, shape index: {}]   ;;  %s12094_s20 = inlined_call_operand.vmem [shape: f32[128,32], index: 20, kind: input, shape index: {}]   ;;  %s12095_s21 = inlined_call_operand.vmem [shape: f32[1,32], index: 21, kind: input, shape index: {}]   ;;  %s12096_s22 = inlined_call_operand.hbm [shape: f32[8,2,32], index: 22, kind: output, shape index: {}]  }
   0x1   :  { %12104 = sst [smem:[#allocation11_spill]] %s12074_s0 }
   0x2   :  { %12105 = sst [smem:[#allocation12_spill]] %s12075_s1 }
   0x3   :  { %12106 = sst [smem:[#allocation13_spill]] %s12076_s2 }
   0x4   :  { %12107 = sst [smem:[#allocation14_spill]] %s12077_s3 }
   0x5   :  { %12108 = sst [smem:[#allocation15_spill]] %s12078_s4 }
   0x6   :  { %12109 = sst [smem:[#allocation16_spill]] %s12079_s5 }
   0x7   :  { %12110 = sst [smem:[#allocation17_spill]] %s12080_s6 }
   0x8   :  { %27 = vsyncpa [#allocation7], 0 }
   0x9   :  { %28 = vsyncpa [#allocation6], 0  ;;  %s12111_s29 = sld [smem:[#allocation11_spill]] }
   0xf   :  { %s35_s30 = sshll.u32 %s12111_s29, 4  ;;  %s36_s30 = int_to_ptr.vmem [resolvable:$true] %s35_s30 }
  0x10   :  { %s8980_s4 = scalar_lea.vmem %s36_s30, 16  ;;  %p8985_p1 = scmp.lt.s32.totalorder %s36_s30, %s36_s30 }
  0x11   :  { %p8981_p0 = scmp.ne.s32.totalorder %s36_s30, %s8980_s4  ;;  %p8986_p2 = scmp.lt.s32.totalorder %s8980_s4, %s8980_s4 }
  0x13   :  { %p8987_p3 = por %p8986_p2, %p8985_p1 }
  0x15   :  { %p8988_p4 = pnand %p8987_p3, %p8981_p0 }
  0x17   :  { %8991 = shalt.err (!%p8988_p4)
}
  0x18   :  { %s9016_s0 = smov [#allocation5]  }
  0x19   :  { %38 = dma.vmem_to_smem %s36_s30, 16, %s9016_s0, [#allocation7]  }
  0x1a   :  { %9012 = dma.done.wait [#allocation7], 16  }
  0x1b   :  { %9013 = vsyncadd [#allocation7], 4294967280 }
  0x1c   :  { %84 = sfence }
  0x1d   :  { %s12112_s5 = sld [smem:[#allocation17_spill]]  ;;  %v9017_v1 = vmov 0.0   ;;  %vm9018_vm0 = vmmov 0   ;;  %v9194_v5 = vld [vmem:[%s12082_s8 + $0x18] sm:$0xff]  ;;  %v9204_v6 = vld [vmem:[%s12082_s8 + $0x10] sm:$0xff]  ;;  %v9213_v7 = vld [vmem:[%s12082_s8 + $0x8] sm:$0xff] }
  0x1e   :  { %7711 = vmatprep.subr.mxu1 %v9017_v1  ;;  %7719 = vmatprep.mubr.msk.f32.mxu1 %vm9018_vm0, %v9017_v1  ;;  %v9223_v8 = vld [vmem:[%s12082_s8] sm:$0xff]  ;;  %v9019_v12 = vmov 0   ;;  %s9020_s25 = smov 64   ;;  %s12113_s28 = sld [smem:[#allocation12_spill]]  ;;  %vm99_vm1 = vcmask 261120   ;;  %vm1987_vm2 = vcmask 254976  }
  0x1f   :  { %7733 = vmatprep.subr.mxu0 %v9017_v1  ;;  %7741 = vmatprep.mubr.msk.f32.mxu0 %vm9018_vm0, %v9017_v1  ;;  %v9244_v9 = vld [vmem:[%s12081_s7] ss:$0 sm:$0xff]  ;;  %s12114_s4 = sld [smem:[#allocation13_spill]]  ;;  %s9021_s26 = smov 96   ;;  %2733 = vst.msk [vmem:[#allocation8] sm:$0x3] %vm1987_vm2, %v9017_v1 }
  0x20   :  { %8684 = vset.pattern.permute.xlu1 %v9019_v12  ;;  %8683 = vset.pattern.permute.xlu0 %v9019_v12  ;;  %v9251_v14 = vld [vmem:[%s12083_s9] ss:$0 sm:$0xff]  ;;  %s12115_s1 = sld [smem:[#allocation14_spill]]  ;;  %vm12102_vm3 = vcmask 517120   ;;  %vm1913_vm4 = vcmask 523264  }
  0x21   :  { %s12117_s23 = sld [smem:[#allocation15_spill]] }
  0x22   :  { %s10066_s3 = sld [smem:[#allocation5]] }
  0x23   :  { %v9160_v0 = vld [vmem:[%s12112_s5 + $0x18] sm:$0xff]  ;;  %v9166_v2 = vld [vmem:[%s12112_s5 + $0x10] sm:$0xff]  ;;  %v9176_v3 = vld [vmem:[%s12112_s5 + $0x8] sm:$0xff] }
  0x24   :  { %7712 = vmatpush3.msra.mxu1 %v9160_v0  ;;  %7734 = vmatpush3.msra.mxu0 %v9160_v0  ;;  %v9185_v4 = vld [vmem:[%s12112_s5] sm:$0xff] }
  0x25   :  { %7713 = vmatprep.subr.mxu1 %v9017_v1  ;;  %7735 = vmatprep.subr.mxu0 %v9017_v1  ;;  %v254_v18 = vld [vmem:[%s12113_s28] sm:$0x3]  ;;  %v7127_v21 = vld [vmem:[%s12114_s4 + $0xe] sm:$0x3] }
  0x26   :  { %7714 = vmatpush3.msra.mxu1 %v9166_v2  ;;  %7736 = vmatpush3.msra.mxu0 %v9166_v2  ;;  %v7123_v26 = vld [vmem:[%s12115_s1 + $0xe] sm:$0x3]  ;;  %v85_v27 = vld [vmem:[%s12115_s1] sm:$0x3] }
  0x27   :  { %7715 = vmatprep.subr.mxu1 %v9017_v1  ;;  %7737 = vmatprep.subr.mxu0 %v9017_v1  ;;  %v329_v28 = vsub.f32 1.0, %v7123_v26  ;;  %v321_v37 = vsub.f32 1.0, %v85_v27 }
  0x28   :  { %7716 = vmatpush3.msra.mxu1 %v9176_v3  ;;  %7738 = vmatpush3.msra.mxu0 %v9176_v3  ;;  %p7186_p5 = scmp.ne.s32.totalorder %s10066_s3, 0 }
  0x29   :  { %7717 = vmatprep.subr.mxu1 %v9017_v1  ;;  %7739 = vmatprep.subr.mxu0 %v9017_v1 }
  0x2a   :  { %7718 = vmatpush3.msra.mxu1 %v9185_v4  ;;  %7740 = vmatpush3.msra.mxu0 %v9185_v4 }
  0x2b   :  { %7720 = vmatmul.mubr.f32.vlgmr.msra.gmra.mxu1 %v9017_v1  ;;  %7722 = vmatprep.subr.mxu1 %v9017_v1 }
  0x2c   :  { %7723 = vmatpush3.msra.mxu1 %v9194_v5  ;;  %7730 = vmatprep.mubr.msk.f32.mxu1 %vm9018_vm0, %v9017_v1 }
  0x2d   :  { %7724 = vmatprep.subr.mxu1 %v9017_v1  ;;  %7755 = vmatprep.subr.mxu0 %v9017_v1 }
  0x2e   :  { %7725 = vmatpush3.msra.mxu1 %v9204_v6 }
  0x2f   :  { %7726 = vmatprep.subr.mxu1 %v9017_v1 }
  0x30   :  { %7727 = vmatpush3.msra.mxu1 %v9213_v7 }
  0x31   :  { %7728 = vmatprep.subr.mxu1 %v9017_v1 }
  0x32   :  { %7729 = vmatpush3.msra.mxu1 %v9223_v8 }
  0x33   :  { %7731 = vmatmul.mubr.f32.vlgmr.msra.gmra.mxu1 %v9017_v1  ;;  %7744 = vmatprep.subr.mxu1 %v9017_v1 }
  0x34   :  { %7745 = vmatpush3.msra.mxu1 %v9194_v5  ;;  %7752 = vmatprep.mubr.msk.f32.mxu1 %vm9018_vm0, %v9017_v1 }
  0x35   :  { %7746 = vmatprep.subr.mxu1 %v9017_v1 }
  0x36   :  { %7747 = vmatpush3.msra.mxu1 %v9204_v6 }
  0x37   :  { %7748 = vmatprep.subr.mxu1 %v9017_v1 }
  0x38   :  { %7749 = vmatpush3.msra.mxu1 %v9213_v7 }
  0x39   :  { %7750 = vmatprep.subr.mxu1 %v9017_v1 }
  0x3a   :  { %7751 = vmatpush3.msra.mxu1 %v9223_v8 }
  0x3b   :  { %7766 = vmatprep.subr.mxu1 %v9017_v1 }
  0xeb   :  { %v169_v10 = vpop.f32.mrf.mxu1 }
  0xec   :  { %v170_v11 = vadd.f32 %v9244_v9, %v169_v10 }
  0xed   :  { %v7721_v13 = vpop.f32.mrf.mxu1 }
  0xee   :  { %263 = vrot.lane.b32.xlu0 %v170_v11, %s9020_s25  ;;  %v255_v19 = vadd.f32 %v254_v18, %v170_v11 }
  0xf0   :  { %v7126_v20 = vmul.f32 -1.442695, %v255_v19  ;;  %v7133_v19 = vld [vmem:[%s12113_s28 + $0x2] sm:$0x3] }
  0xf2   :  { %8685 = vpow2.f32 %v7126_v20 }
  0xf3   :  { %v250_v15 = vpop.f32.mrf.mxu1 }
  0xf4   :  { %v251_v16 = vadd.f32 %v9251_v14, %v250_v15 }
  0xf5   :  { %v7732_v17 = vpop.f32.mrf.mxu1 }
  0xf6   :  { %291 = vrot.lane.b32.xlu0 %v251_v16, %s9020_s25  ;;  %v283_v22 = vadd.f32 %v7127_v21, %v251_v16 }
  0xf8   :  { %v7128_v23 = vmul.f32 -1.442695, %v283_v22  ;;  %v7135_v22 = vld [vmem:[%s12114_s4 + $0xc] sm:$0x3] }
  0xfa   :  { %8687 = vpow2.f32 %v7128_v23  ;;  %311 = vperm.xlu0 %8683, %v85_v27  }
  0xfe   :  { %332 = vperm.xlu0 %8683, %v329_v28  }
  0xff   :  { %v8686_v24 = vpop.eup %8685 }
 0x100   :  { %v259_v25 = vadd.f32 1.0, %v8686_v24 }
 0x102   :  { %8689 = vrcp.f32 %v259_v25 }
 0x107   :  { %v8688_v29 = vpop.eup %8687 }
 0x108   :  { %v287_v30 = vadd.f32 1.0, %v8688_v29 }
 0x10a   :  { %8691 = vrcp.f32 %v287_v30 }
 0x10f   :  { %v8690_v31 = vpop.eup %8689 }
 0x110   :  { %v273_v47 = vsub.f32 1.0, %v8690_v31  ;;  %v279_v49 = vmul.f32 0.0, %v8690_v31 }
 0x117   :  { %v8692_v34 = vpop.eup %8691 }
 0x118   :  { %v301_v55 = vsub.f32 1.0, %v8692_v34  ;;  %v307_v58 = vmul.f32 0.0, %v8692_v34 }
 0x160   :  { %v264_v32 = vpop.permute.xlu0 %263 }
 0x161   :  { %v266_v33 = vmul.f32 %v8690_v31, %v264_v32  ;;  %v7129_v32 = vld [vmem:[%s12115_s1 + $0x2] sm:$0x3] }
 0x163   :  { %268 = vrot.lane.b32.xlu1 %v266_v33, %s9020_s25  ;;  %v559_v33 = vsub.f32 1.0, %v7129_v32 }
 0x168   :  { %v292_v35 = vpop.permute.xlu0 %291 }
 0x169   :  { %v294_v36 = vmul.f32 %v8692_v34, %v292_v35 }
 0x16b   :  { %296 = vrot.lane.b32.xlu1 %v294_v36, %s9020_s25 }
 0x16f   :  { %317 = vperm.xlu1 %8684, %v7123_v26  }
 0x173   :  { %324 = vperm.xlu1 %8684, %v321_v37   ;;  %v7130_v37 = vld [vmem:[%s12115_s1 + $0xc] sm:$0x3] }
 0x175   :  { %v9275_v46 = vpop.permute.xlu0 %311 }
 0x179   :  { %v9277_v51 = vpop.permute.xlu0 %332 }
 0x17a   :  { %v335_v61 = vmul.f32 0.0, %v9277_v51 }
 0x1d5   :  { %v269_v38 = vpop.permute.xlu1 %268 }
 0x1d6   :  { %v271_v39 = vadd.f32 %v269_v38, %v254_v18  ;;  %v567_v38 = vsub.f32 1.0, %v7130_v37 }
 0x1d8   :  { %8693 = vtanh.f32 %v271_v39 }
 0x1dd   :  { %v297_v40 = vpop.permute.xlu1 %296 }
 0x1de   :  { %v299_v41 = vadd.f32 %v7127_v21, %v297_v40 }
 0x1e0   :  { %8695 = vtanh.f32 %v299_v41 }
 0x1e5   :  { %v8694_v42 = vpop.eup %8693 }
 0x1e6   :  { %275 = vrot.lane.b32.xlu1 %v8694_v42, %s9021_s26 }
 0x1ea   :  { %v9271_v44 = vpop.permute.xlu1 %317 }
 0x1ed   :  { %v8696_v43 = vpop.eup %8695 }
 0x1ee   :  { %303 = vrot.lane.b32.xlu0 %v8696_v43, %s9021_s26  ;;  %v9273_v45 = vpop.permute.xlu1 %324 }
 0x1ef   :  { %v327_v53 = vmul.f32 0.0, %v9273_v45 }
 0x258   :  { %v276_v48 = vpop.permute.xlu1 %275 }
 0x259   :  { %v278_v50 = vmul.f32 %v276_v48, %v273_v47 }
 0x25b   :  { %v280_v52 = vadd.f32 %v279_v49, %v278_v50 }
 0x25d   :  { %v9281_v54 = vmul.f32 %v9275_v46, %v280_v52 }
 0x25f   :  { %v9284_v56 = vadd.f32 %v327_v53, %v9281_v54 }
 0x260   :  { %v304_v57 = vpop.permute.xlu0 %303 }
 0x261   :  { %v306_v59 = vmul.f32 %v304_v57, %v301_v55  ;;  %342 = vrot.lane.b32.xlu1 %v9284_v56, %s9021_s26 }
 0x263   :  { %v308_v60 = vadd.f32 %v307_v58, %v306_v59 }
 0x265   :  { %v9290_v62 = vmul.f32 %v9271_v44, %v308_v60 }
 0x267   :  { %v9293_v63 = vadd.f32 %v335_v61, %v9290_v62 }
 0x269   :  { %417 = vrot.lane.b32.xlu0 %v9293_v63, %s9021_s26 }
 0x2d3   :  { %v343_v10 = vpop.permute.xlu1 %342 }
 0x2d4   :  { %7742 = vmatmul.mubr.msk.f32.vlgmr.msra.gmra.mxu0 %vm99_vm1, %v343_v10 }
 0x2d5   :  { %7756 = vmatpush3.msra.mxu0 %v9160_v0  ;;  %7763 = vmatprep.mubr.msk.f32.mxu0 %vm9018_vm0, %v9017_v1 }
 0x2d6   :  { %7757 = vmatprep.subr.mxu0 %v9017_v1 }
 0x2d7   :  { %7758 = vmatpush3.msra.mxu0 %v9166_v2 }
 0x2d8   :  { %7759 = vmatprep.subr.mxu0 %v9017_v1 }
 0x2d9   :  { %7760 = vmatpush3.msra.mxu0 %v9176_v3 }
 0x2da   :  { %7761 = vmatprep.subr.mxu0 %v9017_v1 }
 0x2db   :  { %v418_v11 = vpop.permute.xlu0 %417  ;;  %7762 = vmatpush3.msra.mxu0 %v9185_v4 }
 0x2dc   :  { %7753 = vmatmul.mubr.msk.f32.vlgmr.msra.gmra.mxu1 %vm99_vm1, %v418_v11  ;;  %7777 = vmatprep.subr.mxu0 %v9017_v1 }
 0x2dd   :  { %7767 = vmatpush3.msra.mxu1 %v9194_v5  ;;  %7774 = vmatprep.mubr.msk.f32.mxu1 %vm9018_vm0, %v9017_v1 }
 0x2de   :  { %7768 = vmatprep.subr.mxu1 %v9017_v1 }
 0x2df   :  { %7769 = vmatpush3.msra.mxu1 %v9204_v6 }
 0x2e0   :  { %7770 = vmatprep.subr.mxu1 %v9017_v1 }
 0x2e1   :  { %7771 = vmatpush3.msra.mxu1 %v9213_v7 }
 0x2e2   :  { %7772 = vmatprep.subr.mxu1 %v9017_v1 }
 0x2e3   :  { %7773 = vmatpush3.msra.mxu1 %v9223_v8 }
 0x2e4   :  { %7788 = vmatprep.subr.mxu1 %v9017_v1 }
 0x394   :  { %v412_v12 = vpop.f32.mrf.mxu0 }
 0x395   :  { %v413_v13 = vadd.f32 %v9244_v9, %v412_v12 }
 0x396   :  { %v7743_v15 = vpop.f32.mrf.mxu0 }
 0x397   :  { %501 = vrot.lane.b32.xlu1 %v413_v13, %s9020_s25  ;;  %v493_v20 = vadd.f32 %v7133_v19, %v413_v13 }
 0x399   :  { %v7134_v21 = vmul.f32 -1.442695, %v493_v20 }
 0x39b   :  { %8697 = vpow2.f32 %v7134_v21 }
 0x39c   :  { %v487_v16 = vpop.f32.mrf.mxu1 }
 0x39d   :  { %v488_v17 = vadd.f32 %v9251_v14, %v487_v16 }
 0x39e   :  { %v7754_v18 = vpop.f32.mrf.mxu1 }
 0x39f   :  { %529 = vrot.lane.b32.xlu0 %v488_v17, %s9020_s25  ;;  %v521_v23 = vadd.f32 %v7135_v22, %v488_v17 }
 0x3a1   :  { %v7136_v24 = vmul.f32 -1.442695, %v521_v23 }
 0x3a3   :  { %8699 = vpow2.f32 %v7136_v24 }
 0x3a8   :  { %v8698_v25 = vpop.eup %8697 }
 0x3a9   :  { %v497_v26 = vadd.f32 1.0, %v8698_v25 }
 0x3ab   :  { %8701 = vrcp.f32 %v497_v26  ;;  %v7141_v26 = vld [vmem:[%s12113_s28 + $0x4] sm:$0x3] }
 0x3b0   :  { %v8700_v27 = vpop.eup %8699 }
 0x3b1   :  { %v525_v28 = vadd.f32 1.0, %v8700_v27 }
 0x3b3   :  { %8703 = vrcp.f32 %v525_v28 }
 0x3b8   :  { %v8702_v29 = vpop.eup %8701 }
 0x3b9   :  { %v511_v52 = vsub.f32 1.0, %v8702_v29  ;;  %v517_v55 = vmul.f32 %v8702_v29, %v9284_v56 }
 0x3c0   :  { %v8704_v34 = vpop.eup %8703 }
 0x3c1   :  { %v539_v10 = vsub.f32 1.0, %v8704_v34  ;;  %v545_v13 = vmul.f32 %v8704_v34, %v9293_v63 }
 0x409   :  { %v502_v30 = vpop.permute.xlu1 %501 }
 0x40a   :  { %v504_v31 = vmul.f32 %v8702_v29, %v502_v30  ;;  %v7143_v29 = vld [vmem:[%s12114_s4 + $0xa] sm:$0x3] }
 0x40c   :  { %506 = vrot.lane.b32.xlu1 %v504_v31, %s9020_s25 }
 0x410   :  { %549 = vperm.xlu1 %8684, %v7129_v32  }
 0x411   :  { %v530_v35 = vpop.permute.xlu0 %529 }
 0x412   :  { %v532_v36 = vmul.f32 %v8704_v34, %v530_v35 }
 0x414   :  { %534 = vrot.lane.b32.xlu0 %v532_v36, %s9020_s25  ;;  %562 = vperm.xlu1 %8684, %v559_v33  }
 0x418   :  { %555 = vperm.xlu0 %8683, %v7130_v37  }
 0x41c   :  { %570 = vperm.xlu0 %8683, %v567_v38  }
 0x47e   :  { %v507_v39 = vpop.permute.xlu1 %506 }
 0x47f   :  { %v509_v40 = vadd.f32 %v7133_v19, %v507_v39  ;;  %v7137_v39 = vld [vmem:[%s12115_s1 + $0x4] sm:$0x3] }
 0x481   :  { %8705 = vtanh.f32 %v509_v40  ;;  %v797_v40 = vsub.f32 1.0, %v7137_v39 }
 0x486   :  { %v535_v41 = vpop.permute.xlu0 %534 }
 0x487   :  { %v537_v42 = vadd.f32 %v7135_v22, %v535_v41 }
 0x489   :  { %8707 = vtanh.f32 %v537_v42 }
 0x48b   :  { %v9339_v48 = vpop.permute.xlu1 %549 }
 0x48e   :  { %v8706_v43 = vpop.eup %8705 }
 0x48f   :  { %513 = vrot.lane.b32.xlu1 %v8706_v43, %s9021_s26  ;;  %v9341_v49 = vpop.permute.xlu1 %562 }
 0x490   :  { %v565_v60 = vmul.f32 %v9341_v49, %v9284_v56 }
 0x493   :  { %v9343_v50 = vpop.permute.xlu0 %555 }
 0x496   :  { %v8708_v47 = vpop.eup %8707 }
 0x497   :  { %541 = vrot.lane.b32.xlu0 %v8708_v47, %s9021_s26  ;;  %v9346_v59 = vpop.permute.xlu0 %570  ;;  %v7138_v47 = vld [vmem:[%s12115_s1 + $0xa] sm:$0x3] }
 0x498   :  { %v573_v17 = vmul.f32 %v9346_v59, %v9293_v63 }
 0x501   :  { %v514_v53 = vpop.permute.xlu1 %513 }
 0x502   :  { %v516_v57 = vmul.f32 %v514_v53, %v511_v52  ;;  %v805_v52 = vsub.f32 1.0, %v7138_v47 }
 0x504   :  { %v518_v58 = vadd.f32 %v517_v55, %v516_v57 }
 0x506   :  { %v9351_v61 = vmul.f32 %v9339_v48, %v518_v58 }
 0x508   :  { %v9354_v11 = vadd.f32 %v565_v60, %v9351_v61 }
 0x509   :  { %v542_v12 = vpop.permute.xlu0 %541 }
 0x50a   :  { %v544_v15 = vmul.f32 %v542_v12, %v539_v10  ;;  %580 = vrot.lane.b32.xlu1 %v9354_v11, %s9021_s26 }
 0x50c   :  { %v546_v16 = vadd.f32 %v545_v13, %v544_v15 }
 0x50e   :  { %v9362_v56 = vmul.f32 %v9343_v50, %v546_v16 }
 0x510   :  { %v9365_v18 = vadd.f32 %v573_v17, %v9362_v56 }
 0x512   :  { %655 = vrot.lane.b32.xlu0 %v9365_v18, %s9021_s26 }
 0x57c   :  { %v581_v19 = vpop.permute.xlu1 %580 }
 0x57d   :  { %7764 = vmatmul.mubr.msk.f32.vlgmr.msra.gmra.mxu0 %vm99_vm1, %v581_v19 }
 0x57e   :  { %7778 = vmatpush3.msra.mxu0 %v9160_v0  ;;  %7785 = vmatprep.mubr.msk.f32.mxu0 %vm9018_vm0, %v9017_v1 }
 0x57f   :  { %7779 = vmatprep.subr.mxu0 %v9017_v1 }
 0x580   :  { %7780 = vmatpush3.msra.mxu0 %v9166_v2 }
 0x581   :  { %7781 = vmatprep.subr.mxu0 %v9017_v1 }
 0x582   :  { %7782 = vmatpush3.msra.mxu0 %v9176_v3 }
 0x583   :  { %7783 = vmatprep.subr.mxu0 %v9017_v1 }
 0x584   :  { %v656_v63 = vpop.permute.xlu0 %655  ;;  %7784 = vmatpush3.msra.mxu0 %v9185_v4 }
 0x585   :  { %7775 = vmatmul.mubr.msk.f32.vlgmr.msra.gmra.mxu1 %vm99_vm1, %v656_v63  ;;  %7799 = vmatprep.subr.mxu0 %v9017_v1 }
 0x586   :  { %7789 = vmatpush3.msra.mxu1 %v9194_v5  ;;  %7796 = vmatprep.mubr.msk.f32.mxu1 %vm9018_vm0, %v9017_v1 }
 0x587   :  { %7790 = vmatprep.subr.mxu1 %v9017_v1 }
 0x588   :  { %7791 = vmatpush3.msra.mxu1 %v9204_v6 }
 0x589   :  { %7792 = vmatprep.subr.mxu1 %v9017_v1 }
 0x58a   :  { %7793 = vmatpush3.msra.mxu1 %v9213_v7 }
 0x58b   :  { %7794 = vmatprep.subr.mxu1 %v9017_v1 }
 0x58c   :  { %7795 = vmatpush3.msra.mxu1 %v9223_v8 }
 0x58d   :  { %7810 = vmatprep.subr.mxu1 %v9017_v1 }
 0x63d   :  { %v650_v20 = vpop.f32.mrf.mxu0 }
 0x63e   :  { %v651_v21 = vadd.f32 %v9244_v9, %v650_v20 }
 0x63f   :  { %v7765_v22 = vpop.f32.mrf.mxu0 }
 0x640   :  { %739 = vrot.lane.b32.xlu1 %v651_v21, %s9020_s25  ;;  %v731_v27 = vadd.f32 %v7141_v26, %v651_v21 }
 0x642   :  { %v7142_v28 = vmul.f32 -1.442695, %v731_v27 }
 0x644   :  { %8709 = vpow2.f32 %v7142_v28 }
 0x645   :  { %v725_v23 = vpop.f32.mrf.mxu1 }
 0x646   :  { %v726_v24 = vadd.f32 %v9251_v14, %v725_v23 }
 0x647   :  { %v7776_v25 = vpop.f32.mrf.mxu1 }
 0x648   :  { %767 = vrot.lane.b32.xlu0 %v726_v24, %s9020_s25  ;;  %v759_v30 = vadd.f32 %v7143_v29, %v726_v24 }
 0x64a   :  { %v7144_v31 = vmul.f32 -1.442695, %v759_v30 }
 0x64c   :  { %8711 = vpow2.f32 %v7144_v31 }
 0x651   :  { %v8710_v32 = vpop.eup %8709 }
 0x652   :  { %v735_v33 = vadd.f32 1.0, %v8710_v32 }
 0x654   :  { %8713 = vrcp.f32 %v735_v33 }
 0x659   :  { %v8712_v34 = vpop.eup %8711 }
 0x65a   :  { %v763_v35 = vadd.f32 1.0, %v8712_v34 }
 0x65c   :  { %8715 = vrcp.f32 %v763_v35 }
 0x661   :  { %v8714_v36 = vpop.eup %8713 }
 0x662   :  { %v749_v16 = vsub.f32 1.0, %v8714_v36  ;;  %v755_v19 = vmul.f32 %v8714_v36, %v9354_v11 }
 0x669   :  { %v8716_v41 = vpop.eup %8715 }
 0x66a   :  { %v777_v24 = vsub.f32 1.0, %v8716_v41  ;;  %v783_v27 = vmul.f32 %v8716_v41, %v9365_v18 }
 0x6b2   :  { %v740_v37 = vpop.permute.xlu1 %739 }
 0x6b3   :  { %v742_v38 = vmul.f32 %v8714_v36, %v740_v37 }
 0x6b5   :  { %744 = vrot.lane.b32.xlu1 %v742_v38, %s9020_s25 }
 0x6b9   :  { %787 = vperm.xlu1 %8684, %v7137_v39   ;;  %v7149_v39 = vld [vmem:[%s12113_s28 + $0x6] sm:$0x3] }
 0x6ba   :  { %v768_v42 = vpop.permute.xlu0 %767 }
 0x6bb   :  { %v770_v43 = vmul.f32 %v8716_v41, %v768_v42  ;;  %v7151_v42 = vld [vmem:[%s12114_s4 + $0x8] sm:$0x3] }
 0x6bd   :  { %772 = vrot.lane.b32.xlu0 %v770_v43, %s9020_s25  ;;  %800 = vperm.xlu1 %8684, %v797_v40  }
 0x6c1   :  { %793 = vperm.xlu0 %8683, %v7138_v47  }
 0x6c5   :  { %808 = vperm.xlu0 %8683, %v805_v52  }
 0x727   :  { %v745_v53 = vpop.permute.xlu1 %744 }
 0x728   :  { %v747_v55 = vadd.f32 %v7141_v26, %v745_v53 }
 0x72a   :  { %8717 = vtanh.f32 %v747_v55 }
 0x72f   :  { %v773_v57 = vpop.permute.xlu0 %772 }
 0x730   :  { %v775_v58 = vadd.f32 %v7143_v29, %v773_v57 }
 0x732   :  { %8719 = vtanh.f32 %v775_v58 }
 0x734   :  { %v9411_v12 = vpop.permute.xlu1 %787 }
 0x737   :  { %v8718_v60 = vpop.eup %8717 }
 0x738   :  { %751 = vrot.lane.b32.xlu1 %v8718_v60, %s9021_s26  ;;  %v9413_v13 = vpop.permute.xlu1 %800 }
 0x739   :  { %v803_v22 = vmul.f32 %v9413_v13, %v9354_v11 }
 0x73c   :  { %v9415_v15 = vpop.permute.xlu0 %793 }
 0x73f   :  { %v8720_v10 = vpop.eup %8719 }
 0x740   :  { %779 = vrot.lane.b32.xlu0 %v8720_v10, %s9021_s26  ;;  %v9418_v21 = vpop.permute.xlu0 %808 }
 0x741   :  { %v811_v30 = vmul.f32 %v9418_v21, %v9365_v18 }
 0x7aa   :  { %v752_v17 = vpop.permute.xlu1 %751 }
 0x7ab   :  { %v754_v63 = vmul.f32 %v752_v17, %v749_v16  ;;  %v7145_v16 = vld [vmem:[%s12115_s1 + $0x6] sm:$0x3] }
 0x7ac   :  { %v1035_v17 = vsub.f32 1.0, %v7145_v16 }
 0x7ad   :  { %v756_v20 = vadd.f32 %v755_v19, %v754_v63 }
 0x7af   :  { %v9423_v23 = vmul.f32 %v9411_v12, %v756_v20 }
 0x7b1   :  { %v9426_v25 = vadd.f32 %v803_v22, %v9423_v23  ;;  %v7146_v22 = vld [vmem:[%s12115_s1 + $0x8] sm:$0x3] }
 0x7b2   :  { %v780_v26 = vpop.permute.xlu0 %779 }
 0x7b3   :  { %v782_v28 = vmul.f32 %v780_v26, %v777_v24  ;;  %818 = vrot.lane.b32.xlu1 %v9426_v25, %s9021_s26  ;;  %v1043_v24 = vsub.f32 1.0, %v7146_v22 }
 0x7b5   :  { %v784_v29 = vadd.f32 %v783_v27, %v782_v28 }
 0x7b7   :  { %v9434_v11 = vmul.f32 %v9415_v15, %v784_v29 }
 0x7b9   :  { %v9437_v31 = vadd.f32 %v811_v30, %v9434_v11 }
 0x7bb   :  { %893 = vrot.lane.b32.xlu0 %v9437_v31, %s9021_s26 }
 0x825   :  { %v819_v32 = vpop.permute.xlu1 %818 }
 0x826   :  { %7786 = vmatmul.mubr.msk.f32.vlgmr.msra.gmra.mxu0 %vm99_vm1, %v819_v32 }
 0x827   :  { %7800 = vmatpush3.msra.mxu0 %v9160_v0  ;;  %7807 = vmatprep.mubr.msk.f32.mxu0 %vm9018_vm0, %v9017_v1 }
 0x828   :  { %7801 = vmatprep.subr.mxu0 %v9017_v1 }
 0x829   :  { %7802 = vmatpush3.msra.mxu0 %v9166_v2 }
 0x82a   :  { %7803 = vmatprep.subr.mxu0 %v9017_v1 }
 0x82b   :  { %7804 = vmatpush3.msra.mxu0 %v9176_v3 }
 0x82c   :  { %7805 = vmatprep.subr.mxu0 %v9017_v1 }
 0x82d   :  { %v894_v18 = vpop.permute.xlu0 %893  ;;  %7806 = vmatpush3.msra.mxu0 %v9185_v4 }
 0x82e   :  { %7797 = vmatmul.mubr.msk.f32.vlgmr.msra.gmra.mxu1 %vm99_vm1, %v894_v18  ;;  %7821 = vmatprep.subr.mxu0 %v9017_v1 }
 0x82f   :  { %7811 = vmatpush3.msra.mxu1 %v9194_v5  ;;  %7818 = vmatprep.mubr.msk.f32.mxu1 %vm9018_vm0, %v9017_v1 }
 0x830   :  { %7812 = vmatprep.subr.mxu1 %v9017_v1 }
 0x831   :  { %7813 = vmatpush3.msra.mxu1 %v9204_v6 }
 0x832   :  { %7814 = vmatprep.subr.mxu1 %v9017_v1 }
 0x833   :  { %7815 = vmatpush3.msra.mxu1 %v9213_v7 }
 0x834   :  { %7816 = vmatprep.subr.mxu1 %v9017_v1 }
 0x835   :  { %7817 = vmatpush3.msra.mxu1 %v9223_v8 }
 0x836   :  { %7832 = vmatprep.subr.mxu1 %v9017_v1 }
 0x8e6   :  { %v888_v33 = vpop.f32.mrf.mxu0 }
 0x8e7   :  { %v889_v34 = vadd.f32 %v9244_v9, %v888_v33 }
 0x8e8   :  { %v7787_v35 = vpop.f32.mrf.mxu0 }
 0x8e9   :  { %977 = vrot.lane.b32.xlu1 %v889_v34, %s9020_s25  ;;  %v969_v40 = vadd.f32 %v7149_v39, %v889_v34 }
 0x8eb   :  { %v7150_v41 = vmul.f32 -1.442695, %v969_v40 }
 0x8ed   :  { %8721 = vpow2.f32 %v7150_v41 }
 0x8ee   :  { %v963_v36 = vpop.f32.mrf.mxu1 }
 0x8ef   :  { %v964_v37 = vadd.f32 %v9251_v14, %v963_v36 }
 0x8f0   :  { %v7798_v38 = vpop.f32.mrf.mxu1 }
 0x8f1   :  { %1005 = vrot.lane.b32.xlu0 %v964_v37, %s9020_s25  ;;  %v997_v43 = vadd.f32 %v7151_v42, %v964_v37 }
 0x8f3   :  { %v7152_v47 = vmul.f32 -1.442695, %v997_v43 }
 0x8f5   :  { %8723 = vpow2.f32 %v7152_v47 }
 0x8fa   :  { %v8722_v52 = vpop.eup %8721 }
 0x8fb   :  { %v973_v53 = vadd.f32 1.0, %v8722_v52 }
 0x8fd   :  { %8725 = vrcp.f32 %v973_v53 }
 0x902   :  { %v8724_v55 = vpop.eup %8723 }
 0x903   :  { %v1001_v57 = vadd.f32 1.0, %v8724_v55 }
 0x905   :  { %8727 = vrcp.f32 %v1001_v57 }
 0x90a   :  { %v8726_v58 = vpop.eup %8725 }
 0x90b   :  { %v987_v35 = vsub.f32 1.0, %v8726_v58  ;;  %v993_v37 = vmul.f32 %v8726_v58, %v9426_v25 }
 0x912   :  { %v8728_v19 = vpop.eup %8727 }
 0x913   :  { %v1015_v43 = vsub.f32 1.0, %v8728_v19  ;;  %v1021_v53 = vmul.f32 %v8728_v19, %v9437_v31 }
 0x95b   :  { %v978_v60 = vpop.permute.xlu1 %977 }
 0x95c   :  { %v980_v10 = vmul.f32 %v8726_v58, %v978_v60 }
 0x95e   :  { %982 = vrot.lane.b32.xlu1 %v980_v10, %s9020_s25 }
 0x962   :  { %1025 = vperm.xlu1 %8684, %v7145_v16  }
 0x963   :  { %v1006_v63 = vpop.permute.xlu0 %1005 }
 0x964   :  { %v1008_v20 = vmul.f32 %v8728_v19, %v1006_v63 }
 0x966   :  { %1010 = vrot.lane.b32.xlu0 %v1008_v20, %s9020_s25  ;;  %1038 = vperm.xlu1 %8684, %v1035_v17  }
 0x96a   :  { %1031 = vperm.xlu0 %8683, %v7146_v22  }
 0x96e   :  { %1046 = vperm.xlu0 %8683, %v1043_v24   ;;  %v7155_v24 = vld [vmem:[%s12113_s28 + $0x8] sm:$0x3] }
 0x9d0   :  { %v983_v26 = vpop.permute.xlu1 %982 }
 0x9d1   :  { %v985_v27 = vadd.f32 %v7149_v39, %v983_v26 }
 0x9d3   :  { %8729 = vtanh.f32 %v985_v27 }
 0x9d8   :  { %v1011_v28 = vpop.permute.xlu0 %1010 }
 0x9d9   :  { %v1013_v29 = vadd.f32 %v7151_v42, %v1011_v28  ;;  %v7157_v28 = vld [vmem:[%s12114_s4 + $0x6] sm:$0x3] }
 0x9db   :  { %8731 = vtanh.f32 %v1013_v29 }
 0x9dd   :  { %v9483_v18 = vpop.permute.xlu1 %1025 }
 0x9e0   :  { %v8730_v30 = vpop.eup %8729 }
 0x9e1   :  { %989 = vrot.lane.b32.xlu1 %v8730_v30, %s9021_s26  ;;  %v9485_v33 = vpop.permute.xlu1 %1038 }
 0x9e2   :  { %v1041_v41 = vmul.f32 %v9485_v33, %v9426_v25 }
 0x9e5   :  { %v9487_v34 = vpop.permute.xlu0 %1031 }
 0x9e8   :  { %v8732_v32 = vpop.eup %8731 }
 0x9e9   :  { %1017 = vrot.lane.b32.xlu0 %v8732_v32, %s9021_s26  ;;  %v9490_v40 = vpop.permute.xlu0 %1046 }
 0x9ea   :  { %v1049_v58 = vmul.f32 %v9490_v40, %v9437_v31 }
 0xa53   :  { %v990_v36 = vpop.permute.xlu1 %989 }
 0xa54   :  { %v992_v38 = vmul.f32 %v990_v36, %v987_v35 }
 0xa56   :  { %v994_v39 = vadd.f32 %v993_v37, %v992_v38 }
 0xa58   :  { %v9495_v42 = vmul.f32 %v9483_v18, %v994_v39 }
 0xa5a   :  { %v9498_v47 = vadd.f32 %v1041_v41, %v9495_v42 }
 0xa5b   :  { %v1018_v52 = vpop.permute.xlu0 %1017 }
 0xa5c   :  { %v1020_v55 = vmul.f32 %v1018_v52, %v1015_v43  ;;  %1052 = vrot.lane.b32.xlu1 %v9498_v47, %s9021_s26 }
 0xa5e   :  { %v1022_v57 = vadd.f32 %v1021_v53, %v1020_v55 }
 0xa60   :  { %v9506_v25 = vmul.f32 %v9487_v34, %v1022_v57 }
 0xa62   :  { %v9509_v60 = vadd.f32 %v1049_v58, %v9506_v25 }
 0xa64   :  { %1127 = vrot.lane.b32.xlu0 %v9509_v60, %s9021_s26 }
 0xace   :  { %v1053_v10 = vpop.permute.xlu1 %1052 }
 0xacf   :  { %7808 = vmatmul.mubr.msk.f32.vlgmr.msra.gmra.mxu0 %vm99_vm1, %v1053_v10 }
 0xad0   :  { %7822 = vmatpush3.msra.mxu0 %v9160_v0  ;;  %7829 = vmatprep.mubr.msk.f32.mxu0 %vm9018_vm0, %v9017_v1 }
 0xad1   :  { %7823 = vmatprep.subr.mxu0 %v9017_v1 }
 0xad2   :  { %7824 = vmatpush3.msra.mxu0 %v9166_v2 }
 0xad3   :  { %7825 = vmatprep.subr.mxu0 %v9017_v1 }
 0xad4   :  { %7826 = vmatpush3.msra.mxu0 %v9176_v3 }
 0xad5   :  { %7827 = vmatprep.subr.mxu0 %v9017_v1 }
 0xad6   :  { %v1128_v31 = vpop.permute.xlu0 %1127  ;;  %7828 = vmatpush3.msra.mxu0 %v9185_v4 }
 0xad7   :  { %7819 = vmatmul.mubr.msk.f32.vlgmr.msra.gmra.mxu1 %vm99_vm1, %v1128_v31  ;;  %7843 = vmatprep.subr.mxu0 %v9017_v1 }
 0xad8   :  { %7833 = vmatpush3.msra.mxu1 %v9194_v5  ;;  %7840 = vmatprep.mubr.msk.f32.mxu1 %vm9018_vm0, %v9017_v1 }
 0xad9   :  { %7834 = vmatprep.subr.mxu1 %v9017_v1 }
 0xada   :  { %7835 = vmatpush3.msra.mxu1 %v9204_v6 }
 0xadb   :  { %7836 = vmatprep.subr.mxu1 %v9017_v1 }
 0xadc   :  { %7837 = vmatpush3.msra.mxu1 %v9213_v7 }
 0xadd   :  { %7838 = vmatprep.subr.mxu1 %v9017_v1 }
 0xade   :  { %7839 = vmatpush3.msra.mxu1 %v9223_v8 }
 0xadf   :  { %7854 = vmatprep.subr.mxu1 %v9017_v1 }
 0xb8f   :  { %v1122_v16 = vpop.f32.mrf.mxu0 }
 0xb90   :  { %v1123_v17 = vadd.f32 %v9244_v9, %v1122_v16 }
 0xb91   :  { %v7809_v19 = vpop.f32.mrf.mxu0 }
 0xb92   :  { %1211 = vrot.lane.b32.xlu1 %v1123_v17, %s9020_s25  ;;  %v1203_v26 = vadd.f32 %v7155_v24, %v1123_v17 }
 0xb94   :  { %v7156_v27 = vmul.f32 -1.442695, %v1203_v26 }
 0xb96   :  { %8733 = vpow2.f32 %v7156_v27 }
 0xb97   :  { %v1197_v63 = vpop.f32.mrf.mxu1 }
 0xb98   :  { %v1198_v20 = vadd.f32 %v9251_v14, %v1197_v63 }
 0xb99   :  { %v7820_v22 = vpop.f32.mrf.mxu1 }
 0xb9a   :  { %1239 = vrot.lane.b32.xlu0 %v1198_v20, %s9020_s25  ;;  %v1231_v29 = vadd.f32 %v7157_v28, %v1198_v20 }
 0xb9c   :  { %v7158_v30 = vmul.f32 -1.442695, %v1231_v29 }
 0xb9e   :  { %8735 = vpow2.f32 %v7158_v30 }
 0xba3   :  { %v8734_v32 = vpop.eup %8733 }
 0xba4   :  { %v1207_v35 = vadd.f32 1.0, %v8734_v32 }
 0xba6   :  { %8737 = vrcp.f32 %v1207_v35 }
 0xbab   :  { %v8736_v36 = vpop.eup %8735 }
 0xbac   :  { %v1235_v37 = vadd.f32 1.0, %v8736_v36 }
 0xbae   :  { %8739 = vrcp.f32 %v1235_v37 }
 0xbb3   :  { %v8738_v38 = vpop.eup %8737 }
 0xbb4   :  { %v1221_v17 = vsub.f32 1.0, %v8738_v38  ;;  %v1227_v63 = vmul.f32 %v8738_v38, %v9498_v47 }
 0xbbb   :  { %v8740_v43 = vpop.eup %8739 }
 0xbbc   :  { %v1249_v27 = vsub.f32 1.0, %v8740_v43  ;;  %v1255_v30 = vmul.f32 %v8740_v43, %v9509_v60 }
 0xc04   :  { %v1212_v39 = vpop.permute.xlu1 %1211 }
 0xc05   :  { %v1214_v41 = vmul.f32 %v8738_v38, %v1212_v39 }
 0xc07   :  { %1216 = vrot.lane.b32.xlu1 %v1214_v41, %s9020_s25 }
 0xc0c   :  { %v1240_v52 = vpop.permute.xlu0 %1239 }
 0xc0d   :  { %v1242_v53 = vmul.f32 %v8740_v43, %v1240_v52 }
 0xc0f   :  { %1244 = vrot.lane.b32.xlu0 %v1242_v53, %s9020_s25 }
 0xc79   :  { %v1217_v55 = vpop.permute.xlu1 %1216 }
 0xc7a   :  { %v1219_v57 = vadd.f32 %v7155_v24, %v1217_v55  ;;  %v1259_v24 = vmul.f32 %v9490_v40, %v9498_v47 }
 0xc7c   :  { %8741 = vtanh.f32 %v1219_v57 }
 0xc81   :  { %v1245_v58 = vpop.permute.xlu0 %1244 }
 0xc82   :  { %v1247_v10 = vadd.f32 %v7157_v28, %v1245_v58 }
 0xc84   :  { %8743 = vtanh.f32 %v1247_v10 }
 0xc89   :  { %v8742_v31 = vpop.eup %8741 }
 0xc8a   :  { %1223 = vrot.lane.b32.xlu1 %v8742_v31, %s9021_s26 }
 0xc91   :  { %v8744_v16 = vpop.eup %8743 }
 0xc92   :  { %1251 = vrot.lane.b32.xlu0 %v8744_v16, %s9021_s26 }
 0xcfc   :  { %v1224_v19 = vpop.permute.xlu1 %1223 }
 0xcfd   :  { %v1226_v20 = vmul.f32 %v1224_v19, %v1221_v17 }
 0xcff   :  { %v1228_v22 = vadd.f32 %v1227_v63, %v1226_v20 }
 0xd01   :  { %v9551_v26 = vmul.f32 %v1228_v22, %v9487_v34  ;;  %v1261_v34 = vmul.f32 %v9509_v60, %v9485_v33  ;;  %v7163_v60 = vld [vmem:[%s12114_s4 + $0x4] sm:$0x3] }
 0xd03   :  { %v9556_v28 = vadd.f32 %v1259_v24, %v9551_v26 }
 0xd04   :  { %v1252_v29 = vpop.permute.xlu0 %1251 }
 0xd05   :  { %v1254_v32 = vmul.f32 %v1252_v29, %v1249_v27  ;;  %1264 = vrot.lane.b32.xlu1 %v9556_v28, %s9021_s26 }
 0xd07   :  { %v1256_v35 = vadd.f32 %v1255_v30, %v1254_v32  ;;  %v1471_v32 = vmul.f32 %v9556_v28, %v9418_v21 }
 0xd09   :  { %v9562_v36 = vmul.f32 %v1256_v35, %v9483_v18 }
 0xd0b   :  { %v9567_v40 = vadd.f32 %v1261_v34, %v9562_v36 }
 0xd0d   :  { %1339 = vrot.lane.b32.xlu0 %v9567_v40, %s9021_s26 }
 0xd77   :  { %v1265_v47 = vpop.permute.xlu1 %1264 }
 0xd78   :  { %7830 = vmatmul.mubr.msk.f32.vlgmr.msra.gmra.mxu0 %vm99_vm1, %v1265_v47 }
 0xd79   :  { %7844 = vmatpush3.msra.mxu0 %v9160_v0  ;;  %7851 = vmatprep.mubr.msk.f32.mxu0 %vm9018_vm0, %v9017_v1 }
 0xd7a   :  { %7845 = vmatprep.subr.mxu0 %v9017_v1 }
 0xd7b   :  { %7846 = vmatpush3.msra.mxu0 %v9166_v2 }
 0xd7c   :  { %7847 = vmatprep.subr.mxu0 %v9017_v1 }
 0xd7d   :  { %7848 = vmatpush3.msra.mxu0 %v9176_v3 }
 0xd7e   :  { %7849 = vmatprep.subr.mxu0 %v9017_v1 }
 0xd7f   :  { %v1340_v18 = vpop.permute.xlu0 %1339  ;;  %7850 = vmatpush3.msra.mxu0 %v9185_v4 }
 0xd80   :  { %7841 = vmatmul.mubr.msk.f32.vlgmr.msra.gmra.mxu1 %vm99_vm1, %v1340_v18  ;;  %7865 = vmatprep.subr.mxu0 %v9017_v1 }
 0xd81   :  { %7855 = vmatpush3.msra.mxu1 %v9194_v5  ;;  %7862 = vmatprep.mubr.msk.f32.mxu1 %vm9018_vm0, %v9017_v1 }
 0xd82   :  { %7856 = vmatprep.subr.mxu1 %v9017_v1 }
 0xd83   :  { %7857 = vmatpush3.msra.mxu1 %v9204_v6 }
 0xd84   :  { %7858 = vmatprep.subr.mxu1 %v9017_v1 }
 0xd85   :  { %7859 = vmatpush3.msra.mxu1 %v9213_v7  ;;  %v7161_v7 = vld [vmem:[%s12113_s28 + $0xa] sm:$0x3] }
 0xd86   :  { %7860 = vmatprep.subr.mxu1 %v9017_v1 }
 0xd87   :  { %7861 = vmatpush3.msra.mxu1 %v9223_v8 }
 0xd88   :  { %7876 = vmatprep.subr.mxu1 %v9017_v1 }
 0xe38   :  { %v1334_v0 = vpop.f32.mrf.mxu0 }
 0xe39   :  { %v1335_v2 = vadd.f32 %v9244_v9, %v1334_v0 }
 0xe3a   :  { %v7831_v3 = vpop.f32.mrf.mxu0 }
 0xe3b   :  { %1423 = vrot.lane.b32.xlu1 %v1335_v2, %s9020_s25  ;;  %v1415_v33 = vadd.f32 %v7161_v7, %v1335_v2 }
 0xe3d   :  { %v7162_v8 = vmul.f32 -1.442695, %v1415_v33  ;;  %v8789_v33 = vld [vmem:[%s12082_s8 + $0x8] sm:$0xff] }
 0xe3f   :  { %8745 = vpow2.f32 %v7162_v8  ;;  %v8790_v8 = vld [vmem:[%s12082_s8] sm:$0xff] }
 0xe40   :  { %v1409_v4 = vpop.f32.mrf.mxu1 }
 0xe41   :  { %v1410_v5 = vadd.f32 %v9251_v14, %v1409_v4  ;;  %v8783_v4 = vld [vmem:[%s12112_s5 + $0x18] sm:$0xff] }
 0xe42   :  { %v7842_v6 = vpop.f32.mrf.mxu1 }
 0xe43   :  { %1451 = vrot.lane.b32.xlu0 %v1410_v5, %s9020_s25  ;;  %v1443_v9 = vadd.f32 %v7163_v60, %v1410_v5  ;;  %v8786_v5 = vld [vmem:[%s12112_s5] sm:$0xff]  ;;  %v8787_v6 = vld [vmem:[%s12082_s8 + $0x18] sm:$0xff] }
 0xe45   :  { %v7164_v37 = vmul.f32 -1.442695, %v1443_v9  ;;  %v9670_v9 = vld [vmem:[%s12081_s7] ss:$0 sm:$0xff] }
 0xe47   :  { %8747 = vpow2.f32 %v7164_v37 }
 0xe4c   :  { %v8746_v38 = vpop.eup %8745 }
 0xe4d   :  { %v1419_v39 = vadd.f32 1.0, %v8746_v38 }
 0xe4f   :  { %8749 = vrcp.f32 %v1419_v39 }
 0xe54   :  { %v8748_v14 = vpop.eup %8747 }
 0xe55   :  { %v1447_v41 = vadd.f32 1.0, %v8748_v14  ;;  %v9677_v14 = vld [vmem:[%s12083_s9] ss:$0 sm:$0xff] }
 0xe57   :  { %8751 = vrcp.f32 %v1447_v41 }
 0xe5c   :  { %v8750_v43 = vpop.eup %8749 }
 0xe5d   :  { %v1433_v20 = vsub.f32 1.0, %v8750_v43  ;;  %v1439_v24 = vmul.f32 %v8750_v43, %v9556_v28 }
 0xe64   :  { %v8752_v55 = vpop.eup %8751 }
 0xe65   :  { %v1461_v35 = vsub.f32 1.0, %v8752_v55  ;;  %v1467_v18 = vmul.f32 %v8752_v55, %v9567_v40 }
 0xead   :  { %v1424_v52 = vpop.permute.xlu1 %1423 }
 0xeae   :  { %v1426_v53 = vmul.f32 %v8750_v43, %v1424_v52  ;;  %v7167_v52 = vld [vmem:[%s12113_s28 + $0xc] sm:$0x3] }
 0xeb0   :  { %1428 = vrot.lane.b32.xlu1 %v1426_v53, %s9020_s25 }
 0xeb5   :  { %v1452_v57 = vpop.permute.xlu0 %1451 }
 0xeb6   :  { %v1454_v58 = vmul.f32 %v8752_v55, %v1452_v57  ;;  %v7169_v57 = vld [vmem:[%s12114_s4 + $0x2] sm:$0x3] }
 0xeb8   :  { %1456 = vrot.lane.b32.xlu0 %v1454_v58, %s9020_s25 }
 0xf22   :  { %v1429_v10 = vpop.permute.xlu1 %1428 }
 0xf23   :  { %v1431_v31 = vadd.f32 %v7161_v7, %v1429_v10  ;;  %v8788_v7 = vld [vmem:[%s12082_s8 + $0x10] sm:$0xff] }
 0xf25   :  { %8753 = vtanh.f32 %v1431_v31 }
 0xf2a   :  { %v1457_v16 = vpop.permute.xlu0 %1456 }
 0xf2b   :  { %v1459_v17 = vadd.f32 %v7163_v60, %v1457_v16 }
 0xf2d   :  { %8755 = vtanh.f32 %v1459_v17 }
 0xf32   :  { %v8754_v19 = vpop.eup %8753 }
 0xf33   :  { %1435 = vrot.lane.b32.xlu1 %v8754_v19, %s9021_s26 }
 0xf3a   :  { %v8756_v63 = vpop.eup %8755 }
 0xf3b   :  { %1463 = vrot.lane.b32.xlu0 %v8756_v63, %s9021_s26 }
 0xfa5   :  { %v1436_v22 = vpop.permute.xlu1 %1435 }
 0xfa6   :  { %v1438_v27 = vmul.f32 %v1436_v22, %v1433_v20 }
 0xfa8   :  { %v1440_v29 = vadd.f32 %v1439_v24, %v1438_v27 }
 0xfaa   :  { %v9609_v30 = vmul.f32 %v1440_v29, %v9415_v15  ;;  %v1473_v15 = vmul.f32 %v9567_v40, %v9413_v13  ;;  %v8785_v13 = vld [vmem:[%s12112_s5 + $0x8] sm:$0xff] }
 0xfac   :  { %v9614_v34 = vadd.f32 %v1471_v32, %v9609_v30 }
 0xfad   :  { %v1464_v47 = vpop.permute.xlu0 %1463 }
 0xfae   :  { %v1466_v0 = vmul.f32 %v1464_v47, %v1461_v35  ;;  %1476 = vrot.lane.b32.xlu1 %v9614_v34, %s9021_s26 }
 0xfb0   :  { %v1468_v2 = vadd.f32 %v1467_v18, %v1466_v0 }
 0xfb2   :  { %v9620_v3 = vmul.f32 %v1468_v2, %v9411_v12  ;;  %v8784_v12 = vld [vmem:[%s12112_s5 + $0x10] sm:$0xff] }
 0xfb4   :  { %v9625_v21 = vadd.f32 %v1473_v15, %v9620_v3 }
 0xfb6   :  { %1551 = vrot.lane.b32.xlu0 %v9625_v21, %s9021_s26 }
0x1020   :  { %v1477_v28 = vpop.permute.xlu1 %1476 }
0x1021   :  { %7852 = vmatmul.mubr.msk.f32.vlgmr.msra.gmra.mxu0 %vm99_vm1, %v1477_v28 }
0x1022   :  { %7866 = vmatpush3.msra.mxu0 %v8783_v4  ;;  %7873 = vmatprep.mubr.msk.f32.mxu0 %vm9018_vm0, %v9017_v1 }
0x1023   :  { %7867 = vmatprep.subr.mxu0 %v9017_v1 }
0x1024   :  { %7868 = vmatpush3.msra.mxu0 %v8784_v12 }
0x1025   :  { %7869 = vmatprep.subr.mxu0 %v9017_v1 }
0x1026   :  { %7870 = vmatpush3.msra.mxu0 %v8785_v13 }
0x1027   :  { %7871 = vmatprep.subr.mxu0 %v9017_v1 }
0x1028   :  { %v1552_v40 = vpop.permute.xlu0 %1551  ;;  %7872 = vmatpush3.msra.mxu0 %v8786_v5  ;;  %v1683_v5 = vmul.f32 %v9614_v34, %v9346_v59 }
0x1029   :  { %7863 = vmatmul.mubr.msk.f32.vlgmr.msra.gmra.mxu1 %vm99_vm1, %v1552_v40  ;;  %7887 = vmatprep.subr.mxu0 %v9017_v1 }
0x102a   :  { %7877 = vmatpush3.msra.mxu1 %v8787_v6  ;;  %7884 = vmatprep.mubr.msk.f32.mxu1 %vm9018_vm0, %v9017_v1 }
0x102b   :  { %7878 = vmatprep.subr.mxu1 %v9017_v1 }
0x102c   :  { %7879 = vmatpush3.msra.mxu1 %v8788_v7 }
0x102d   :  { %7880 = vmatprep.subr.mxu1 %v9017_v1 }
0x102e   :  { %7881 = vmatpush3.msra.mxu1 %v8789_v33 }
0x102f   :  { %7882 = vmatprep.subr.mxu1 %v9017_v1 }
0x1030   :  { %7883 = vmatpush3.msra.mxu1 %v8790_v8 }
0x1031   :  { %7906 = vmatprep.subr.mxu1 %v9017_v1 }
0x10e1   :  { %v1546_v60 = vpop.f32.mrf.mxu0 }
0x10e2   :  { %v1547_v37 = vadd.f32 %v9670_v9, %v1546_v60 }
0x10e3   :  { %v7853_v38 = vpop.f32.mrf.mxu0 }
0x10e4   :  { %1635 = vrot.lane.b32.xlu1 %v1547_v37, %s9020_s25  ;;  %v1627_v53 = vadd.f32 %v7167_v52, %v1547_v37 }
0x10e6   :  { %v7168_v55 = vmul.f32 -1.442695, %v1627_v53  ;;  %v7173_v53 = vld [vmem:[%s12113_s28 + $0xe] sm:$0x3]  ;;  %s12116_s28 = sld [smem:[#allocation16_spill]] }
0x10e8   :  { %8757 = vpow2.f32 %v7168_v55 }
0x10e9   :  { %v1621_v39 = vpop.f32.mrf.mxu1 }
0x10ea   :  { %v1622_v41 = vadd.f32 %v9677_v14, %v1621_v39 }
0x10eb   :  { %v7864_v43 = vpop.f32.mrf.mxu1 }
0x10ec   :  { %1663 = vrot.lane.b32.xlu0 %v1622_v41, %s9020_s25  ;;  %v1655_v58 = vadd.f32 %v7169_v57, %v1622_v41 }
0x10ee   :  { %v7170_v10 = vmul.f32 -1.442695, %v1655_v58  ;;  %v1865_v58 = vld [vmem:[%s12114_s4] sm:$0x3] }
0x10f0   :  { %8759 = vpow2.f32 %v7170_v10 }
0x10f5   :  { %v8758_v31 = vpop.eup %8757 }
0x10f6   :  { %v1631_v16 = vadd.f32 1.0, %v8758_v31 }
0x10f8   :  { %8761 = vrcp.f32 %v1631_v16 }
0x10fd   :  { %v8760_v17 = vpop.eup %8759 }
0x10fe   :  { %v1659_v19 = vadd.f32 1.0, %v8760_v17 }
0x1100   :  { %8763 = vrcp.f32 %v1659_v19 }
0x1105   :  { %v8762_v63 = vpop.eup %8761 }
0x1106   :  { %v1645_v15 = vsub.f32 1.0, %v8762_v63  ;;  %v1651_v4 = vmul.f32 %v8762_v63, %v9614_v34 }
0x110d   :  { %v8764_v24 = vpop.eup %8763 }
0x110e   :  { %v1673_v6 = vsub.f32 1.0, %v8764_v24  ;;  %v1679_v8 = vmul.f32 %v8764_v24, %v9625_v21 }
0x1156   :  { %v1636_v20 = vpop.permute.xlu1 %1635 }
0x1157   :  { %v1638_v22 = vmul.f32 %v8762_v63, %v1636_v20 }
0x1159   :  { %1640 = vrot.lane.b32.xlu1 %v1638_v22, %s9020_s25 }
0x115e   :  { %v1664_v27 = vpop.permute.xlu0 %1663 }
0x115f   :  { %v1666_v29 = vmul.f32 %v8764_v24, %v1664_v27 }
0x1161   :  { %1668 = vrot.lane.b32.xlu0 %v1666_v29, %s9020_s25  ;;  %v9740_v29 = vld [vmem:[%s12086_s12 + $0x38] sm:$0xff] }
0x11cb   :  { %v1641_v32 = vpop.permute.xlu1 %1640 }
0x11cc   :  { %v1643_v35 = vadd.f32 %v7167_v52, %v1641_v32  ;;  %v9745_v32 = vld [vmem:[%s12086_s12 + $0x30] sm:$0xff] }
0x11ce   :  { %8765 = vtanh.f32 %v1643_v35 }
0x11d3   :  { %v1669_v47 = vpop.permute.xlu0 %1668 }
0x11d4   :  { %v1671_v18 = vadd.f32 %v7169_v57, %v1669_v47 }
0x11d6   :  { %8767 = vtanh.f32 %v1671_v18  ;;  %v9758_v18 = vld [vmem:[%s12086_s12 + $0x28] sm:$0xff] }
0x11db   :  { %v8766_v0 = vpop.eup %8765 }
0x11dc   :  { %1647 = vrot.lane.b32.xlu1 %v8766_v0, %s9021_s26  ;;  %v9766_v0 = vld [vmem:[%s12086_s12 + $0x20] sm:$0xff] }
0x11e3   :  { %v8768_v2 = vpop.eup %8767 }
0x11e4   :  { %1675 = vrot.lane.b32.xlu0 %v8768_v2, %s9021_s26  ;;  %v9774_v2 = vld [vmem:[%s12086_s12 + $0x18] sm:$0xff] }
0x124e   :  { %v1648_v28 = vpop.permute.xlu1 %1647 }
0x124f   :  { %v1650_v12 = vmul.f32 %v1648_v28, %v1645_v15 }
0x1251   :  { %v1652_v13 = vadd.f32 %v1651_v4, %v1650_v12  ;;  %v9784_v4 = vld [vmem:[%s12086_s12 + $0x10] sm:$0xff]  ;;  %v9793_v12 = vld [vmem:[%s12086_s12 + $0x8] sm:$0xff] }
0x1253   :  { %v9693_v40 = vmul.f32 %v1652_v13, %v9343_v50  ;;  %v1685_v50 = vmul.f32 %v9625_v21, %v9341_v49  ;;  %v9802_v13 = vld [vmem:[%s12086_s12] sm:$0xff] }
0x1255   :  { %v9698_v7 = vadd.f32 %v1683_v5, %v9693_v40 }
0x1256   :  { %v1676_v33 = vpop.permute.xlu0 %1675 }
0x1257   :  { %v1678_v60 = vmul.f32 %v1676_v33, %v1673_v6  ;;  %1688 = vrot.lane.b32.xlu1 %v9698_v7, %s9021_s26 }
0x1259   :  { %v1680_v37 = vadd.f32 %v1679_v8, %v1678_v60 }
0x125b   :  { %v9704_v38 = vmul.f32 %v1680_v37, %v9339_v48 }
0x125d   :  { %v9709_v59 = vadd.f32 %v1685_v50, %v9704_v38 }
0x125f   :  { %1763 = vrot.lane.b32.xlu0 %v9709_v59, %s9021_s26 }
0x12c9   :  { %v1689_v34 = vpop.permute.xlu1 %1688 }
0x12ca   :  { %7874 = vmatmul.mubr.msk.f32.vlgmr.msra.gmra.mxu0 %vm99_vm1, %v1689_v34 }
0x12cb   :  { %7903 = vmatprep.mubr.msk.f32.mxu0 %vm9018_vm0, %v9017_v1  ;;  %7888 = vmatpush3.msra.mxu0 %v9740_v29 }
0x12cc   :  { %7889 = vmatprep.subr.mxu0 %v9017_v1 }
0x12cd   :  { %7890 = vmatpush3.msra.mxu0 %v9745_v32 }
0x12ce   :  { %7891 = vmatprep.subr.mxu0 %v9017_v1 }
0x12cf   :  { %7892 = vmatpush3.msra.mxu0 %v9758_v18 }
0x12d0   :  { %7893 = vmatprep.subr.mxu0 %v9017_v1 }
0x12d1   :  { %v1764_v39 = vpop.permute.xlu0 %1763  ;;  %7894 = vmatpush3.msra.mxu0 %v9766_v0 }
0x12d2   :  { %7885 = vmatmul.mubr.msk.f32.vlgmr.msra.gmra.mxu1 %vm99_vm1, %v1764_v39  ;;  %7895 = vmatprep.subr.mxu0 %v9017_v1 }
0x12d3   :  { %7922 = vmatprep.mubr.msk.f32.mxu1 %vm9018_vm0, %v9017_v1  ;;  %7907 = vmatpush3.msra.mxu1 %v9740_v29 }
0x12d4   :  { %7908 = vmatprep.subr.mxu1 %v9017_v1  ;;  %7896 = vmatpush3.msra.mxu0 %v9774_v2 }
0x12d5   :  { %7909 = vmatpush3.msra.mxu1 %v9745_v32  ;;  %7897 = vmatprep.subr.mxu0 %v9017_v1 }
0x12d6   :  { %7910 = vmatprep.subr.mxu1 %v9017_v1  ;;  %7898 = vmatpush3.msra.mxu0 %v9784_v4 }
0x12d7   :  { %7911 = vmatpush3.msra.mxu1 %v9758_v18  ;;  %7899 = vmatprep.subr.mxu0 %v9017_v1 }
0x12d8   :  { %7912 = vmatprep.subr.mxu1 %v9017_v1  ;;  %7900 = vmatpush3.msra.mxu0 %v9793_v12 }
0x12d9   :  { %7913 = vmatpush3.msra.mxu1 %v9766_v0  ;;  %7901 = vmatprep.subr.mxu0 %v9017_v1 }
0x12da   :  { %7914 = vmatprep.subr.mxu1 %v9017_v1  ;;  %7902 = vmatpush3.msra.mxu0 %v9802_v13 }
0x12db   :  { %7915 = vmatpush3.msra.mxu1 %v9774_v2  ;;  %7925 = vmatprep.subr.mxu0 %v9017_v1 }
0x12dc   :  { %7916 = vmatprep.subr.mxu1 %v9017_v1 }
0x12dd   :  { %7917 = vmatpush3.msra.mxu1 %v9784_v4 }
0x12de   :  { %7918 = vmatprep.subr.mxu1 %v9017_v1 }
0x12df   :  { %7919 = vmatpush3.msra.mxu1 %v9793_v12 }
0x12e0   :  { %7920 = vmatprep.subr.mxu1 %v9017_v1 }
0x12e1   :  { %7921 = vmatpush3.msra.mxu1 %v9802_v13 }
0x12e2   :  { %7944 = vmatprep.subr.mxu1 %v9017_v1 }
0x138a   :  { %v1758_v48 = vpop.f32.mrf.mxu0 }
0x138b   :  { %v1759_v49 = vadd.f32 %v9670_v9, %v1758_v48 }
0x138c   :  { %v7875_v21 = vpop.f32.mrf.mxu0 }
0x138d   :  { %1847 = vrot.lane.b32.xlu1 %v1759_v49, %s9020_s25  ;;  %v1839_v55 = vadd.f32 %v7173_v53, %v1759_v49 }
0x138f   :  { %v7174_v57 = vmul.f32 -1.442695, %v1839_v55 }
0x1391   :  { %8769 = vpow2.f32 %v7174_v57 }
0x1392   :  { %v1833_v41 = vpop.f32.mrf.mxu1 }
0x1393   :  { %v1834_v43 = vadd.f32 %v9677_v14, %v1833_v41 }
0x1394   :  { %v7886_v52 = vpop.f32.mrf.mxu1 }
0x1395   :  { %1874 = vrot.lane.b32.xlu0 %v1834_v43, %s9020_s25  ;;  %v1866_v9 = vadd.f32 %v1865_v58, %v1834_v43 }
0x1397   :  { %v7175_v10 = vmul.f32 -1.442695, %v1866_v9 }
0x1399   :  { %8771 = vpow2.f32 %v7175_v10  ;;  %v2631_v10 = vld [vmem:[%s12084_s10 + $0x38] sm:$0xff] }
0x139e   :  { %v8770_v31 = vpop.eup %8769 }
0x139f   :  { %v1843_v16 = vadd.f32 1.0, %v8770_v31  ;;  %v2630_v31 = vld [vmem:[%s12084_s10 + $0x30] sm:$0xff] }
0x13a1   :  { %8773 = vrcp.f32 %v1843_v16  ;;  %v2629_v16 = vld [vmem:[%s12084_s10 + $0x28] sm:$0xff] }
0x13a6   :  { %v8772_v14 = vpop.eup %8771 }
0x13a7   :  { %v1870_v17 = vadd.f32 1.0, %v8772_v14  ;;  %v2628_v14 = vld [vmem:[%s12084_s10 + $0x20] sm:$0xff] }
0x13a9   :  { %8775 = vrcp.f32 %v1870_v17  ;;  %v2627_v17 = vld [vmem:[%s12084_s10 + $0x18] sm:$0xff] }
0x13ae   :  { %v9729_v19 = vpop.eup %8773 }
0x13b6   :  { %v9733_v22 = vpop.eup %8775 }
0x13b7   :  { %v1890_v34 = vmul.f32 %v9733_v22, %v9709_v59 }
0x13ff   :  { %v1848_v63 = vpop.permute.xlu1 %1847 }
0x1400   :  { %v1850_v20 = vmul.f32 %v9729_v19, %v1848_v63  ;;  %v2625_v63 = vld [vmem:[%s12084_s10 + $0x8] sm:$0xff] }
0x1402   :  { %1852 = vrot.lane.b32.xlu1 %v1850_v20, %s9020_s25  ;;  %v2624_v20 = vld [vmem:[%s12084_s10] sm:$0xff] }
0x1407   :  { %v1875_v24 = vpop.permute.xlu0 %1874 }
0x1408   :  { %v1877_v27 = vmul.f32 %v9733_v22, %v1875_v24  ;;  %v1896_v24 = vmul.f32 %v9709_v59, %v9273_v45  ;;  %v10053_v45 = vld [vmem:[%s12117_s23] sm:$0xff] }
0x1409   :  { %v10063_v59 = vld [vmem:[%s12088_s14] ss:$0 sm:$0xff]  ;;  %vm2730_vm5 = vcmp.gt.f32.partialorder %v10053_v45, 0.0 }
0x140a   :  { %1879 = vrot.lane.b32.xlu0 %v1877_v27, %s9020_s25 }
0x1474   :  { %v1853_v35 = vpop.permute.xlu1 %1852 }
0x1475   :  { %v1855_v47 = vadd.f32 %v7173_v53, %v1853_v35 }
0x1477   :  { %8777 = vtanh.f32 %v1855_v47 }
0x147c   :  { %v1880_v15 = vpop.permute.xlu0 %1879 }
0x147d   :  { %v1882_v28 = vadd.f32 %v1880_v15, %v1865_v58 }
0x147f   :  { %8779 = vtanh.f32 %v1882_v28 }
0x1484   :  { %v8778_v5 = vpop.eup %8777 }
0x1485   :  { %1859 = vrot.lane.b32.xlu1 %v8778_v5, %s9021_s26 }
0x1489   :  { %1899 = vrot.lane.b32.xlu1 %v9281_v54, %s9021_s26  ;;  %v1857_v54 = vsub.f32 1.0, %v9729_v19 }
0x148c   :  { %v8780_v6 = vpop.eup %8779 }
0x148d   :  { %1886 = vrot.lane.b32.xlu0 %v8780_v6, %s9021_s26  ;;  %2080 = vrot.lane.b32.xlu1 %v9423_v23, %s9021_s26  ;;  %v1863_v23 = vmul.f32 %v9729_v19, %v9698_v7  ;;  %v2626_v19 = vld [vmem:[%s12084_s10 + $0x10] sm:$0xff] }
0x1491   :  { %1990 = vrot.lane.b32.xlu0 %v9351_v61, %s9021_s26  ;;  %2260 = vrot.lane.b32.xlu1 %v9551_v26, %s9021_s26 }
0x1495   :  { %2170 = vrot.lane.b32.xlu0 %v9495_v42, %s9021_s26  ;;  %2440 = vrot.lane.b32.xlu1 %v9693_v40, %s9021_s26  ;;  %v1894_v40 = vmul.f32 %v9698_v7, %v9277_v51 }
0x1499   :  { %2350 = vrot.lane.b32.xlu0 %v9609_v30, %s9021_s26  ;;  %v1884_v30 = vsub.f32 1.0, %v9733_v22  ;;  %v2734_v22 = vld [vmem:[%s12116_s28] sm:$0x3] }
0x149a   :  { %2735 = vst.msk [vmem:[#allocation4] sm:$0x3] %vm1987_vm2, %v2734_v22 }
0x14f7   :  { %v1860_v33 = vpop.permute.xlu1 %1859 }
0x14f8   :  { %v1862_v8 = vmul.f32 %v1860_v33, %v1857_v54 }
0x14fa   :  { %v1864_v61 = vadd.f32 %v1863_v23, %v1862_v8 }
0x14fb   :  { %v1900_v26 = vpop.permute.xlu1 %1899 }
0x14fc   :  { %v1892_v42 = vmul.f32 %v1864_v61, %v9271_v44 }
0x14fe   :  { %2530 = vrot.lane.b32.xlu0 %v1892_v42, %s9021_s26  ;;  %v1895_v60 = vadd.f32 %v1894_v40, %v1892_v42 }
0x14ff   :  { %v1887_v37 = vpop.permute.xlu0 %1886  ;;  %v2081_v50 = vpop.permute.xlu1 %2080 }
0x1500   :  { %v1889_v39 = vmul.f32 %v1887_v37, %v1884_v30  ;;  %v9839_v48 = vsel %vm99_vm1, %v2081_v50, %v9620_v3  ;;  %2620 = vrot.lane.b32.xlu1 %v1895_v60, %s9021_s26 }
0x1501   :  { %2085 = vst.msk [vmem:[#allocation2 + $0x4] sm:$0x3] %vm12102_vm3, %v9839_v48 }
0x1502   :  { %v1891_v44 = vadd.f32 %v1890_v34, %v1889_v39  ;;  %v7184_v39 = vld [vmem:[%s12085_s11] ss:$0 sm:$0xff] }
0x1503   :  { %v1991_v51 = vpop.permute.xlu0 %1990  ;;  %v2261_v7 = vpop.permute.xlu1 %2260 }
0x1504   :  { %v9845_v49 = vmul.f32 %v1891_v44, %v9275_v46  ;;  %v1993_v21 = vsel %vm99_vm1, %v1991_v51, %v9704_v38  ;;  %v9851_v41 = vsel %vm99_vm1, %v2261_v7, %v9506_v25 }
0x1505   :  { %1995 = vst.msk [vmem:[#allocation2 + $0x2] sm:$0x3] %vm12102_vm3, %v1993_v21  ;;  %2265 = vst.msk [vmem:[#allocation2 + $0x8] sm:$0x3] %vm12102_vm3, %v9851_v41  ;;  %7923 = vmatmul.mubr.msk.f32.vlgmr.msra.gmra.mxu1 %vm1913_vm4, %v1993_v21 }
0x1506   :  { %7945 = vmatpush3.msra.mxu1 %v9740_v29  ;;  %v1902_v46 = vsel %vm99_vm1, %v1900_v26, %v9845_v49  ;;  %7960 = vmatprep.mubr.msk.f32.mxu1 %vm9018_vm0, %v9017_v1 }
0x1507   :  { %7946 = vmatprep.subr.mxu1 %v9017_v1  ;;  %v2171_v3 = vpop.permute.xlu0 %2170  ;;  %1904 = vst.msk [vmem:[#allocation2] sm:$0x3] %vm12102_vm3, %v1902_v46  ;;  %7904 = vmatmul.mubr.msk.f32.vlgmr.msra.gmra.mxu0 %vm1913_vm4, %v1902_v46  ;;  %v2441_v25 = vpop.permute.xlu1 %2440 }
0x1508   :  { %v9865_v38 = vld [vmem:[#allocation2 + $0x4] sm:$0x3]  ;;  %7947 = vmatpush3.msra.mxu1 %v9745_v32  ;;  %v2173_v43 = vsel %vm99_vm1, %v2171_v3, %v9562_v36  ;;  %7926 = vmatpush3.msra.mxu0 %v9740_v29  ;;  %v9873_v52 = vsel %vm99_vm1, %v2441_v25, %v9362_v56 }
0x1509   :  { %2175 = vst.msk [vmem:[#allocation2 + $0x6] sm:$0x3] %vm12102_vm3, %v2173_v43  ;;  %2445 = vst.msk [vmem:[#allocation2 + $0xc] sm:$0x3] %vm12102_vm3, %v9873_v52  ;;  %7927 = vmatprep.subr.mxu0 %v9017_v1  ;;  %7948 = vmatprep.subr.mxu1 %v9017_v1 }
0x150a   :  { %7928 = vmatpush3.msra.mxu0 %v9745_v32  ;;  %7949 = vmatpush3.msra.mxu1 %v9758_v18 }
0x150b   :  { %7929 = vmatprep.subr.mxu0 %v9017_v1  ;;  %7950 = vmatprep.subr.mxu1 %v9017_v1  ;;  %v2351_v36 = vpop.permute.xlu0 %2350 }
0x150c   :  { %v9884_v56 = vld [vmem:[#allocation2 + $0x2] sm:$0x3]  ;;  %v9886_v53 = vld [vmem:[#allocation2 + $0x8] sm:$0x3]  ;;  %7951 = vmatpush3.msra.mxu1 %v9766_v0  ;;  %v2353_v55 = vsel %vm99_vm1, %v2351_v36, %v9434_v11  ;;  %7930 = vmatpush3.msra.mxu0 %v9758_v18 }
0x150d   :  { %2355 = vst.msk [vmem:[#allocation2 + $0xa] sm:$0x3] %vm12102_vm3, %v2353_v55  ;;  %7931 = vmatprep.subr.mxu0 %v9017_v1  ;;  %7952 = vmatprep.subr.mxu1 %v9017_v1 }
0x150e   :  { %v9895_v57 = vld [vmem:[#allocation2] sm:$0x3]  ;;  %7932 = vmatpush3.msra.mxu0 %v9766_v0  ;;  %7953 = vmatpush3.msra.mxu1 %v9774_v2 }
0x150f   :  { %7933 = vmatprep.subr.mxu0 %v9017_v1  ;;  %7954 = vmatprep.subr.mxu1 %v9017_v1 }
0x1510   :  { %v9901_v58 = vld [vmem:[#allocation2 + $0x6] sm:$0x3]  ;;  %v9903_v11 = vld [vmem:[#allocation2 + $0xc] sm:$0x3]  ;;  %7934 = vmatpush3.msra.mxu0 %v9774_v2  ;;  %7955 = vmatpush3.msra.mxu1 %v9784_v4 }
0x1511   :  { %7935 = vmatprep.subr.mxu0 %v9017_v1  ;;  %7956 = vmatprep.subr.mxu1 %v9017_v1 }
0x1512   :  { %7936 = vmatpush3.msra.mxu0 %v9784_v4  ;;  %7957 = vmatpush3.msra.mxu1 %v9793_v12 }
0x1513   :  { %7937 = vmatprep.subr.mxu0 %v9017_v1  ;;  %7958 = vmatprep.subr.mxu1 %v9017_v1 }
0x1514   :  { %v9913_v9 = vld [vmem:[#allocation2 + $0xa] sm:$0x3]  ;;  %7938 = vmatpush3.msra.mxu0 %v9793_v12  ;;  %7959 = vmatpush3.msra.mxu1 %v9802_v13 }
0x1515   :  { %7939 = vmatprep.subr.mxu0 %v9017_v1  ;;  %7961 = vmatmul.mubr.msk.f32.vlgmr.msra.gmra.mxu1 %vm1913_vm4, %v2173_v43 }
0x1516   :  { %7982 = vmatprep.subr.mxu1 %v9017_v1  ;;  %7940 = vmatpush3.msra.mxu0 %v9802_v13 }
0x1517   :  { %7941 = vmatprep.mubr.msk.f32.mxu0 %vm9018_vm0, %v9017_v1  ;;  %7983 = vmatpush3.msra.mxu1 %v9740_v29 }
0x1518   :  { %7942 = vmatmul.mubr.msk.f32.vlgmr.msra.gmra.mxu0 %vm1913_vm4, %v9839_v48  ;;  %7963 = vmatprep.subr.mxu0 %v9017_v1 }
0x1519   :  { %7984 = vmatprep.subr.mxu1 %v9017_v1  ;;  %7964 = vmatpush3.msra.mxu0 %v9740_v29 }
0x151a   :  { %7985 = vmatpush3.msra.mxu1 %v9745_v32  ;;  %7965 = vmatprep.subr.mxu0 %v9017_v1 }
0x151b   :  { %7986 = vmatprep.subr.mxu1 %v9017_v1  ;;  %7966 = vmatpush3.msra.mxu0 %v9745_v32 }
0x151c   :  { %7987 = vmatpush3.msra.mxu1 %v9758_v18  ;;  %7967 = vmatprep.subr.mxu0 %v9017_v1 }
0x151d   :  { %7988 = vmatprep.subr.mxu1 %v9017_v1  ;;  %7968 = vmatpush3.msra.mxu0 %v9758_v18 }
0x151e   :  { %7989 = vmatpush3.msra.mxu1 %v9766_v0  ;;  %7969 = vmatprep.subr.mxu0 %v9017_v1 }
0x151f   :  { %7990 = vmatprep.subr.mxu1 %v9017_v1  ;;  %7970 = vmatpush3.msra.mxu0 %v9766_v0 }
0x1520   :  { %7991 = vmatpush3.msra.mxu1 %v9774_v2  ;;  %7971 = vmatprep.subr.mxu0 %v9017_v1 }
0x1521   :  { %7992 = vmatprep.subr.mxu1 %v9017_v1  ;;  %7972 = vmatpush3.msra.mxu0 %v9774_v2 }
0x1522   :  { %7993 = vmatpush3.msra.mxu1 %v9784_v4  ;;  %7973 = vmatprep.subr.mxu0 %v9017_v1 }
0x1523   :  { %7994 = vmatprep.subr.mxu1 %v9017_v1  ;;  %7974 = vmatpush3.msra.mxu0 %v9784_v4 }
0x1524   :  { %7995 = vmatpush3.msra.mxu1 %v9793_v12  ;;  %7975 = vmatprep.subr.mxu0 %v9017_v1 }
0x1525   :  { %7996 = vmatprep.subr.mxu1 %v9017_v1  ;;  %7976 = vmatpush3.msra.mxu0 %v9793_v12 }
0x1526   :  { %7997 = vmatpush3.msra.mxu1 %v9802_v13  ;;  %7998 = vmatprep.mubr.msk.f32.mxu1 %vm9018_vm0, %v9017_v1 }
0x1527   :  { %7977 = vmatprep.subr.mxu0 %v9017_v1  ;;  %7999 = vmatmul.mubr.msk.f32.vlgmr.msra.gmra.mxu1 %vm1913_vm4, %v2353_v55 }
0x1528   :  { %7978 = vmatpush3.msra.mxu0 %v9802_v13  ;;  %7979 = vmatprep.mubr.msk.f32.mxu0 %vm9018_vm0, %v9017_v1 }
0x1529   :  { %7980 = vmatmul.mubr.msk.f32.vlgmr.msra.gmra.mxu0 %vm1913_vm4, %v9851_v41  ;;  %8001 = vmatprep.subr.mxu0 %v9017_v1 }
0x152a   :  { %8002 = vmatpush3.msra.mxu0 %v9740_v29  ;;  %8017 = vmatprep.mubr.msk.f32.mxu0 %vm9018_vm0, %v9017_v1 }
0x152b   :  { %8003 = vmatprep.subr.mxu0 %v9017_v1  ;;  %8020 = vmatprep.subr.mxu1 %v9017_v1 }
0x152c   :  { %8004 = vmatpush3.msra.mxu0 %v9745_v32  ;;  %8021 = vmatpush3.msra.mxu1 %v9740_v29 }
0x152d   :  { %8005 = vmatprep.subr.mxu0 %v9017_v1  ;;  %8022 = vmatprep.subr.mxu1 %v9017_v1 }
0x152e   :  { %8006 = vmatpush3.msra.mxu0 %v9758_v18  ;;  %8023 = vmatpush3.msra.mxu1 %v9745_v32  ;;  %v1897_v32 = vadd.f32 %v1896_v24, %v9845_v49 }
0x152f   :  { %8007 = vmatprep.subr.mxu0 %v9017_v1  ;;  %8024 = vmatprep.subr.mxu1 %v9017_v1 }
0x1530   :  { %8008 = vmatpush3.msra.mxu0 %v9766_v0  ;;  %8025 = vmatpush3.msra.mxu1 %v9758_v18 }
0x1531   :  { %8009 = vmatprep.subr.mxu0 %v9017_v1  ;;  %8026 = vmatprep.subr.mxu1 %v9017_v1 }
0x1532   :  { %8010 = vmatpush3.msra.mxu0 %v9774_v2  ;;  %8027 = vmatpush3.msra.mxu1 %v9766_v0 }
0x1533   :  { %8011 = vmatprep.subr.mxu0 %v9017_v1  ;;  %8028 = vmatprep.subr.mxu1 %v9017_v1 }
0x1534   :  { %8012 = vmatpush3.msra.mxu0 %v9784_v4  ;;  %8029 = vmatpush3.msra.mxu1 %v9774_v2 }
0x1535   :  { %8013 = vmatprep.subr.mxu0 %v9017_v1  ;;  %8030 = vmatprep.subr.mxu1 %v9017_v1 }
0x1536   :  { %8014 = vmatpush3.msra.mxu0 %v9793_v12  ;;  %8031 = vmatpush3.msra.mxu1 %v9784_v4 }
0x1537   :  { %8015 = vmatprep.subr.mxu0 %v9017_v1  ;;  %8032 = vmatprep.subr.mxu1 %v9017_v1 }
0x1538   :  { %8016 = vmatpush3.msra.mxu0 %v9802_v13  ;;  %8033 = vmatpush3.msra.mxu1 %v9793_v12 }
0x1539   :  { %8018 = vmatmul.mubr.msk.f32.vlgmr.msra.gmra.mxu0 %vm1913_vm4, %v9873_v52  ;;  %8039 = vmatprep.subr.mxu0 %v9017_v1 }
0x153a   :  { %8040 = vmatpush3.msra.mxu0 %v2631_v10  ;;  %8034 = vmatprep.subr.mxu1 %v9017_v1 }
0x153b   :  { %8041 = vmatprep.subr.mxu0 %v9017_v1  ;;  %8035 = vmatpush3.msra.mxu1 %v9802_v13 }
0x153c   :  { %8042 = vmatpush3.msra.mxu0 %v2630_v31  ;;  %8036 = vmatprep.mubr.msk.f32.mxu1 %vm9018_vm0, %v9017_v1 }
0x153d   :  { %8043 = vmatprep.subr.mxu0 %v9017_v1  ;;  %8055 = vmatprep.mubr.msk.f32.mxu0 %vm9018_vm0, %v9017_v1 }
0x153e   :  { %8044 = vmatpush3.msra.mxu0 %v2629_v16 }
0x153f   :  { %8045 = vmatprep.subr.mxu0 %v9017_v1 }
0x1540   :  { %8046 = vmatpush3.msra.mxu0 %v2628_v14 }
0x1541   :  { %8047 = vmatprep.subr.mxu0 %v9017_v1 }
0x1542   :  { %8048 = vmatpush3.msra.mxu0 %v2627_v17 }
0x1543   :  { %8049 = vmatprep.subr.mxu0 %v9017_v1 }
0x1544   :  { %8050 = vmatpush3.msra.mxu0 %v2626_v19 }
0x1545   :  { %8051 = vmatprep.subr.mxu0 %v9017_v1 }
0x1546   :  { %8052 = vmatpush3.msra.mxu0 %v2625_v63 }
0x1547   :  { %8053 = vmatprep.subr.mxu0 %v9017_v1 }
0x1548   :  { %8054 = vmatpush3.msra.mxu0 %v2624_v20 }
0x1570   :  { %v2531_v27 = vpop.permute.xlu0 %2530 }
0x1571   :  { %v2533_v29 = vsel %vm99_vm1, %v2531_v27, %v9290_v62  ;;  %v10058_v62 = vld [vmem:[%s12087_s13] ss:$0 sm:$0xff] }
0x1572   :  { %2535 = vst.msk [vmem:[#allocation2 + $0xe] sm:$0x3] %vm12102_vm3, %v2533_v29  ;;  %8037 = vmatmul.mubr.msk.f32.vlgmr.msra.gmra.mxu1 %vm1913_vm4, %v2533_v29  ;;  %v2621_v35 = vpop.permute.xlu1 %2620 }
0x1573   :  { %v2623_v47 = vsel %vm99_vm1, %v2621_v35, %v1897_v32 }
0x1574   :  { %8056 = vmatmul.mubr.msk.f32.vlgmr.msra.gmra.mxu0 %vm1913_vm4, %v2623_v47 }
0x1579   :  { %v10048_v18 = vld [vmem:[#allocation2 + $0xe] sm:$0x3] }
0x15c5   :  { %v2073_v0 = vpop.f32.mrf.mxu1 }
0x15c6   :  { %2078 = vst.msk [vmem:[#allocation3 + $0x2] sm:$0x3] %vm1987_vm2, %v2073_v0 }
0x15c7   :  { %v1983_v2 = vpop.f32.mrf.mxu0  ;;  %v7924_v15 = vpop.f32.mrf.mxu1 }
0x15c8   :  { %1988 = vst.msk [vmem:[#allocation3] sm:$0x3] %vm1987_vm2, %v1983_v2 }
0x15c9   :  { %v7905_v28 = vpop.f32.mrf.mxu0 }
0x15cd   :  { %v10070_v4 = vld [vmem:[#allocation3 + $0x2] sm:$0x3] }
0x15cf   :  { %v10072_v12 = vld [vmem:[#allocation3] sm:$0x3] }
0x15d5   :  { %v2253_v13 = vpop.f32.mrf.mxu1 }
0x15d6   :  { %2258 = vst.msk [vmem:[#allocation3 + $0x6] sm:$0x3] %vm1987_vm2, %v2253_v13 }
0x15d7   :  { %v7962_v5 = vpop.f32.mrf.mxu1 }
0x15d8   :  { %v2163_v6 = vpop.f32.mrf.mxu0 }
0x15d9   :  { %2168 = vst.msk [vmem:[#allocation3 + $0x4] sm:$0x3] %vm1987_vm2, %v2163_v6 }
0x15da   :  { %v7943_v54 = vpop.f32.mrf.mxu0 }
0x15dd   :  { %v10076_v33 = vld [vmem:[#allocation3 + $0x6] sm:$0x3] }
0x15e0   :  { %v10078_v23 = vld [vmem:[#allocation3 + $0x4] sm:$0x3] }
0x15e7   :  { %v2433_v8 = vpop.f32.mrf.mxu1 }
0x15e8   :  { %2438 = vst.msk [vmem:[#allocation3 + $0xa] sm:$0x3] %vm1987_vm2, %v2433_v8 }
0x15e9   :  { %v2343_v61 = vpop.f32.mrf.mxu0  ;;  %v8000_v26 = vpop.f32.mrf.mxu1 }
0x15ea   :  { %2348 = vst.msk [vmem:[#allocation3 + $0x8] sm:$0x3] %vm1987_vm2, %v2343_v61 }
0x15eb   :  { %v7981_v42 = vpop.f32.mrf.mxu0 }
0x15ef   :  { %v10082_v40 = vld [vmem:[#allocation3 + $0xa] sm:$0x3] }
0x15f1   :  { %v10084_v30 = vld [vmem:[#allocation3 + $0x8] sm:$0x3] }
0x15f9   :  { %v2523_v60 = vpop.f32.mrf.mxu0 }
0x15fa   :  { %2528 = vst.msk [vmem:[#allocation3 + $0xc] sm:$0x3] %vm1987_vm2, %v2523_v60 }
0x15fb   :  { %v8019_v37 = vpop.f32.mrf.mxu0 }
0x1601   :  { %v10087_v50 = vld [vmem:[#allocation3 + $0xc] sm:$0x3] }
0x1632   :  { %v2613_v34 = vpop.f32.mrf.mxu1 }
0x1633   :  { %2618 = vst.msk [vmem:[#allocation3 + $0xe] sm:$0x3] %vm1987_vm2, %v2613_v34 }
0x1634   :  { %v8038_v48 = vpop.f32.mrf.mxu1  ;;  %v2708_v44 = vpop.f32.mrf.mxu0 }
0x1635   :  { %v2709_v51 = vadd.f32 %v7184_v39, %v2708_v44 }
0x1636   :  { %v8057_v7 = vpop.f32.mrf.mxu0 }
0x1637   :  { %8781 = vtanh.f32 %v2709_v51 }
0x163a   :  { %v10093_v49 = vld [vmem:[#allocation3 + $0xe] sm:$0x3] }
0x1640   :  { %2740 = sbr.rel (%p7186_p5) target bundleno = 6043 (0x179b), region = 97 }
0x1644   :  { %v10095_v21 = vpop.eup %8781 }
0x1645   :  { %v2741_v41 = vlaneseq  ;;  %v2756_v46 = vld [vmem:[%s12093_s19 + $0x20] sm:$0xff]  ;;  %v9022_v3 = vmov 0.0   ;;  %v2755_v25 = vld [vmem:[%s12093_s19 + $0x18] sm:$0xff]  ;;  %v2754_v52 = vld [vmem:[%s12093_s19 + $0x10] sm:$0xff]  ;;  %vm9023_vm6 = vmmov 0   ;;  %vm2757_vm7 = vcmask 326656  }
0x1646   :  { %8058 = vmatprep.subr.mxu0 %v9022_v3  ;;  %v2753_v10 = vld [vmem:[%s12093_s19 + $0x8] sm:$0xff]  ;;  %v2752_v31 = vld [vmem:[%s12093_s19] sm:$0xff]  ;;  %8068 = vmatprep.mubr.msk.f32.mxu0 %vm9023_vm6, %v9022_v3 }
0x1647   :  { %v2742_v43 = vand.u32 127, %v2741_v41  ;;  %8059 = vmatpush3.msra.mxu0 %v2756_v46 }
0x1648   :  { %8060 = vmatprep.subr.mxu0 %v9022_v3 }
0x1649   :  { %v2743_v36 = vcvt.s32.f32 %v2742_v43  ;;  %8061 = vmatpush3.msra.mxu0 %v2755_v25 }
0x164a   :  { %8062 = vmatprep.subr.mxu0 %v9022_v3 }
0x164b   :  { %v2746_v55 = vsel %vm99_vm1, %v2743_v36, inf  ;;  %8063 = vmatpush3.msra.mxu0 %v2754_v52 }
0x164c   :  { %2747 = vmin.xlane.f32.xlu0 %v2746_v55  ;;  %8064 = vmatprep.subr.mxu0 %v9022_v3 }
0x164d   :  { %8065 = vmatpush3.msra.mxu0 %v2753_v10 }
0x164e   :  { %8066 = vmatprep.subr.mxu0 %v9022_v3 }
0x164f   :  { %8067 = vmatpush3.msra.mxu0 %v2752_v31 }
0x16d5   :  { %v2748_v16 = vpop.xlane.xlu0 %2747 }
0x16d6   :  { %vm2749_vm8 = vcmp.eq.f32.partialorder %v2743_v36, %v2748_v16 }
0x16d7   :  { %v7187_v14 = vsel %vm2749_vm8, 1.0, %v9022_v3 }
0x16d8   :  { %8069 = vmatmul.mubr.msk.f32.vlgmr.msra.gmra.mxu0 %vm2757_vm7, %v7187_v14 }
0x1798   :  { %v2827_v17 = vpop.f32.mrf.mxu0 }
0x1799   :  { %2831 = vst.msk [vmem:[#allocation4] sm:$0x3] %vm1987_vm2, %v2827_v17 }
0x179a   :  { %v8070_v19 = vpop.f32.mrf.mxu0 }
0x179b PF:  { %8071 = vmatprep.subr.mxu1 %v9017_v1  ;;  %v2836_v63 = vld [vmem:[%s12089_s15 + $0x18] sm:$0xff]  ;;  %v2835_v20 = vld [vmem:[%s12089_s15 + $0x10] sm:$0xff]  ;;  %8079 = vmatprep.mubr.msk.f32.mxu1 %vm9018_vm0, %v9017_v1  ;;  %v2834_v22 = vld [vmem:[%s12089_s15 + $0x8] sm:$0xff]  ;;  %vm3030_vm9 = vcmask 1041409   ;;  %vm3032_vm10 = vcmask 1042434   ;;  %vm3034_vm11 = vcmask 1043459  }
0x179c   :  { %8072 = vmatpush3.msra.mxu1 %v2836_v63  ;;  %8109 = vmatprep.subr.mxu0 %v9017_v1  ;;  %v2833_v24 = vld [vmem:[%s12089_s15] sm:$0xff]  ;;  %vm3036_vm12 = vcmask 1044484   ;;  %vm3038_vm13 = vcmask 1045509   ;;  %vm3040_vm14 = vcmask 1046534   ;;  %vm3042_vm15 = vcmask 1047559   ;;  %s9024_s12 = smov 32  }
0x179d   :  { %8073 = vmatprep.subr.mxu1 %v9017_v1  ;;  %8141 = vmatprep.mubr.msk.f32.mxu0 %vm9018_vm0, %v9017_v1  ;;  %vm12103_vm4 = vcmask 15360   ;;  %s12118_s7 = sld [smem:[#allocation16_spill]]  ;;  %vm12101_vm6 = vcmask 785408  }
0x179e   :  { %8074 = vmatpush3.msra.mxu1 %v2835_v20  ;;  %s7198_s8 = sld [smem:[#allocation5 + $0x1]] }
0x179f   :  { %8075 = vmatprep.subr.mxu1 %v9017_v1 }
0x17a0   :  { %8076 = vmatpush3.msra.mxu1 %v2834_v22 }
0x17a1   :  { %8077 = vmatprep.subr.mxu1 %v9017_v1 }
0x17a2   :  { %8078 = vmatpush3.msra.mxu1 %v2833_v24  ;;  %v2996_v24 = vlaneseq }
0x17a3   :  { %8080 = vmatmul.mubr.msk.f32.vlgmr.msra.gmra.mxu1 %vm99_vm1, %v10095_v21  ;;  %8082 = vmatprep.subr.mxu1 %v9017_v1 }
0x17a4   :  { %8106 = vmatprep.mubr.msk.f32.mxu1 %vm9018_vm0, %v9017_v1  ;;  %p7199_p6 = scmp.ne.s32.totalorder %s7198_s8, 0 }
0x1863   :  { %v10141_v27 = vpop.f32.mrf.mxu1 }
0x1864   :  { %v2922_v29 = vadd.f32 %v10141_v27, %v10078_v23  ;;  %v2920_v32 = vadd.f32 %v10141_v27, %v10072_v12  ;;  %v2923_v35 = vadd.f32 %v10141_v27, %v10076_v33  ;;  %v2921_v47 = vadd.f32 %v10141_v27, %v10070_v4 }
0x1865   :  { %v8081_v0 = vpop.f32.mrf.mxu1  ;;  %v2925_v2 = vadd.f32 %v10141_v27, %v10082_v40  ;;  %v2924_v15 = vadd.f32 %v10141_v27, %v10084_v30  ;;  %v2927_v8 = vadd.f32 %v10141_v27, %v10093_v49  ;;  %v2926_v26 = vadd.f32 %v10141_v27, %v10087_v50 }
0x1866   :  { %v2936_v28 = vadd.f32 %v10058_v62, %v2922_v29  ;;  %v2934_v13 = vadd.f32 %v10058_v62, %v2920_v32  ;;  %v2937_v5 = vadd.f32 %v10058_v62, %v2923_v35  ;;  %v2935_v6 = vadd.f32 %v10058_v62, %v2921_v47 }
0x1867   :  { %v2939_v54 = vadd.f32 %v10058_v62, %v2925_v2  ;;  %v2938_v61 = vadd.f32 %v10058_v62, %v2924_v15  ;;  %v2941_v42 = vadd.f32 %v10058_v62, %v2927_v8  ;;  %v2940_v60 = vadd.f32 %v10058_v62, %v2926_v26 }
0x1868   :  { %8793 = vtanh.f32 %v2936_v28  ;;  %v10183_v29 = vand.u32 127, %v2996_v24  ;;  %v10185_v32 = vshrl.u32 %v2996_v24, 7 }
0x1869   :  { %8795 = vtanh.f32 %v2934_v13 }
0x186a   :  { %8797 = vtanh.f32 %v2937_v5  ;;  %v10189_v0 = vsub.s32 %v10183_v29, %v10185_v32 }
0x186b   :  { %8799 = vtanh.f32 %v2935_v6 }
0x186c   :  { %8801 = vtanh.f32 %v2939_v54 }
0x186d   :  { %8803 = vtanh.f32 %v2938_v61 }
0x186e   :  { %8805 = vtanh.f32 %v2941_v42 }
0x186f   :  { %8807 = vtanh.f32 %v2940_v60 }
0x1875   :  { %v8794_v37 = vpop.eup %8793 }
0x1876   :  { %v8796_v34 = vpop.eup %8795  ;;  %v2958_v39 = vmul.f32 %v8794_v37, %v10063_v59 }
0x1877   :  { %v8798_v48 = vpop.eup %8797  ;;  %v2956_v44 = vmul.f32 %v8796_v34, %v10063_v59 }
0x1878   :  { %v8800_v51 = vpop.eup %8799  ;;  %v2970_v7 = vsel %vm1987_vm2, %v2958_v39, 0.0  ;;  %v2959_v41 = vmul.f32 %v8798_v48, %v10063_v59 }
0x1879   :  { %v8802_v46 = vpop.eup %8801  ;;  %2971 = vadd.xlane.f32.xlu1 %v2970_v7  ;;  %v2964_v3 = vsel %vm1987_vm2, %v2956_v44, 0.0  ;;  %v2957_v25 = vmul.f32 %v8800_v51, %v10063_v59 }
0x187a   :  { %v8804_v43 = vpop.eup %8803  ;;  %2965 = vadd.xlane.f32.xlu0 %v2964_v3  ;;  %v2973_v52 = vsel %vm1987_vm2, %v2959_v41, 0.0  ;;  %v2961_v36 = vmul.f32 %v8802_v46, %v10063_v59 }
0x187b   :  { %v8806_v55 = vpop.eup %8805  ;;  %v2967_v10 = vsel %vm1987_vm2, %v2957_v25, 0.0  ;;  %v2960_v31 = vmul.f32 %v8804_v43, %v10063_v59 }
0x187c   :  { %v8808_v16 = vpop.eup %8807  ;;  %v2979_v14 = vsel %vm1987_vm2, %v2961_v36, 0.0  ;;  %v2963_v17 = vmul.f32 %v8806_v55, %v10063_v59 }
0x187d   :  { %2974 = vadd.xlane.f32.xlu1 %v2973_v52  ;;  %v2976_v19 = vsel %vm1987_vm2, %v2960_v31, 0.0  ;;  %v2962_v63 = vmul.f32 %v8808_v16, %v10063_v59 }
0x187e   :  { %2968 = vadd.xlane.f32.xlu0 %v2967_v10  ;;  %v2985_v20 = vsel %vm1987_vm2, %v2963_v17, 0.0 }
0x187f   :  { %v2982_v22 = vsel %vm1987_vm2, %v2962_v63, 0.0 }
0x1881   :  { %2980 = vadd.xlane.f32.xlu1 %v2979_v14 }
0x1882   :  { %2977 = vadd.xlane.f32.xlu0 %v2976_v19 }
0x1885   :  { %2986 = vadd.xlane.f32.xlu1 %v2985_v20 }
0x1886   :  { %2983 = vadd.xlane.f32.xlu0 %v2982_v22 }
0x1902   :  { %v2972_v35 = vpop.xlane.xlu1 %2971 }
0x1903   :  { %v2966_v47 = vpop.xlane.xlu0 %2965  ;;  %v3009_v5 = vrot.slane %v2972_v35, %v10189_v0 }
0x1904   :  { %v3001_v28 = vrot.slane %v2966_v47, %v10189_v0 }
0x1906   :  { %v2975_v2 = vpop.xlane.xlu1 %2974 }
0x1907   :  { %v2969_v15 = vpop.xlane.xlu0 %2968  ;;  %v3013_v6 = vrot.slane %v2975_v2, %v10189_v0  ;;  %v10211_v2 = vsub.s32 1, %v10185_v32 }
0x1908   :  { %v3005_v13 = vrot.slane %v2969_v15, %v10189_v0  ;;  %v10214_v15 = vsub.s32 0, %v10185_v32 }
0x190a   :  { %v3031_v54 = vsel %vm3030_vm9, %v3005_v13, %v3001_v28  ;;  %v2981_v8 = vpop.xlane.xlu1 %2980 }
0x190b   :  { %v3033_v61 = vsel %vm3032_vm10, %v3009_v5, %v3031_v54  ;;  %v2978_v26 = vpop.xlane.xlu0 %2977  ;;  %v3021_v37 = vrot.slane %v2981_v8, %v10189_v0  ;;  %v10219_v54 = vsub.s32 2, %v10185_v32  ;;  %v10222_v8 = vsub.s32 4, %v10185_v32 }
0x190c   :  { %v3035_v42 = vsel %vm3034_vm11, %v3013_v6, %v3033_v61  ;;  %v3017_v60 = vrot.slane %v2978_v26, %v10189_v0 }
0x190e   :  { %v3037_v34 = vsel %vm3036_vm12, %v3017_v60, %v3035_v42  ;;  %v2987_v39 = vpop.xlane.xlu1 %2986  ;;  %v10227_v42 = vsub.s32 3, %v10185_v32  ;;  %v10230_v60 = vsub.s32 6, %v10185_v32 }
0x190f   :  { %v3029_v48 = vrot.slane %v2987_v39, %v10189_v0  ;;  %v2984_v44 = vpop.xlane.xlu0 %2983  ;;  %v3039_v7 = vsel %vm3038_vm13, %v3021_v37, %v3037_v34  ;;  %v10235_v39 = vsub.s32 5, %v10185_v32 }
0x1910   :  { %v3025_v51 = vrot.slane %v2984_v44, %v10189_v0  ;;  %v10239_v44 = vsub.s32 7, %v10185_v32  ;;  %v3158_v32 = vld [vmem:[%s12090_s16 + $0x40] sm:$0xff] }
0x1912   :  { %v3041_v41 = vsel %vm3040_vm14, %v3025_v51, %v3039_v7  ;;  %v3161_v51 = vld [vmem:[%s12090_s16 + $0x58] sm:$0xff]  ;;  %v3160_v7 = vld [vmem:[%s12090_s16 + $0x50] sm:$0xff] }
0x1913   :  { %v3043_v46 = vsel %vm3042_vm15, %v3029_v48, %v3041_v41  ;;  %8083 = vmatpush3.msra.mxu1 %v3161_v51 }
0x1914   :  { %v3045_v3 = vsel %vm2730_vm5, %v3043_v46, -1e+10  ;;  %8084 = vmatprep.subr.mxu1 %v9017_v1  ;;  %v3159_v46 = vld [vmem:[%s12090_s16 + $0x48] sm:$0xff] }
0x1915   :  { %v3047_v25 = vsel %vm12103_vm4, %v3045_v3, -inf  ;;  %8085 = vmatpush3.msra.mxu1 %v3160_v7 }
0x1916   :  { %v3048_v43 = vrot.slane %v3047_v25, 4  ;;  %8086 = vmatprep.subr.mxu1 %v9017_v1 }
0x1917   :  { %8087 = vmatpush3.msra.mxu1 %v3159_v46 }
0x1918   :  { %v3049_v52 = vmax.f32 %v3047_v25, %v3048_v43  ;;  %8088 = vmatprep.subr.mxu1 %v9017_v1  ;;  %v3157_v25 = vld [vmem:[%s12090_s16 + $0x38] sm:$0xff]  ;;  %v3156_v43 = vld [vmem:[%s12090_s16 + $0x30] sm:$0xff] }
0x1919   :  { %8089 = vmatpush3.msra.mxu1 %v3158_v32 }
0x191a   :  { %v3050_v36 = vrot.slane %v3049_v52, 2  ;;  %8090 = vmatprep.subr.mxu1 %v9017_v1 }
0x191b   :  { %8091 = vmatpush3.msra.mxu1 %v3157_v25 }
0x191c   :  { %v3051_v55 = vmax.f32 %v3049_v52, %v3050_v36  ;;  %8092 = vmatprep.subr.mxu1 %v9017_v1  ;;  %v3155_v52 = vld [vmem:[%s12090_s16 + $0x28] sm:$0xff]  ;;  %v3154_v36 = vld [vmem:[%s12090_s16 + $0x20] sm:$0xff] }
0x191d   :  { %8093 = vmatpush3.msra.mxu1 %v3156_v43 }
0x191e   :  { %v3052_v10 = vrot.slane %v3051_v55, 1  ;;  %8094 = vmatprep.subr.mxu1 %v9017_v1 }
0x191f   :  { %8095 = vmatpush3.msra.mxu1 %v3155_v52 }
0x1920   :  { %v3053_v31 = vmax.f32 %v3051_v55, %v3052_v10  ;;  %8096 = vmatprep.subr.mxu1 %v9017_v1  ;;  %v3153_v55 = vld [vmem:[%s12090_s16 + $0x18] sm:$0xff]  ;;  %v3152_v10 = vld [vmem:[%s12090_s16 + $0x10] sm:$0xff] }
0x1921   :  { %8097 = vmatpush3.msra.mxu1 %v3154_v36 }
0x1922   :  { %v3054_v16 = vsub.f32 %v3045_v3, %v3053_v31  ;;  %v7190_v3 = vld [vmem:[%s12092_s18] ss:$0 sm:$0xff]  ;;  %8098 = vmatprep.subr.mxu1 %v9017_v1  ;;  %v3151_v31 = vld [vmem:[%s12090_s16 + $0x8] sm:$0xff] }
0x1923   :  { %8099 = vmatpush3.msra.mxu1 %v3153_v55 }
0x1924   :  { %v3055_v14 = vmul.f32 1.442695, %v3054_v16  ;;  %8100 = vmatprep.subr.mxu1 %v9017_v1 }
0x1925   :  { %8101 = vmatpush3.msra.mxu1 %v3152_v10 }
0x1926   :  { %8809 = vpow2.f32 %v3055_v14  ;;  %8102 = vmatprep.subr.mxu1 %v9017_v1 }
0x1927   :  { %8103 = vmatpush3.msra.mxu1 %v3151_v31 }
0x1928   :  { %8104 = vmatprep.subr.mxu1 %v9017_v1 }
0x1933   :  { %v8810_v17 = vpop.eup %8809 }
0x1934   :  { %v3057_v19 = vsel %vm12103_vm4, %v8810_v17, 0.0 }
0x1935   :  { %v3058_v63 = vrot.slane %v3057_v19, 4 }
0x1937   :  { %v3059_v20 = vadd.f32 %v3058_v63, %v3057_v19 }
0x1939   :  { %v3060_v22 = vrot.slane %v3059_v20, 2 }
0x193b   :  { %v3061_v24 = vadd.f32 %v3060_v22, %v3059_v20 }
0x193d   :  { %v3062_v35 = vrot.slane %v3061_v24, 1 }
0x193f   :  { %v3063_v47 = vadd.f32 %v3062_v35, %v3061_v24 }
0x1941   :  { %8811 = vrcp.f32 %v3063_v47  ;;  %v7197_v47 = vld [vmem:[%s12118_s7 + $0x2] sm:$0x3] }
0x194e   :  { %v8812_v28 = vpop.eup %8811 }
0x194f   :  { %v3065_v13 = vmul.f32 %v8812_v28, %v8810_v17 }
0x1951   :  { %v3076_v5 = vrot.slane %v3065_v13, %v10211_v2  ;;  %v3069_v6 = vrot.slane %v3065_v13, %v10214_v15  ;;  %v3083_v61 = vrot.slane %v3065_v13, %v10219_v54  ;;  %v3097_v26 = vrot.slane %v3065_v13, %v10222_v8 }
0x1952   :  { %v3090_v37 = vrot.slane %v3065_v13, %v10227_v42  ;;  %v3111_v34 = vrot.slane %v3065_v13, %v10230_v60  ;;  %v3104_v48 = vrot.slane %v3065_v13, %v10235_v39  ;;  %v3118_v41 = vrot.slane %v3065_v13, %v10239_v44 }
0x1953   :  { %3078 = vbcast.lane.b32.xlu1 %v3076_v5, 256  ;;  %3071 = vbcast.lane.b32.xlu0 %v3069_v6, 256  ;;  %v2832_v6 = vld [vmem:[#allocation4] sm:$0x3] }
0x1954   :  { %3382 = vst.msk [vmem:[#allocation4] sm:$0x3] %vm1987_vm2, %v7197_v47 }
0x1957   :  { %3085 = vbcast.lane.b32.xlu1 %v3083_v61, 256  ;;  %3099 = vbcast.lane.b32.xlu0 %v3097_v26, 256 }
0x195b   :  { %3092 = vbcast.lane.b32.xlu1 %v3090_v37, 256  ;;  %3113 = vbcast.lane.b32.xlu0 %v3111_v34, 256  ;;  %v3150_v37 = vld [vmem:[%s12090_s16] sm:$0xff] }
0x195c   :  { %8105 = vmatpush3.msra.mxu1 %v3150_v37 }
0x195f   :  { %3106 = vbcast.lane.b32.xlu1 %v3104_v48, 256 }
0x1963   :  { %3120 = vbcast.lane.b32.xlu1 %v3118_v41, 256 }
0x1967   :  { %2916 = vrot.lane.b32.xlu1 %v7190_v3, %s9024_s12 }
0x19c5   :  { %v3079_v16 = vpop.permute.xlu1 %3078  ;;  %v3072_v14 = vpop.permute.xlu0 %3071 }
0x19c6   :  { %v3123_v17 = vmul.f32 %v3079_v16, %v9884_v56  ;;  %v3122_v19 = vmul.f32 %v3072_v14, %v9895_v57 }
0x19c8   :  { %v3131_v22 = vsel %vm12102_vm3, %v3123_v17, 0.0  ;;  %v3130_v24 = vsel %vm12102_vm3, %v3122_v19, 0.0 }
0x19c9   :  { %v3086_v63 = vpop.permute.xlu1 %3085  ;;  %v3100_v20 = vpop.permute.xlu0 %3099  ;;  %v3132_v13 = vadd.f32 %v3131_v22, %v3130_v24  ;;  %v7193_v22 = vld [vmem:[%s12091_s17] ss:$0 sm:$0xff] }
0x19ca   :  { %v3124_v35 = vmul.f32 %v3086_v63, %v9865_v38  ;;  %v3126_v61 = vmul.f32 %v3100_v20, %v9886_v53 }
0x19cc   :  { %v3133_v28 = vsel %vm12102_vm3, %v3124_v35, 0.0  ;;  %v3137_v46 = vsel %vm12102_vm3, %v3126_v61, 0.0 }
0x19cd   :  { %v3093_v5 = vpop.permute.xlu1 %3092  ;;  %v3134_v34 = vadd.f32 %v3133_v28, %v3132_v13  ;;  %v3114_v48 = vpop.permute.xlu0 %3113 }
0x19ce   :  { %v3125_v26 = vmul.f32 %v3093_v5, %v9901_v58  ;;  %v3128_v32 = vmul.f32 %v3114_v48, %v9903_v11 }
0x19d0   :  { %v3135_v51 = vsel %vm12102_vm3, %v3125_v26, 0.0  ;;  %v3141_v55 = vsel %vm12102_vm3, %v3128_v32, 0.0 }
0x19d1   :  { %v3136_v7 = vadd.f32 %v3135_v51, %v3134_v34  ;;  %v3107_v41 = vpop.permute.xlu1 %3106 }
0x19d2   :  { %v3127_v3 = vmul.f32 %v3107_v41, %v9913_v9  ;;  %v3299_v41 = vld [vmem:[%s12094_s20 + $0x70] sm:$0xff] }
0x19d3   :  { %v3138_v25 = vadd.f32 %v3137_v46, %v3136_v7  ;;  %v3300_v7 = vld [vmem:[%s12094_s20 + $0x78] sm:$0xff] }
0x19d4   :  { %v3139_v43 = vsel %vm12102_vm3, %v3127_v3, 0.0  ;;  %8110 = vmatpush3.msra.mxu0 %v3300_v7  ;;  %v3296_v46 = vld [vmem:[%s12094_s20 + $0x58] sm:$0xff]  ;;  %v3295_v3 = vld [vmem:[%s12094_s20 + $0x50] sm:$0xff] }
0x19d5   :  { %v3140_v52 = vadd.f32 %v3139_v43, %v3138_v25  ;;  %v3121_v36 = vpop.permute.xlu1 %3120  ;;  %8111 = vmatprep.subr.mxu0 %v9017_v1  ;;  %v3294_v25 = vld [vmem:[%s12094_s20 + $0x48] sm:$0xff]  ;;  %v3293_v43 = vld [vmem:[%s12094_s20 + $0x40] sm:$0xff] }
0x19d6   :  { %v3129_v10 = vmul.f32 %v3121_v36, %v10048_v18  ;;  %8112 = vmatpush3.msra.mxu0 %v3299_v41  ;;  %v3291_v36 = vld [vmem:[%s12094_s20 + $0x30] sm:$0xff] }
0x19d7   :  { %v3142_v31 = vadd.f32 %v3141_v55, %v3140_v52  ;;  %8113 = vmatprep.subr.mxu0 %v9017_v1  ;;  %v3292_v52 = vld [vmem:[%s12094_s20 + $0x38] sm:$0xff]  ;;  %v3290_v55 = vld [vmem:[%s12094_s20 + $0x28] sm:$0xff] }
0x19d8   :  { %v3143_v16 = vsel %vm12102_vm3, %v3129_v10, 0.0  ;;  %v3289_v10 = vld [vmem:[%s12094_s20 + $0x20] sm:$0xff] }
0x19d9   :  { %v3144_v14 = vadd.f32 %v3143_v16, %v3142_v31  ;;  %v2917_v17 = vpop.permute.xlu1 %2916  ;;  %v3288_v31 = vld [vmem:[%s12094_s20 + $0x18] sm:$0xff]  ;;  %v3287_v16 = vld [vmem:[%s12094_s20 + $0x10] sm:$0xff] }
0x19da   :  { %v2919_v19 = vadd.f32 %v2917_v17, %v10141_v27  ;;  %v3285_v17 = vld [vmem:[%s12094_s20] sm:$0xff] }
0x19db   :  { %3146 = vrot.lane.b32.xlu0 %v3144_v14, %s9024_s12  ;;  %v3286_v14 = vld [vmem:[%s12094_s20 + $0x8] sm:$0xff] }
0x19dc   :  { %3254 = vrot.lane.b32.xlu1 %v2919_v19, %s9024_s12 }
0x19df   :  { %3244 = vrot.lane.b32.xlu0 %v2919_v19, %s9021_s26 }
0x1a4d   :  { %v10317_v63 = vpop.permute.xlu0 %3146 }
0x1a4e   :  { %v3149_v20 = vsel %vm99_vm1, %v2832_v6, %v10317_v63  ;;  %v3255_v37 = vpop.permute.xlu1 %3254 }
0x1a4f   :  { %8107 = vmatmul.mubr.msk.f32.vlgmr.msra.gmra.mxu1 %vm12101_vm6, %v3149_v20 }
0x1a51   :  { %v3245_v35 = vpop.permute.xlu0 %3244 }
0x1b0f   :  { %v3239_v24 = vpop.f32.mrf.mxu1 }
0x1b10   :  { %v3240_v27 = vadd.f32 %v7193_v22, %v3239_v24 }
0x1b11   :  { %v8108_v47 = vpop.f32.mrf.mxu1 }
0x1b12   :  { %v3247_v28 = vadd.f32 %v3245_v35, %v3240_v27 }
0x1b14   :  { %v7195_v13 = vmul.f32 -1.442695, %v3247_v28 }
0x1b16   :  { %8813 = vpow2.f32 %v7195_v13 }
0x1b23   :  { %v8814_v5 = vpop.eup %8813 }
0x1b24   :  { %v3251_v61 = vadd.f32 1.0, %v8814_v5 }
0x1b26   :  { %8815 = vrcp.f32 %v3251_v61  ;;  %v7196_v61 = vld [vmem:[%s12095_s21] ss:$0 sm:$0xff] }
0x1b33   :  { %v10325_v26 = vpop.eup %8815 }
0x1b34   :  { %v3257_v34 = vmul.f32 %v10325_v26, %v3255_v37  ;;  %v3264_v20 = vsub.f32 1.0, %v10325_v26 }
0x1b36   :  { %3259 = vrot.lane.b32.xlu0 %v3257_v34, %s9020_s25 }
0x1b3a   :  { %3270 = vrot.lane.b32.xlu0 %v10095_v21, %s9024_s12  ;;  %v3298_v21 = vld [vmem:[%s12094_s20 + $0x68] sm:$0xff] }
0x1b3b   :  { %8114 = vmatpush3.msra.mxu0 %v3298_v21 }
0x1b3c   :  { %8115 = vmatprep.subr.mxu0 %v9017_v1 }
0x1b3e   :  { %3280 = vrot.lane.b32.xlu0 %v2832_v6, %s9021_s26  ;;  %v3297_v6 = vld [vmem:[%s12094_s20 + $0x60] sm:$0xff] }
0x1b3f   :  { %8116 = vmatpush3.msra.mxu0 %v3297_v6 }
0x1b40   :  { %8117 = vmatprep.subr.mxu0 %v9017_v1 }
0x1b41   :  { %8118 = vmatpush3.msra.mxu0 %v3296_v46 }
0x1b42   :  { %8119 = vmatprep.subr.mxu0 %v9017_v1 }
0x1b43   :  { %8120 = vmatpush3.msra.mxu0 %v3295_v3 }
0x1b44   :  { %8121 = vmatprep.subr.mxu0 %v9017_v1 }
0x1b45   :  { %8122 = vmatpush3.msra.mxu0 %v3294_v25 }
0x1b46   :  { %8123 = vmatprep.subr.mxu0 %v9017_v1 }
0x1b47   :  { %8124 = vmatpush3.msra.mxu0 %v3293_v43 }
0x1b48   :  { %8125 = vmatprep.subr.mxu0 %v9017_v1 }
0x1b49   :  { %8126 = vmatpush3.msra.mxu0 %v3292_v52 }
0x1b4a   :  { %8127 = vmatprep.subr.mxu0 %v9017_v1 }
0x1b4b   :  { %8128 = vmatpush3.msra.mxu0 %v3291_v36 }
0x1b4c   :  { %8129 = vmatprep.subr.mxu0 %v9017_v1 }
0x1b4d   :  { %8130 = vmatpush3.msra.mxu0 %v3290_v55 }
0x1b4e   :  { %8131 = vmatprep.subr.mxu0 %v9017_v1 }
0x1b4f   :  { %8132 = vmatpush3.msra.mxu0 %v3289_v10 }
0x1b50   :  { %8133 = vmatprep.subr.mxu0 %v9017_v1 }
0x1b51   :  { %8134 = vmatpush3.msra.mxu0 %v3288_v31 }
0x1b52   :  { %8135 = vmatprep.subr.mxu0 %v9017_v1 }
0x1b53   :  { %8136 = vmatpush3.msra.mxu0 %v3287_v16 }
0x1b54   :  { %8137 = vmatprep.subr.mxu0 %v9017_v1 }
0x1b55   :  { %8138 = vmatpush3.msra.mxu0 %v3286_v14 }
0x1b56   :  { %8139 = vmatprep.subr.mxu0 %v9017_v1 }
0x1b57   :  { %8140 = vmatpush3.msra.mxu0 %v3285_v17 }
0x1ba8   :  { %v3260_v48 = vpop.permute.xlu0 %3259 }
0x1ba9   :  { %v3262_v51 = vadd.f32 %v3260_v48, %v3240_v27 }
0x1bab   :  { %8817 = vtanh.f32 %v3262_v51 }
0x1bac   :  { %v3271_v19 = vpop.permute.xlu0 %3270 }
0x1bad   :  { %v3273_v24 = vmul.f32 %v10325_v26, %v3271_v19 }
0x1bb0   :  { %v3281_v47 = vpop.permute.xlu0 %3280 }
0x1bb8   :  { %v8818_v32 = vpop.eup %8817 }
0x1bb9   :  { %3266 = vrot.lane.b32.xlu1 %v8818_v32, %s9021_s26 }
0x1c2b   :  { %v3267_v22 = vpop.permute.xlu1 %3266 }
0x1c2c   :  { %v3269_v27 = vmul.f32 %v3267_v22, %v3264_v20 }
0x1c2e   :  { %v10398_v35 = vadd.f32 %v3273_v24, %v3269_v27 }
0x1c30   :  { %3276 = vrot.lane.b32.xlu1 %v10398_v35, %s9021_s26 }
0x1ca2   :  { %v3277_v28 = vpop.permute.xlu1 %3276 }
0x1ca3   :  { %v3283_v13 = vsel %vm99_vm1, %v3277_v28, %v10317_v63 }
0x1ca4   :  { %v3284_v5 = vsel %vm12101_vm6, %v3283_v13, %v3281_v47 }
0x1ca5   :  { %8142 = vmatmul.mubr.f32.vlgmr.msra.gmra.mxu0 %v3284_v5 }
0x1d64   :  { %3387 = sbr.rel (%p7199_p6) target bundleno = 8006 (0x1f46), region = 101 }
0x1d65   :  { %v3374_v26 = vpop.f32.mrf.mxu0 }
0x1d66   :  { %v3375_v37 = vadd.f32 %v7196_v61, %v3374_v26 }
0x1d67   :  { %v8143_v34 = vpop.f32.mrf.mxu0 }
0x1d68   :  { %3379 = vst.msk [vmem:[#allocation8 + $0x2] sm:$0x3] %vm1987_vm2, %v3375_v37 }
0x1d69   :  { %v3388_v48 = vsel %vm1987_vm2, %v3375_v37, -inf  ;;  %v3404_v63 = vld [vmem:[%s12093_s19 + $0x20] sm:$0xff]  ;;  %v9025_v51 = vmov 0.0   ;;  %v3403_v7 = vld [vmem:[%s12093_s19 + $0x18] sm:$0xff]  ;;  %v3402_v41 = vld [vmem:[%s12093_s19 + $0x10] sm:$0xff]  ;;  %v3391_v6 = vcvt.s32.f32 %v10183_v29  ;;  %vm9026_vm8 = vmmov 0  }
0x1d6a   :  { %3389 = vmax.xlane.f32.xlu0 %v3388_v48  ;;  %8144 = vmatprep.subr.mxu0 %v9025_v51  ;;  %v3401_v21 = vld [vmem:[%s12093_s19 + $0x8] sm:$0xff]  ;;  %v3400_v25 = vld [vmem:[%s12093_s19] sm:$0xff]  ;;  %vm3405_vm6 = vcmask 326656  }
0x1d6b   :  { %8145 = vmatpush3.msra.mxu0 %v3404_v63  ;;  %8154 = vmatprep.mubr.msk.f32.mxu0 %vm9026_vm8, %v9025_v51 }
0x1d6c   :  { %8146 = vmatprep.subr.mxu0 %v9025_v51 }
0x1d6d   :  { %8147 = vmatpush3.msra.mxu0 %v3403_v7 }
0x1d6e   :  { %8148 = vmatprep.subr.mxu0 %v9025_v51 }
0x1d6f   :  { %8149 = vmatpush3.msra.mxu0 %v3402_v41 }
0x1d70   :  { %8150 = vmatprep.subr.mxu0 %v9025_v51 }
0x1d71   :  { %8151 = vmatpush3.msra.mxu0 %v3401_v21 }
0x1d72   :  { %8152 = vmatprep.subr.mxu0 %v9025_v51 }
0x1d73   :  { %8153 = vmatpush3.msra.mxu0 %v3400_v25 }
0x1df3   :  { %v3390_v46 = vpop.xlane.xlu0 %3389 }
0x1df4   :  { %vm3392_vm7 = vcmp.ge.f32.partialorder %v3375_v37, %v3390_v46 }
0x1df5   :  { %v3393_v32 = vsel %vm3392_vm7, %v3391_v6, 32.0 }
0x1df6   :  { %v3394_v3 = vsel %vm1987_vm2, %v3393_v32, inf }
0x1df7   :  { %3395 = vmin.xlane.f32.xlu0 %v3394_v3 }
0x1e80   :  { %v3396_v43 = vpop.xlane.xlu0 %3395 }
0x1e81   :  { %vm3397_vm3 = vcmp.eq.f32.partialorder %v3391_v6, %v3396_v43 }
0x1e82   :  { %v7200_v52 = vsel %vm3397_vm3, 1.0, %v9025_v51 }
0x1e83   :  { %8155 = vmatmul.mubr.msk.f32.vlgmr.msra.gmra.mxu0 %vm3405_vm6, %v7200_v52 }
0x1f43   :  { %v3475_v36 = vpop.f32.mrf.mxu0 }
0x1f44   :  { %3479 = vst.msk [vmem:[#allocation4] sm:$0x3] %vm1987_vm2, %v3475_v36 }
0x1f45   :  { %v8156_v55 = vpop.f32.mrf.mxu0 }
0x1f46 PF:  { %8157 = vmatprep.subr.mxu1 %v9017_v1  ;;  %v3484_v10 = vld [vmem:[%s12089_s15 + $0x18] sm:$0xff]  ;;  %v3483_v31 = vld [vmem:[%s12089_s15 + $0x10] sm:$0xff]  ;;  %8165 = vmatprep.mubr.msk.f32.mxu1 %vm9018_vm0, %v9017_v1  ;;  %v3482_v16 = vld [vmem:[%s12089_s15 + $0x8] sm:$0xff]  ;;  %vm12119_vm3 = vcmask 517120   ;;  %s12121_s5 = sld [smem:[#allocation16_spill]] }
0x1f47   :  { %8158 = vmatpush3.msra.mxu1 %v3484_v10  ;;  %8195 = vmatprep.subr.mxu0 %v9017_v1  ;;  %v3481_v14 = vld [vmem:[%s12089_s15] sm:$0xff]  ;;  %vm12120_vm6 = vmmov %vm12119_vm3  ;;  %s7209_s30 = sld [smem:[#allocation5 + $0x2]] }
0x1f48   :  { %8159 = vmatprep.subr.mxu1 %v9017_v1  ;;  %8227 = vmatprep.mubr.msk.f32.mxu0 %vm9018_vm0, %v9017_v1  ;;  %vm12122_vm7 = vmmov %vm12119_vm3 }
0x1f49   :  { %8160 = vmatpush3.msra.mxu1 %v3483_v31  ;;  %vm12123_vm8 = vmmov %vm12119_vm3 }
0x1f4a   :  { %8161 = vmatprep.subr.mxu1 %v9017_v1 }
0x1f4b   :  { %8162 = vmatpush3.msra.mxu1 %v3482_v16 }
0x1f4c   :  { %8163 = vmatprep.subr.mxu1 %v9017_v1 }
0x1f4d   :  { %8164 = vmatpush3.msra.mxu1 %v3481_v14  ;;  %p7210_p7 = scmp.ne.s32.totalorder %s7209_s30, 0 }
0x1f4e   :  { %8166 = vmatmul.mubr.msk.f32.vlgmr.msra.gmra.mxu1 %vm99_vm1, %v3277_v28  ;;  %8168 = vmatprep.subr.mxu1 %v9017_v1 }
0x1f4f   :  { %8192 = vmatprep.mubr.msk.f32.mxu1 %vm9018_vm0, %v9017_v1 }
0x200e   :  { %v10453_v17 = vpop.f32.mrf.mxu1 }
0x200f   :  { %v3569_v19 = vadd.f32 %v10453_v17, %v10078_v23  ;;  %v3567_v20 = vadd.f32 %v10453_v17, %v10072_v12  ;;  %v3570_v22 = vadd.f32 %v10453_v17, %v10076_v33  ;;  %v3568_v24 = vadd.f32 %v10453_v17, %v10070_v4 }
0x2010   :  { %v8167_v27 = vpop.f32.mrf.mxu1  ;;  %v3572_v47 = vadd.f32 %v10453_v17, %v10082_v40  ;;  %v3571_v28 = vadd.f32 %v10453_v17, %v10084_v30  ;;  %v3574_v34 = vadd.f32 %v10453_v17, %v10093_v49  ;;  %v3573_v63 = vadd.f32 %v10453_v17, %v10087_v50 }
0x2011   :  { %v3577_v13 = vadd.f32 %v10058_v62, %v3569_v19  ;;  %v3575_v5 = vadd.f32 %v10058_v62, %v3567_v20  ;;  %v3578_v61 = vadd.f32 %v10058_v62, %v3570_v22  ;;  %v3576_v26 = vadd.f32 %v10058_v62, %v3568_v24 }
0x2012   :  { %v3580_v37 = vadd.f32 %v10058_v62, %v3572_v47  ;;  %v3579_v48 = vadd.f32 %v10058_v62, %v3571_v28  ;;  %v3582_v51 = vadd.f32 %v10058_v62, %v3574_v34  ;;  %v3581_v7 = vadd.f32 %v10058_v62, %v3573_v63 }
0x2013   :  { %8819 = vtanh.f32 %v3577_v13 }
0x2014   :  { %8821 = vtanh.f32 %v3575_v5 }
0x2015   :  { %8823 = vtanh.f32 %v3578_v61 }
0x2016   :  { %8825 = vtanh.f32 %v3576_v26 }
0x2017   :  { %8827 = vtanh.f32 %v3580_v37 }
0x2018   :  { %8829 = vtanh.f32 %v3579_v48 }
0x2019   :  { %8831 = vtanh.f32 %v3582_v51 }
0x201a   :  { %8833 = vtanh.f32 %v3581_v7 }
0x2020   :  { %v8820_v41 = vpop.eup %8819 }
0x2021   :  { %v8822_v21 = vpop.eup %8821  ;;  %v3593_v6 = vmul.f32 %v8820_v41, %v10063_v59 }
0x2022   :  { %v8824_v46 = vpop.eup %8823  ;;  %v3591_v32 = vmul.f32 %v8822_v21, %v10063_v59 }
0x2023   :  { %v8826_v3 = vpop.eup %8825  ;;  %v3605_v25 = vsel %vm1987_vm2, %v3593_v6, 0.0  ;;  %v3594_v43 = vmul.f32 %v8824_v46, %v10063_v59 }
0x2024   :  { %v8828_v52 = vpop.eup %8827  ;;  %3606 = vadd.xlane.f32.xlu1 %v3605_v25  ;;  %v3599_v36 = vsel %vm1987_vm2, %v3591_v32, 0.0  ;;  %v3592_v55 = vmul.f32 %v8826_v3, %v10063_v59 }
0x2025   :  { %v8830_v10 = vpop.eup %8829  ;;  %3600 = vadd.xlane.f32.xlu0 %v3599_v36  ;;  %v3608_v31 = vsel %vm1987_vm2, %v3594_v43, 0.0  ;;  %v3596_v16 = vmul.f32 %v8828_v52, %v10063_v59 }
0x2026   :  { %v8832_v14 = vpop.eup %8831  ;;  %v3602_v19 = vsel %vm1987_vm2, %v3592_v55, 0.0  ;;  %v3595_v20 = vmul.f32 %v8830_v10, %v10063_v59 }
0x2027   :  { %v8834_v22 = vpop.eup %8833  ;;  %v3614_v24 = vsel %vm1987_vm2, %v3596_v16, 0.0  ;;  %v3598_v27 = vmul.f32 %v8832_v14, %v10063_v59 }
0x2028   :  { %3609 = vadd.xlane.f32.xlu1 %v3608_v31  ;;  %v3611_v47 = vsel %vm1987_vm2, %v3595_v20, 0.0  ;;  %v3597_v28 = vmul.f32 %v8834_v22, %v10063_v59 }
0x2029   :  { %3603 = vadd.xlane.f32.xlu0 %v3602_v19  ;;  %v3620_v13 = vsel %vm1987_vm2, %v3598_v27, 0.0 }
0x202a   :  { %v3617_v5 = vsel %vm1987_vm2, %v3597_v28, 0.0 }
0x202c   :  { %3615 = vadd.xlane.f32.xlu1 %v3614_v24 }
0x202d   :  { %3612 = vadd.xlane.f32.xlu0 %v3611_v47 }
0x2030   :  { %3621 = vadd.xlane.f32.xlu1 %v3620_v13 }
0x2031   :  { %3618 = vadd.xlane.f32.xlu0 %v3617_v5 }
0x20ad   :  { %v3607_v61 = vpop.xlane.xlu1 %3606 }
0x20ae   :  { %v3601_v26 = vpop.xlane.xlu0 %3600  ;;  %v3642_v51 = vrot.slane %v3607_v61, %v10189_v0 }
0x20af   :  { %v3634_v48 = vrot.slane %v3601_v26, %v10189_v0 }
0x20b1   :  { %v3610_v37 = vpop.xlane.xlu1 %3609 }
0x20b2   :  { %v3604_v34 = vpop.xlane.xlu0 %3603  ;;  %v3646_v7 = vrot.slane %v3610_v37, %v10189_v0 }
0x20b3   :  { %v3638_v63 = vrot.slane %v3604_v34, %v10189_v0 }
0x20b5   :  { %v3663_v41 = vsel %vm3030_vm9, %v3638_v63, %v3634_v48  ;;  %v3616_v21 = vpop.xlane.xlu1 %3615 }
0x20b6   :  { %v3664_v6 = vsel %vm3032_vm10, %v3642_v51, %v3663_v41  ;;  %v3613_v46 = vpop.xlane.xlu0 %3612  ;;  %v3654_v25 = vrot.slane %v3616_v21, %v10189_v0 }
0x20b7   :  { %v3665_v32 = vsel %vm3034_vm11, %v3646_v7, %v3664_v6  ;;  %v3650_v3 = vrot.slane %v3613_v46, %v10189_v0 }
0x20b9   :  { %v3666_v43 = vsel %vm3036_vm12, %v3650_v3, %v3665_v32  ;;  %v3622_v52 = vpop.xlane.xlu1 %3621 }
0x20ba   :  { %v3662_v36 = vrot.slane %v3622_v52, %v10189_v0  ;;  %v3619_v55 = vpop.xlane.xlu0 %3618  ;;  %v3667_v31 = vsel %vm3038_vm13, %v3654_v25, %v3666_v43 }
0x20bb   :  { %v3658_v10 = vrot.slane %v3619_v55, %v10189_v0  ;;  %v3786_v55 = vld [vmem:[%s12090_s16 + $0x58] sm:$0xff] }
0x20bc   :  { %8169 = vmatpush3.msra.mxu1 %v3786_v55 }
0x20bd   :  { %v3668_v16 = vsel %vm3040_vm14, %v3658_v10, %v3667_v31  ;;  %v3785_v10 = vld [vmem:[%s12090_s16 + $0x50] sm:$0xff]  ;;  %8170 = vmatprep.subr.mxu1 %v9017_v1 }
0x20be   :  { %v3669_v14 = vsel %vm3042_vm15, %v3662_v36, %v3668_v16  ;;  %v3784_v16 = vld [vmem:[%s12090_s16 + $0x48] sm:$0xff]  ;;  %8171 = vmatpush3.msra.mxu1 %v3785_v10 }
0x20bf   :  { %v3671_v19 = vsel %vm2730_vm5, %v3669_v14, -1e+10  ;;  %8172 = vmatprep.subr.mxu1 %v9017_v1  ;;  %v3783_v14 = vld [vmem:[%s12090_s16 + $0x40] sm:$0xff] }
0x20c0   :  { %v3672_v20 = vsel %vm12103_vm4, %v3671_v19, -inf  ;;  %8173 = vmatpush3.msra.mxu1 %v3784_v16 }
0x20c1   :  { %v3673_v22 = vrot.slane %v3672_v20, 4  ;;  %8174 = vmatprep.subr.mxu1 %v9017_v1 }
0x20c2   :  { %8175 = vmatpush3.msra.mxu1 %v3783_v14 }
0x20c3   :  { %v3674_v24 = vmax.f32 %v3672_v20, %v3673_v22  ;;  %v3782_v20 = vld [vmem:[%s12090_s16 + $0x38] sm:$0xff]  ;;  %8176 = vmatprep.subr.mxu1 %v9017_v1  ;;  %v3781_v22 = vld [vmem:[%s12090_s16 + $0x30] sm:$0xff] }
0x20c4   :  { %8177 = vmatpush3.msra.mxu1 %v3782_v20 }
0x20c5   :  { %v3675_v27 = vrot.slane %v3674_v24, 2  ;;  %8178 = vmatprep.subr.mxu1 %v9017_v1 }
0x20c6   :  { %8179 = vmatpush3.msra.mxu1 %v3781_v22 }
0x20c7   :  { %v3676_v47 = vmax.f32 %v3674_v24, %v3675_v27  ;;  %v3780_v24 = vld [vmem:[%s12090_s16 + $0x28] sm:$0xff]  ;;  %8180 = vmatprep.subr.mxu1 %v9017_v1  ;;  %v3779_v27 = vld [vmem:[%s12090_s16 + $0x20] sm:$0xff] }
0x20c8   :  { %8181 = vmatpush3.msra.mxu1 %v3780_v24 }
0x20c9   :  { %v3677_v28 = vrot.slane %v3676_v47, 1  ;;  %8182 = vmatprep.subr.mxu1 %v9017_v1 }
0x20ca   :  { %8183 = vmatpush3.msra.mxu1 %v3779_v27 }
0x20cb   :  { %v3678_v13 = vmax.f32 %v3676_v47, %v3677_v28  ;;  %v3778_v47 = vld [vmem:[%s12090_s16 + $0x18] sm:$0xff]  ;;  %8184 = vmatprep.subr.mxu1 %v9017_v1  ;;  %v3777_v28 = vld [vmem:[%s12090_s16 + $0x10] sm:$0xff] }
0x20cc   :  { %8185 = vmatpush3.msra.mxu1 %v3778_v47 }
0x20cd   :  { %v3679_v5 = vsub.f32 %v3671_v19, %v3678_v13  ;;  %v7203_v19 = vld [vmem:[%s12092_s18] ss:$0 sm:$0xff]  ;;  %8186 = vmatprep.subr.mxu1 %v9017_v1  ;;  %v3776_v13 = vld [vmem:[%s12090_s16 + $0x8] sm:$0xff] }
0x20ce   :  { %8187 = vmatpush3.msra.mxu1 %v3777_v28 }
0x20cf   :  { %v3680_v61 = vmul.f32 1.442695, %v3679_v5  ;;  %8188 = vmatprep.subr.mxu1 %v9017_v1 }
0x20d0   :  { %8189 = vmatpush3.msra.mxu1 %v3776_v13 }
0x20d1   :  { %8835 = vpow2.f32 %v3680_v61  ;;  %8190 = vmatprep.subr.mxu1 %v9017_v1 }
0x20de   :  { %v8836_v26 = vpop.eup %8835 }
0x20df   :  { %v3682_v37 = vsel %vm12103_vm4, %v8836_v26, 0.0  ;;  %vm12126_vm4 = vmmov %vm12119_vm3 }
0x20e0   :  { %v3683_v34 = vrot.slane %v3682_v37, 4 }
0x20e2   :  { %v3684_v48 = vadd.f32 %v3683_v34, %v3682_v37 }
0x20e4   :  { %v3685_v63 = vrot.slane %v3684_v48, 2 }
0x20e6   :  { %v3686_v51 = vadd.f32 %v3685_v63, %v3684_v48 }
0x20e8   :  { %v3687_v7 = vrot.slane %v3686_v51, 1 }
0x20ea   :  { %v3688_v41 = vadd.f32 %v3687_v7, %v3686_v51 }
0x20ec   :  { %8837 = vrcp.f32 %v3688_v41  ;;  %v7208_v41 = vld [vmem:[%s12121_s5 + $0x4] sm:$0x3] }
0x20f9   :  { %v8838_v21 = vpop.eup %8837 }
0x20fa   :  { %v3690_v6 = vmul.f32 %v8838_v21, %v8836_v26 }
0x20fc   :  { %v3701_v46 = vrot.slane %v3690_v6, %v10211_v2  ;;  %v3694_v32 = vrot.slane %v3690_v6, %v10214_v15  ;;  %v3708_v3 = vrot.slane %v3690_v6, %v10219_v54  ;;  %v3722_v25 = vrot.slane %v3690_v6, %v10222_v8 }
0x20fd   :  { %v3715_v43 = vrot.slane %v3690_v6, %v10227_v42  ;;  %v3736_v52 = vrot.slane %v3690_v6, %v10230_v60  ;;  %v3729_v36 = vrot.slane %v3690_v6, %v10235_v39  ;;  %v3743_v31 = vrot.slane %v3690_v6, %v10239_v44 }
0x20fe   :  { %3703 = vbcast.lane.b32.xlu1 %v3701_v46, 256  ;;  %3696 = vbcast.lane.b32.xlu0 %v3694_v32, 256  ;;  %v10579_v32 = vld [vmem:[#allocation4] sm:$0x3] }
0x20ff   :  { %4003 = vst.msk [vmem:[#allocation4] sm:$0x3] %vm1987_vm2, %v7208_v41 }
0x2102   :  { %3710 = vbcast.lane.b32.xlu1 %v3708_v3, 256  ;;  %3724 = vbcast.lane.b32.xlu0 %v3722_v25, 256 }
0x2106   :  { %3717 = vbcast.lane.b32.xlu1 %v3715_v43, 256  ;;  %3738 = vbcast.lane.b32.xlu0 %v3736_v52, 256  ;;  %v3775_v43 = vld [vmem:[%s12090_s16] sm:$0xff] }
0x2107   :  { %8191 = vmatpush3.msra.mxu1 %v3775_v43 }
0x210a   :  { %3731 = vbcast.lane.b32.xlu1 %v3729_v36, 256 }
0x210e   :  { %3745 = vbcast.lane.b32.xlu1 %v3743_v31, 256 }
0x2112   :  { %3563 = vrot.lane.b32.xlu1 %v7203_v19, %s9024_s12 }
0x2170   :  { %v3704_v5 = vpop.permute.xlu1 %3703  ;;  %v3697_v61 = vpop.permute.xlu0 %3696 }
0x2171   :  { %v3748_v26 = vmul.f32 %v3704_v5, %v9884_v56  ;;  %v3747_v37 = vmul.f32 %v3697_v61, %v9895_v57 }
0x2173   :  { %v3756_v63 = vsel %vm12119_vm3, %v3748_v26, 0.0  ;;  %v3755_v51 = vsel %vm12120_vm6, %v3747_v37, 0.0  ;;  %vm12124_vm6 = vmmov %vm12119_vm3 }
0x2174   :  { %v3711_v34 = vpop.permute.xlu1 %3710  ;;  %v3725_v48 = vpop.permute.xlu0 %3724  ;;  %v3757_v6 = vadd.f32 %v3756_v63, %v3755_v51  ;;  %v7204_v63 = vld [vmem:[%s12091_s17] ss:$0 sm:$0xff] }
0x2175   :  { %v3749_v7 = vmul.f32 %v3711_v34, %v9865_v38  ;;  %v3751_v3 = vmul.f32 %v3725_v48, %v9886_v53 }
0x2177   :  { %v3758_v21 = vsel %vm12122_vm7, %v3749_v7, 0.0  ;;  %v3762_v16 = vsel %vm12119_vm3, %v3751_v3, 0.0  ;;  %vm12125_vm7 = vmmov %vm12119_vm3 }
0x2178   :  { %v3718_v46 = vpop.permute.xlu1 %3717  ;;  %v3759_v52 = vadd.f32 %v3758_v21, %v3757_v6  ;;  %v3739_v36 = vpop.permute.xlu0 %3738 }
0x2179   :  { %v3750_v25 = vmul.f32 %v3718_v46, %v9901_v58  ;;  %v3753_v14 = vmul.f32 %v3739_v36, %v9903_v11 }
0x217b   :  { %v3760_v55 = vsel %vm12123_vm8, %v3750_v25, 0.0  ;;  %v3766_v47 = vsel %vm12125_vm7, %v3753_v14, 0.0  ;;  %vm12127_vm8 = vcmask 785408   ;;  %v3918_v14 = vld [vmem:[%s12094_s20 + $0x60] sm:$0xff] }
0x217c   :  { %v3761_v10 = vadd.f32 %v3760_v55, %v3759_v52  ;;  %v3732_v31 = vpop.permute.xlu1 %3731 }
0x217d   :  { %v3752_v19 = vmul.f32 %v3732_v31, %v9913_v9  ;;  %v3920_v31 = vld [vmem:[%s12094_s20 + $0x70] sm:$0xff] }
0x217e   :  { %v3763_v20 = vadd.f32 %v3762_v16, %v3761_v10  ;;  %v3921_v10 = vld [vmem:[%s12094_s20 + $0x78] sm:$0xff]  ;;  %v3919_v16 = vld [vmem:[%s12094_s20 + $0x68] sm:$0xff] }
0x217f   :  { %v3764_v22 = vsel %vm12124_vm6, %v3752_v19, 0.0  ;;  %8196 = vmatpush3.msra.mxu0 %v3921_v10  ;;  %v3917_v19 = vld [vmem:[%s12094_s20 + $0x58] sm:$0xff] }
0x2180   :  { %v3765_v24 = vadd.f32 %v3764_v22, %v3763_v20  ;;  %v3746_v27 = vpop.permute.xlu1 %3745  ;;  %8197 = vmatprep.subr.mxu0 %v9017_v1  ;;  %v3916_v22 = vld [vmem:[%s12094_s20 + $0x50] sm:$0xff] }
0x2181   :  { %v3754_v28 = vmul.f32 %v3746_v27, %v10048_v18  ;;  %8198 = vmatpush3.msra.mxu0 %v3920_v31  ;;  %v3914_v27 = vld [vmem:[%s12094_s20 + $0x40] sm:$0xff] }
0x2182   :  { %v3767_v13 = vadd.f32 %v3766_v47, %v3765_v24  ;;  %8199 = vmatprep.subr.mxu0 %v9017_v1  ;;  %v3915_v24 = vld [vmem:[%s12094_s20 + $0x48] sm:$0xff]  ;;  %v3913_v47 = vld [vmem:[%s12094_s20 + $0x38] sm:$0xff] }
0x2183   :  { %v3768_v5 = vsel %vm12126_vm4, %v3754_v28, 0.0  ;;  %8200 = vmatpush3.msra.mxu0 %v3919_v16  ;;  %v3912_v28 = vld [vmem:[%s12094_s20 + $0x30] sm:$0xff]  ;;  %vm12128_vm4 = vmmov %vm12127_vm8 }
0x2184   :  { %v3564_v61 = vpop.permute.xlu1 %3563  ;;  %v3769_v26 = vadd.f32 %v3768_v5, %v3767_v13  ;;  %8201 = vmatprep.subr.mxu0 %v9017_v1  ;;  %v3910_v13 = vld [vmem:[%s12094_s20 + $0x20] sm:$0xff]  ;;  %v3909_v5 = vld [vmem:[%s12094_s20 + $0x18] sm:$0xff] }
0x2185   :  { %v3566_v37 = vadd.f32 %v3564_v61, %v10453_v17  ;;  %8202 = vmatpush3.msra.mxu0 %v3918_v14  ;;  %v3908_v61 = vld [vmem:[%s12094_s20 + $0x10] sm:$0xff] }
0x2186   :  { %3771 = vrot.lane.b32.xlu0 %v3769_v26, %s9024_s12  ;;  %8203 = vmatprep.subr.mxu0 %v9017_v1  ;;  %v3907_v26 = vld [vmem:[%s12094_s20 + $0x8] sm:$0xff] }
0x2187   :  { %3878 = vrot.lane.b32.xlu1 %v3566_v37, %s9024_s12  ;;  %8204 = vmatpush3.msra.mxu0 %v3917_v19 }
0x2188   :  { %8205 = vmatprep.subr.mxu0 %v9017_v1 }
0x2189   :  { %8206 = vmatpush3.msra.mxu0 %v3916_v22 }
0x218a   :  { %3868 = vrot.lane.b32.xlu0 %v3566_v37, %s9021_s26  ;;  %8207 = vmatprep.subr.mxu0 %v9017_v1  ;;  %v3906_v37 = vld [vmem:[%s12094_s20] sm:$0xff] }
0x218b   :  { %8208 = vmatpush3.msra.mxu0 %v3915_v24 }
0x218c   :  { %8209 = vmatprep.subr.mxu0 %v9017_v1 }
0x218d   :  { %8210 = vmatpush3.msra.mxu0 %v3914_v27 }
0x218e   :  { %8211 = vmatprep.subr.mxu0 %v9017_v1 }
0x218f   :  { %8212 = vmatpush3.msra.mxu0 %v3913_v47 }
0x2190   :  { %8213 = vmatprep.subr.mxu0 %v9017_v1 }
0x2191   :  { %8214 = vmatpush3.msra.mxu0 %v3912_v28 }
0x2192   :  { %8215 = vmatprep.subr.mxu0 %v9017_v1 }
0x21f8   :  { %v10599_v34 = vpop.permute.xlu0 %3771 }
0x21f9   :  { %v3774_v48 = vsel %vm99_vm1, %v10579_v32, %v10599_v34  ;;  %v3879_v43 = vpop.permute.xlu1 %3878 }
0x21fa   :  { %8193 = vmatmul.mubr.msk.f32.vlgmr.msra.gmra.mxu1 %vm12127_vm8, %v3774_v48 }
0x21fc   :  { %v3869_v7 = vpop.permute.xlu0 %3868 }
0x22ba   :  { %v3863_v51 = vpop.f32.mrf.mxu1 }
0x22bb   :  { %v3864_v17 = vadd.f32 %v7204_v63, %v3863_v51 }
0x22bc   :  { %v8194_v41 = vpop.f32.mrf.mxu1 }
0x22bd   :  { %v3871_v21 = vadd.f32 %v3869_v7, %v3864_v17 }
0x22bf   :  { %v7206_v6 = vmul.f32 -1.442695, %v3871_v21 }
0x22c1   :  { %8839 = vpow2.f32 %v7206_v6 }
0x22ce   :  { %v8840_v46 = vpop.eup %8839 }
0x22cf   :  { %v3875_v3 = vadd.f32 1.0, %v8840_v46 }
0x22d1   :  { %8841 = vrcp.f32 %v3875_v3  ;;  %v7207_v3 = vld [vmem:[%s12095_s21] ss:$0 sm:$0xff] }
0x22de   :  { %v8842_v25 = vpop.eup %8841 }
0x22df   :  { %v3881_v52 = vmul.f32 %v8842_v25, %v3879_v43  ;;  %v3888_v48 = vsub.f32 1.0, %v8842_v25 }
0x22e1   :  { %3883 = vrot.lane.b32.xlu0 %v3881_v52, %s9020_s25 }
0x2353   :  { %v3884_v36 = vpop.permute.xlu0 %3883 }
0x2354   :  { %v3886_v55 = vadd.f32 %v3884_v36, %v3864_v17  ;;  %v3894_v17 = vmul.f32 %v8842_v25, %v10398_v35 }
0x2356   :  { %8843 = vtanh.f32 %v3886_v55 }
0x2363   :  { %v8844_v20 = vpop.eup %8843 }
0x2364   :  { %3890 = vrot.lane.b32.xlu1 %v8844_v20, %s9021_s26 }
0x2368   :  { %3901 = vrot.lane.b32.xlu1 %v10579_v32, %s9021_s26  ;;  %v3911_v32 = vld [vmem:[%s12094_s20 + $0x28] sm:$0xff] }
0x2369   :  { %8216 = vmatpush3.msra.mxu0 %v3911_v32 }
0x236a   :  { %8217 = vmatprep.subr.mxu0 %v9017_v1 }
0x236b   :  { %8218 = vmatpush3.msra.mxu0 %v3910_v13 }
0x236c   :  { %8219 = vmatprep.subr.mxu0 %v9017_v1 }
0x236d   :  { %8220 = vmatpush3.msra.mxu0 %v3909_v5 }
0x236e   :  { %8221 = vmatprep.subr.mxu0 %v9017_v1 }
0x236f   :  { %8222 = vmatpush3.msra.mxu0 %v3908_v61 }
0x2370   :  { %8223 = vmatprep.subr.mxu0 %v9017_v1 }
0x2371   :  { %8224 = vmatpush3.msra.mxu0 %v3907_v26 }
0x2372   :  { %8225 = vmatprep.subr.mxu0 %v9017_v1 }
0x2373   :  { %8226 = vmatpush3.msra.mxu0 %v3906_v37 }
0x23d6   :  { %v3891_v63 = vpop.permute.xlu1 %3890 }
0x23d7   :  { %v3893_v51 = vmul.f32 %v3891_v63, %v3888_v48 }
0x23d9   :  { %v10676_v7 = vadd.f32 %v3894_v17, %v3893_v51 }
0x23da   :  { %v3902_v41 = vpop.permute.xlu1 %3901 }
0x23db   :  { %3897 = vrot.lane.b32.xlu0 %v10676_v7, %s9021_s26 }
0x244d   :  { %v3898_v21 = vpop.permute.xlu0 %3897 }
0x244e   :  { %v3904_v6 = vsel %vm99_vm1, %v3898_v21, %v10599_v34 }
0x244f   :  { %v3905_v46 = vsel %vm12128_vm4, %v3904_v6, %v3902_v41 }
0x2450   :  { %8228 = vmatmul.mubr.f32.vlgmr.msra.gmra.mxu0 %v3905_v46 }
0x250f   :  { %4008 = sbr.rel (%p7210_p7) target bundleno = 9969 (0x26f1), region = 105 }
0x2510   :  { %v3995_v43 = vpop.f32.mrf.mxu0 }
0x2511   :  { %v3996_v35 = vadd.f32 %v7207_v3, %v3995_v43 }
0x2512   :  { %v8229_v25 = vpop.f32.mrf.mxu0 }
0x2513   :  { %4000 = vst.msk [vmem:[#allocation8 + $0x4] sm:$0x3] %vm1987_vm2, %v3996_v35 }
0x2514   :  { %v4009_v52 = vsel %vm1987_vm2, %v3996_v35, -inf  ;;  %v4025_v34 = vld [vmem:[%s12093_s19 + $0x20] sm:$0xff]  ;;  %v9027_v36 = vmov 0.0   ;;  %v4024_v55 = vld [vmem:[%s12093_s19 + $0x18] sm:$0xff]  ;;  %v4023_v10 = vld [vmem:[%s12093_s19 + $0x10] sm:$0xff]  ;;  %v4012_v16 = vcvt.s32.f32 %v10183_v29  ;;  %vm9028_vm6 = vmmov 0  }
0x2515   :  { %4010 = vmax.xlane.f32.xlu0 %v4009_v52  ;;  %8230 = vmatprep.subr.mxu0 %v9027_v36  ;;  %v4022_v31 = vld [vmem:[%s12093_s19 + $0x8] sm:$0xff]  ;;  %v4021_v22 = vld [vmem:[%s12093_s19] sm:$0xff]  ;;  %vm4026_vm7 = vcmask 326656  }
0x2516   :  { %8231 = vmatpush3.msra.mxu0 %v4025_v34  ;;  %8240 = vmatprep.mubr.msk.f32.mxu0 %vm9028_vm6, %v9027_v36 }
0x2517   :  { %8232 = vmatprep.subr.mxu0 %v9027_v36 }
0x2518   :  { %8233 = vmatpush3.msra.mxu0 %v4024_v55 }
0x2519   :  { %8234 = vmatprep.subr.mxu0 %v9027_v36 }
0x251a   :  { %8235 = vmatpush3.msra.mxu0 %v4023_v10 }
0x251b   :  { %8236 = vmatprep.subr.mxu0 %v9027_v36 }
0x251c   :  { %8237 = vmatpush3.msra.mxu0 %v4022_v31 }
0x251d   :  { %8238 = vmatprep.subr.mxu0 %v9027_v36 }
0x251e   :  { %8239 = vmatpush3.msra.mxu0 %v4021_v22 }
0x259e   :  { %v4011_v14 = vpop.xlane.xlu0 %4010 }
0x259f   :  { %vm4013_vm3 = vcmp.ge.f32.partialorder %v3996_v35, %v4011_v14 }
0x25a0   :  { %v4014_v19 = vsel %vm4013_vm3, %v4012_v16, 32.0 }
0x25a1   :  { %v4015_v20 = vsel %vm1987_vm2, %v4014_v19, inf }
0x25a2   :  { %4016 = vmin.xlane.f32.xlu0 %v4015_v20 }
0x262b   :  { %v4017_v24 = vpop.xlane.xlu0 %4016 }
0x262c   :  { %vm4018_vm8 = vcmp.eq.f32.partialorder %v4012_v16, %v4017_v24 }
0x262d   :  { %v7211_v27 = vsel %vm4018_vm8, 1.0, %v9027_v36 }
0x262e   :  { %8241 = vmatmul.mubr.msk.f32.vlgmr.msra.gmra.mxu0 %vm4026_vm7, %v7211_v27 }
0x26ee   :  { %v4096_v47 = vpop.f32.mrf.mxu0 }
0x26ef   :  { %4100 = vst.msk [vmem:[#allocation4] sm:$0x3] %vm1987_vm2, %v4096_v47 }
0x26f0   :  { %v8242_v28 = vpop.f32.mrf.mxu0 }
0x26f1 PF:  { %8243 = vmatprep.subr.mxu1 %v9017_v1  ;;  %v4105_v32 = vld [vmem:[%s12089_s15 + $0x18] sm:$0xff]  ;;  %v4104_v13 = vld [vmem:[%s12089_s15 + $0x10] sm:$0xff]  ;;  %8251 = vmatprep.mubr.msk.f32.mxu1 %vm9018_vm0, %v9017_v1  ;;  %v4103_v5 = vld [vmem:[%s12089_s15 + $0x8] sm:$0xff]  ;;  %vm12129_vm4 = vcmask 15360   ;;  %vm12131_vm6 = vcmask 517120   ;;  %s12133_s4 = sld [smem:[#allocation16_spill]] }
0x26f2   :  { %8244 = vmatpush3.msra.mxu1 %v4105_v32  ;;  %8281 = vmatprep.subr.mxu0 %v9017_v1  ;;  %v4102_v61 = vld [vmem:[%s12089_s15] sm:$0xff]  ;;  %vm12130_vm3 = vmmov %vm12129_vm4  ;;  %s7220_s1 = sld [smem:[#allocation5 + $0x3]] }
0x26f3   :  { %8245 = vmatprep.subr.mxu1 %v9017_v1  ;;  %8313 = vmatprep.mubr.msk.f32.mxu0 %vm9018_vm0, %v9017_v1  ;;  %vm12132_vm7 = vmmov %vm12131_vm6 }
0x26f4   :  { %8246 = vmatpush3.msra.mxu1 %v4104_v13  ;;  %vm12134_vm8 = vmmov %vm12131_vm6 }
0x26f5   :  { %8247 = vmatprep.subr.mxu1 %v9017_v1 }
0x26f6   :  { %8248 = vmatpush3.msra.mxu1 %v4103_v5 }
0x26f7   :  { %8249 = vmatprep.subr.mxu1 %v9017_v1 }
0x26f8   :  { %8250 = vmatpush3.msra.mxu1 %v4102_v61  ;;  %p7221_p8 = scmp.ne.s32.totalorder %s7220_s1, 0 }
0x26f9   :  { %8252 = vmatmul.mubr.msk.f32.vlgmr.msra.gmra.mxu1 %vm99_vm1, %v3898_v21  ;;  %8254 = vmatprep.subr.mxu1 %v9017_v1 }
0x26fa   :  { %8278 = vmatprep.mubr.msk.f32.mxu1 %vm9018_vm0, %v9017_v1 }
0x27b9   :  { %v10731_v26 = vpop.f32.mrf.mxu1 }
0x27ba   :  { %v4190_v37 = vadd.f32 %v10731_v26, %v10078_v23  ;;  %v4188_v48 = vadd.f32 %v10731_v26, %v10072_v12  ;;  %v4191_v63 = vadd.f32 %v10731_v26, %v10076_v33  ;;  %v4189_v51 = vadd.f32 %v10731_v26, %v10070_v4 }
0x27bb   :  { %v8253_v17 = vpop.f32.mrf.mxu1  ;;  %v4193_v41 = vadd.f32 %v10731_v26, %v10082_v40  ;;  %v4192_v21 = vadd.f32 %v10731_v26, %v10084_v30  ;;  %v4195_v25 = vadd.f32 %v10731_v26, %v10093_v49  ;;  %v4194_v34 = vadd.f32 %v10731_v26, %v10087_v50 }
0x27bc   :  { %v4198_v6 = vadd.f32 %v10058_v62, %v4190_v37  ;;  %v4196_v46 = vadd.f32 %v10058_v62, %v4188_v48  ;;  %v4199_v3 = vadd.f32 %v10058_v62, %v4191_v63  ;;  %v4197_v43 = vadd.f32 %v10058_v62, %v4189_v51 }
0x27bd   :  { %v4201_v35 = vadd.f32 %v10058_v62, %v4193_v41  ;;  %v4200_v52 = vadd.f32 %v10058_v62, %v4192_v21  ;;  %v4203_v36 = vadd.f32 %v10058_v62, %v4195_v25  ;;  %v4202_v55 = vadd.f32 %v10058_v62, %v4194_v34 }
0x27be   :  { %8845 = vtanh.f32 %v4198_v6 }
0x27bf   :  { %8847 = vtanh.f32 %v4196_v46 }
0x27c0   :  { %8849 = vtanh.f32 %v4199_v3 }
0x27c1   :  { %8851 = vtanh.f32 %v4197_v43 }
0x27c2   :  { %8853 = vtanh.f32 %v4201_v35 }
0x27c3   :  { %8855 = vtanh.f32 %v4200_v52 }
0x27c4   :  { %8857 = vtanh.f32 %v4203_v36 }
0x27c5   :  { %8859 = vtanh.f32 %v4202_v55 }
0x27cb   :  { %v8846_v10 = vpop.eup %8845 }
0x27cc   :  { %v8848_v31 = vpop.eup %8847  ;;  %v4214_v16 = vmul.f32 %v8846_v10, %v10063_v59 }
0x27cd   :  { %v8850_v14 = vpop.eup %8849  ;;  %v4212_v19 = vmul.f32 %v8848_v31, %v10063_v59 }
0x27ce   :  { %v8852_v20 = vpop.eup %8851  ;;  %v4226_v22 = vsel %vm1987_vm2, %v4214_v16, 0.0  ;;  %v4215_v24 = vmul.f32 %v8850_v14, %v10063_v59 }
0x27cf   :  { %v8854_v27 = vpop.eup %8853  ;;  %4227 = vadd.xlane.f32.xlu1 %v4226_v22  ;;  %v4220_v47 = vsel %vm1987_vm2, %v4212_v19, 0.0  ;;  %v4213_v28 = vmul.f32 %v8852_v20, %v10063_v59 }
0x27d0   :  { %v8856_v32 = vpop.eup %8855  ;;  %4221 = vadd.xlane.f32.xlu0 %v4220_v47  ;;  %v4229_v13 = vsel %vm1987_vm2, %v4215_v24, 0.0  ;;  %v4217_v5 = vmul.f32 %v8854_v27, %v10063_v59 }
0x27d1   :  { %v8858_v61 = vpop.eup %8857  ;;  %v4223_v37 = vsel %vm1987_vm2, %v4213_v28, 0.0  ;;  %v4216_v48 = vmul.f32 %v8856_v32, %v10063_v59 }
0x27d2   :  { %v8860_v63 = vpop.eup %8859  ;;  %v4235_v51 = vsel %vm1987_vm2, %v4217_v5, 0.0  ;;  %v4219_v17 = vmul.f32 %v8858_v61, %v10063_v59 }
0x27d3   :  { %4230 = vadd.xlane.f32.xlu1 %v4229_v13  ;;  %v4232_v41 = vsel %vm1987_vm2, %v4216_v48, 0.0  ;;  %v4218_v21 = vmul.f32 %v8860_v63, %v10063_v59 }
0x27d4   :  { %4224 = vadd.xlane.f32.xlu0 %v4223_v37  ;;  %v4241_v6 = vsel %vm1987_vm2, %v4219_v17, 0.0 }
0x27d5   :  { %v4238_v46 = vsel %vm1987_vm2, %v4218_v21, 0.0 }
0x27d7   :  { %4236 = vadd.xlane.f32.xlu1 %v4235_v51 }
0x27d8   :  { %4233 = vadd.xlane.f32.xlu0 %v4232_v41 }
0x27db   :  { %4242 = vadd.xlane.f32.xlu1 %v4241_v6 }
0x27dc   :  { %4239 = vadd.xlane.f32.xlu0 %v4238_v46 }
0x2858   :  { %v4228_v3 = vpop.xlane.xlu1 %4227 }
0x2859   :  { %v4222_v43 = vpop.xlane.xlu0 %4221  ;;  %v4263_v36 = vrot.slane %v4228_v3, %v10189_v0 }
0x285a   :  { %v4255_v52 = vrot.slane %v4222_v43, %v10189_v0 }
0x285c   :  { %v4231_v35 = vpop.xlane.xlu1 %4230 }
0x285d   :  { %v4225_v25 = vpop.xlane.xlu0 %4224  ;;  %v4267_v55 = vrot.slane %v4231_v35, %v10189_v0 }
0x285e   :  { %v4259_v34 = vrot.slane %v4225_v25, %v10189_v0 }
0x2860   :  { %v4284_v10 = vsel %vm3030_vm9, %v4259_v34, %v4255_v52  ;;  %v4237_v31 = vpop.xlane.xlu1 %4236 }
0x2861   :  { %v4285_v16 = vsel %vm3032_vm10, %v4263_v36, %v4284_v10  ;;  %v4234_v14 = vpop.xlane.xlu0 %4233  ;;  %v4275_v22 = vrot.slane %v4237_v31, %v10189_v0 }
0x2862   :  { %v4286_v19 = vsel %vm3034_vm11, %v4267_v55, %v4285_v16  ;;  %v4271_v20 = vrot.slane %v4234_v14, %v10189_v0 }
0x2864   :  { %v4287_v24 = vsel %vm3036_vm12, %v4271_v20, %v4286_v19  ;;  %v4243_v27 = vpop.xlane.xlu1 %4242 }
0x2865   :  { %v4283_v47 = vrot.slane %v4243_v27, %v10189_v0  ;;  %v4240_v28 = vpop.xlane.xlu0 %4239  ;;  %v4288_v13 = vsel %vm3038_vm13, %v4275_v22, %v4287_v24 }
0x2866   :  { %v4279_v32 = vrot.slane %v4240_v28, %v10189_v0  ;;  %v4407_v28 = vld [vmem:[%s12090_s16 + $0x58] sm:$0xff] }
0x2867   :  { %8255 = vmatpush3.msra.mxu1 %v4407_v28 }
0x2868   :  { %v4289_v5 = vsel %vm3040_vm14, %v4279_v32, %v4288_v13  ;;  %v4406_v32 = vld [vmem:[%s12090_s16 + $0x50] sm:$0xff]  ;;  %8256 = vmatprep.subr.mxu1 %v9017_v1 }
0x2869   :  { %v4290_v61 = vsel %vm3042_vm15, %v4283_v47, %v4289_v5  ;;  %v4405_v5 = vld [vmem:[%s12090_s16 + $0x48] sm:$0xff]  ;;  %8257 = vmatpush3.msra.mxu1 %v4406_v32 }
0x286a   :  { %v4292_v37 = vsel %vm2730_vm5, %v4290_v61, -1e+10  ;;  %8258 = vmatprep.subr.mxu1 %v9017_v1  ;;  %v4404_v61 = vld [vmem:[%s12090_s16 + $0x40] sm:$0xff] }
0x286b   :  { %v4293_v48 = vsel %vm12129_vm4, %v4292_v37, -inf  ;;  %8259 = vmatpush3.msra.mxu1 %v4405_v5  ;;  %vm12135_vm4 = vmmov %vm12131_vm6 }
0x286c   :  { %v4294_v63 = vrot.slane %v4293_v48, 4  ;;  %8260 = vmatprep.subr.mxu1 %v9017_v1 }
0x286d   :  { %8261 = vmatpush3.msra.mxu1 %v4404_v61 }
0x286e   :  { %v4295_v51 = vmax.f32 %v4293_v48, %v4294_v63  ;;  %v4403_v48 = vld [vmem:[%s12090_s16 + $0x38] sm:$0xff]  ;;  %8262 = vmatprep.subr.mxu1 %v9017_v1  ;;  %v4402_v63 = vld [vmem:[%s12090_s16 + $0x30] sm:$0xff] }
0x286f   :  { %8263 = vmatpush3.msra.mxu1 %v4403_v48 }
0x2870   :  { %v4296_v17 = vrot.slane %v4295_v51, 2  ;;  %8264 = vmatprep.subr.mxu1 %v9017_v1 }
0x2871   :  { %8265 = vmatpush3.msra.mxu1 %v4402_v63 }
0x2872   :  { %v4297_v41 = vmax.f32 %v4295_v51, %v4296_v17  ;;  %v4401_v51 = vld [vmem:[%s12090_s16 + $0x28] sm:$0xff]  ;;  %8266 = vmatprep.subr.mxu1 %v9017_v1  ;;  %v4400_v17 = vld [vmem:[%s12090_s16 + $0x20] sm:$0xff] }
0x2873   :  { %8267 = vmatpush3.msra.mxu1 %v4401_v51 }
0x2874   :  { %v4298_v21 = vrot.slane %v4297_v41, 1  ;;  %8268 = vmatprep.subr.mxu1 %v9017_v1 }
0x2875   :  { %8269 = vmatpush3.msra.mxu1 %v4400_v17 }
0x2876   :  { %v4299_v6 = vmax.f32 %v4297_v41, %v4298_v21  ;;  %v4399_v41 = vld [vmem:[%s12090_s16 + $0x18] sm:$0xff]  ;;  %8270 = vmatprep.subr.mxu1 %v9017_v1  ;;  %v4398_v21 = vld [vmem:[%s12090_s16 + $0x10] sm:$0xff] }
0x2877   :  { %8271 = vmatpush3.msra.mxu1 %v4399_v41 }
0x2878   :  { %v4300_v46 = vsub.f32 %v4292_v37, %v4299_v6  ;;  %v7214_v37 = vld [vmem:[%s12092_s18] ss:$0 sm:$0xff]  ;;  %8272 = vmatprep.subr.mxu1 %v9017_v1  ;;  %v4397_v6 = vld [vmem:[%s12090_s16 + $0x8] sm:$0xff] }
0x2879   :  { %8273 = vmatpush3.msra.mxu1 %v4398_v21 }
0x287a   :  { %v4301_v3 = vmul.f32 1.442695, %v4300_v46  ;;  %8274 = vmatprep.subr.mxu1 %v9017_v1 }
0x287b   :  { %8275 = vmatpush3.msra.mxu1 %v4397_v6 }
0x287c   :  { %8861 = vpow2.f32 %v4301_v3  ;;  %8276 = vmatprep.subr.mxu1 %v9017_v1 }
0x2889   :  { %v8862_v43 = vpop.eup %8861 }
0x288a   :  { %v4303_v35 = vsel %vm12130_vm3, %v8862_v43, 0.0  ;;  %vm12136_vm3 = vmmov %vm12135_vm4 }
0x288b   :  { %v4304_v25 = vrot.slane %v4303_v35, 4 }
0x288d   :  { %v4305_v52 = vadd.f32 %v4304_v25, %v4303_v35 }
0x288f   :  { %v4306_v34 = vrot.slane %v4305_v52, 2 }
0x2891   :  { %v4307_v36 = vadd.f32 %v4306_v34, %v4305_v52 }
0x2893   :  { %v4308_v55 = vrot.slane %v4307_v36, 1 }
0x2895   :  { %v4309_v10 = vadd.f32 %v4308_v55, %v4307_v36 }
0x2897   :  { %8863 = vrcp.f32 %v4309_v10  ;;  %v7219_v10 = vld [vmem:[%s12133_s4 + $0x6] sm:$0x3] }
0x28a4   :  { %v8864_v31 = vpop.eup %8863 }
0x28a5   :  { %v4311_v16 = vmul.f32 %v8864_v31, %v8862_v43 }
0x28a7   :  { %v4322_v14 = vrot.slane %v4311_v16, %v10211_v2  ;;  %v4315_v19 = vrot.slane %v4311_v16, %v10214_v15  ;;  %v4329_v20 = vrot.slane %v4311_v16, %v10219_v54  ;;  %v4343_v22 = vrot.slane %v4311_v16, %v10222_v8 }
0x28a8   :  { %v4336_v24 = vrot.slane %v4311_v16, %v10227_v42  ;;  %v4357_v27 = vrot.slane %v4311_v16, %v10230_v60  ;;  %v4350_v47 = vrot.slane %v4311_v16, %v10235_v39  ;;  %v4364_v13 = vrot.slane %v4311_v16, %v10239_v44 }
0x28a9   :  { %4324 = vbcast.lane.b32.xlu1 %v4322_v14, 256  ;;  %4317 = vbcast.lane.b32.xlu0 %v4315_v19, 256  ;;  %v10857_v19 = vld [vmem:[#allocation4] sm:$0x3] }
0x28aa   :  { %4624 = vst.msk [vmem:[#allocation4] sm:$0x3] %vm1987_vm2, %v7219_v10 }
0x28ad   :  { %4331 = vbcast.lane.b32.xlu1 %v4329_v20, 256  ;;  %4345 = vbcast.lane.b32.xlu0 %v4343_v22, 256 }
0x28b1   :  { %4338 = vbcast.lane.b32.xlu1 %v4336_v24, 256  ;;  %4359 = vbcast.lane.b32.xlu0 %v4357_v27, 256  ;;  %v4396_v24 = vld [vmem:[%s12090_s16] sm:$0xff] }
0x28b2   :  { %8277 = vmatpush3.msra.mxu1 %v4396_v24 }
0x28b5   :  { %4352 = vbcast.lane.b32.xlu1 %v4350_v47, 256 }
0x28b9   :  { %4366 = vbcast.lane.b32.xlu1 %v4364_v13, 256 }
0x28bd   :  { %4184 = vrot.lane.b32.xlu1 %v7214_v37, %s9024_s12 }
0x291b   :  { %v4325_v46 = vpop.permute.xlu1 %4324  ;;  %v4318_v3 = vpop.permute.xlu0 %4317 }
0x291c   :  { %v4369_v43 = vmul.f32 %v4325_v46, %v9884_v56  ;;  %v4368_v35 = vmul.f32 %v4318_v3, %v9895_v57 }
0x291e   :  { %v4377_v34 = vsel %vm12131_vm6, %v4369_v43, 0.0  ;;  %v4376_v36 = vsel %vm12132_vm7, %v4368_v35, 0.0  ;;  %vm12137_vm6 = vmmov %vm12136_vm3 }
0x291f   :  { %v4332_v25 = vpop.permute.xlu1 %4331  ;;  %v4346_v52 = vpop.permute.xlu0 %4345  ;;  %v4378_v16 = vadd.f32 %v4377_v34, %v4376_v36  ;;  %vm12138_vm7 = vmmov %vm12136_vm3  ;;  %v7215_v34 = vld [vmem:[%s12091_s17] ss:$0 sm:$0xff] }
0x2920   :  { %v4370_v55 = vmul.f32 %v4332_v25, %v9865_v38  ;;  %v4372_v20 = vmul.f32 %v4346_v52, %v9886_v53 }
0x2922   :  { %v4379_v31 = vsel %vm12134_vm8, %v4370_v55, 0.0  ;;  %v4383_v5 = vsel %vm12136_vm3, %v4372_v20, 0.0  ;;  %vm12139_vm8 = vmmov %vm12136_vm3 }
0x2923   :  { %v4339_v14 = vpop.permute.xlu1 %4338  ;;  %v4380_v27 = vadd.f32 %v4379_v31, %v4378_v16  ;;  %v4360_v47 = vpop.permute.xlu0 %4359 }
0x2924   :  { %v4371_v22 = vmul.f32 %v4339_v14, %v9901_v58  ;;  %v4374_v61 = vmul.f32 %v4360_v47, %v9903_v11 }
0x2926   :  { %v4381_v28 = vsel %vm12135_vm4, %v4371_v22, 0.0  ;;  %v4387_v41 = vsel %vm12138_vm7, %v4374_v61, 0.0  ;;  %vm12140_vm4 = vcmask 785408   ;;  %v4539_v61 = vld [vmem:[%s12094_s20 + $0x60] sm:$0xff] }
0x2927   :  { %v4382_v32 = vadd.f32 %v4381_v28, %v4380_v27  ;;  %v4353_v13 = vpop.permute.xlu1 %4352  ;;  %vm12141_vm3 = vmmov %vm12140_vm4 }
0x2928   :  { %v4373_v37 = vmul.f32 %v4353_v13, %v9913_v9  ;;  %v4541_v13 = vld [vmem:[%s12094_s20 + $0x70] sm:$0xff] }
0x2929   :  { %v4384_v48 = vadd.f32 %v4383_v5, %v4382_v32  ;;  %v4542_v32 = vld [vmem:[%s12094_s20 + $0x78] sm:$0xff]  ;;  %v4540_v5 = vld [vmem:[%s12094_s20 + $0x68] sm:$0xff] }
0x292a   :  { %v4385_v63 = vsel %vm12137_vm6, %v4373_v37, 0.0  ;;  %8282 = vmatpush3.msra.mxu0 %v4542_v32  ;;  %v4538_v37 = vld [vmem:[%s12094_s20 + $0x58] sm:$0xff] }
0x292b   :  { %v4386_v51 = vadd.f32 %v4385_v63, %v4384_v48  ;;  %v4367_v17 = vpop.permute.xlu1 %4366  ;;  %8283 = vmatprep.subr.mxu0 %v9017_v1  ;;  %v4537_v63 = vld [vmem:[%s12094_s20 + $0x50] sm:$0xff] }
0x292c   :  { %v4375_v21 = vmul.f32 %v4367_v17, %v10048_v18  ;;  %8284 = vmatpush3.msra.mxu0 %v4541_v13  ;;  %v4535_v17 = vld [vmem:[%s12094_s20 + $0x40] sm:$0xff] }
0x292d   :  { %v4388_v6 = vadd.f32 %v4387_v41, %v4386_v51  ;;  %8285 = vmatprep.subr.mxu0 %v9017_v1  ;;  %v4536_v51 = vld [vmem:[%s12094_s20 + $0x48] sm:$0xff]  ;;  %v4534_v41 = vld [vmem:[%s12094_s20 + $0x38] sm:$0xff] }
0x292e   :  { %v4389_v46 = vsel %vm12139_vm8, %v4375_v21, 0.0  ;;  %8286 = vmatpush3.msra.mxu0 %v4540_v5  ;;  %v4533_v21 = vld [vmem:[%s12094_s20 + $0x30] sm:$0xff] }
0x292f   :  { %v4185_v3 = vpop.permute.xlu1 %4184  ;;  %v4390_v43 = vadd.f32 %v4389_v46, %v4388_v6  ;;  %8287 = vmatprep.subr.mxu0 %v9017_v1  ;;  %v4531_v6 = vld [vmem:[%s12094_s20 + $0x20] sm:$0xff]  ;;  %v4530_v46 = vld [vmem:[%s12094_s20 + $0x18] sm:$0xff] }
0x2930   :  { %v4187_v35 = vadd.f32 %v4185_v3, %v10731_v26  ;;  %8288 = vmatpush3.msra.mxu0 %v4539_v61  ;;  %v4529_v3 = vld [vmem:[%s12094_s20 + $0x10] sm:$0xff] }
0x2931   :  { %4392 = vrot.lane.b32.xlu0 %v4390_v43, %s9024_s12  ;;  %8289 = vmatprep.subr.mxu0 %v9017_v1  ;;  %v4528_v43 = vld [vmem:[%s12094_s20 + $0x8] sm:$0xff] }
0x2932   :  { %4499 = vrot.lane.b32.xlu1 %v4187_v35, %s9024_s12  ;;  %8290 = vmatpush3.msra.mxu0 %v4538_v37 }
0x2933   :  { %8291 = vmatprep.subr.mxu0 %v9017_v1 }
0x2934   :  { %8292 = vmatpush3.msra.mxu0 %v4537_v63 }
0x2935   :  { %4489 = vrot.lane.b32.xlu0 %v4187_v35, %s9021_s26  ;;  %8293 = vmatprep.subr.mxu0 %v9017_v1  ;;  %v4527_v35 = vld [vmem:[%s12094_s20] sm:$0xff] }
0x2936   :  { %8294 = vmatpush3.msra.mxu0 %v4536_v51 }
0x2937   :  { %8295 = vmatprep.subr.mxu0 %v9017_v1 }
0x2938   :  { %8296 = vmatpush3.msra.mxu0 %v4535_v17 }
0x2939   :  { %8297 = vmatprep.subr.mxu0 %v9017_v1 }
0x293a   :  { %8298 = vmatpush3.msra.mxu0 %v4534_v41 }
0x293b   :  { %8299 = vmatprep.subr.mxu0 %v9017_v1 }
0x293c   :  { %8300 = vmatpush3.msra.mxu0 %v4533_v21 }
0x293d   :  { %8301 = vmatprep.subr.mxu0 %v9017_v1 }
0x29a3   :  { %v10877_v25 = vpop.permute.xlu0 %4392 }
0x29a4   :  { %v4395_v52 = vsel %vm99_vm1, %v10857_v19, %v10877_v25  ;;  %v4500_v24 = vpop.permute.xlu1 %4499 }
0x29a5   :  { %8279 = vmatmul.mubr.msk.f32.vlgmr.msra.gmra.mxu1 %vm12140_vm4, %v4395_v52 }
0x29a7   :  { %v4490_v55 = vpop.permute.xlu0 %4489 }
0x2a65   :  { %v4484_v36 = vpop.f32.mrf.mxu1 }
0x2a66   :  { %v4485_v26 = vadd.f32 %v7215_v34, %v4484_v36 }
0x2a67   :  { %v8280_v10 = vpop.f32.mrf.mxu1 }
0x2a68   :  { %v4492_v31 = vadd.f32 %v4490_v55, %v4485_v26 }
0x2a6a   :  { %v7217_v16 = vmul.f32 -1.442695, %v4492_v31 }
0x2a6c   :  { %8865 = vpow2.f32 %v7217_v16 }
0x2a79   :  { %v8866_v14 = vpop.eup %8865 }
0x2a7a   :  { %v4496_v20 = vadd.f32 1.0, %v8866_v14 }
0x2a7c   :  { %8867 = vrcp.f32 %v4496_v20  ;;  %v7218_v20 = vld [vmem:[%s12095_s21] ss:$0 sm:$0xff] }
0x2a89   :  { %v8868_v22 = vpop.eup %8867 }
0x2a8a   :  { %v4502_v27 = vmul.f32 %v8868_v22, %v4500_v24  ;;  %v4509_v52 = vsub.f32 1.0, %v8868_v22 }
0x2a8c   :  { %4504 = vrot.lane.b32.xlu0 %v4502_v27, %s9020_s25 }
0x2afe   :  { %v4505_v47 = vpop.permute.xlu0 %4504 }
0x2aff   :  { %v4507_v28 = vadd.f32 %v4505_v47, %v4485_v26  ;;  %v4515_v26 = vmul.f32 %v8868_v22, %v10676_v7 }
0x2b01   :  { %8869 = vtanh.f32 %v4507_v28 }
0x2b0e   :  { %v8870_v48 = vpop.eup %8869 }
0x2b0f   :  { %4511 = vrot.lane.b32.xlu1 %v8870_v48, %s9021_s26 }
0x2b13   :  { %4522 = vrot.lane.b32.xlu1 %v10857_v19, %s9021_s26  ;;  %v4532_v19 = vld [vmem:[%s12094_s20 + $0x28] sm:$0xff] }
0x2b14   :  { %8302 = vmatpush3.msra.mxu0 %v4532_v19 }
0x2b15   :  { %8303 = vmatprep.subr.mxu0 %v9017_v1 }
0x2b16   :  { %8304 = vmatpush3.msra.mxu0 %v4531_v6 }
0x2b17   :  { %8305 = vmatprep.subr.mxu0 %v9017_v1 }
0x2b18   :  { %8306 = vmatpush3.msra.mxu0 %v4530_v46 }
0x2b19   :  { %8307 = vmatprep.subr.mxu0 %v9017_v1 }
0x2b1a   :  { %8308 = vmatpush3.msra.mxu0 %v4529_v3 }
0x2b1b   :  { %8309 = vmatprep.subr.mxu0 %v9017_v1 }
0x2b1c   :  { %8310 = vmatpush3.msra.mxu0 %v4528_v43 }
0x2b1d   :  { %8311 = vmatprep.subr.mxu0 %v9017_v1 }
0x2b1e   :  { %8312 = vmatpush3.msra.mxu0 %v4527_v35 }
0x2b81   :  { %v4512_v34 = vpop.permute.xlu1 %4511 }
0x2b82   :  { %v4514_v36 = vmul.f32 %v4512_v34, %v4509_v52 }
0x2b84   :  { %v10954_v55 = vadd.f32 %v4515_v26, %v4514_v36 }
0x2b85   :  { %v4523_v10 = vpop.permute.xlu1 %4522 }
0x2b86   :  { %4518 = vrot.lane.b32.xlu0 %v10954_v55, %s9021_s26 }
0x2bf8   :  { %v4519_v31 = vpop.permute.xlu0 %4518 }
0x2bf9   :  { %v4525_v16 = vsel %vm99_vm1, %v4519_v31, %v10877_v25 }
0x2bfa   :  { %v4526_v14 = vsel %vm12141_vm3, %v4525_v16, %v4523_v10 }
0x2bfb   :  { %8314 = vmatmul.mubr.f32.vlgmr.msra.gmra.mxu0 %v4526_v14 }
0x2cba   :  { %4629 = sbr.rel (%p7221_p8) target bundleno = 11932 (0x2e9c), region = 109 }
0x2cbb   :  { %v4616_v24 = vpop.f32.mrf.mxu0 }
0x2cbc   :  { %v4617_v7 = vadd.f32 %v7218_v20, %v4616_v24 }
0x2cbd   :  { %v8315_v22 = vpop.f32.mrf.mxu0 }
0x2cbe   :  { %4621 = vst.msk [vmem:[#allocation8 + $0x6] sm:$0x3] %vm1987_vm2, %v4617_v7 }
0x2cbf   :  { %v4630_v27 = vsel %vm1987_vm2, %v4617_v7, -inf  ;;  %v4646_v25 = vld [vmem:[%s12093_s19 + $0x20] sm:$0xff]  ;;  %v9029_v47 = vmov 0.0   ;;  %v4645_v28 = vld [vmem:[%s12093_s19 + $0x18] sm:$0xff]  ;;  %v4644_v32 = vld [vmem:[%s12093_s19 + $0x10] sm:$0xff]  ;;  %v4633_v5 = vcvt.s32.f32 %v10183_v29  ;;  %vm9030_vm7 = vmmov 0  }
0x2cc0   :  { %4631 = vmax.xlane.f32.xlu0 %v4630_v27  ;;  %8316 = vmatprep.subr.mxu0 %v9029_v47  ;;  %v4643_v13 = vld [vmem:[%s12093_s19 + $0x8] sm:$0xff]  ;;  %v4642_v63 = vld [vmem:[%s12093_s19] sm:$0xff]  ;;  %vm4647_vm8 = vcmask 326656  }
0x2cc1   :  { %8317 = vmatpush3.msra.mxu0 %v4646_v25  ;;  %8326 = vmatprep.mubr.msk.f32.mxu0 %vm9030_vm7, %v9029_v47 }
0x2cc2   :  { %8318 = vmatprep.subr.mxu0 %v9029_v47 }
0x2cc3   :  { %8319 = vmatpush3.msra.mxu0 %v4645_v28 }
0x2cc4   :  { %8320 = vmatprep.subr.mxu0 %v9029_v47 }
0x2cc5   :  { %8321 = vmatpush3.msra.mxu0 %v4644_v32 }
0x2cc6   :  { %8322 = vmatprep.subr.mxu0 %v9029_v47 }
0x2cc7   :  { %8323 = vmatpush3.msra.mxu0 %v4643_v13 }
0x2cc8   :  { %8324 = vmatprep.subr.mxu0 %v9029_v47 }
0x2cc9   :  { %8325 = vmatpush3.msra.mxu0 %v4642_v63 }
0x2d49   :  { %v4632_v61 = vpop.xlane.xlu0 %4631 }
0x2d4a   :  { %vm4634_vm6 = vcmp.ge.f32.partialorder %v4617_v7, %v4632_v61 }
0x2d4b   :  { %v4635_v37 = vsel %vm4634_vm6, %v4633_v5, 32.0 }
0x2d4c   :  { %v4636_v48 = vsel %vm1987_vm2, %v4635_v37, inf }
0x2d4d   :  { %4637 = vmin.xlane.f32.xlu0 %v4636_v48 }
0x2dd6   :  { %v4638_v51 = vpop.xlane.xlu0 %4637 }
0x2dd7   :  { %vm4639_vm4 = vcmp.eq.f32.partialorder %v4633_v5, %v4638_v51 }
0x2dd8   :  { %v7222_v17 = vsel %vm4639_vm4, 1.0, %v9029_v47 }
0x2dd9   :  { %8327 = vmatmul.mubr.msk.f32.vlgmr.msra.gmra.mxu0 %vm4647_vm8, %v7222_v17 }
0x2e99   :  { %v4717_v41 = vpop.f32.mrf.mxu0 }
0x2e9a   :  { %4721 = vst.msk [vmem:[#allocation4] sm:$0x3] %vm1987_vm2, %v4717_v41 }
0x2e9b   :  { %v8328_v21 = vpop.f32.mrf.mxu0 }
0x2e9c PF:  { %8329 = vmatprep.subr.mxu1 %v9017_v1  ;;  %v4726_v19 = vld [vmem:[%s12089_s15 + $0x18] sm:$0xff]  ;;  %v4725_v6 = vld [vmem:[%s12089_s15 + $0x10] sm:$0xff]  ;;  %8337 = vmatprep.mubr.msk.f32.mxu1 %vm9018_vm0, %v9017_v1  ;;  %v4724_v46 = vld [vmem:[%s12089_s15 + $0x8] sm:$0xff]  ;;  %vm12142_vm3 = vcmask 15360   ;;  %vm12144_vm7 = vcmask 517120   ;;  %s12146_s2 = sld [smem:[#allocation16_spill]] }
0x2e9d   :  { %8330 = vmatpush3.msra.mxu1 %v4726_v19  ;;  %8367 = vmatprep.subr.mxu0 %v9017_v1  ;;  %v4723_v3 = vld [vmem:[%s12089_s15] sm:$0xff]  ;;  %vm12143_vm6 = vmmov %vm12142_vm3  ;;  %s7231_s23 = sld [smem:[#allocation5 + $0x4]] }
0x2e9e   :  { %8331 = vmatprep.subr.mxu1 %v9017_v1  ;;  %8399 = vmatprep.mubr.msk.f32.mxu0 %vm9018_vm0, %v9017_v1  ;;  %vm12145_vm8 = vmmov %vm12144_vm7 }
0x2e9f   :  { %8332 = vmatpush3.msra.mxu1 %v4725_v6  ;;  %vm12147_vm4 = vmmov %vm12144_vm7 }
0x2ea0   :  { %8333 = vmatprep.subr.mxu1 %v9017_v1 }
0x2ea1   :  { %8334 = vmatpush3.msra.mxu1 %v4724_v46 }
0x2ea2   :  { %8335 = vmatprep.subr.mxu1 %v9017_v1 }
0x2ea3   :  { %8336 = vmatpush3.msra.mxu1 %v4723_v3  ;;  %p7232_p9 = scmp.ne.s32.totalorder %s7231_s23, 0 }
0x2ea4   :  { %8338 = vmatmul.mubr.msk.f32.vlgmr.msra.gmra.mxu1 %vm99_vm1, %v4519_v31  ;;  %8340 = vmatprep.subr.mxu1 %v9017_v1 }
0x2ea5   :  { %8364 = vmatprep.mubr.msk.f32.mxu1 %vm9018_vm0, %v9017_v1 }
0x2f64   :  { %v11009_v43 = vpop.f32.mrf.mxu1 }
0x2f65   :  { %v4811_v35 = vadd.f32 %v11009_v43, %v10078_v23  ;;  %v4809_v52 = vadd.f32 %v11009_v43, %v10072_v12  ;;  %v4812_v34 = vadd.f32 %v11009_v43, %v10076_v33  ;;  %v4810_v36 = vadd.f32 %v11009_v43, %v10070_v4 }
0x2f66   :  { %v8339_v26 = vpop.f32.mrf.mxu1  ;;  %v4814_v10 = vadd.f32 %v11009_v43, %v10082_v40  ;;  %v4813_v31 = vadd.f32 %v11009_v43, %v10084_v30  ;;  %v4816_v22 = vadd.f32 %v11009_v43, %v10093_v49  ;;  %v4815_v25 = vadd.f32 %v11009_v43, %v10087_v50 }
0x2f67   :  { %v4819_v16 = vadd.f32 %v10058_v62, %v4811_v35  ;;  %v4817_v14 = vadd.f32 %v10058_v62, %v4809_v52  ;;  %v4820_v20 = vadd.f32 %v10058_v62, %v4812_v34  ;;  %v4818_v24 = vadd.f32 %v10058_v62, %v4810_v36 }
0x2f68   :  { %v4822_v7 = vadd.f32 %v10058_v62, %v4814_v10  ;;  %v4821_v27 = vadd.f32 %v10058_v62, %v4813_v31  ;;  %v4824_v47 = vadd.f32 %v10058_v62, %v4816_v22  ;;  %v4823_v28 = vadd.f32 %v10058_v62, %v4815_v25 }
0x2f69   :  { %8871 = vtanh.f32 %v4819_v16 }
0x2f6a   :  { %8873 = vtanh.f32 %v4817_v14 }
0x2f6b   :  { %8875 = vtanh.f32 %v4820_v20 }
0x2f6c   :  { %8877 = vtanh.f32 %v4818_v24 }
0x2f6d   :  { %8879 = vtanh.f32 %v4822_v7 }
0x2f6e   :  { %8881 = vtanh.f32 %v4821_v27 }
0x2f6f   :  { %8883 = vtanh.f32 %v4824_v47 }
0x2f70   :  { %8885 = vtanh.f32 %v4823_v28 }
0x2f76   :  { %v8872_v32 = vpop.eup %8871 }
0x2f77   :  { %v8874_v13 = vpop.eup %8873  ;;  %v4835_v5 = vmul.f32 %v8872_v32, %v10063_v59 }
0x2f78   :  { %v8876_v61 = vpop.eup %8875  ;;  %v4833_v37 = vmul.f32 %v8874_v13, %v10063_v59 }
0x2f79   :  { %v8878_v48 = vpop.eup %8877  ;;  %v4847_v63 = vsel %vm1987_vm2, %v4835_v5, 0.0  ;;  %v4836_v51 = vmul.f32 %v8876_v61, %v10063_v59 }
0x2f7a   :  { %v8880_v17 = vpop.eup %8879  ;;  %4848 = vadd.xlane.f32.xlu1 %v4847_v63  ;;  %v4841_v41 = vsel %vm1987_vm2, %v4833_v37, 0.0  ;;  %v4834_v21 = vmul.f32 %v8878_v48, %v10063_v59 }
0x2f7b   :  { %v8882_v19 = vpop.eup %8881  ;;  %4842 = vadd.xlane.f32.xlu0 %v4841_v41  ;;  %v4850_v6 = vsel %vm1987_vm2, %v4836_v51, 0.0  ;;  %v4838_v46 = vmul.f32 %v8880_v17, %v10063_v59 }
0x2f7c   :  { %v8884_v3 = vpop.eup %8883  ;;  %v4844_v35 = vsel %vm1987_vm2, %v4834_v21, 0.0  ;;  %v4837_v52 = vmul.f32 %v8882_v19, %v10063_v59 }
0x2f7d   :  { %v8886_v34 = vpop.eup %8885  ;;  %v4856_v36 = vsel %vm1987_vm2, %v4838_v46, 0.0  ;;  %v4840_v26 = vmul.f32 %v8884_v3, %v10063_v59 }
0x2f7e   :  { %4851 = vadd.xlane.f32.xlu1 %v4850_v6  ;;  %v4853_v10 = vsel %vm1987_vm2, %v4837_v52, 0.0  ;;  %v4839_v31 = vmul.f32 %v8886_v34, %v10063_v59 }
0x2f7f   :  { %4845 = vadd.xlane.f32.xlu0 %v4844_v35  ;;  %v4862_v16 = vsel %vm1987_vm2, %v4840_v26, 0.0 }
0x2f80   :  { %v4859_v14 = vsel %vm1987_vm2, %v4839_v31, 0.0 }
0x2f82   :  { %4857 = vadd.xlane.f32.xlu1 %v4856_v36 }
0x2f83   :  { %4854 = vadd.xlane.f32.xlu0 %v4853_v10 }
0x2f86   :  { %4863 = vadd.xlane.f32.xlu1 %v4862_v16 }
0x2f87   :  { %4860 = vadd.xlane.f32.xlu0 %v4859_v14 }
0x3003   :  { %v4849_v20 = vpop.xlane.xlu1 %4848 }
0x3004   :  { %v4843_v24 = vpop.xlane.xlu0 %4842  ;;  %v4884_v47 = vrot.slane %v4849_v20, %v10189_v0 }
0x3005   :  { %v4876_v27 = vrot.slane %v4843_v24, %v10189_v0 }
0x3007   :  { %v4852_v7 = vpop.xlane.xlu1 %4851 }
0x3008   :  { %v4846_v22 = vpop.xlane.xlu0 %4845  ;;  %v4888_v28 = vrot.slane %v4852_v7, %v10189_v0 }
0x3009   :  { %v4880_v25 = vrot.slane %v4846_v22, %v10189_v0 }
0x300b   :  { %v4905_v32 = vsel %vm3030_vm9, %v4880_v25, %v4876_v27  ;;  %v4858_v13 = vpop.xlane.xlu1 %4857 }
0x300c   :  { %v4906_v5 = vsel %vm3032_vm10, %v4884_v47, %v4905_v32  ;;  %v4855_v61 = vpop.xlane.xlu0 %4854  ;;  %v4896_v63 = vrot.slane %v4858_v13, %v10189_v0 }
0x300d   :  { %v4907_v37 = vsel %vm3034_vm11, %v4888_v28, %v4906_v5  ;;  %v4892_v48 = vrot.slane %v4855_v61, %v10189_v0 }
0x300f   :  { %v4908_v51 = vsel %vm3036_vm12, %v4892_v48, %v4907_v37  ;;  %v4864_v17 = vpop.xlane.xlu1 %4863 }
0x3010   :  { %v4904_v41 = vrot.slane %v4864_v17, %v10189_v0  ;;  %v4861_v21 = vpop.xlane.xlu0 %4860  ;;  %v4909_v6 = vsel %vm3038_vm13, %v4896_v63, %v4908_v51 }
0x3011   :  { %v4900_v19 = vrot.slane %v4861_v21, %v10189_v0  ;;  %v5028_v21 = vld [vmem:[%s12090_s16 + $0x58] sm:$0xff] }
0x3012   :  { %8341 = vmatpush3.msra.mxu1 %v5028_v21 }
0x3013   :  { %v4910_v46 = vsel %vm3040_vm14, %v4900_v19, %v4909_v6  ;;  %v5027_v19 = vld [vmem:[%s12090_s16 + $0x50] sm:$0xff]  ;;  %8342 = vmatprep.subr.mxu1 %v9017_v1 }
0x3014   :  { %v4911_v3 = vsel %vm3042_vm15, %v4904_v41, %v4910_v46  ;;  %v5026_v46 = vld [vmem:[%s12090_s16 + $0x48] sm:$0xff]  ;;  %8343 = vmatpush3.msra.mxu1 %v5027_v19 }
0x3015   :  { %v4913_v35 = vsel %vm2730_vm5, %v4911_v3, -1e+10  ;;  %8344 = vmatprep.subr.mxu1 %v9017_v1  ;;  %v5025_v3 = vld [vmem:[%s12090_s16 + $0x40] sm:$0xff] }
0x3016   :  { %v4914_v52 = vsel %vm12142_vm3, %v4913_v35, -inf  ;;  %8345 = vmatpush3.msra.mxu1 %v5026_v46  ;;  %vm12148_vm3 = vmmov %vm12147_vm4 }
0x3017   :  { %v4915_v34 = vrot.slane %v4914_v52, 4  ;;  %8346 = vmatprep.subr.mxu1 %v9017_v1 }
0x3018   :  { %8347 = vmatpush3.msra.mxu1 %v5025_v3 }
0x3019   :  { %v4916_v36 = vmax.f32 %v4914_v52, %v4915_v34  ;;  %v5024_v52 = vld [vmem:[%s12090_s16 + $0x38] sm:$0xff]  ;;  %8348 = vmatprep.subr.mxu1 %v9017_v1  ;;  %v5023_v34 = vld [vmem:[%s12090_s16 + $0x30] sm:$0xff] }
0x301a   :  { %8349 = vmatpush3.msra.mxu1 %v5024_v52 }
0x301b   :  { %v4917_v26 = vrot.slane %v4916_v36, 2  ;;  %8350 = vmatprep.subr.mxu1 %v9017_v1 }
0x301c   :  { %8351 = vmatpush3.msra.mxu1 %v5023_v34 }
0x301d   :  { %v4918_v10 = vmax.f32 %v4916_v36, %v4917_v26  ;;  %v5022_v36 = vld [vmem:[%s12090_s16 + $0x28] sm:$0xff]  ;;  %8352 = vmatprep.subr.mxu1 %v9017_v1  ;;  %v5021_v26 = vld [vmem:[%s12090_s16 + $0x20] sm:$0xff] }
0x301e   :  { %8353 = vmatpush3.msra.mxu1 %v5022_v36 }
0x301f   :  { %v4919_v31 = vrot.slane %v4918_v10, 1  ;;  %8354 = vmatprep.subr.mxu1 %v9017_v1 }
0x3020   :  { %8355 = vmatpush3.msra.mxu1 %v5021_v26 }
0x3021   :  { %v4920_v16 = vmax.f32 %v4918_v10, %v4919_v31  ;;  %v5020_v10 = vld [vmem:[%s12090_s16 + $0x18] sm:$0xff]  ;;  %8356 = vmatprep.subr.mxu1 %v9017_v1  ;;  %v5019_v31 = vld [vmem:[%s12090_s16 + $0x10] sm:$0xff] }
0x3022   :  { %8357 = vmatpush3.msra.mxu1 %v5020_v10 }
0x3023   :  { %v4921_v14 = vsub.f32 %v4913_v35, %v4920_v16  ;;  %v7225_v35 = vld [vmem:[%s12092_s18] ss:$0 sm:$0xff]  ;;  %8358 = vmatprep.subr.mxu1 %v9017_v1  ;;  %v5018_v16 = vld [vmem:[%s12090_s16 + $0x8] sm:$0xff] }
0x3024   :  { %8359 = vmatpush3.msra.mxu1 %v5019_v31 }
0x3025   :  { %v4922_v20 = vmul.f32 1.442695, %v4921_v14  ;;  %8360 = vmatprep.subr.mxu1 %v9017_v1 }
0x3026   :  { %8361 = vmatpush3.msra.mxu1 %v5018_v16 }
0x3027   :  { %8887 = vpow2.f32 %v4922_v20  ;;  %8362 = vmatprep.subr.mxu1 %v9017_v1 }
0x3034   :  { %v8888_v24 = vpop.eup %8887 }
0x3035   :  { %v4924_v7 = vsel %vm12143_vm6, %v8888_v24, 0.0  ;;  %vm12149_vm6 = vmmov %vm12148_vm3 }
0x3036   :  { %v4925_v22 = vrot.slane %v4924_v7, 4 }
0x3038   :  { %v4926_v27 = vadd.f32 %v4925_v22, %v4924_v7 }
0x303a   :  { %v4927_v25 = vrot.slane %v4926_v27, 2 }
0x303c   :  { %v4928_v47 = vadd.f32 %v4927_v25, %v4926_v27 }
0x303e   :  { %v4929_v28 = vrot.slane %v4928_v47, 1 }
0x3040   :  { %v4930_v32 = vadd.f32 %v4929_v28, %v4928_v47 }
0x3042   :  { %8889 = vrcp.f32 %v4930_v32  ;;  %v7230_v32 = vld [vmem:[%s12146_s2 + $0x8] sm:$0x3] }
0x304f   :  { %v8890_v13 = vpop.eup %8889 }
0x3050   :  { %v4932_v5 = vmul.f32 %v8890_v13, %v8888_v24 }
0x3052   :  { %v4943_v61 = vrot.slane %v4932_v5, %v10211_v2  ;;  %v4936_v37 = vrot.slane %v4932_v5, %v10214_v15  ;;  %v4950_v48 = vrot.slane %v4932_v5, %v10219_v54  ;;  %v4964_v63 = vrot.slane %v4932_v5, %v10222_v8 }
0x3053   :  { %v4957_v51 = vrot.slane %v4932_v5, %v10227_v42  ;;  %v4978_v17 = vrot.slane %v4932_v5, %v10230_v60  ;;  %v4971_v41 = vrot.slane %v4932_v5, %v10235_v39  ;;  %v4985_v6 = vrot.slane %v4932_v5, %v10239_v44 }
0x3054   :  { %4945 = vbcast.lane.b32.xlu1 %v4943_v61, 256  ;;  %4938 = vbcast.lane.b32.xlu0 %v4936_v37, 256  ;;  %v11135_v37 = vld [vmem:[#allocation4] sm:$0x3] }
0x3055   :  { %5245 = vst.msk [vmem:[#allocation4] sm:$0x3] %vm1987_vm2, %v7230_v32 }
0x3058   :  { %4952 = vbcast.lane.b32.xlu1 %v4950_v48, 256  ;;  %4966 = vbcast.lane.b32.xlu0 %v4964_v63, 256 }
0x305c   :  { %4959 = vbcast.lane.b32.xlu1 %v4957_v51, 256  ;;  %4980 = vbcast.lane.b32.xlu0 %v4978_v17, 256  ;;  %v5017_v51 = vld [vmem:[%s12090_s16] sm:$0xff] }
0x305d   :  { %8363 = vmatpush3.msra.mxu1 %v5017_v51 }
0x3060   :  { %4973 = vbcast.lane.b32.xlu1 %v4971_v41, 256 }
0x3064   :  { %4987 = vbcast.lane.b32.xlu1 %v4985_v6, 256 }
0x3068   :  { %4805 = vrot.lane.b32.xlu1 %v7225_v35, %s9024_s12 }
0x30c6   :  { %v4946_v14 = vpop.permute.xlu1 %4945  ;;  %v4939_v20 = vpop.permute.xlu0 %4938 }
0x30c7   :  { %v4990_v24 = vmul.f32 %v4946_v14, %v9884_v56  ;;  %v4989_v7 = vmul.f32 %v4939_v20, %v9895_v57 }
0x30c9   :  { %v4998_v25 = vsel %vm12144_vm7, %v4990_v24, 0.0  ;;  %v4997_v47 = vsel %vm12145_vm8, %v4989_v7, 0.0  ;;  %vm12150_vm7 = vmmov %vm12148_vm3 }
0x30ca   :  { %v4953_v22 = vpop.permute.xlu1 %4952  ;;  %v4967_v27 = vpop.permute.xlu0 %4966  ;;  %v4999_v5 = vadd.f32 %v4998_v25, %v4997_v47  ;;  %vm12151_vm8 = vmmov %vm12148_vm3  ;;  %v7226_v25 = vld [vmem:[%s12091_s17] ss:$0 sm:$0xff] }
0x30cb   :  { %v4991_v28 = vmul.f32 %v4953_v22, %v9865_v38  ;;  %v4993_v48 = vmul.f32 %v4967_v27, %v9886_v53 }
0x30cd   :  { %v5000_v13 = vsel %vm12147_vm4, %v4991_v28, 0.0  ;;  %v5004_v46 = vsel %vm12149_vm6, %v4993_v48, 0.0  ;;  %vm12152_vm4 = vmmov %vm12148_vm3 }
0x30ce   :  { %v4960_v61 = vpop.permute.xlu1 %4959  ;;  %v5001_v17 = vadd.f32 %v5000_v13, %v4999_v5  ;;  %v4981_v41 = vpop.permute.xlu0 %4980 }
0x30cf   :  { %v4992_v63 = vmul.f32 %v4960_v61, %v9901_v58  ;;  %v4995_v3 = vmul.f32 %v4981_v41, %v9903_v11 }
0x30d1   :  { %v5002_v21 = vsel %vm12148_vm3, %v4992_v63, 0.0  ;;  %v5008_v10 = vsel %vm12151_vm8, %v4995_v3, 0.0  ;;  %vm12153_vm3 = vcmask 785408   ;;  %v5160_v3 = vld [vmem:[%s12094_s20 + $0x60] sm:$0xff] }
0x30d2   :  { %v5003_v19 = vadd.f32 %v5002_v21, %v5001_v17  ;;  %v4974_v6 = vpop.permute.xlu1 %4973  ;;  %vm12154_vm6 = vmmov %vm12153_vm3 }
0x30d3   :  { %v4994_v35 = vmul.f32 %v4974_v6, %v9913_v9  ;;  %v5162_v6 = vld [vmem:[%s12094_s20 + $0x70] sm:$0xff] }
0x30d4   :  { %v5005_v52 = vadd.f32 %v5004_v46, %v5003_v19  ;;  %v5163_v19 = vld [vmem:[%s12094_s20 + $0x78] sm:$0xff]  ;;  %v5161_v46 = vld [vmem:[%s12094_s20 + $0x68] sm:$0xff] }
0x30d5   :  { %v5006_v34 = vsel %vm12150_vm7, %v4994_v35, 0.0  ;;  %8368 = vmatpush3.msra.mxu0 %v5163_v19  ;;  %v5159_v35 = vld [vmem:[%s12094_s20 + $0x58] sm:$0xff] }
0x30d6   :  { %v5007_v36 = vadd.f32 %v5006_v34, %v5005_v52  ;;  %v4988_v26 = vpop.permute.xlu1 %4987  ;;  %8369 = vmatprep.subr.mxu0 %v9017_v1  ;;  %v5158_v34 = vld [vmem:[%s12094_s20 + $0x50] sm:$0xff] }
0x30d7   :  { %v4996_v31 = vmul.f32 %v4988_v26, %v10048_v18  ;;  %8370 = vmatpush3.msra.mxu0 %v5162_v6  ;;  %v5156_v26 = vld [vmem:[%s12094_s20 + $0x40] sm:$0xff] }
0x30d8   :  { %v5009_v16 = vadd.f32 %v5008_v10, %v5007_v36  ;;  %8371 = vmatprep.subr.mxu0 %v9017_v1  ;;  %v5157_v36 = vld [vmem:[%s12094_s20 + $0x48] sm:$0xff]  ;;  %v5155_v10 = vld [vmem:[%s12094_s20 + $0x38] sm:$0xff] }
0x30d9   :  { %v5010_v14 = vsel %vm12152_vm4, %v4996_v31, 0.0  ;;  %8372 = vmatpush3.msra.mxu0 %v5161_v46  ;;  %v5154_v31 = vld [vmem:[%s12094_s20 + $0x30] sm:$0xff] }
0x30da   :  { %v4806_v20 = vpop.permute.xlu1 %4805  ;;  %v5011_v24 = vadd.f32 %v5010_v14, %v5009_v16  ;;  %8373 = vmatprep.subr.mxu0 %v9017_v1  ;;  %v5152_v16 = vld [vmem:[%s12094_s20 + $0x20] sm:$0xff]  ;;  %v5151_v14 = vld [vmem:[%s12094_s20 + $0x18] sm:$0xff] }
0x30db   :  { %v4808_v7 = vadd.f32 %v4806_v20, %v11009_v43  ;;  %8374 = vmatpush3.msra.mxu0 %v5160_v3  ;;  %v5150_v20 = vld [vmem:[%s12094_s20 + $0x10] sm:$0xff] }
0x30dc   :  { %5013 = vrot.lane.b32.xlu0 %v5011_v24, %s9024_s12  ;;  %8375 = vmatprep.subr.mxu0 %v9017_v1  ;;  %v5149_v24 = vld [vmem:[%s12094_s20 + $0x8] sm:$0xff] }
0x30dd   :  { %5120 = vrot.lane.b32.xlu1 %v4808_v7, %s9024_s12  ;;  %8376 = vmatpush3.msra.mxu0 %v5159_v35 }
0x30de   :  { %8377 = vmatprep.subr.mxu0 %v9017_v1 }
0x30df   :  { %8378 = vmatpush3.msra.mxu0 %v5158_v34 }
0x30e0   :  { %5110 = vrot.lane.b32.xlu0 %v4808_v7, %s9021_s26  ;;  %8379 = vmatprep.subr.mxu0 %v9017_v1  ;;  %v5148_v7 = vld [vmem:[%s12094_s20] sm:$0xff] }
0x30e1   :  { %8380 = vmatpush3.msra.mxu0 %v5157_v36 }
0x30e2   :  { %8381 = vmatprep.subr.mxu0 %v9017_v1 }
0x30e3   :  { %8382 = vmatpush3.msra.mxu0 %v5156_v26 }
0x30e4   :  { %8383 = vmatprep.subr.mxu0 %v9017_v1 }
0x30e5   :  { %8384 = vmatpush3.msra.mxu0 %v5155_v10 }
0x30e6   :  { %8385 = vmatprep.subr.mxu0 %v9017_v1 }
0x30e7   :  { %8386 = vmatpush3.msra.mxu0 %v5154_v31 }
0x30e8   :  { %8387 = vmatprep.subr.mxu0 %v9017_v1 }
0x314e   :  { %v11155_v22 = vpop.permute.xlu0 %5013 }
0x314f   :  { %v5016_v27 = vsel %vm99_vm1, %v11135_v37, %v11155_v22  ;;  %v5121_v51 = vpop.permute.xlu1 %5120 }
0x3150   :  { %8365 = vmatmul.mubr.msk.f32.vlgmr.msra.gmra.mxu1 %vm12153_vm3, %v5016_v27 }
0x3152   :  { %v5111_v28 = vpop.permute.xlu0 %5110 }
0x3210   :  { %v5105_v47 = vpop.f32.mrf.mxu1 }
0x3211   :  { %v5106_v43 = vadd.f32 %v7226_v25, %v5105_v47 }
0x3212   :  { %v8366_v32 = vpop.f32.mrf.mxu1 }
0x3213   :  { %v5113_v13 = vadd.f32 %v5111_v28, %v5106_v43 }
0x3215   :  { %v7228_v5 = vmul.f32 -1.442695, %v5113_v13 }
0x3217   :  { %8891 = vpow2.f32 %v7228_v5 }
0x3224   :  { %v8892_v61 = vpop.eup %8891 }
0x3225   :  { %v5117_v48 = vadd.f32 1.0, %v8892_v61 }
0x3227   :  { %8893 = vrcp.f32 %v5117_v48  ;;  %v7229_v48 = vld [vmem:[%s12095_s21] ss:$0 sm:$0xff] }
0x3234   :  { %v8894_v63 = vpop.eup %8893 }
0x3235   :  { %v5123_v17 = vmul.f32 %v8894_v63, %v5121_v51  ;;  %v5130_v27 = vsub.f32 1.0, %v8894_v63 }
0x3237   :  { %5125 = vrot.lane.b32.xlu0 %v5123_v17, %s9020_s25 }
0x32a9   :  { %v5126_v41 = vpop.permute.xlu0 %5125 }
0x32aa   :  { %v5128_v21 = vadd.f32 %v5126_v41, %v5106_v43  ;;  %v5136_v43 = vmul.f32 %v8894_v63, %v10954_v55 }
0x32ac   :  { %8895 = vtanh.f32 %v5128_v21 }
0x32b9   :  { %v8896_v52 = vpop.eup %8895 }
0x32ba   :  { %5132 = vrot.lane.b32.xlu1 %v8896_v52, %s9021_s26 }
0x32be   :  { %5143 = vrot.lane.b32.xlu1 %v11135_v37, %s9021_s26  ;;  %v5153_v37 = vld [vmem:[%s12094_s20 + $0x28] sm:$0xff] }
0x32bf   :  { %8388 = vmatpush3.msra.mxu0 %v5153_v37 }
0x32c0   :  { %8389 = vmatprep.subr.mxu0 %v9017_v1 }
0x32c1   :  { %8390 = vmatpush3.msra.mxu0 %v5152_v16 }
0x32c2   :  { %8391 = vmatprep.subr.mxu0 %v9017_v1 }
0x32c3   :  { %8392 = vmatpush3.msra.mxu0 %v5151_v14 }
0x32c4   :  { %8393 = vmatprep.subr.mxu0 %v9017_v1 }
0x32c5   :  { %8394 = vmatpush3.msra.mxu0 %v5150_v20 }
0x32c6   :  { %8395 = vmatprep.subr.mxu0 %v9017_v1 }
0x32c7   :  { %8396 = vmatpush3.msra.mxu0 %v5149_v24 }
0x32c8   :  { %8397 = vmatprep.subr.mxu0 %v9017_v1 }
0x32c9   :  { %8398 = vmatpush3.msra.mxu0 %v5148_v7 }
0x332c   :  { %v5133_v25 = vpop.permute.xlu1 %5132 }
0x332d   :  { %v5135_v47 = vmul.f32 %v5133_v25, %v5130_v27 }
0x332f   :  { %v11232_v28 = vadd.f32 %v5136_v43, %v5135_v47 }
0x3330   :  { %v5144_v32 = vpop.permute.xlu1 %5143 }
0x3331   :  { %5139 = vrot.lane.b32.xlu0 %v11232_v28, %s9021_s26 }
0x33a3   :  { %v5140_v13 = vpop.permute.xlu0 %5139 }
0x33a4   :  { %v5146_v5 = vsel %vm99_vm1, %v5140_v13, %v11155_v22 }
0x33a5   :  { %v5147_v61 = vsel %vm12154_vm6, %v5146_v5, %v5144_v32 }
0x33a6   :  { %8400 = vmatmul.mubr.f32.vlgmr.msra.gmra.mxu0 %v5147_v61 }
0x3465   :  { %5250 = sbr.rel (%p7232_p9) target bundleno = 13895 (0x3647), region = 113 }
0x3466   :  { %v5237_v51 = vpop.f32.mrf.mxu0 }
0x3467   :  { %v5238_v55 = vadd.f32 %v7229_v48, %v5237_v51 }
0x3468   :  { %v8401_v63 = vpop.f32.mrf.mxu0 }
0x3469   :  { %5242 = vst.msk [vmem:[#allocation8 + $0x8] sm:$0x3] %vm1987_vm2, %v5238_v55 }
0x346a   :  { %v5251_v17 = vsel %vm1987_vm2, %v5238_v55, -inf  ;;  %v5267_v22 = vld [vmem:[%s12093_s19 + $0x20] sm:$0xff]  ;;  %v9031_v41 = vmov 0.0   ;;  %v5266_v21 = vld [vmem:[%s12093_s19 + $0x18] sm:$0xff]  ;;  %v5265_v19 = vld [vmem:[%s12093_s19 + $0x10] sm:$0xff]  ;;  %v5254_v46 = vcvt.s32.f32 %v10183_v29  ;;  %vm9032_vm8 = vmmov 0  }
0x346b   :  { %5252 = vmax.xlane.f32.xlu0 %v5251_v17  ;;  %8402 = vmatprep.subr.mxu0 %v9031_v41  ;;  %v5264_v6 = vld [vmem:[%s12093_s19 + $0x8] sm:$0xff]  ;;  %v5263_v34 = vld [vmem:[%s12093_s19] sm:$0xff]  ;;  %vm5268_vm4 = vcmask 326656  }
0x346c   :  { %8403 = vmatpush3.msra.mxu0 %v5267_v22  ;;  %8412 = vmatprep.mubr.msk.f32.mxu0 %vm9032_vm8, %v9031_v41 }
0x346d   :  { %8404 = vmatprep.subr.mxu0 %v9031_v41 }
0x346e   :  { %8405 = vmatpush3.msra.mxu0 %v5266_v21 }
0x346f   :  { %8406 = vmatprep.subr.mxu0 %v9031_v41 }
0x3470   :  { %8407 = vmatpush3.msra.mxu0 %v5265_v19 }
0x3471   :  { %8408 = vmatprep.subr.mxu0 %v9031_v41 }
0x3472   :  { %8409 = vmatpush3.msra.mxu0 %v5264_v6 }
0x3473   :  { %8410 = vmatprep.subr.mxu0 %v9031_v41 }
0x3474   :  { %8411 = vmatpush3.msra.mxu0 %v5263_v34 }
0x34f4   :  { %v5253_v3 = vpop.xlane.xlu0 %5252 }
0x34f5   :  { %vm5255_vm7 = vcmp.ge.f32.partialorder %v5238_v55, %v5253_v3 }
0x34f6   :  { %v5256_v35 = vsel %vm5255_vm7, %v5254_v46, 32.0 }
0x34f7   :  { %v5257_v52 = vsel %vm1987_vm2, %v5256_v35, inf }
0x34f8   :  { %5258 = vmin.xlane.f32.xlu0 %v5257_v52 }
0x3581   :  { %v5259_v36 = vpop.xlane.xlu0 %5258 }
0x3582   :  { %vm5260_vm3 = vcmp.eq.f32.partialorder %v5254_v46, %v5259_v36 }
0x3583   :  { %v7233_v26 = vsel %vm5260_vm3, 1.0, %v9031_v41 }
0x3584   :  { %8413 = vmatmul.mubr.msk.f32.vlgmr.msra.gmra.mxu0 %vm5268_vm4, %v7233_v26 }
0x3644   :  { %v5338_v10 = vpop.f32.mrf.mxu0 }
0x3645   :  { %5342 = vst.msk [vmem:[#allocation4] sm:$0x3] %vm1987_vm2, %v5338_v10 }
0x3646   :  { %v8414_v31 = vpop.f32.mrf.mxu0 }
0x3647 PF:  { %8415 = vmatprep.subr.mxu1 %v9017_v1  ;;  %v5347_v37 = vld [vmem:[%s12089_s15 + $0x18] sm:$0xff]  ;;  %v5346_v16 = vld [vmem:[%s12089_s15 + $0x10] sm:$0xff]  ;;  %8423 = vmatprep.mubr.msk.f32.mxu1 %vm9018_vm0, %v9017_v1  ;;  %v5345_v14 = vld [vmem:[%s12089_s15 + $0x8] sm:$0xff]  ;;  %vm12155_vm6 = vcmask 15360   ;;  %vm12157_vm8 = vcmask 517120   ;;  %s12159_s14 = sld [smem:[#allocation16_spill]] }
0x3648   :  { %8416 = vmatpush3.msra.mxu1 %v5347_v37  ;;  %8453 = vmatprep.subr.mxu0 %v9017_v1  ;;  %v5344_v20 = vld [vmem:[%s12089_s15] sm:$0xff]  ;;  %vm12156_vm7 = vmmov %vm12155_vm6  ;;  %s7242_s27 = sld [smem:[#allocation5 + $0x5]] }
0x3649   :  { %8417 = vmatprep.subr.mxu1 %v9017_v1  ;;  %8485 = vmatprep.mubr.msk.f32.mxu0 %vm9018_vm0, %v9017_v1  ;;  %vm12158_vm4 = vmmov %vm12157_vm8 }
0x364a   :  { %8418 = vmatpush3.msra.mxu1 %v5346_v16  ;;  %vm12160_vm3 = vmmov %vm12158_vm4 }
0x364b   :  { %8419 = vmatprep.subr.mxu1 %v9017_v1 }
0x364c   :  { %8420 = vmatpush3.msra.mxu1 %v5345_v14 }
0x364d   :  { %8421 = vmatprep.subr.mxu1 %v9017_v1 }
0x364e   :  { %8422 = vmatpush3.msra.mxu1 %v5344_v20  ;;  %p7243_p10 = scmp.ne.s32.totalorder %s7242_s27, 0 }
0x364f   :  { %8424 = vmatmul.mubr.msk.f32.vlgmr.msra.gmra.mxu1 %vm99_vm1, %v5140_v13  ;;  %8426 = vmatprep.subr.mxu1 %v9017_v1 }
0x3650   :  { %8450 = vmatprep.mubr.msk.f32.mxu1 %vm9018_vm0, %v9017_v1 }
0x370f   :  { %v11287_v24 = vpop.f32.mrf.mxu1 }
0x3710   :  { %v5432_v7 = vadd.f32 %v11287_v24, %v10078_v23  ;;  %v5430_v27 = vadd.f32 %v11287_v24, %v10072_v12  ;;  %v5433_v25 = vadd.f32 %v11287_v24, %v10076_v33  ;;  %v5431_v47 = vadd.f32 %v11287_v24, %v10070_v4 }
0x3711   :  { %v8425_v43 = vpop.f32.mrf.mxu1  ;;  %v5435_v32 = vadd.f32 %v11287_v24, %v10082_v40  ;;  %v5434_v13 = vadd.f32 %v11287_v24, %v10084_v30  ;;  %v5437_v63 = vadd.f32 %v11287_v24, %v10093_v49  ;;  %v5436_v22 = vadd.f32 %v11287_v24, %v10087_v50 }
0x3712   :  { %v5440_v5 = vadd.f32 %v10058_v62, %v5432_v7  ;;  %v5438_v61 = vadd.f32 %v10058_v62, %v5430_v27  ;;  %v5441_v48 = vadd.f32 %v10058_v62, %v5433_v25  ;;  %v5439_v51 = vadd.f32 %v10058_v62, %v5431_v47 }
0x3713   :  { %v5443_v55 = vadd.f32 %v10058_v62, %v5435_v32  ;;  %v5442_v17 = vadd.f32 %v10058_v62, %v5434_v13  ;;  %v5445_v41 = vadd.f32 %v10058_v62, %v5437_v63  ;;  %v5444_v21 = vadd.f32 %v10058_v62, %v5436_v22 }
0x3714   :  { %8897 = vtanh.f32 %v5440_v5 }
0x3715   :  { %8899 = vtanh.f32 %v5438_v61 }
0x3716   :  { %8901 = vtanh.f32 %v5441_v48 }
0x3717   :  { %8903 = vtanh.f32 %v5439_v51 }
0x3718   :  { %8905 = vtanh.f32 %v5443_v55 }
0x3719   :  { %8907 = vtanh.f32 %v5442_v17 }
0x371a   :  { %8909 = vtanh.f32 %v5445_v41 }
0x371b   :  { %8911 = vtanh.f32 %v5444_v21 }
0x3721   :  { %v8898_v19 = vpop.eup %8897 }
0x3722   :  { %v8900_v6 = vpop.eup %8899  ;;  %v5456_v46 = vmul.f32 %v8898_v19, %v10063_v59 }
0x3723   :  { %v8902_v3 = vpop.eup %8901  ;;  %v5454_v35 = vmul.f32 %v8900_v6, %v10063_v59 }
0x3724   :  { %v8904_v52 = vpop.eup %8903  ;;  %v5468_v34 = vsel %vm1987_vm2, %v5456_v46, 0.0  ;;  %v5457_v36 = vmul.f32 %v8902_v3, %v10063_v59 }
0x3725   :  { %v8906_v26 = vpop.eup %8905  ;;  %5469 = vadd.xlane.f32.xlu1 %v5468_v34  ;;  %v5462_v10 = vsel %vm1987_vm2, %v5454_v35, 0.0  ;;  %v5455_v31 = vmul.f32 %v8904_v52, %v10063_v59 }
0x3726   :  { %v8908_v37 = vpop.eup %8907  ;;  %5463 = vadd.xlane.f32.xlu0 %v5462_v10  ;;  %v5471_v16 = vsel %vm1987_vm2, %v5457_v36, 0.0  ;;  %v5459_v14 = vmul.f32 %v8906_v26, %v10063_v59 }
0x3727   :  { %v8910_v20 = vpop.eup %8909  ;;  %v5465_v7 = vsel %vm1987_vm2, %v5455_v31, 0.0  ;;  %v5458_v27 = vmul.f32 %v8908_v37, %v10063_v59 }
0x3728   :  { %v8912_v25 = vpop.eup %8911  ;;  %v5477_v47 = vsel %vm1987_vm2, %v5459_v14, 0.0  ;;  %v5461_v43 = vmul.f32 %v8910_v20, %v10063_v59 }
0x3729   :  { %5472 = vadd.xlane.f32.xlu1 %v5471_v16  ;;  %v5474_v32 = vsel %vm1987_vm2, %v5458_v27, 0.0  ;;  %v5460_v13 = vmul.f32 %v8912_v25, %v10063_v59 }
0x372a   :  { %5466 = vadd.xlane.f32.xlu0 %v5465_v7  ;;  %v5483_v5 = vsel %vm1987_vm2, %v5461_v43, 0.0 }
0x372b   :  { %v5480_v61 = vsel %vm1987_vm2, %v5460_v13, 0.0 }
0x372d   :  { %5478 = vadd.xlane.f32.xlu1 %v5477_v47 }
0x372e   :  { %5475 = vadd.xlane.f32.xlu0 %v5474_v32 }
0x3731   :  { %5484 = vadd.xlane.f32.xlu1 %v5483_v5 }
0x3732   :  { %5481 = vadd.xlane.f32.xlu0 %v5480_v61 }
0x37ae   :  { %v5470_v48 = vpop.xlane.xlu1 %5469 }
0x37af   :  { %v5464_v51 = vpop.xlane.xlu0 %5463  ;;  %v5505_v41 = vrot.slane %v5470_v48, %v10189_v0 }
0x37b0   :  { %v5497_v17 = vrot.slane %v5464_v51, %v10189_v0 }
0x37b2   :  { %v5473_v55 = vpop.xlane.xlu1 %5472 }
0x37b3   :  { %v5467_v63 = vpop.xlane.xlu0 %5466  ;;  %v5509_v21 = vrot.slane %v5473_v55, %v10189_v0 }
0x37b4   :  { %v5501_v22 = vrot.slane %v5467_v63, %v10189_v0 }
0x37b6   :  { %v5526_v19 = vsel %vm3030_vm9, %v5501_v22, %v5497_v17  ;;  %v5479_v6 = vpop.xlane.xlu1 %5478 }
0x37b7   :  { %v5527_v46 = vsel %vm3032_vm10, %v5505_v41, %v5526_v19  ;;  %v5476_v3 = vpop.xlane.xlu0 %5475  ;;  %v5517_v34 = vrot.slane %v5479_v6, %v10189_v0 }
0x37b8   :  { %v5528_v35 = vsel %vm3034_vm11, %v5509_v21, %v5527_v46  ;;  %v5513_v52 = vrot.slane %v5476_v3, %v10189_v0 }
0x37ba   :  { %v5529_v36 = vsel %vm3036_vm12, %v5513_v52, %v5528_v35  ;;  %v5485_v26 = vpop.xlane.xlu1 %5484 }
0x37bb   :  { %v5525_v10 = vrot.slane %v5485_v26, %v10189_v0  ;;  %v5482_v31 = vpop.xlane.xlu0 %5481  ;;  %v5530_v16 = vsel %vm3038_vm13, %v5517_v34, %v5529_v36 }
0x37bc   :  { %v5521_v37 = vrot.slane %v5482_v31, %v10189_v0  ;;  %v5649_v31 = vld [vmem:[%s12090_s16 + $0x58] sm:$0xff] }
0x37bd   :  { %8427 = vmatpush3.msra.mxu1 %v5649_v31 }
0x37be   :  { %v5531_v14 = vsel %vm3040_vm14, %v5521_v37, %v5530_v16  ;;  %v5648_v37 = vld [vmem:[%s12090_s16 + $0x50] sm:$0xff]  ;;  %8428 = vmatprep.subr.mxu1 %v9017_v1 }
0x37bf   :  { %v5532_v20 = vsel %vm3042_vm15, %v5525_v10, %v5531_v14  ;;  %v5647_v14 = vld [vmem:[%s12090_s16 + $0x48] sm:$0xff]  ;;  %8429 = vmatpush3.msra.mxu1 %v5648_v37 }
0x37c0   :  { %v5534_v7 = vsel %vm2730_vm5, %v5532_v20, -1e+10  ;;  %8430 = vmatprep.subr.mxu1 %v9017_v1  ;;  %v5646_v20 = vld [vmem:[%s12090_s16 + $0x40] sm:$0xff] }
0x37c1   :  { %v5535_v27 = vsel %vm12155_vm6, %v5534_v7, -inf  ;;  %8431 = vmatpush3.msra.mxu1 %v5647_v14  ;;  %vm12161_vm6 = vmmov %vm12160_vm3 }
0x37c2   :  { %v5536_v25 = vrot.slane %v5535_v27, 4  ;;  %8432 = vmatprep.subr.mxu1 %v9017_v1 }
0x37c3   :  { %8433 = vmatpush3.msra.mxu1 %v5646_v20 }
0x37c4   :  { %v5537_v47 = vmax.f32 %v5535_v27, %v5536_v25  ;;  %v5645_v27 = vld [vmem:[%s12090_s16 + $0x38] sm:$0xff]  ;;  %8434 = vmatprep.subr.mxu1 %v9017_v1  ;;  %v5644_v25 = vld [vmem:[%s12090_s16 + $0x30] sm:$0xff] }
0x37c5   :  { %8435 = vmatpush3.msra.mxu1 %v5645_v27 }
0x37c6   :  { %v5538_v43 = vrot.slane %v5537_v47, 2  ;;  %8436 = vmatprep.subr.mxu1 %v9017_v1 }
0x37c7   :  { %8437 = vmatpush3.msra.mxu1 %v5644_v25 }
0x37c8   :  { %v5539_v32 = vmax.f32 %v5537_v47, %v5538_v43  ;;  %v5643_v47 = vld [vmem:[%s12090_s16 + $0x28] sm:$0xff]  ;;  %8438 = vmatprep.subr.mxu1 %v9017_v1  ;;  %v5642_v43 = vld [vmem:[%s12090_s16 + $0x20] sm:$0xff] }
0x37c9   :  { %8439 = vmatpush3.msra.mxu1 %v5643_v47 }
0x37ca   :  { %v5540_v13 = vrot.slane %v5539_v32, 1  ;;  %8440 = vmatprep.subr.mxu1 %v9017_v1 }
0x37cb   :  { %8441 = vmatpush3.msra.mxu1 %v5642_v43 }
0x37cc   :  { %v5541_v5 = vmax.f32 %v5539_v32, %v5540_v13  ;;  %v5641_v32 = vld [vmem:[%s12090_s16 + $0x18] sm:$0xff]  ;;  %8442 = vmatprep.subr.mxu1 %v9017_v1  ;;  %v5640_v13 = vld [vmem:[%s12090_s16 + $0x10] sm:$0xff] }
0x37cd   :  { %8443 = vmatpush3.msra.mxu1 %v5641_v32 }
0x37ce   :  { %v5542_v61 = vsub.f32 %v5534_v7, %v5541_v5  ;;  %v7236_v7 = vld [vmem:[%s12092_s18] ss:$0 sm:$0xff]  ;;  %8444 = vmatprep.subr.mxu1 %v9017_v1  ;;  %v5639_v5 = vld [vmem:[%s12090_s16 + $0x8] sm:$0xff] }
0x37cf   :  { %8445 = vmatpush3.msra.mxu1 %v5640_v13 }
0x37d0   :  { %v5543_v48 = vmul.f32 1.442695, %v5542_v61  ;;  %8446 = vmatprep.subr.mxu1 %v9017_v1 }
0x37d1   :  { %8447 = vmatpush3.msra.mxu1 %v5639_v5 }
0x37d2   :  { %8913 = vpow2.f32 %v5543_v48  ;;  %8448 = vmatprep.subr.mxu1 %v9017_v1 }
0x37df   :  { %v8914_v51 = vpop.eup %8913 }
0x37e0   :  { %v5545_v55 = vsel %vm12156_vm7, %v8914_v51, 0.0  ;;  %vm12162_vm7 = vmmov %vm12160_vm3 }
0x37e1   :  { %v5546_v63 = vrot.slane %v5545_v55, 4 }
0x37e3   :  { %v5547_v17 = vadd.f32 %v5546_v63, %v5545_v55 }
0x37e5   :  { %v5548_v22 = vrot.slane %v5547_v17, 2 }
0x37e7   :  { %v5549_v41 = vadd.f32 %v5548_v22, %v5547_v17 }
0x37e9   :  { %v5550_v21 = vrot.slane %v5549_v41, 1 }
0x37eb   :  { %v5551_v19 = vadd.f32 %v5550_v21, %v5549_v41 }
0x37ed   :  { %8915 = vrcp.f32 %v5551_v19  ;;  %v7241_v19 = vld [vmem:[%s12159_s14 + $0xa] sm:$0x3] }
0x37fa   :  { %v8916_v6 = vpop.eup %8915 }
0x37fb   :  { %v5553_v46 = vmul.f32 %v8916_v6, %v8914_v51 }
0x37fd   :  { %v5564_v3 = vrot.slane %v5553_v46, %v10211_v2  ;;  %v5557_v35 = vrot.slane %v5553_v46, %v10214_v15  ;;  %v5571_v52 = vrot.slane %v5553_v46, %v10219_v54  ;;  %v5585_v34 = vrot.slane %v5553_v46, %v10222_v8 }
0x37fe   :  { %v5578_v36 = vrot.slane %v5553_v46, %v10227_v42  ;;  %v5599_v26 = vrot.slane %v5553_v46, %v10230_v60  ;;  %v5592_v10 = vrot.slane %v5553_v46, %v10235_v39  ;;  %v5606_v16 = vrot.slane %v5553_v46, %v10239_v44 }
0x37ff   :  { %5566 = vbcast.lane.b32.xlu1 %v5564_v3, 256  ;;  %5559 = vbcast.lane.b32.xlu0 %v5557_v35, 256  ;;  %v11413_v35 = vld [vmem:[#allocation4] sm:$0x3] }
0x3800   :  { %5866 = vst.msk [vmem:[#allocation4] sm:$0x3] %vm1987_vm2, %v7241_v19 }
0x3803   :  { %5573 = vbcast.lane.b32.xlu1 %v5571_v52, 256  ;;  %5587 = vbcast.lane.b32.xlu0 %v5585_v34, 256 }
0x3807   :  { %5580 = vbcast.lane.b32.xlu1 %v5578_v36, 256  ;;  %5601 = vbcast.lane.b32.xlu0 %v5599_v26, 256  ;;  %v5638_v36 = vld [vmem:[%s12090_s16] sm:$0xff] }
0x3808   :  { %8449 = vmatpush3.msra.mxu1 %v5638_v36 }
0x380b   :  { %5594 = vbcast.lane.b32.xlu1 %v5592_v10, 256 }
0x380f   :  { %5608 = vbcast.lane.b32.xlu1 %v5606_v16, 256 }
0x3813   :  { %5426 = vrot.lane.b32.xlu1 %v7236_v7, %s9024_s12 }
0x3871   :  { %v5567_v61 = vpop.permute.xlu1 %5566  ;;  %v5560_v48 = vpop.permute.xlu0 %5559 }
0x3872   :  { %v5611_v51 = vmul.f32 %v5567_v61, %v9884_v56  ;;  %v5610_v55 = vmul.f32 %v5560_v48, %v9895_v57 }
0x3874   :  { %v5619_v22 = vsel %vm12157_vm8, %v5611_v51, 0.0  ;;  %v5618_v41 = vsel %vm12158_vm4, %v5610_v55, 0.0  ;;  %vm12163_vm8 = vmmov %vm12160_vm3 }
0x3875   :  { %v5574_v63 = vpop.permute.xlu1 %5573  ;;  %v5588_v17 = vpop.permute.xlu0 %5587  ;;  %v5620_v46 = vadd.f32 %v5619_v22, %v5618_v41  ;;  %vm12164_vm4 = vmmov %vm12160_vm3  ;;  %v7237_v22 = vld [vmem:[%s12091_s17] ss:$0 sm:$0xff] }
0x3876   :  { %v5612_v21 = vmul.f32 %v5574_v63, %v9865_v38  ;;  %v5614_v52 = vmul.f32 %v5588_v17, %v9886_v53 }
0x3878   :  { %v5621_v6 = vsel %vm12160_vm3, %v5612_v21, 0.0  ;;  %v5625_v14 = vsel %vm12162_vm7, %v5614_v52, 0.0 }
0x3879   :  { %v5581_v3 = vpop.permute.xlu1 %5580  ;;  %v5622_v26 = vadd.f32 %v5621_v6, %v5620_v46  ;;  %v5602_v10 = vpop.permute.xlu0 %5601 }
0x387a   :  { %v5613_v34 = vmul.f32 %v5581_v3, %v9901_v58  ;;  %v5616_v20 = vmul.f32 %v5602_v10, %v9903_v11 }
0x387c   :  { %v5623_v31 = vsel %vm12161_vm6, %v5613_v34, 0.0  ;;  %v5629_v32 = vsel %vm12164_vm4, %v5616_v20, 0.0  ;;  %vm12165_vm6 = vcmask 785408   ;;  %v5781_v20 = vld [vmem:[%s12094_s20 + $0x60] sm:$0xff] }
0x387d   :  { %v5624_v37 = vadd.f32 %v5623_v31, %v5622_v26  ;;  %v5595_v16 = vpop.permute.xlu1 %5594  ;;  %vm12166_vm7 = vmmov %vm12165_vm6 }
0x387e   :  { %v5615_v7 = vmul.f32 %v5595_v16, %v9913_v9  ;;  %v5783_v16 = vld [vmem:[%s12094_s20 + $0x70] sm:$0xff] }
0x387f   :  { %v5626_v27 = vadd.f32 %v5625_v14, %v5624_v37  ;;  %v5784_v37 = vld [vmem:[%s12094_s20 + $0x78] sm:$0xff]  ;;  %v5782_v14 = vld [vmem:[%s12094_s20 + $0x68] sm:$0xff] }
0x3880   :  { %v5627_v25 = vsel %vm12163_vm8, %v5615_v7, 0.0  ;;  %8454 = vmatpush3.msra.mxu0 %v5784_v37  ;;  %v5780_v7 = vld [vmem:[%s12094_s20 + $0x58] sm:$0xff] }
0x3881   :  { %v5628_v47 = vadd.f32 %v5627_v25, %v5626_v27  ;;  %v5609_v43 = vpop.permute.xlu1 %5608  ;;  %8455 = vmatprep.subr.mxu0 %v9017_v1  ;;  %v5779_v25 = vld [vmem:[%s12094_s20 + $0x50] sm:$0xff] }
0x3882   :  { %v5617_v13 = vmul.f32 %v5609_v43, %v10048_v18  ;;  %8456 = vmatpush3.msra.mxu0 %v5783_v16  ;;  %v5777_v43 = vld [vmem:[%s12094_s20 + $0x40] sm:$0xff] }
0x3883   :  { %v5630_v5 = vadd.f32 %v5629_v32, %v5628_v47  ;;  %8457 = vmatprep.subr.mxu0 %v9017_v1  ;;  %v5778_v47 = vld [vmem:[%s12094_s20 + $0x48] sm:$0xff]  ;;  %v5776_v32 = vld [vmem:[%s12094_s20 + $0x38] sm:$0xff] }
0x3884   :  { %v5631_v61 = vsel %vm12160_vm3, %v5617_v13, 0.0  ;;  %8458 = vmatpush3.msra.mxu0 %v5782_v14  ;;  %v5775_v13 = vld [vmem:[%s12094_s20 + $0x30] sm:$0xff] }
0x3885   :  { %v5427_v48 = vpop.permute.xlu1 %5426  ;;  %v5632_v51 = vadd.f32 %v5631_v61, %v5630_v5  ;;  %8459 = vmatprep.subr.mxu0 %v9017_v1  ;;  %v5773_v5 = vld [vmem:[%s12094_s20 + $0x20] sm:$0xff]  ;;  %v5772_v61 = vld [vmem:[%s12094_s20 + $0x18] sm:$0xff] }
0x3886   :  { %v5429_v55 = vadd.f32 %v5427_v48, %v11287_v24  ;;  %8460 = vmatpush3.msra.mxu0 %v5781_v20  ;;  %v5771_v48 = vld [vmem:[%s12094_s20 + $0x10] sm:$0xff] }
0x3887   :  { %5634 = vrot.lane.b32.xlu0 %v5632_v51, %s9024_s12  ;;  %8461 = vmatprep.subr.mxu0 %v9017_v1  ;;  %v5770_v51 = vld [vmem:[%s12094_s20 + $0x8] sm:$0xff] }
0x3888   :  { %5741 = vrot.lane.b32.xlu1 %v5429_v55, %s9024_s12  ;;  %8462 = vmatpush3.msra.mxu0 %v5780_v7 }
0x3889   :  { %8463 = vmatprep.subr.mxu0 %v9017_v1 }
0x388a   :  { %8464 = vmatpush3.msra.mxu0 %v5779_v25 }
0x388b   :  { %5731 = vrot.lane.b32.xlu0 %v5429_v55, %s9021_s26  ;;  %8465 = vmatprep.subr.mxu0 %v9017_v1  ;;  %v5769_v55 = vld [vmem:[%s12094_s20] sm:$0xff] }
0x388c   :  { %8466 = vmatpush3.msra.mxu0 %v5778_v47 }
0x388d   :  { %8467 = vmatprep.subr.mxu0 %v9017_v1 }
0x388e   :  { %8468 = vmatpush3.msra.mxu0 %v5777_v43 }
0x388f   :  { %8469 = vmatprep.subr.mxu0 %v9017_v1 }
0x3890   :  { %8470 = vmatpush3.msra.mxu0 %v5776_v32 }
0x3891   :  { %8471 = vmatprep.subr.mxu0 %v9017_v1 }
0x3892   :  { %8472 = vmatpush3.msra.mxu0 %v5775_v13 }
0x3893   :  { %8473 = vmatprep.subr.mxu0 %v9017_v1 }
0x38f9   :  { %v11433_v63 = vpop.permute.xlu0 %5634 }
0x38fa   :  { %v5637_v17 = vsel %vm99_vm1, %v11413_v35, %v11433_v63  ;;  %v5742_v36 = vpop.permute.xlu1 %5741 }
0x38fb   :  { %8451 = vmatmul.mubr.msk.f32.vlgmr.msra.gmra.mxu1 %vm12165_vm6, %v5637_v17 }
0x38fd   :  { %v5732_v21 = vpop.permute.xlu0 %5731 }
0x39bb   :  { %v5726_v41 = vpop.f32.mrf.mxu1 }
0x39bc   :  { %v5727_v24 = vadd.f32 %v7237_v22, %v5726_v41 }
0x39bd   :  { %v8452_v19 = vpop.f32.mrf.mxu1 }
0x39be   :  { %v5734_v6 = vadd.f32 %v5732_v21, %v5727_v24 }
0x39c0   :  { %v7239_v46 = vmul.f32 -1.442695, %v5734_v6 }
0x39c2   :  { %8917 = vpow2.f32 %v7239_v46 }
0x39cf   :  { %v8918_v3 = vpop.eup %8917 }
0x39d0   :  { %v5738_v52 = vadd.f32 1.0, %v8918_v3 }
0x39d2   :  { %8919 = vrcp.f32 %v5738_v52  ;;  %v7240_v52 = vld [vmem:[%s12095_s21] ss:$0 sm:$0xff] }
0x39df   :  { %v8920_v34 = vpop.eup %8919 }
0x39e0   :  { %v5744_v26 = vmul.f32 %v8920_v34, %v5742_v36  ;;  %v5751_v17 = vsub.f32 1.0, %v8920_v34 }
0x39e2   :  { %5746 = vrot.lane.b32.xlu0 %v5744_v26, %s9020_s25 }
0x3a54   :  { %v5747_v10 = vpop.permute.xlu0 %5746 }
0x3a55   :  { %v5749_v31 = vadd.f32 %v5747_v10, %v5727_v24  ;;  %v5757_v24 = vmul.f32 %v8920_v34, %v11232_v28 }
0x3a57   :  { %8921 = vtanh.f32 %v5749_v31 }
0x3a64   :  { %v8922_v27 = vpop.eup %8921 }
0x3a65   :  { %5753 = vrot.lane.b32.xlu1 %v8922_v27, %s9021_s26 }
0x3a69   :  { %5764 = vrot.lane.b32.xlu1 %v11413_v35, %s9021_s26  ;;  %v5774_v35 = vld [vmem:[%s12094_s20 + $0x28] sm:$0xff] }
0x3a6a   :  { %8474 = vmatpush3.msra.mxu0 %v5774_v35 }
0x3a6b   :  { %8475 = vmatprep.subr.mxu0 %v9017_v1 }
0x3a6c   :  { %8476 = vmatpush3.msra.mxu0 %v5773_v5 }
0x3a6d   :  { %8477 = vmatprep.subr.mxu0 %v9017_v1 }
0x3a6e   :  { %8478 = vmatpush3.msra.mxu0 %v5772_v61 }
0x3a6f   :  { %8479 = vmatprep.subr.mxu0 %v9017_v1 }
0x3a70   :  { %8480 = vmatpush3.msra.mxu0 %v5771_v48 }
0x3a71   :  { %8481 = vmatprep.subr.mxu0 %v9017_v1 }
0x3a72   :  { %8482 = vmatpush3.msra.mxu0 %v5770_v51 }
0x3a73   :  { %8483 = vmatprep.subr.mxu0 %v9017_v1 }
0x3a74   :  { %8484 = vmatpush3.msra.mxu0 %v5769_v55 }
0x3ad7   :  { %v5754_v22 = vpop.permute.xlu1 %5753 }
0x3ad8   :  { %v5756_v41 = vmul.f32 %v5754_v22, %v5751_v17 }
0x3ada   :  { %v11510_v21 = vadd.f32 %v5757_v24, %v5756_v41 }
0x3adb   :  { %v5765_v19 = vpop.permute.xlu1 %5764 }
0x3adc   :  { %5760 = vrot.lane.b32.xlu0 %v11510_v21, %s9021_s26 }
0x3b4e   :  { %v5761_v6 = vpop.permute.xlu0 %5760 }
0x3b4f   :  { %v5767_v46 = vsel %vm99_vm1, %v5761_v6, %v11433_v63 }
0x3b50   :  { %v5768_v3 = vsel %vm12166_vm7, %v5767_v46, %v5765_v19 }
0x3b51   :  { %8486 = vmatmul.mubr.f32.vlgmr.msra.gmra.mxu0 %v5768_v3 }
0x3c10   :  { %5871 = sbr.rel (%p7243_p10) target bundleno = 15858 (0x3df2), region = 117 }
0x3c11   :  { %v5858_v36 = vpop.f32.mrf.mxu0 }
0x3c12   :  { %v5859_v28 = vadd.f32 %v7240_v52, %v5858_v36 }
0x3c13   :  { %v8487_v34 = vpop.f32.mrf.mxu0 }
0x3c14   :  { %5863 = vst.msk [vmem:[#allocation8 + $0xa] sm:$0x3] %vm1987_vm2, %v5859_v28 }
0x3c15   :  { %v5872_v26 = vsel %vm1987_vm2, %v5859_v28, -inf  ;;  %v5888_v63 = vld [vmem:[%s12093_s19 + $0x20] sm:$0xff]  ;;  %v9033_v10 = vmov 0.0   ;;  %v5887_v31 = vld [vmem:[%s12093_s19 + $0x18] sm:$0xff]  ;;  %v5886_v37 = vld [vmem:[%s12093_s19 + $0x10] sm:$0xff]  ;;  %v5875_v14 = vcvt.s32.f32 %v10183_v29  ;;  %vm9034_vm4 = vmmov 0  }
0x3c16   :  { %5873 = vmax.xlane.f32.xlu0 %v5872_v26  ;;  %8488 = vmatprep.subr.mxu0 %v9033_v10  ;;  %v5885_v16 = vld [vmem:[%s12093_s19 + $0x8] sm:$0xff]  ;;  %v5884_v25 = vld [vmem:[%s12093_s19] sm:$0xff]  ;;  %vm5889_vm3 = vcmask 326656  }
0x3c17   :  { %8489 = vmatpush3.msra.mxu0 %v5888_v63  ;;  %8498 = vmatprep.mubr.msk.f32.mxu0 %vm9034_vm4, %v9033_v10 }
0x3c18   :  { %8490 = vmatprep.subr.mxu0 %v9033_v10 }
0x3c19   :  { %8491 = vmatpush3.msra.mxu0 %v5887_v31 }
0x3c1a   :  { %8492 = vmatprep.subr.mxu0 %v9033_v10 }
0x3c1b   :  { %8493 = vmatpush3.msra.mxu0 %v5886_v37 }
0x3c1c   :  { %8494 = vmatprep.subr.mxu0 %v9033_v10 }
0x3c1d   :  { %8495 = vmatpush3.msra.mxu0 %v5885_v16 }
0x3c1e   :  { %8496 = vmatprep.subr.mxu0 %v9033_v10 }
0x3c1f   :  { %8497 = vmatpush3.msra.mxu0 %v5884_v25 }
0x3c9f   :  { %v5874_v20 = vpop.xlane.xlu0 %5873 }
0x3ca0   :  { %vm5876_vm8 = vcmp.ge.f32.partialorder %v5859_v28, %v5874_v20 }
0x3ca1   :  { %v5877_v7 = vsel %vm5876_vm8, %v5875_v14, 32.0 }
0x3ca2   :  { %v5878_v27 = vsel %vm1987_vm2, %v5877_v7, inf }
0x3ca3   :  { %5879 = vmin.xlane.f32.xlu0 %v5878_v27 }
0x3d2c   :  { %v5880_v47 = vpop.xlane.xlu0 %5879 }
0x3d2d   :  { %vm5881_vm6 = vcmp.eq.f32.partialorder %v5875_v14, %v5880_v47 }
0x3d2e   :  { %v7244_v43 = vsel %vm5881_vm6, 1.0, %v9033_v10 }
0x3d2f   :  { %8499 = vmatmul.mubr.msk.f32.vlgmr.msra.gmra.mxu0 %vm5889_vm3, %v7244_v43 }
0x3def   :  { %v5959_v32 = vpop.f32.mrf.mxu0 }
0x3df0   :  { %5963 = vst.msk [vmem:[#allocation4] sm:$0x3] %vm1987_vm2, %v5959_v32 }
0x3df1   :  { %v8500_v13 = vpop.f32.mrf.mxu0 }
0x3df2 PF:  { %8501 = vmatprep.subr.mxu1 %v9017_v1  ;;  %v5968_v35 = vld [vmem:[%s12089_s15 + $0x18] sm:$0xff]  ;;  %v5967_v5 = vld [vmem:[%s12089_s15 + $0x10] sm:$0xff]  ;;  %8509 = vmatprep.mubr.msk.f32.mxu1 %vm9018_vm0, %v9017_v1  ;;  %v5966_v61 = vld [vmem:[%s12089_s15 + $0x8] sm:$0xff]  ;;  %vm12167_vm7 = vcmask 15360   ;;  %vm12169_vm4 = vcmask 517120   ;;  %s12171_s7 = sld [smem:[#allocation16_spill]] }
0x3df3   :  { %8502 = vmatpush3.msra.mxu1 %v5968_v35  ;;  %8539 = vmatprep.subr.mxu0 %v9017_v1  ;;  %v5965_v48 = vld [vmem:[%s12089_s15] sm:$0xff]  ;;  %vm12168_vm8 = vmmov %vm12167_vm7  ;;  %s7253_s8 = sld [smem:[#allocation5 + $0x6]] }
0x3df4   :  { %8503 = vmatprep.subr.mxu1 %v9017_v1  ;;  %8571 = vmatprep.mubr.msk.f32.mxu0 %vm9018_vm0, %v9017_v1  ;;  %vm12170_vm3 = vmmov %vm12169_vm4 }
0x3df5   :  { %8504 = vmatpush3.msra.mxu1 %v5967_v5  ;;  %vm12172_vm6 = vmmov %vm12170_vm3 }
0x3df6   :  { %8505 = vmatprep.subr.mxu1 %v9017_v1 }
0x3df7   :  { %8506 = vmatpush3.msra.mxu1 %v5966_v61 }
0x3df8   :  { %8507 = vmatprep.subr.mxu1 %v9017_v1 }
0x3df9   :  { %8508 = vmatpush3.msra.mxu1 %v5965_v48  ;;  %p7254_p11 = scmp.ne.s32.totalorder %s7253_s8, 0 }
0x3dfa   :  { %8510 = vmatmul.mubr.msk.f32.vlgmr.msra.gmra.mxu1 %vm99_vm1, %v5761_v6  ;;  %8512 = vmatprep.subr.mxu1 %v9017_v1 }
0x3dfb   :  { %8536 = vmatprep.mubr.msk.f32.mxu1 %vm9018_vm0, %v9017_v1 }
0x3eba   :  { %v11565_v51 = vpop.f32.mrf.mxu1 }
0x3ebb   :  { %v6053_v55 = vadd.f32 %v11565_v51, %v10078_v23  ;;  %v6051_v17 = vadd.f32 %v11565_v51, %v10072_v12  ;;  %v6054_v22 = vadd.f32 %v11565_v51, %v10076_v33  ;;  %v6052_v41 = vadd.f32 %v11565_v51, %v10070_v4 }
0x3ebc   :  { %v8511_v24 = vpop.f32.mrf.mxu1  ;;  %v6056_v19 = vadd.f32 %v11565_v51, %v10082_v40  ;;  %v6055_v6 = vadd.f32 %v11565_v51, %v10084_v30  ;;  %v6058_v34 = vadd.f32 %v11565_v51, %v10093_v49  ;;  %v6057_v63 = vadd.f32 %v11565_v51, %v10087_v50 }
0x3ebd   :  { %v6061_v46 = vadd.f32 %v10058_v62, %v6053_v55  ;;  %v6059_v3 = vadd.f32 %v10058_v62, %v6051_v17  ;;  %v6062_v52 = vadd.f32 %v10058_v62, %v6054_v22  ;;  %v6060_v36 = vadd.f32 %v10058_v62, %v6052_v41 }
0x3ebe   :  { %v6064_v28 = vadd.f32 %v10058_v62, %v6056_v19  ;;  %v6063_v26 = vadd.f32 %v10058_v62, %v6055_v6  ;;  %v6066_v10 = vadd.f32 %v10058_v62, %v6058_v34  ;;  %v6065_v31 = vadd.f32 %v10058_v62, %v6057_v63 }
0x3ebf   :  { %8923 = vtanh.f32 %v6061_v46 }
0x3ec0   :  { %8925 = vtanh.f32 %v6059_v3 }
0x3ec1   :  { %8927 = vtanh.f32 %v6062_v52 }
0x3ec2   :  { %8929 = vtanh.f32 %v6060_v36 }
0x3ec3   :  { %8931 = vtanh.f32 %v6064_v28 }
0x3ec4   :  { %8933 = vtanh.f32 %v6063_v26 }
0x3ec5   :  { %8935 = vtanh.f32 %v6066_v10 }
0x3ec6   :  { %8937 = vtanh.f32 %v6065_v31 }
0x3ecc   :  { %v8924_v37 = vpop.eup %8923 }
0x3ecd   :  { %v8926_v16 = vpop.eup %8925  ;;  %v6077_v14 = vmul.f32 %v8924_v37, %v10063_v59 }
0x3ece   :  { %v8928_v20 = vpop.eup %8927  ;;  %v6075_v7 = vmul.f32 %v8926_v16, %v10063_v59 }
0x3ecf   :  { %v8930_v27 = vpop.eup %8929  ;;  %v6089_v25 = vsel %vm1987_vm2, %v6077_v14, 0.0  ;;  %v6078_v47 = vmul.f32 %v8928_v20, %v10063_v59 }
0x3ed0   :  { %v8932_v43 = vpop.eup %8931  ;;  %6090 = vadd.xlane.f32.xlu1 %v6089_v25  ;;  %v6083_v32 = vsel %vm1987_vm2, %v6075_v7, 0.0  ;;  %v6076_v13 = vmul.f32 %v8930_v27, %v10063_v59 }
0x3ed1   :  { %v8934_v35 = vpop.eup %8933  ;;  %6084 = vadd.xlane.f32.xlu0 %v6083_v32  ;;  %v6092_v5 = vsel %vm1987_vm2, %v6078_v47, 0.0  ;;  %v6080_v61 = vmul.f32 %v8932_v43, %v10063_v59 }
0x3ed2   :  { %v8936_v48 = vpop.eup %8935  ;;  %v6086_v55 = vsel %vm1987_vm2, %v6076_v13, 0.0  ;;  %v6079_v17 = vmul.f32 %v8934_v35, %v10063_v59 }
0x3ed3   :  { %v8938_v22 = vpop.eup %8937  ;;  %v6098_v41 = vsel %vm1987_vm2, %v6080_v61, 0.0  ;;  %v6082_v24 = vmul.f32 %v8936_v48, %v10063_v59 }
0x3ed4   :  { %6093 = vadd.xlane.f32.xlu1 %v6092_v5  ;;  %v6095_v19 = vsel %vm1987_vm2, %v6079_v17, 0.0  ;;  %v6081_v6 = vmul.f32 %v8938_v22, %v10063_v59 }
0x3ed5   :  { %6087 = vadd.xlane.f32.xlu0 %v6086_v55  ;;  %v6104_v46 = vsel %vm1987_vm2, %v6082_v24, 0.0 }
0x3ed6   :  { %v6101_v3 = vsel %vm1987_vm2, %v6081_v6, 0.0 }
0x3ed8   :  { %6099 = vadd.xlane.f32.xlu1 %v6098_v41 }
0x3ed9   :  { %6096 = vadd.xlane.f32.xlu0 %v6095_v19 }
0x3edc   :  { %6105 = vadd.xlane.f32.xlu1 %v6104_v46 }
0x3edd   :  { %6102 = vadd.xlane.f32.xlu0 %v6101_v3 }
0x3f59   :  { %v6091_v52 = vpop.xlane.xlu1 %6090 }
0x3f5a   :  { %v6085_v36 = vpop.xlane.xlu0 %6084  ;;  %v6126_v10 = vrot.slane %v6091_v52, %v10189_v0 }
0x3f5b   :  { %v6118_v26 = vrot.slane %v6085_v36, %v10189_v0 }
0x3f5d   :  { %v6094_v28 = vpop.xlane.xlu1 %6093 }
0x3f5e   :  { %v6088_v34 = vpop.xlane.xlu0 %6087  ;;  %v6130_v31 = vrot.slane %v6094_v28, %v10189_v0 }
0x3f5f   :  { %v6122_v63 = vrot.slane %v6088_v34, %v10189_v0 }
0x3f61   :  { %v6147_v37 = vsel %vm3030_vm9, %v6122_v63, %v6118_v26  ;;  %v6100_v16 = vpop.xlane.xlu1 %6099 }
0x3f62   :  { %v6148_v14 = vsel %vm3032_vm10, %v6126_v10, %v6147_v37  ;;  %v6097_v20 = vpop.xlane.xlu0 %6096  ;;  %v6138_v25 = vrot.slane %v6100_v16, %v10189_v0 }
0x3f63   :  { %v6149_v7 = vsel %vm3034_vm11, %v6130_v31, %v6148_v14  ;;  %v6134_v27 = vrot.slane %v6097_v20, %v10189_v0 }
0x3f65   :  { %v6150_v47 = vsel %vm3036_vm12, %v6134_v27, %v6149_v7  ;;  %v6106_v43 = vpop.xlane.xlu1 %6105 }
0x3f66   :  { %v6146_v32 = vrot.slane %v6106_v43, %v10189_v0  ;;  %v6103_v13 = vpop.xlane.xlu0 %6102  ;;  %v6151_v5 = vsel %vm3038_vm13, %v6138_v25, %v6150_v47 }
0x3f67   :  { %v6142_v35 = vrot.slane %v6103_v13, %v10189_v0  ;;  %v6270_v13 = vld [vmem:[%s12090_s16 + $0x58] sm:$0xff] }
0x3f68   :  { %8513 = vmatpush3.msra.mxu1 %v6270_v13 }
0x3f69   :  { %v6152_v61 = vsel %vm3040_vm14, %v6142_v35, %v6151_v5  ;;  %v6269_v35 = vld [vmem:[%s12090_s16 + $0x50] sm:$0xff]  ;;  %8514 = vmatprep.subr.mxu1 %v9017_v1 }
0x3f6a   :  { %v6153_v48 = vsel %vm3042_vm15, %v6146_v32, %v6152_v61  ;;  %v6268_v61 = vld [vmem:[%s12090_s16 + $0x48] sm:$0xff]  ;;  %8515 = vmatpush3.msra.mxu1 %v6269_v35 }
0x3f6b   :  { %v6155_v55 = vsel %vm2730_vm5, %v6153_v48, -1e+10  ;;  %8516 = vmatprep.subr.mxu1 %v9017_v1  ;;  %v6267_v48 = vld [vmem:[%s12090_s16 + $0x40] sm:$0xff] }
0x3f6c   :  { %v6156_v17 = vsel %vm12167_vm7, %v6155_v55, -inf  ;;  %8517 = vmatpush3.msra.mxu1 %v6268_v61  ;;  %vm12173_vm7 = vmmov %vm12170_vm3 }
0x3f6d   :  { %v6157_v22 = vrot.slane %v6156_v17, 4  ;;  %8518 = vmatprep.subr.mxu1 %v9017_v1 }
0x3f6e   :  { %8519 = vmatpush3.msra.mxu1 %v6267_v48 }
0x3f6f   :  { %v6158_v41 = vmax.f32 %v6156_v17, %v6157_v22  ;;  %v6266_v17 = vld [vmem:[%s12090_s16 + $0x38] sm:$0xff]  ;;  %8520 = vmatprep.subr.mxu1 %v9017_v1  ;;  %v6265_v22 = vld [vmem:[%s12090_s16 + $0x30] sm:$0xff] }
0x3f70   :  { %8521 = vmatpush3.msra.mxu1 %v6266_v17 }
0x3f71   :  { %v6159_v24 = vrot.slane %v6158_v41, 2  ;;  %8522 = vmatprep.subr.mxu1 %v9017_v1 }
0x3f72   :  { %8523 = vmatpush3.msra.mxu1 %v6265_v22 }
0x3f73   :  { %v6160_v19 = vmax.f32 %v6158_v41, %v6159_v24  ;;  %v6264_v41 = vld [vmem:[%s12090_s16 + $0x28] sm:$0xff]  ;;  %8524 = vmatprep.subr.mxu1 %v9017_v1  ;;  %v6263_v24 = vld [vmem:[%s12090_s16 + $0x20] sm:$0xff] }
0x3f74   :  { %8525 = vmatpush3.msra.mxu1 %v6264_v41 }
0x3f75   :  { %v6161_v6 = vrot.slane %v6160_v19, 1  ;;  %8526 = vmatprep.subr.mxu1 %v9017_v1 }
0x3f76   :  { %8527 = vmatpush3.msra.mxu1 %v6263_v24 }
0x3f77   :  { %v6162_v46 = vmax.f32 %v6160_v19, %v6161_v6  ;;  %v6262_v19 = vld [vmem:[%s12090_s16 + $0x18] sm:$0xff]  ;;  %8528 = vmatprep.subr.mxu1 %v9017_v1  ;;  %v6261_v6 = vld [vmem:[%s12090_s16 + $0x10] sm:$0xff] }
0x3f78   :  { %8529 = vmatpush3.msra.mxu1 %v6262_v19 }
0x3f79   :  { %v6163_v3 = vsub.f32 %v6155_v55, %v6162_v46  ;;  %v7247_v55 = vld [vmem:[%s12092_s18] ss:$0 sm:$0xff]  ;;  %8530 = vmatprep.subr.mxu1 %v9017_v1  ;;  %v6260_v46 = vld [vmem:[%s12090_s16 + $0x8] sm:$0xff] }
0x3f7a   :  { %8531 = vmatpush3.msra.mxu1 %v6261_v6 }
0x3f7b   :  { %v6164_v52 = vmul.f32 1.442695, %v6163_v3  ;;  %8532 = vmatprep.subr.mxu1 %v9017_v1 }
0x3f7c   :  { %8533 = vmatpush3.msra.mxu1 %v6260_v46 }
0x3f7d   :  { %8939 = vpow2.f32 %v6164_v52  ;;  %8534 = vmatprep.subr.mxu1 %v9017_v1 }
0x3f8a   :  { %v8940_v36 = vpop.eup %8939 }
0x3f8b   :  { %v6166_v28 = vsel %vm12168_vm8, %v8940_v36, 0.0  ;;  %vm12174_vm8 = vmmov %vm12170_vm3 }
0x3f8c   :  { %v6167_v34 = vrot.slane %v6166_v28, 4 }
0x3f8e   :  { %v6168_v26 = vadd.f32 %v6167_v34, %v6166_v28 }
0x3f90   :  { %v6169_v63 = vrot.slane %v6168_v26, 2 }
0x3f92   :  { %v6170_v10 = vadd.f32 %v6169_v63, %v6168_v26 }
0x3f94   :  { %v6171_v31 = vrot.slane %v6170_v10, 1 }
0x3f96   :  { %v6172_v37 = vadd.f32 %v6171_v31, %v6170_v10 }
0x3f98   :  { %8941 = vrcp.f32 %v6172_v37  ;;  %v7252_v37 = vld [vmem:[%s12171_s7 + $0xc] sm:$0x3] }
0x3fa5   :  { %v8942_v16 = vpop.eup %8941 }
0x3fa6   :  { %v6174_v14 = vmul.f32 %v8942_v16, %v8940_v36 }
0x3fa8   :  { %v6185_v20 = vrot.slane %v6174_v14, %v10211_v2  ;;  %v6178_v7 = vrot.slane %v6174_v14, %v10214_v15  ;;  %v6192_v27 = vrot.slane %v6174_v14, %v10219_v54  ;;  %v6206_v25 = vrot.slane %v6174_v14, %v10222_v8 }
0x3fa9   :  { %v6199_v47 = vrot.slane %v6174_v14, %v10227_v42  ;;  %v6220_v43 = vrot.slane %v6174_v14, %v10230_v60  ;;  %v6213_v32 = vrot.slane %v6174_v14, %v10235_v39  ;;  %v6227_v5 = vrot.slane %v6174_v14, %v10239_v44 }
0x3faa   :  { %6187 = vbcast.lane.b32.xlu1 %v6185_v20, 256  ;;  %6180 = vbcast.lane.b32.xlu0 %v6178_v7, 256  ;;  %v11691_v7 = vld [vmem:[#allocation4] sm:$0x3] }
0x3fab   :  { %6487 = vst.msk [vmem:[#allocation4] sm:$0x3] %vm1987_vm2, %v7252_v37 }
0x3fae   :  { %6194 = vbcast.lane.b32.xlu1 %v6192_v27, 256  ;;  %6208 = vbcast.lane.b32.xlu0 %v6206_v25, 256 }
0x3fb2   :  { %6201 = vbcast.lane.b32.xlu1 %v6199_v47, 256  ;;  %6222 = vbcast.lane.b32.xlu0 %v6220_v43, 256  ;;  %v6259_v47 = vld [vmem:[%s12090_s16] sm:$0xff] }
0x3fb3   :  { %8535 = vmatpush3.msra.mxu1 %v6259_v47 }
0x3fb6   :  { %6215 = vbcast.lane.b32.xlu1 %v6213_v32, 256 }
0x3fba   :  { %6229 = vbcast.lane.b32.xlu1 %v6227_v5, 256 }
0x3fbe   :  { %6047 = vrot.lane.b32.xlu1 %v7247_v55, %s9024_s12 }
0x401c   :  { %v6188_v3 = vpop.permute.xlu1 %6187  ;;  %v6181_v52 = vpop.permute.xlu0 %6180 }
0x401d   :  { %v6232_v36 = vmul.f32 %v6188_v3, %v9884_v56  ;;  %v6231_v28 = vmul.f32 %v6181_v52, %v9895_v57 }
0x401f   :  { %v6240_v63 = vsel %vm12169_vm4, %v6232_v36, 0.0  ;;  %v6239_v10 = vsel %vm12170_vm3, %v6231_v28, 0.0  ;;  %vm12175_vm4 = vmmov %vm12170_vm3 }
0x4020   :  { %v6195_v34 = vpop.permute.xlu1 %6194  ;;  %v6209_v26 = vpop.permute.xlu0 %6208  ;;  %v6241_v14 = vadd.f32 %v6240_v63, %v6239_v10  ;;  %v7248_v63 = vld [vmem:[%s12091_s17] ss:$0 sm:$0xff] }
0x4021   :  { %v6233_v31 = vmul.f32 %v6195_v34, %v9865_v38  ;;  %v6235_v27 = vmul.f32 %v6209_v26, %v9886_v53 }
0x4023   :  { %v6242_v16 = vsel %vm12172_vm6, %v6233_v31, 0.0  ;;  %v6246_v61 = vsel %vm12174_vm8, %v6235_v27, 0.0  ;;  %vm12176_vm6 = vmmov %vm12170_vm3 }
0x4024   :  { %v6202_v20 = vpop.permute.xlu1 %6201  ;;  %v6243_v43 = vadd.f32 %v6242_v16, %v6241_v14  ;;  %v6223_v32 = vpop.permute.xlu0 %6222 }
0x4025   :  { %v6234_v25 = vmul.f32 %v6202_v20, %v9901_v58  ;;  %v6237_v48 = vmul.f32 %v6223_v32, %v9903_v11 }
0x4027   :  { %v6244_v13 = vsel %vm12173_vm7, %v6234_v25, 0.0  ;;  %v6250_v19 = vsel %vm12170_vm3, %v6237_v48, 0.0  ;;  %vm12177_vm7 = vcmask 785408   ;;  %v6402_v48 = vld [vmem:[%s12094_s20 + $0x60] sm:$0xff] }
0x4028   :  { %v6245_v35 = vadd.f32 %v6244_v13, %v6243_v43  ;;  %v6216_v5 = vpop.permute.xlu1 %6215  ;;  %vm12178_vm8 = vmmov %vm12177_vm7 }
0x4029   :  { %v6236_v55 = vmul.f32 %v6216_v5, %v9913_v9  ;;  %v6404_v5 = vld [vmem:[%s12094_s20 + $0x70] sm:$0xff] }
0x402a   :  { %v6247_v17 = vadd.f32 %v6246_v61, %v6245_v35  ;;  %v6405_v35 = vld [vmem:[%s12094_s20 + $0x78] sm:$0xff]  ;;  %v6403_v61 = vld [vmem:[%s12094_s20 + $0x68] sm:$0xff] }
0x402b   :  { %v6248_v22 = vsel %vm12175_vm4, %v6236_v55, 0.0  ;;  %8540 = vmatpush3.msra.mxu0 %v6405_v35  ;;  %v6401_v55 = vld [vmem:[%s12094_s20 + $0x58] sm:$0xff] }
0x402c   :  { %v6249_v41 = vadd.f32 %v6248_v22, %v6247_v17  ;;  %v6230_v24 = vpop.permute.xlu1 %6229  ;;  %8541 = vmatprep.subr.mxu0 %v9017_v1  ;;  %v6400_v22 = vld [vmem:[%s12094_s20 + $0x50] sm:$0xff] }
0x402d   :  { %v6238_v6 = vmul.f32 %v6230_v24, %v10048_v18  ;;  %8542 = vmatpush3.msra.mxu0 %v6404_v5  ;;  %v6398_v24 = vld [vmem:[%s12094_s20 + $0x40] sm:$0xff] }
0x402e   :  { %v6251_v46 = vadd.f32 %v6250_v19, %v6249_v41  ;;  %8543 = vmatprep.subr.mxu0 %v9017_v1  ;;  %v6399_v41 = vld [vmem:[%s12094_s20 + $0x48] sm:$0xff]  ;;  %v6397_v19 = vld [vmem:[%s12094_s20 + $0x38] sm:$0xff] }
0x402f   :  { %v6252_v3 = vsel %vm12176_vm6, %v6238_v6, 0.0  ;;  %8544 = vmatpush3.msra.mxu0 %v6403_v61  ;;  %v6396_v6 = vld [vmem:[%s12094_s20 + $0x30] sm:$0xff] }
0x4030   :  { %v6048_v52 = vpop.permute.xlu1 %6047  ;;  %v6253_v36 = vadd.f32 %v6252_v3, %v6251_v46  ;;  %8545 = vmatprep.subr.mxu0 %v9017_v1  ;;  %v6394_v46 = vld [vmem:[%s12094_s20 + $0x20] sm:$0xff]  ;;  %v6393_v3 = vld [vmem:[%s12094_s20 + $0x18] sm:$0xff] }
0x4031   :  { %v6050_v28 = vadd.f32 %v6048_v52, %v11565_v51  ;;  %8546 = vmatpush3.msra.mxu0 %v6402_v48  ;;  %v6392_v52 = vld [vmem:[%s12094_s20 + $0x10] sm:$0xff] }
0x4032   :  { %6255 = vrot.lane.b32.xlu0 %v6253_v36, %s9024_s12  ;;  %8547 = vmatprep.subr.mxu0 %v9017_v1  ;;  %v6391_v36 = vld [vmem:[%s12094_s20 + $0x8] sm:$0xff] }
0x4033   :  { %6362 = vrot.lane.b32.xlu1 %v6050_v28, %s9024_s12  ;;  %8548 = vmatpush3.msra.mxu0 %v6401_v55 }
0x4034   :  { %8549 = vmatprep.subr.mxu0 %v9017_v1 }
0x4035   :  { %8550 = vmatpush3.msra.mxu0 %v6400_v22 }
0x4036   :  { %6352 = vrot.lane.b32.xlu0 %v6050_v28, %s9021_s26  ;;  %8551 = vmatprep.subr.mxu0 %v9017_v1  ;;  %v6390_v28 = vld [vmem:[%s12094_s20] sm:$0xff] }
0x4037   :  { %8552 = vmatpush3.msra.mxu0 %v6399_v41 }
0x4038   :  { %8553 = vmatprep.subr.mxu0 %v9017_v1 }
0x4039   :  { %8554 = vmatpush3.msra.mxu0 %v6398_v24 }
0x403a   :  { %8555 = vmatprep.subr.mxu0 %v9017_v1 }
0x403b   :  { %8556 = vmatpush3.msra.mxu0 %v6397_v19 }
0x403c   :  { %8557 = vmatprep.subr.mxu0 %v9017_v1 }
0x403d   :  { %8558 = vmatpush3.msra.mxu0 %v6396_v6 }
0x403e   :  { %8559 = vmatprep.subr.mxu0 %v9017_v1 }
0x40a4   :  { %v11711_v34 = vpop.permute.xlu0 %6255 }
0x40a5   :  { %v6258_v26 = vsel %vm99_vm1, %v11691_v7, %v11711_v34  ;;  %v6363_v47 = vpop.permute.xlu1 %6362 }
0x40a6   :  { %8537 = vmatmul.mubr.msk.f32.vlgmr.msra.gmra.mxu1 %vm12177_vm7, %v6258_v26 }
0x40a8   :  { %v6353_v31 = vpop.permute.xlu0 %6352 }
0x4166   :  { %v6347_v10 = vpop.f32.mrf.mxu1 }
0x4167   :  { %v6348_v51 = vadd.f32 %v7248_v63, %v6347_v10 }
0x4168   :  { %v8538_v37 = vpop.f32.mrf.mxu1 }
0x4169   :  { %v6355_v16 = vadd.f32 %v6353_v31, %v6348_v51 }
0x416b   :  { %v7250_v14 = vmul.f32 -1.442695, %v6355_v16 }
0x416d   :  { %8943 = vpow2.f32 %v7250_v14 }
0x417a   :  { %v8944_v20 = vpop.eup %8943 }
0x417b   :  { %v6359_v27 = vadd.f32 1.0, %v8944_v20 }
0x417d   :  { %8945 = vrcp.f32 %v6359_v27  ;;  %v7251_v27 = vld [vmem:[%s12095_s21] ss:$0 sm:$0xff] }
0x418a   :  { %v8946_v25 = vpop.eup %8945 }
0x418b   :  { %v6365_v43 = vmul.f32 %v8946_v25, %v6363_v47  ;;  %v6372_v26 = vsub.f32 1.0, %v8946_v25 }
0x418d   :  { %6367 = vrot.lane.b32.xlu0 %v6365_v43, %s9020_s25 }
0x41ff   :  { %v6368_v32 = vpop.permute.xlu0 %6367 }
0x4200   :  { %v6370_v13 = vadd.f32 %v6368_v32, %v6348_v51  ;;  %v6378_v51 = vmul.f32 %v8946_v25, %v11510_v21 }
0x4202   :  { %8947 = vtanh.f32 %v6370_v13 }
0x420f   :  { %v8948_v17 = vpop.eup %8947 }
0x4210   :  { %6374 = vrot.lane.b32.xlu1 %v8948_v17, %s9021_s26 }
0x4214   :  { %6385 = vrot.lane.b32.xlu1 %v11691_v7, %s9021_s26  ;;  %v6395_v7 = vld [vmem:[%s12094_s20 + $0x28] sm:$0xff] }
0x4215   :  { %8560 = vmatpush3.msra.mxu0 %v6395_v7 }
0x4216   :  { %8561 = vmatprep.subr.mxu0 %v9017_v1 }
0x4217   :  { %8562 = vmatpush3.msra.mxu0 %v6394_v46 }
0x4218   :  { %8563 = vmatprep.subr.mxu0 %v9017_v1 }
0x4219   :  { %8564 = vmatpush3.msra.mxu0 %v6393_v3 }
0x421a   :  { %8565 = vmatprep.subr.mxu0 %v9017_v1 }
0x421b   :  { %8566 = vmatpush3.msra.mxu0 %v6392_v52 }
0x421c   :  { %8567 = vmatprep.subr.mxu0 %v9017_v1 }
0x421d   :  { %8568 = vmatpush3.msra.mxu0 %v6391_v36 }
0x421e   :  { %8569 = vmatprep.subr.mxu0 %v9017_v1 }
0x421f   :  { %8570 = vmatpush3.msra.mxu0 %v6390_v28 }
0x4282   :  { %v6375_v63 = vpop.permute.xlu1 %6374 }
0x4283   :  { %v6377_v10 = vmul.f32 %v6375_v63, %v6372_v26 }
0x4285   :  { %v11788_v31 = vadd.f32 %v6378_v51, %v6377_v10 }
0x4286   :  { %v6386_v37 = vpop.permute.xlu1 %6385 }
0x4287   :  { %6381 = vrot.lane.b32.xlu0 %v11788_v31, %s9021_s26 }
0x42f9   :  { %v6382_v16 = vpop.permute.xlu0 %6381 }
0x42fa   :  { %v6388_v14 = vsel %vm99_vm1, %v6382_v16, %v11711_v34 }
0x42fb   :  { %v6389_v20 = vsel %vm12178_vm8, %v6388_v14, %v6386_v37 }
0x42fc   :  { %8572 = vmatmul.mubr.f32.vlgmr.msra.gmra.mxu0 %v6389_v20 }
0x43bb   :  { %6492 = sbr.rel (%p7254_p11) target bundleno = 17821 (0x459d), region = 121 }
0x43bc   :  { %v6479_v47 = vpop.f32.mrf.mxu0 }
0x43bd   :  { %v6480_v21 = vadd.f32 %v7251_v27, %v6479_v47 }
0x43be   :  { %v8573_v25 = vpop.f32.mrf.mxu0 }
0x43bf   :  { %6484 = vst.msk [vmem:[#allocation8 + $0xc] sm:$0x3] %vm1987_vm2, %v6480_v21 }
0x43c0   :  { %v6493_v43 = vsel %vm1987_vm2, %v6480_v21, -inf  ;;  %v6509_v34 = vld [vmem:[%s12093_s19 + $0x20] sm:$0xff]  ;;  %v9035_v32 = vmov 0.0   ;;  %v6508_v13 = vld [vmem:[%s12093_s19 + $0x18] sm:$0xff]  ;;  %v6507_v35 = vld [vmem:[%s12093_s19 + $0x10] sm:$0xff]  ;;  %v6496_v61 = vcvt.s32.f32 %v10183_v29  ;;  %vm9036_vm3 = vmmov 0  }
0x43c1   :  { %6494 = vmax.xlane.f32.xlu0 %v6493_v43  ;;  %8574 = vmatprep.subr.mxu0 %v9035_v32  ;;  %v6506_v5 = vld [vmem:[%s12093_s19 + $0x8] sm:$0xff]  ;;  %v6505_v22 = vld [vmem:[%s12093_s19] sm:$0xff]  ;;  %vm6510_vm6 = vcmask 326656  }
0x43c2   :  { %8575 = vmatpush3.msra.mxu0 %v6509_v34  ;;  %8584 = vmatprep.mubr.msk.f32.mxu0 %vm9036_vm3, %v9035_v32 }
0x43c3   :  { %8576 = vmatprep.subr.mxu0 %v9035_v32 }
0x43c4   :  { %8577 = vmatpush3.msra.mxu0 %v6508_v13 }
0x43c5   :  { %8578 = vmatprep.subr.mxu0 %v9035_v32 }
0x43c6   :  { %8579 = vmatpush3.msra.mxu0 %v6507_v35 }
0x43c7   :  { %8580 = vmatprep.subr.mxu0 %v9035_v32 }
0x43c8   :  { %8581 = vmatpush3.msra.mxu0 %v6506_v5 }
0x43c9   :  { %8582 = vmatprep.subr.mxu0 %v9035_v32 }
0x43ca   :  { %8583 = vmatpush3.msra.mxu0 %v6505_v22 }
0x444a   :  { %v6495_v48 = vpop.xlane.xlu0 %6494 }
0x444b   :  { %vm6497_vm4 = vcmp.ge.f32.partialorder %v6480_v21, %v6495_v48 }
0x444c   :  { %v6498_v55 = vsel %vm6497_vm4, %v6496_v61, 32.0 }
0x444d   :  { %v6499_v17 = vsel %vm1987_vm2, %v6498_v55, inf }
0x444e   :  { %6500 = vmin.xlane.f32.xlu0 %v6499_v17 }
0x44d7   :  { %v6501_v41 = vpop.xlane.xlu0 %6500 }
0x44d8   :  { %vm6502_vm7 = vcmp.eq.f32.partialorder %v6496_v61, %v6501_v41 }
0x44d9   :  { %v7255_v24 = vsel %vm6502_vm7, 1.0, %v9035_v32 }
0x44da   :  { %8585 = vmatmul.mubr.msk.f32.vlgmr.msra.gmra.mxu0 %vm6510_vm6, %v7255_v24 }
0x459a   :  { %v6580_v19 = vpop.f32.mrf.mxu0 }
0x459b   :  { %6584 = vst.msk [vmem:[#allocation4] sm:$0x3] %vm1987_vm2, %v6580_v19 }
0x459c   :  { %v8586_v29 = vpop.f32.mrf.mxu0 }
0x459d PF:  { %8587 = vmatprep.subr.mxu1 %v9017_v1  ;;  %v6589_v6 = vld [vmem:[%s12089_s15 + $0x18] sm:$0xff]  ;;  %v6588_v7 = vld [vmem:[%s12089_s15 + $0x10] sm:$0xff]  ;;  %8595 = vmatprep.mubr.msk.f32.mxu1 %vm9018_vm0, %v9017_v1  ;;  %v6587_v46 = vld [vmem:[%s12089_s15 + $0x8] sm:$0xff]  ;;  %vm12189_vm4 = vcmask 785408   ;;  %s9037_s1 = smov [#allocation8]  }
0x459e   :  { %8588 = vmatpush3.msra.mxu1 %v6589_v6  ;;  %8625 = vmatprep.subr.mxu0 %v9017_v1  ;;  %v6586_v3 = vld [vmem:[%s12089_s15] sm:$0xff]  ;;  %vm12190_vm3 = vmmov %vm12189_vm4  ;;  %s7111_s28 = sshll.u32 %s9037_s1, 4  ;;  %s7112_s28 = int_to_ptr.vmem [resolvable:$true] %s7111_s28 }
0x459f   :  { %8589 = vmatprep.subr.mxu1 %v9017_v1  ;;  %8657 = vmatprep.mubr.msk.f32.mxu0 %vm9018_vm0, %v9017_v1  ;;  %p8997_p13 = scmp.lt.s32.totalorder %s7112_s28, %s7112_s28 }
0x45a0   :  { %8590 = vmatpush3.msra.mxu1 %v6588_v7 }
0x45a1   :  { %8591 = vmatprep.subr.mxu1 %v9017_v1 }
0x45a2   :  { %8592 = vmatpush3.msra.mxu1 %v6587_v46 }
0x45a3   :  { %8593 = vmatprep.subr.mxu1 %v9017_v1 }
0x45a4   :  { %8594 = vmatpush3.msra.mxu1 %v6586_v3 }
0x45a5   :  { %8596 = vmatmul.mubr.msk.f32.vlgmr.msra.gmra.mxu1 %vm99_vm1, %v6382_v16  ;;  %8598 = vmatprep.subr.mxu1 %v9017_v1 }
0x45a6   :  { %8622 = vmatprep.mubr.msk.f32.mxu1 %vm9018_vm0, %v9017_v1  ;;  %vm12179_vm0 = vcmask 15360  }
0x4665   :  { %v11843_v52 = vpop.f32.mrf.mxu1 }
0x4666   :  { %v6674_v36 = vadd.f32 %v11843_v52, %v10078_v23  ;;  %v6672_v28 = vadd.f32 %v11843_v52, %v10072_v12  ;;  %v6675_v26 = vadd.f32 %v11843_v52, %v10076_v33  ;;  %v6673_v63 = vadd.f32 %v11843_v52, %v10070_v4 }
0x4667   :  { %v8597_v10 = vpop.f32.mrf.mxu1  ;;  %v6677_v51 = vadd.f32 %v11843_v52, %v10082_v40  ;;  %v6676_v37 = vadd.f32 %v11843_v52, %v10084_v30  ;;  %v6679_v4 = vadd.f32 %v11843_v52, %v10093_v49  ;;  %v6678_v30 = vadd.f32 %v11843_v52, %v10087_v50 }
0x4668   :  { %v6682_v16 = vadd.f32 %v10058_v62, %v6674_v36  ;;  %v6680_v23 = vadd.f32 %v10058_v62, %v6672_v28  ;;  %v6683_v14 = vadd.f32 %v10058_v62, %v6675_v26  ;;  %v6681_v12 = vadd.f32 %v10058_v62, %v6673_v63 }
0x4669   :  { %v6685_v33 = vadd.f32 %v10058_v62, %v6677_v51  ;;  %v6684_v40 = vadd.f32 %v10058_v62, %v6676_v37  ;;  %v6687_v20 = vadd.f32 %v10058_v62, %v6679_v4  ;;  %v6686_v27 = vadd.f32 %v10058_v62, %v6678_v30 }
0x466a   :  { %8954 = vtanh.f32 %v6682_v16 }
0x466b   :  { %8956 = vtanh.f32 %v6680_v23 }
0x466c   :  { %8958 = vtanh.f32 %v6683_v14 }
0x466d   :  { %8960 = vtanh.f32 %v6681_v12 }
0x466e   :  { %8962 = vtanh.f32 %v6685_v33 }
0x466f   :  { %8964 = vtanh.f32 %v6684_v40 }
0x4670   :  { %8966 = vtanh.f32 %v6687_v20 }
0x4671   :  { %8968 = vtanh.f32 %v6686_v27 }
0x4677   :  { %v8955_v47 = vpop.eup %8954 }
0x4678   :  { %v8957_v21 = vpop.eup %8956  ;;  %v6698_v49 = vmul.f32 %v8955_v47, %v10063_v59 }
0x4679   :  { %v8959_v25 = vpop.eup %8958  ;;  %v6696_v43 = vmul.f32 %v8957_v21, %v10063_v59 }
0x467a   :  { %v8961_v34 = vpop.eup %8960  ;;  %v6710_v50 = vsel %vm1987_vm2, %v6698_v49, 0.0  ;;  %v6699_v32 = vmul.f32 %v8959_v25, %v10063_v59 }
0x467b   :  { %v8963_v13 = vpop.eup %8962  ;;  %6711 = vadd.xlane.f32.xlu1 %v6710_v50  ;;  %v6704_v35 = vsel %vm1987_vm2, %v6696_v43, 0.0  ;;  %v6697_v62 = vmul.f32 %v8961_v34, %v10063_v59 }
0x467c   :  { %v8965_v5 = vpop.eup %8964  ;;  %6705 = vadd.xlane.f32.xlu0 %v6704_v35  ;;  %v6713_v61 = vsel %vm1987_vm2, %v6699_v32, 0.0  ;;  %v6701_v48 = vmul.f32 %v8963_v13, %v10063_v59 }
0x467d   :  { %v8967_v55 = vpop.eup %8966  ;;  %v6707_v17 = vsel %vm1987_vm2, %v6697_v62, 0.0  ;;  %v6700_v22 = vmul.f32 %v8965_v5, %v10063_v59 }
0x467e   :  { %v8969_v41 = vpop.eup %8968  ;;  %v6719_v24 = vsel %vm1987_vm2, %v6701_v48, 0.0  ;;  %v6703_v19 = vmul.f32 %v8967_v55, %v10063_v59 }
0x467f   :  { %6714 = vadd.xlane.f32.xlu1 %v6713_v61  ;;  %v6716_v29 = vsel %vm1987_vm2, %v6700_v22, 0.0  ;;  %v6702_v6 = vmul.f32 %v8969_v41, %v10063_v59 }
0x4680   :  { %6708 = vadd.xlane.f32.xlu0 %v6707_v17  ;;  %v6725_v7 = vsel %vm1987_vm2, %v6703_v19, 0.0 }
0x4681   :  { %v6722_v46 = vsel %vm1987_vm2, %v6702_v6, 0.0 }
0x4683   :  { %6720 = vadd.xlane.f32.xlu1 %v6719_v24 }
0x4684   :  { %6717 = vadd.xlane.f32.xlu0 %v6716_v29 }
0x4687   :  { %6726 = vadd.xlane.f32.xlu1 %v6725_v7 }
0x4688   :  { %6723 = vadd.xlane.f32.xlu0 %v6722_v46 }
0x4704   :  { %v6712_v3 = vpop.xlane.xlu1 %6711 }
0x4705   :  { %v6706_v36 = vpop.xlane.xlu0 %6705  ;;  %v6747_v51 = vrot.slane %v6712_v3, %v10189_v0 }
0x4706   :  { %v6739_v63 = vrot.slane %v6706_v36, %v10189_v0 }
0x4708   :  { %v6715_v28 = vpop.xlane.xlu1 %6714 }
0x4709   :  { %v6709_v26 = vpop.xlane.xlu0 %6708  ;;  %v6751_v37 = vrot.slane %v6715_v28, %v10189_v0 }
0x470a   :  { %v6743_v10 = vrot.slane %v6709_v26, %v10189_v0 }
0x470c   :  { %v6768_v59 = vsel %vm3030_vm9, %v6743_v10, %v6739_v63  ;;  %v6721_v16 = vpop.xlane.xlu1 %6720  ;;  %vm12180_vm9 = vmmov %vm12179_vm0  ;;  %v6885_v10 = vld [vmem:[%s12090_s16 + $0x28] sm:$0xff] }
0x470d   :  { %v6769_v23 = vsel %vm3032_vm10, %v6747_v51, %v6768_v59  ;;  %v6718_v14 = vpop.xlane.xlu0 %6717  ;;  %v6759_v4 = vrot.slane %v6721_v16, %v10189_v0  ;;  %v6884_v51 = vld [vmem:[%s12090_s16 + $0x20] sm:$0xff]  ;;  %v6882_v59 = vld [vmem:[%s12090_s16 + $0x10] sm:$0xff]  ;;  %v6881_v16 = vld [vmem:[%s12090_s16 + $0x8] sm:$0xff] }
0x470e   :  { %v6770_v12 = vsel %vm3034_vm11, %v6751_v37, %v6769_v23  ;;  %v6755_v33 = vrot.slane %v6718_v14, %v10189_v0  ;;  %v6883_v37 = vld [vmem:[%s12090_s16 + $0x18] sm:$0xff] }
0x4710   :  { %v6771_v40 = vsel %vm3036_vm12, %v6755_v33, %v6770_v12  ;;  %v6727_v30 = vpop.xlane.xlu1 %6726 }
0x4711   :  { %v6767_v20 = vrot.slane %v6727_v30, %v10189_v0  ;;  %v6724_v27 = vpop.xlane.xlu0 %6723  ;;  %v6772_v21 = vsel %vm3038_vm13, %v6759_v4, %v6771_v40 }
0x4712   :  { %v6763_v47 = vrot.slane %v6724_v27, %v10189_v0 }
0x4714   :  { %v6773_v49 = vsel %vm3040_vm14, %v6763_v47, %v6772_v21 }
0x4715   :  { %v6774_v25 = vsel %vm3042_vm15, %v6767_v20, %v6773_v49 }
0x4716   :  { %v6776_v43 = vsel %vm2730_vm5, %v6774_v25, -1e+10  ;;  %vm12181_vm5 = vcmask 517120  }
0x4717   :  { %v6777_v34 = vsel %vm12179_vm0, %v6776_v43, -inf  ;;  %vm12182_vm10 = vmmov %vm12181_vm5 }
0x4718   :  { %v6778_v50 = vrot.slane %v6777_v34, 4  ;;  %vm12183_vm11 = vmmov %vm12181_vm5 }
0x4719   :  { %vm12184_vm12 = vmmov %vm12181_vm5 }
0x471a   :  { %v6779_v32 = vmax.f32 %v6777_v34, %v6778_v50  ;;  %vm12185_vm13 = vmmov %vm12181_vm5 }
0x471b   :  { %vm12186_vm14 = vmmov %vm12181_vm5 }
0x471c   :  { %v6780_v13 = vrot.slane %v6779_v32, 2  ;;  %vm12187_vm15 = vmmov %vm12181_vm5 }
0x471d   :  { %vm12188_vm8 = vmmov %vm12181_vm5 }
0x471e   :  { %v6781_v35 = vmax.f32 %v6779_v32, %v6780_v13 }
0x4720   :  { %v6782_v62 = vrot.slane %v6781_v35, 1 }
0x4722   :  { %v6783_v5 = vmax.f32 %v6781_v35, %v6782_v62 }
0x4724   :  { %v6784_v61 = vsub.f32 %v6776_v43, %v6783_v5 }
0x4726   :  { %v6785_v48 = vmul.f32 1.442695, %v6784_v61 }
0x4728   :  { %8970 = vpow2.f32 %v6785_v48 }
0x4735   :  { %v8971_v0 = vpop.eup %8970 }
0x4736   :  { %v6787_v55 = vsel %vm12180_vm9, %v8971_v0, 0.0 }
0x4737   :  { %v6788_v17 = vrot.slane %v6787_v55, 4 }
0x4739   :  { %v6789_v22 = vadd.f32 %v6788_v17, %v6787_v55 }
0x473b   :  { %v6790_v41 = vrot.slane %v6789_v22, 2 }
0x473d   :  { %v6791_v24 = vadd.f32 %v6790_v41, %v6789_v22 }
0x473f   :  { %v6792_v45 = vrot.slane %v6791_v24, 1 }
0x4741   :  { %v6793_v19 = vadd.f32 %v6792_v45, %v6791_v24 }
0x4743   :  { %8972 = vrcp.f32 %v6793_v19 }
0x4750   :  { %v8973_v29 = vpop.eup %8972 }
0x4751   :  { %v6795_v6 = vmul.f32 %v8973_v29, %v8971_v0 }
0x4753   :  { %v6806_v7 = vrot.slane %v6795_v6, %v10211_v2  ;;  %v6799_v46 = vrot.slane %v6795_v6, %v10214_v15  ;;  %v6813_v3 = vrot.slane %v6795_v6, %v10219_v54  ;;  %v6827_v36 = vrot.slane %v6795_v6, %v10222_v8  ;;  %v6891_v2 = vld [vmem:[%s12090_s16 + $0x58] sm:$0xff]  ;;  %v6890_v15 = vld [vmem:[%s12090_s16 + $0x50] sm:$0xff]  ;;  %v6889_v8 = vld [vmem:[%s12090_s16 + $0x48] sm:$0xff] }
0x4754   :  { %v6820_v28 = vrot.slane %v6795_v6, %v10227_v42  ;;  %v6841_v26 = vrot.slane %v6795_v6, %v10230_v60  ;;  %v6834_v63 = vrot.slane %v6795_v6, %v10235_v39  ;;  %8599 = vmatpush3.msra.mxu1 %v6891_v2  ;;  %v6848_v54 = vrot.slane %v6795_v6, %v10239_v44  ;;  %v6888_v42 = vld [vmem:[%s12090_s16 + $0x40] sm:$0xff]  ;;  %v6887_v39 = vld [vmem:[%s12090_s16 + $0x38] sm:$0xff]  ;;  %v6886_v44 = vld [vmem:[%s12090_s16 + $0x30] sm:$0xff] }
0x4755   :  { %6808 = vbcast.lane.b32.xlu1 %v6806_v7, 256  ;;  %6801 = vbcast.lane.b32.xlu0 %v6799_v46, 256  ;;  %v7258_v60 = vld [vmem:[%s12092_s18] ss:$0 sm:$0xff] }
0x4756   :  { %8600 = vmatprep.subr.mxu1 %v9017_v1 }
0x4757   :  { %8601 = vmatpush3.msra.mxu1 %v6890_v15 }
0x4758   :  { %8602 = vmatprep.subr.mxu1 %v9017_v1 }
0x4759   :  { %6815 = vbcast.lane.b32.xlu1 %v6813_v3, 256  ;;  %6829 = vbcast.lane.b32.xlu0 %v6827_v36, 256 }
0x475a   :  { %8603 = vmatpush3.msra.mxu1 %v6889_v8  ;;  %v7025_v8 = vld [vmem:[%s12094_s20 + $0x70] sm:$0xff] }
0x475b   :  { %8604 = vmatprep.subr.mxu1 %v9017_v1 }
0x475c   :  { %8605 = vmatpush3.msra.mxu1 %v6888_v42  ;;  %v7024_v42 = vld [vmem:[%s12094_s20 + $0x68] sm:$0xff] }
0x475d   :  { %6822 = vbcast.lane.b32.xlu1 %v6820_v28, 256  ;;  %6843 = vbcast.lane.b32.xlu0 %v6841_v26, 256 }
0x475e   :  { %8606 = vmatprep.subr.mxu1 %v9017_v1 }
0x475f   :  { %8607 = vmatpush3.msra.mxu1 %v6887_v39 }
0x4760   :  { %8608 = vmatprep.subr.mxu1 %v9017_v1 }
0x4761   :  { %6836 = vbcast.lane.b32.xlu1 %v6834_v63, 256  ;;  %8609 = vmatpush3.msra.mxu1 %v6886_v44  ;;  %v7022_v44 = vld [vmem:[%s12094_s20 + $0x58] sm:$0xff] }
0x4762   :  { %8610 = vmatprep.subr.mxu1 %v9017_v1 }
0x4763   :  { %8611 = vmatpush3.msra.mxu1 %v6885_v10  ;;  %v7021_v10 = vld [vmem:[%s12094_s20 + $0x50] sm:$0xff] }
0x4764   :  { %8612 = vmatprep.subr.mxu1 %v9017_v1 }
0x4765   :  { %6850 = vbcast.lane.b32.xlu1 %v6848_v54, 256  ;;  %8613 = vmatpush3.msra.mxu1 %v6884_v51  ;;  %v7026_v54 = vld [vmem:[%s12094_s20 + $0x78] sm:$0xff]  ;;  %v7020_v51 = vld [vmem:[%s12094_s20 + $0x48] sm:$0xff] }
0x4766   :  { %8614 = vmatprep.subr.mxu1 %v9017_v1  ;;  %8626 = vmatpush3.msra.mxu0 %v7026_v54 }
0x4767   :  { %8615 = vmatpush3.msra.mxu1 %v6883_v37  ;;  %8627 = vmatprep.subr.mxu0 %v9017_v1  ;;  %v7019_v37 = vld [vmem:[%s12094_s20 + $0x40] sm:$0xff] }
0x4768   :  { %8616 = vmatprep.subr.mxu1 %v9017_v1  ;;  %8628 = vmatpush3.msra.mxu0 %v7025_v8 }
0x4769   :  { %6668 = vrot.lane.b32.xlu1 %v7258_v60, %s9024_s12  ;;  %8617 = vmatpush3.msra.mxu1 %v6882_v59  ;;  %v7023_v60 = vld [vmem:[%s12094_s20 + $0x60] sm:$0xff]  ;;  %v7018_v59 = vld [vmem:[%s12094_s20 + $0x38] sm:$0xff] }
0x476a   :  { %8618 = vmatprep.subr.mxu1 %v9017_v1  ;;  %8629 = vmatprep.subr.mxu0 %v9017_v1 }
0x476b   :  { %8619 = vmatpush3.msra.mxu1 %v6881_v16  ;;  %8630 = vmatpush3.msra.mxu0 %v7024_v42  ;;  %v7017_v16 = vld [vmem:[%s12094_s20 + $0x30] sm:$0xff] }
0x476c   :  { %8620 = vmatprep.subr.mxu1 %v9017_v1  ;;  %8631 = vmatprep.subr.mxu0 %v9017_v1 }
0x476d   :  { %8632 = vmatpush3.msra.mxu0 %v7023_v60 }
0x476e   :  { %8633 = vmatprep.subr.mxu0 %v9017_v1 }
0x476f   :  { %8634 = vmatpush3.msra.mxu0 %v7022_v44 }
0x4770   :  { %8635 = vmatprep.subr.mxu0 %v9017_v1 }
0x4771   :  { %8636 = vmatpush3.msra.mxu0 %v7021_v10 }
0x4772   :  { %8637 = vmatprep.subr.mxu0 %v9017_v1 }
0x4773   :  { %8638 = vmatpush3.msra.mxu0 %v7020_v51 }
0x4774   :  { %8639 = vmatprep.subr.mxu0 %v9017_v1 }
0x4775   :  { %8640 = vmatpush3.msra.mxu0 %v7019_v37 }
0x4776   :  { %8641 = vmatprep.subr.mxu0 %v9017_v1 }
0x4777   :  { %8642 = vmatpush3.msra.mxu0 %v7018_v59 }
0x4778   :  { %8643 = vmatprep.subr.mxu0 %v9017_v1 }
0x4779   :  { %8644 = vmatpush3.msra.mxu0 %v7017_v16 }
0x477a   :  { %8645 = vmatprep.subr.mxu0 %v9017_v1 }
0x47c7   :  { %v6809_v23 = vpop.permute.xlu1 %6808  ;;  %v6802_v14 = vpop.permute.xlu0 %6801 }
0x47c8   :  { %v6853_v12 = vmul.f32 %v6809_v23, %v9884_v56  ;;  %v6852_v33 = vmul.f32 %v6802_v14, %v9895_v57  ;;  %v6880_v56 = vld [vmem:[%s12090_s16] sm:$0xff]  ;;  %v7016_v23 = vld [vmem:[%s12094_s20 + $0x28] sm:$0xff] }
0x47c9   :  { %8621 = vmatpush3.msra.mxu1 %v6880_v56  ;;  %v7015_v14 = vld [vmem:[%s12094_s20 + $0x20] sm:$0xff]  ;;  %8646 = vmatpush3.msra.mxu0 %v7016_v23 }
0x47ca   :  { %v6861_v30 = vsel %vm12181_vm5, %v6853_v12, 0.0  ;;  %v6860_v20 = vsel %vm12182_vm10, %v6852_v33, 0.0  ;;  %8647 = vmatprep.subr.mxu0 %v9017_v1  ;;  %v7014_v12 = vld [vmem:[%s12094_s20 + $0x18] sm:$0xff]  ;;  %v7013_v33 = vld [vmem:[%s12094_s20 + $0x10] sm:$0xff] }
0x47cb   :  { %v6816_v4 = vpop.permute.xlu1 %6815  ;;  %v6830_v40 = vpop.permute.xlu0 %6829  ;;  %v6862_v21 = vadd.f32 %v6861_v30, %v6860_v20  ;;  %8648 = vmatpush3.msra.mxu0 %v7015_v14 }
0x47cc   :  { %v6854_v27 = vmul.f32 %v6816_v4, %v9865_v38  ;;  %v6856_v25 = vmul.f32 %v6830_v40, %v9886_v53  ;;  %8649 = vmatprep.subr.mxu0 %v9017_v1  ;;  %v7012_v4 = vld [vmem:[%s12094_s20 + $0x8] sm:$0xff]  ;;  %v7011_v40 = vld [vmem:[%s12094_s20] sm:$0xff] }
0x47cd   :  { %8650 = vmatpush3.msra.mxu0 %v7014_v12 }
0x47ce   :  { %v6863_v47 = vsel %vm12183_vm11, %v6854_v27, 0.0  ;;  %v6867_v38 = vsel %vm12185_vm13, %v6856_v25, 0.0  ;;  %8651 = vmatprep.subr.mxu0 %v9017_v1 }
0x47cf   :  { %v6823_v49 = vpop.permute.xlu1 %6822  ;;  %v6864_v57 = vadd.f32 %v6863_v47, %v6862_v21  ;;  %v6844_v34 = vpop.permute.xlu0 %6843  ;;  %8652 = vmatpush3.msra.mxu0 %v7013_v33 }
0x47d0   :  { %v6855_v43 = vmul.f32 %v6823_v49, %v9901_v58  ;;  %v6858_v35 = vmul.f32 %v6844_v34, %v9903_v11  ;;  %v11983_v11 = vld [vmem:[#allocation4] sm:$0x3]  ;;  %8653 = vmatprep.subr.mxu0 %v9017_v1 }
0x47d1   :  { %8654 = vmatpush3.msra.mxu0 %v7012_v4 }
0x47d2   :  { %v6865_v50 = vsel %vm12184_vm12, %v6855_v43, 0.0  ;;  %v6871_v48 = vsel %vm12187_vm15, %v6858_v35, 0.0  ;;  %8655 = vmatprep.subr.mxu0 %v9017_v1  ;;  %v7262_v1 = vld [vmem:[%s12095_s21] ss:$0 sm:$0xff] }
0x47d3   :  { %v6866_v32 = vadd.f32 %v6865_v50, %v6864_v57  ;;  %v6837_v13 = vpop.permute.xlu1 %6836  ;;  %8656 = vmatpush3.msra.mxu0 %v7011_v40 }
0x47d4   :  { %v6857_v62 = vmul.f32 %v6837_v13, %v9913_v9 }
0x47d5   :  { %v6868_v53 = vadd.f32 %v6867_v38, %v6866_v32 }
0x47d6   :  { %v6869_v58 = vsel %vm12186_vm14, %v6857_v62, 0.0 }
0x47d7   :  { %v6870_v5 = vadd.f32 %v6869_v58, %v6868_v53  ;;  %v6851_v61 = vpop.permute.xlu1 %6850 }
0x47d8   :  { %v6859_v0 = vmul.f32 %v6851_v61, %v10048_v18 }
0x47d9   :  { %v6872_v55 = vadd.f32 %v6871_v48, %v6870_v5 }
0x47da   :  { %v6873_v17 = vsel %vm12188_vm8, %v6859_v0, 0.0 }
0x47db   :  { %v6669_v22 = vpop.permute.xlu1 %6668  ;;  %v6874_v41 = vadd.f32 %v6873_v17, %v6872_v55 }
0x47dc   :  { %v6671_v24 = vadd.f32 %v6669_v22, %v11843_v52  ;;  %v7259_v52 = vld [vmem:[%s12091_s17] ss:$0 sm:$0xff] }
0x47dd   :  { %6876 = vrot.lane.b32.xlu0 %v6874_v41, %s9024_s12 }
0x47de   :  { %6983 = vrot.lane.b32.xlu1 %v6671_v24, %s9024_s12 }
0x47e1   :  { %6973 = vrot.lane.b32.xlu0 %v6671_v24, %s9021_s26 }
0x484f   :  { %v11985_v9 = vpop.permute.xlu0 %6876 }
0x4850   :  { %v6879_v18 = vsel %vm99_vm1, %v11983_v11, %v11985_v9  ;;  %v6984_v26 = vpop.permute.xlu1 %6983 }
0x4851   :  { %8623 = vmatmul.mubr.msk.f32.vlgmr.msra.gmra.mxu1 %vm12189_vm4, %v6879_v18 }
0x4853   :  { %v6974_v29 = vpop.permute.xlu0 %6973 }
0x4911   :  { %v6968_v45 = vpop.f32.mrf.mxu1 }
0x4912   :  { %v6969_v19 = vadd.f32 %v7259_v52, %v6968_v45 }
0x4913   :  { %v8624_v6 = vpop.f32.mrf.mxu1 }
0x4914   :  { %v6976_v7 = vadd.f32 %v6974_v29, %v6969_v19 }
0x4916   :  { %v7261_v46 = vmul.f32 -1.442695, %v6976_v7 }
0x4918   :  { %8974 = vpow2.f32 %v7261_v46 }
0x4925   :  { %v8975_v3 = vpop.eup %8974 }
0x4926   :  { %v6980_v36 = vadd.f32 1.0, %v8975_v3 }
0x4928   :  { %8976 = vrcp.f32 %v6980_v36 }
0x4935   :  { %v8977_v28 = vpop.eup %8976 }
0x4936   :  { %v6986_v63 = vmul.f32 %v8977_v28, %v6984_v26  ;;  %v6993_v30 = vsub.f32 1.0, %v8977_v28  ;;  %v6999_v27 = vmul.f32 %v8977_v28, %v11788_v31 }
0x4938   :  { %6988 = vrot.lane.b32.xlu0 %v6986_v63, %s9020_s25 }
0x49aa   :  { %v6989_v2 = vpop.permute.xlu0 %6988 }
0x49ab   :  { %v6991_v15 = vadd.f32 %v6989_v2, %v6969_v19 }
0x49ad   :  { %8978 = vtanh.f32 %v6991_v15 }
0x49ba   :  { %v8979_v39 = vpop.eup %8978 }
0x49bb   :  { %6995 = vrot.lane.b32.xlu1 %v8979_v39, %s9021_s26 }
0x4a2d   :  { %v6996_v20 = vpop.permute.xlu1 %6995 }
0x4a2e   :  { %v6998_v47 = vmul.f32 %v6996_v20, %v6993_v30 }
0x4a30   :  { %v7000_v21 = vadd.f32 %v6999_v27, %v6998_v47 }
0x4a32   :  { %v8949_v49 = vpack.i.bf16 %v11983_v11, %v7000_v21 }
0x4a34   :  { %8950 = vrot.lane.b32.xlu0 %v8949_v49, %s9021_s26  ;;  %s8992_s26 = scalar_lea.vmem %s7112_s28, 256 }
0x4a35   :  { %p8993_p12 = scmp.ne.s32.totalorder %s7112_s28, %s8992_s26  ;;  %p8998_p0 = scmp.lt.s32.totalorder %s8992_s26, %s8992_s26 }
0x4a37   :  { %p8999_p1 = por %p8998_p0, %p8997_p13 }
0x4a39   :  { %p9000_p2 = pnand %p8999_p1, %p8993_p12 }
0x4aa6   :  { %v8951_v25 = vpop.permute.xlu0 %8950 }
0x4aa7   :  { %v8953_v43 = vunpack.i.h.bf16 %v8951_v25  ;;  %v8952_v56 = vunpack.i.l.bf16 %v8951_v25 }
0x4aa9   :  { %v7009_v57 = vsel %vm99_vm1, %v8952_v56, %v11985_v9 }
0x4aaa   :  { %v7010_v34 = vsel %vm12190_vm3, %v7009_v57, %v8953_v43 }
0x4aab   :  { %8658 = vmatmul.mubr.f32.vlgmr.msra.gmra.mxu0 %v7010_v34 }
0x4b6b   :  { %v7100_v31 = vpop.f32.mrf.mxu0 }
0x4b6c   :  { %v7101_v50 = vadd.f32 %v7262_v1, %v7100_v31 }
0x4b6d   :  { %v8659_v32 = vpop.f32.mrf.mxu0 }
0x4b6e   :  { %7105 = vst.msk [vmem:[#allocation8 + $0xe] sm:$0x3] %vm1987_vm2, %v7101_v50 }
0x4b6f   :  { %9003 = shalt.err (!%p9000_p2)
}
0x4b70   :  { %s9038_s10 = smov 2  }
0x4b71   :  { %7117 = dma.vmem_to_hbm [thread:$0]  %s7112_s28, 256, %s12096_s22, [#allocation6], %s9024_s12, %s9024_s12, %s9038_s10  }
0x4b72   :  { %9014 = dma.done.wait [#allocation6], 256  }
0x4b73   :  { %9015 = vsyncadd [#allocation6], 4294967040 }
0x4b74   :  { %7121 = vsyncpa [#allocation6], 1 }
0x4b75   :  { %7122 = vsyncpa [#allocation7], 1 }

</bundles_post_ra>
